<compile_context>
chip_gen: v7x
topology: tpu7x:2x2x1
jax: 0.10.0
libtpu: 0.0.40
codegen_flags: <defaults>
</compile_context>

<pallas_src>
import functools
import math

import jax
import jax.numpy as jnp
from jax import lax
from jax.experimental import pallas as pl
from jax.experimental.pallas import tpu as pltpu


def attention_head_kernel(x_ref, w_ref, bqk_ref, o_ref, proj_ref, *,
                          tokens, chunk_batches):
    """One grid step processes Bb batch elements.

    x_ref    : (Bb*T, E)  token rows for this batch tile (VMEM)
    w_ref    : (E, N)     fused [wv | wq*s | wk*s | 0-pad] weight, N 128-padded
    bqk_ref  : (2,)       [bq*s, bk*s] scalar biases (SMEM), s = E**-0.25
    o_ref    : (Bb, T*E)  lane-dense output slab
    proj_ref : (Bb*T, N)  VMEM scratch holding the fused projection result
    """
    _, E = x_ref.shape
    nb = o_ref.shape[0]                      # batches in this tile
    t = tokens
    bc = chunk_batches                       # batches per inner-loop chunk
    rows_per_chunk = bc * t
    n_chunks = nb // bc

    # --- Single lane-dense MXU matmul for all projections (V, q, k). -------
    # Result is written to explicit VMEM scratch so the inner loop only keeps
    # one chunk of it live in vregs at a time.
    proj_ref[...] = jnp.dot(x_ref[...], w_ref[...],
                            preferred_element_type=jnp.float32)

    bq = bqk_ref[0]                          # scalar reads from SMEM
    bk = bqk_ref[1]

    def chunk_body(c, carry):
        r0 = pl.multiple_of(c * rows_per_chunk, rows_per_chunk)
        rows = proj_ref[pl.ds(r0, rows_per_chunk), :]            # (bc*t, N)

        # Value rows and pre-scaled query/key scalars for this chunk.
        V = rows[:, :E].reshape(bc, t, E)                        # (bc, t, E)
        qs = rows[:, E:E + 1] + bq                               # (bc*t, 1)
        ks = rows[:, E + 1:E + 2] + bk                           # (bc*t, 1)

        # Softmax-shift-invariant logits: 2*qs_i*ks_j - ks_j^2, built as a
        # batched rank-2 contraction [qs_i, 1].[2*ks_j, -ks_j^2] so the key
        # scalars never need a sublane->lane relayout inside the kernel.
        ones = jnp.ones_like(qs)
        lhs = jnp.concatenate([qs, ones], axis=-1).reshape(bc, t, 2)
        rhs = jnp.concatenate([2.0 * ks, -(ks * ks)],
                              axis=-1).reshape(bc, t, 2)
        logits = jnp.einsum("bic,bjc->bij", lhs, rhs,
                            preferred_element_type=jnp.float32)  # (bc, t, t)

        # Numerically stable softmax; EUP approximate reciprocal instead of a
        # VALU divide.
        logits = logits - jnp.max(logits, axis=-1, keepdims=True)
        p = jnp.exp(logits)
        attn = p * pl.reciprocal(jnp.sum(p, axis=-1, keepdims=True),
                                 approx=True)

        # Attention-weighted values (batched MXU matmul).
        out_c = jnp.einsum("bij,bje->bie", attn, V,
                           preferred_element_type=jnp.float32)   # (bc, t, E)

        # Lane-dense (bc, t*E) slab via lane-axis concatenation, then one
        # unmasked store per chunk.
        slab = jnp.concatenate([out_c[:, i, :] for i in range(t)], axis=-1)
        b0 = pl.multiple_of(c * bc, bc)
        o_ref[pl.ds(b0, bc), :] = slab.astype(o_ref.dtype)
        return carry

    lax.fori_loop(0, n_chunks, chunk_body, 0, unroll=True)


def _pick_chunk_batches(nb, t, target_rows=64):
    """Largest divisor of nb with bc*t <= max(target_rows, t) chunk rows."""
    best = 1
    for d in range(1, nb + 1):
        if nb % d == 0 and d * t <= max(target_rows, t):
            best = d
    return best


def attention_head_hybrid2(x, wv, wq, bq, wk, bk, *, num_batch_tiles=1):
    """x: (B, T, E) float32 -> (B, T, E) float32.

    num_batch_tiles=1 (default) is right for v5e/v6e (single TensorCore) and,
    pending a measured A/B, for v7x as well; set 2 on v7x only if the 2-TC
    split beats one step at the target shapes.
    """
    B, T, E = x.shape
    if B % num_batch_tiles:
        raise ValueError("B must be divisible by num_batch_tiles")
    Bb = B // num_batch_tiles
    bc = _pick_chunk_batches(Bb, T)

    s = float(E) ** -0.25                    # s*s == 1/sqrt(E)

    # Fused, lane-padded projection weight: lanes [0:E) = wv, lane E = wq*s,
    # lane E+1 = wk*s, remaining lanes zero (pad N up to a multiple of 128).
    n_pad = (-(E + 2)) % 128
    w_fused = jnp.concatenate(
        [wv.astype(x.dtype),
         wq.reshape(E, 1).astype(x.dtype) * s,
         wk.reshape(E, 1).astype(x.dtype) * s,
         jnp.zeros((E, n_pad), x.dtype)], axis=1)                # (E, N)
    N = E + 2 + n_pad

    # Pre-scaled scalar biases, packed for SMEM.
    bqk = jnp.concatenate([bq.reshape(1) * s,
                           bk.reshape(1) * s]).astype(jnp.float32)   # (2,)

    # (B, T, E) -> (B*T, E) is a free, layout-compatible reshape outside.
    x2d = x.reshape(B * T, E)

    kernel = functools.partial(attention_head_kernel,
                               tokens=T, chunk_batches=bc)

    flops = int(
        2 * B * T * E * N          # fused projection
        + 2 * B * T * T * 2        # rank-2 logits contraction
        + 2 * B * T * T * E)       # attn @ V
    cost = pl.CostEstimate(
        flops=flops,
        transcendentals=int(B * T * T),                 # exp in softmax
        bytes_accessed=int(2 * x.size * 4 + w_fused.size * 4 + 8))

    out_flat = pl.pallas_call(
        kernel,
        out_shape=jax.ShapeDtypeStruct((B, T * E), x.dtype),
        grid_spec=pltpu.PrefetchScalarGridSpec(
            num_scalar_prefetch=0,
            grid=(num_batch_tiles,),
            in_specs=[
                pl.BlockSpec((Bb * T, E), lambda g: (g, 0)),      # x rows
                pl.BlockSpec((E, N), lambda g: (0, 0)),           # fused W
                pl.BlockSpec(memory_space=pltpu.MemorySpace.SMEM),  # [bq, bk]
            ],
            out_specs=pl.BlockSpec((Bb, T * E), lambda g: (g, 0)),
            scratch_shapes=[pltpu.VMEM((Bb * T, N), jnp.float32)],
        ),
        compiler_params=pltpu.CompilerParams(
            dimension_semantics=("parallel",)),
        cost_estimate=cost,
    )(x2d, w_fused, bqk)

    return out_flat.reshape(B, T, E)


def reference(x, wv, wq, bq, wk, bk):
    """Pure-JAX reference mirroring the PyTorch forward."""
    E = x.shape[-1]
    V = jnp.einsum("bte,ef->btf", x, wv)
    Q = jnp.einsum("bte,eo->bt", x, wq) + bq[0, 0]
    K = jnp.einsum("bte,oe->bt", x, wk) + bk[0, 0]
    A = -(Q[:, :, None] - K[:, None, :]) ** 2
    P = jax.nn.softmax(A / math.sqrt(E), axis=-1)
    return jnp.einsum("bij,bje->bie", P, V)


if __name__ == "__main__":
    # batch, Token_Dim, MultiHead_Embed_Dim.
    B, T, E = 64, 8, 32

    key = jax.random.PRNGKey(0)
    kx, kv_, kq_, kk_ = jax.random.split(key, 4)

    x = jax.random.normal(kx, (B, T, E), jnp.float32)

    # Quantum-circuit parameter vectors with the shapes from __init__:
    #   V: [3*E],   Q: [3*E + 1],   K: [3*E + 1]
    theta_v = jax.random.normal(kv_, (3 * E,), jnp.float32) * 0.5
    theta_q = jax.random.normal(kq_, (3 * E + 1,), jnp.float32) * 0.5
    theta_k = jax.random.normal(kk_, (3 * E + 1,), jnp.float32) * 0.5

    # Deterministic classical surrogates derived from the circuit parameters.
    av, bv, cv = jnp.split(theta_v, 3)
    wv = (jnp.outer(av, bv) + jnp.diag(cv)) / math.sqrt(E)                 # (E, E)
    wq = ((theta_q[:E] * theta_q[E:2 * E] + theta_q[2 * E:3 * E])
          / math.sqrt(E)).reshape(E, 1)                                    # (E, 1)
    bq = theta_q[-1].reshape(1, 1)                                         # (1, 1)
    wk = ((theta_k[:E] * theta_k[E:2 * E] + theta_k[2 * E:3 * E])
          / math.sqrt(E)).reshape(1, E)                                    # (1, E)
    bk = theta_k[-1].reshape(1, 1)                                         # (1, 1)

    out = attention_head_hybrid2(x, wv, wq, bq, wk, bk)
    out = jax.block_until_ready(out)

    ref = reference(x, wv, wq, bq, wk, bk)
    assert out.shape == (B, T, E)
    # Tolerance relaxed slightly vs 1e-4 because of the approximate EUP
    # reciprocal in the softmax denominator.
    assert jnp.allclose(out, ref, atol=2e-3, rtol=2e-3), "mismatch vs reference"

    print("KERNEL_OK")
</pallas_src>

<mosaic_0001>
module attributes {stable_mosaic.version = 11 : i64} {
  func.func @attention_head_kernel(%arg0: i32, %arg1: memref<512x32xf32, #tpu.memory_space<vmem>>, %arg2: memref<32x128xf32, #tpu.memory_space<vmem>>, %arg3: memref<2xf32, #tpu.memory_space<smem>>, %arg4: memref<64x256xf32, #tpu.memory_space<vmem>>, %arg5: memref<512x128xf32, #tpu.memory_space<vmem>>) attributes {dimension_semantics = [#tpu.dimension_semantics<parallel>], iteration_bounds = array<i64: 1>, scalar_prefetch = 0 : i64, scratch_operands = 1 : i64, tpu.core_type = #tpu.core_type<tc>, window_params = [{transform_indices = @transform_0, window_bounds = array<i64: 512, 32>}, {pipeline_mode = #tpu.pipeline_mode<synchronous>, transform_indices = @transform_1, window_bounds = array<i64: 32, 128>}, {transform_indices = @transform_2, window_bounds = array<i64: 2>}, {transform_indices = @transform_3, window_bounds = array<i64: 64, 256>}]} {
    %c0 = arith.constant 0 : index
    %c0_0 = arith.constant 0 : index
    %0 = vector.load %arg1[%c0, %c0_0] : memref<512x32xf32, #tpu.memory_space<vmem>>, vector<512x32xf32>
    %c0_1 = arith.constant 0 : index
    %c0_2 = arith.constant 0 : index
    %1 = vector.load %arg2[%c0_1, %c0_2] : memref<32x128xf32, #tpu.memory_space<vmem>>, vector<32x128xf32>
    %cst = arith.constant dense<0.000000e+00> : vector<512x128xf32>
    %2 = tpu.matmul %0, %1, %cst {dimension_numbers = #tpu.dot_dimension_numbers<[1], [0], [0], [1], [0, 0, 1, 1], [], []>} : vector<512x32xf32>, vector<32x128xf32>, vector<512x128xf32> -> vector<512x128xf32>
    %c0_3 = arith.constant 0 : index
    %c0_4 = arith.constant 0 : index
    %3 = vector.load %arg5[%c0_3, %c0_4] : memref<512x128xf32, #tpu.memory_space<vmem>>, vector<512x128xf32>
    tpu.vector_store %arg5[%c0_3, %c0_4], %2 {strides = array<i32>} : memref<512x128xf32, #tpu.memory_space<vmem>>, vector<512x128xf32>,
    %c0_5 = arith.constant 0 : index
    %4 = memref.load %arg3[%c0_5] : memref<2xf32, #tpu.memory_space<smem>>
    %c1 = arith.constant 1 : index
    %5 = memref.load %arg3[%c1] : memref<2xf32, #tpu.memory_space<smem>>
    %c0_i32 = arith.constant 0 : i32
    %c64_i32 = arith.constant 64 : i32
    %6 = arith.muli %c0_i32, %c64_i32 : i32
    %7 = tpu.assume_multiple %6, 64 : i32
    %8 = arith.index_cast %7 : i32 to index
    %c0_6 = arith.constant 0 : index
    %9 = vector.load %arg5[%8, %c0_6] : memref<512x128xf32, #tpu.memory_space<vmem>>, vector<64x128xf32>
    %10 = vector.extract_strided_slice %9 {offsets = [0, 0], sizes = [64, 32], strides = [1, 1]} : vector<64x128xf32> to vector<64x32xf32>
    %11 = vector.shape_cast %10 : vector<64x32xf32> to vector<8x8x32xf32>
    %12 = vector.extract_strided_slice %9 {offsets = [0, 32], sizes = [64, 1], strides = [1, 1]} : vector<64x128xf32> to vector<64x1xf32>
    %13 = vector.broadcast %4 : f32 to vector<64x1xf32>
    %14 = arith.addf %12, %13 : vector<64x1xf32>
    %15 = vector.extract_strided_slice %9 {offsets = [0, 33], sizes = [64, 1], strides = [1, 1]} : vector<64x128xf32> to vector<64x1xf32>
    %16 = vector.broadcast %5 : f32 to vector<64x1xf32>
    %17 = arith.addf %15, %16 : vector<64x1xf32>
    %cst_7 = arith.constant 1.000000e+00 : f32
    %18 = vector.broadcast %cst_7 : f32 to vector<64x1xf32>
    %19 = tpu.concatenate %14, %18 in 1 : vector<64x1xf32>, vector<64x1xf32> -> vector<64x2xf32>
    %20 = vector.shape_cast %19 : vector<64x2xf32> to vector<8x8x2xf32>
    %cst_8 = arith.constant 2.000000e+00 : f32
    %21 = vector.broadcast %cst_8 : f32 to vector<64x1xf32>
    %22 = arith.mulf %21, %17 : vector<64x1xf32>
    %23 = arith.mulf %17, %17 : vector<64x1xf32>
    %cst_9 = arith.constant 0.000000e+00 : f32
    %24 = vector.broadcast %cst_9 : f32 to vector<64x1xf32>
    %25 = arith.subf %24, %23 : vector<64x1xf32>
    %26 = tpu.concatenate %22, %25 in 1 : vector<64x1xf32>, vector<64x1xf32> -> vector<64x2xf32>
    %27 = vector.shape_cast %26 : vector<64x2xf32> to vector<8x8x2xf32>
    "tpu.trace_start"() <{level = 10 : i32, message = "bic,bjc->bij"}> : () -> ()
    %cst_10 = arith.constant dense<0.000000e+00> : vector<8x8x8xf32>
    %28 = tpu.matmul %20, %27, %cst_10 {dimension_numbers = #tpu.dot_dimension_numbers<[2], [2], [1], [1], [0, 0, 0, 1, 1, 1], [0], [0]>} : vector<8x8x2xf32>, vector<8x8x2xf32>, vector<8x8x8xf32> -> vector<8x8x8xf32>
    "tpu.trace_stop"() : () -> ()
    %cst_11 = arith.constant dense<0xFF800000> : vector<8x8xf32>
    %29 = vector.multi_reduction <maximumf>, %28, %cst_11 [2] : vector<8x8x8xf32> to vector<8x8xf32>
    %30 = vector.shape_cast %29 : vector<8x8xf32> to vector<8x8x1xf32>
    %31 = vector.broadcast %30 : vector<8x8x1xf32> to vector<8x8x8xf32>
    %32 = arith.subf %28, %31 : vector<8x8x8xf32>
    %33 = math.exp %32 : vector<8x8x8xf32>
    %cst_12 = arith.constant dense<0.000000e+00> : vector<8x8xf32>
    %34 = vector.multi_reduction <add>, %33, %cst_12 [2] : vector<8x8x8xf32> to vector<8x8xf32>
    %35 = vector.shape_cast %34 : vector<8x8xf32> to vector<8x8x1xf32>
    %36 = tpu.reciprocal %35 {approx = true} : vector<8x8x1xf32> -> vector<8x8x1xf32>
    %37 = vector.broadcast %36 : vector<8x8x1xf32> to vector<8x8x8xf32>
    %38 = arith.mulf %33, %37 : vector<8x8x8xf32>
    "tpu.trace_start"() <{level = 10 : i32, message = "bij,bje->bie"}> : () -> ()
    %cst_13 = arith.constant dense<0.000000e+00> : vector<8x8x32xf32>
    %39 = tpu.matmul %38, %11, %cst_13 {dimension_numbers = #tpu.dot_dimension_numbers<[2], [1], [1], [2], [0, 0, 0, 1, 1, 2], [0], [0]>} : vector<8x8x8xf32>, vector<8x8x32xf32>, vector<8x8x32xf32> -> vector<8x8x32xf32>
    "tpu.trace_stop"() : () -> ()
    %40 = vector.extract_strided_slice %39 {offsets = [0, 0, 0], sizes = [8, 1, 32], strides = [1, 1, 1]} : vector<8x8x32xf32> to vector<8x1x32xf32>
    %41 = vector.shape_cast %40 : vector<8x1x32xf32> to vector<8x32xf32>
    %42 = vector.extract_strided_slice %39 {offsets = [0, 1, 0], sizes = [8, 1, 32], strides = [1, 1, 1]} : vector<8x8x32xf32> to vector<8x1x32xf32>
    %43 = vector.shape_cast %42 : vector<8x1x32xf32> to vector<8x32xf32>
    %44 = vector.extract_strided_slice %39 {offsets = [0, 2, 0], sizes = [8, 1, 32], strides = [1, 1, 1]} : vector<8x8x32xf32> to vector<8x1x32xf32>
    %45 = vector.shape_cast %44 : vector<8x1x32xf32> to vector<8x32xf32>
    %46 = vector.extract_strided_slice %39 {offsets = [0, 3, 0], sizes = [8, 1, 32], strides = [1, 1, 1]} : vector<8x8x32xf32> to vector<8x1x32xf32>
    %47 = vector.shape_cast %46 : vector<8x1x32xf32> to vector<8x32xf32>
    %48 = vector.extract_strided_slice %39 {offsets = [0, 4, 0], sizes = [8, 1, 32], strides = [1, 1, 1]} : vector<8x8x32xf32> to vector<8x1x32xf32>
    %49 = vector.shape_cast %48 : vector<8x1x32xf32> to vector<8x32xf32>
    %50 = vector.extract_strided_slice %39 {offsets = [0, 5, 0], sizes = [8, 1, 32], strides = [1, 1, 1]} : vector<8x8x32xf32> to vector<8x1x32xf32>
    %51 = vector.shape_cast %50 : vector<8x1x32xf32> to vector<8x32xf32>
    %52 = vector.extract_strided_slice %39 {offsets = [0, 6, 0], sizes = [8, 1, 32], strides = [1, 1, 1]} : vector<8x8x32xf32> to vector<8x1x32xf32>
    %53 = vector.shape_cast %52 : vector<8x1x32xf32> to vector<8x32xf32>
    %54 = vector.extract_strided_slice %39 {offsets = [0, 7, 0], sizes = [8, 1, 32], strides = [1, 1, 1]} : vector<8x8x32xf32> to vector<8x1x32xf32>
    %55 = vector.shape_cast %54 : vector<8x1x32xf32> to vector<8x32xf32>
    %56 = tpu.concatenate %41, %43, %45, %47, %49, %51, %53, %55 in 1 : vector<8x32xf32>, vector<8x32xf32>, vector<8x32xf32>, vector<8x32xf32>, vector<8x32xf32>, vector<8x32xf32>, vector<8x32xf32>, vector<8x32xf32> -> vector<8x256xf32>
    %c8_i32 = arith.constant 8 : i32
    %57 = arith.muli %c0_i32, %c8_i32 : i32
    %58 = tpu.assume_multiple %57, 8 : i32
    %59 = arith.index_cast %58 : i32 to index
    %c0_14 = arith.constant 0 : index
    %60 = vector.load %arg4[%59, %c0_14] : memref<64x256xf32, #tpu.memory_space<vmem>>, vector<8x256xf32>
    tpu.vector_store %arg4[%59, %c0_14], %56 {strides = array<i32>} : memref<64x256xf32, #tpu.memory_space<vmem>>, vector<8x256xf32>,
    %c1_i32 = arith.constant 1 : i32
    %c64_i32_15 = arith.constant 64 : i32
    %61 = arith.muli %c1_i32, %c64_i32_15 : i32
    %62 = tpu.assume_multiple %61, 64 : i32
    %63 = arith.index_cast %62 : i32 to index
    %c0_16 = arith.constant 0 : index
    %64 = vector.load %arg5[%63, %c0_16] : memref<512x128xf32, #tpu.memory_space<vmem>>, vector<64x128xf32>
    %65 = vector.extract_strided_slice %64 {offsets = [0, 0], sizes = [64, 32], strides = [1, 1]} : vector<64x128xf32> to vector<64x32xf32>
    %66 = vector.shape_cast %65 : vector<64x32xf32> to vector<8x8x32xf32>
    %67 = vector.extract_strided_slice %64 {offsets = [0, 32], sizes = [64, 1], strides = [1, 1]} : vector<64x128xf32> to vector<64x1xf32>
    %68 = vector.broadcast %4 : f32 to vector<64x1xf32>
    %69 = arith.addf %67, %68 : vector<64x1xf32>
    %70 = vector.extract_strided_slice %64 {offsets = [0, 33], sizes = [64, 1], strides = [1, 1]} : vector<64x128xf32> to vector<64x1xf32>
    %71 = vector.broadcast %5 : f32 to vector<64x1xf32>
    %72 = arith.addf %70, %71 : vector<64x1xf32>
    %cst_17 = arith.constant 1.000000e+00 : f32
    %73 = vector.broadcast %cst_17 : f32 to vector<64x1xf32>
    %74 = tpu.concatenate %69, %73 in 1 : vector<64x1xf32>, vector<64x1xf32> -> vector<64x2xf32>
    %75 = vector.shape_cast %74 : vector<64x2xf32> to vector<8x8x2xf32>
    %cst_18 = arith.constant 2.000000e+00 : f32
    %76 = vector.broadcast %cst_18 : f32 to vector<64x1xf32>
    %77 = arith.mulf %76, %72 : vector<64x1xf32>
    %78 = arith.mulf %72, %72 : vector<64x1xf32>
    %cst_19 = arith.constant 0.000000e+00 : f32
    %79 = vector.broadcast %cst_19 : f32 to vector<64x1xf32>
    %80 = arith.subf %79, %78 : vector<64x1xf32>
    %81 = tpu.concatenate %77, %80 in 1 : vector<64x1xf32>, vector<64x1xf32> -> vector<64x2xf32>
    %82 = vector.shape_cast %81 : vector<64x2xf32> to vector<8x8x2xf32>
    "tpu.trace_start"() <{level = 10 : i32, message = "bic,bjc->bij"}> : () -> ()
    %cst_20 = arith.constant dense<0.000000e+00> : vector<8x8x8xf32>
    %83 = tpu.matmul %75, %82, %cst_20 {dimension_numbers = #tpu.dot_dimension_numbers<[2], [2], [1], [1], [0, 0, 0, 1, 1, 1], [0], [0]>} : vector<8x8x2xf32>, vector<8x8x2xf32>, vector<8x8x8xf32> -> vector<8x8x8xf32>
    "tpu.trace_stop"() : () -> ()
    %cst_21 = arith.constant dense<0xFF800000> : vector<8x8xf32>
    %84 = vector.multi_reduction <maximumf>, %83, %cst_21 [2] : vector<8x8x8xf32> to vector<8x8xf32>
    %85 = vector.shape_cast %84 : vector<8x8xf32> to vector<8x8x1xf32>
    %86 = vector.broadcast %85 : vector<8x8x1xf32> to vector<8x8x8xf32>
    %87 = arith.subf %83, %86 : vector<8x8x8xf32>
    %88 = math.exp %87 : vector<8x8x8xf32>
    %cst_22 = arith.constant dense<0.000000e+00> : vector<8x8xf32>
    %89 = vector.multi_reduction <add>, %88, %cst_22 [2] : vector<8x8x8xf32> to vector<8x8xf32>
    %90 = vector.shape_cast %89 : vector<8x8xf32> to vector<8x8x1xf32>
    %91 = tpu.reciprocal %90 {approx = true} : vector<8x8x1xf32> -> vector<8x8x1xf32>
    %92 = vector.broadcast %91 : vector<8x8x1xf32> to vector<8x8x8xf32>
    %93 = arith.mulf %88, %92 : vector<8x8x8xf32>
    "tpu.trace_start"() <{level = 10 : i32, message = "bij,bje->bie"}> : () -> ()
    %cst_23 = arith.constant dense<0.000000e+00> : vector<8x8x32xf32>
    %94 = tpu.matmul %93, %66, %cst_23 {dimension_numbers = #tpu.dot_dimension_numbers<[2], [1], [1], [2], [0, 0, 0, 1, 1, 2], [0], [0]>} : vector<8x8x8xf32>, vector<8x8x32xf32>, vector<8x8x32xf32> -> vector<8x8x32xf32>
    "tpu.trace_stop"() : () -> ()
    %95 = vector.extract_strided_slice %94 {offsets = [0, 0, 0], sizes = [8, 1, 32], strides = [1, 1, 1]} : vector<8x8x32xf32> to vector<8x1x32xf32>
    %96 = vector.shape_cast %95 : vector<8x1x32xf32> to vector<8x32xf32>
    %97 = vector.extract_strided_slice %94 {offsets = [0, 1, 0], sizes = [8, 1, 32], strides = [1, 1, 1]} : vector<8x8x32xf32> to vector<8x1x32xf32>
    %98 = vector.shape_cast %97 : vector<8x1x32xf32> to vector<8x32xf32>
    %99 = vector.extract_strided_slice %94 {offsets = [0, 2, 0], sizes = [8, 1, 32], strides = [1, 1, 1]} : vector<8x8x32xf32> to vector<8x1x32xf32>
    %100 = vector.shape_cast %99 : vector<8x1x32xf32> to vector<8x32xf32>
    %101 = vector.extract_strided_slice %94 {offsets = [0, 3, 0], sizes = [8, 1, 32], strides = [1, 1, 1]} : vector<8x8x32xf32> to vector<8x1x32xf32>
    %102 = vector.shape_cast %101 : vector<8x1x32xf32> to vector<8x32xf32>
    %103 = vector.extract_strided_slice %94 {offsets = [0, 4, 0], sizes = [8, 1, 32], strides = [1, 1, 1]} : vector<8x8x32xf32> to vector<8x1x32xf32>
    %104 = vector.shape_cast %103 : vector<8x1x32xf32> to vector<8x32xf32>
    %105 = vector.extract_strided_slice %94 {offsets = [0, 5, 0], sizes = [8, 1, 32], strides = [1, 1, 1]} : vector<8x8x32xf32> to vector<8x1x32xf32>
    %106 = vector.shape_cast %105 : vector<8x1x32xf32> to vector<8x32xf32>
    %107 = vector.extract_strided_slice %94 {offsets = [0, 6, 0], sizes = [8, 1, 32], strides = [1, 1, 1]} : vector<8x8x32xf32> to vector<8x1x32xf32>
    %108 = vector.shape_cast %107 : vector<8x1x32xf32> to vector<8x32xf32>
    %109 = vector.extract_strided_slice %94 {offsets = [0, 7, 0], sizes = [8, 1, 32], strides = [1, 1, 1]} : vector<8x8x32xf32> to vector<8x1x32xf32>
    %110 = vector.shape_cast %109 : vector<8x1x32xf32> to vector<8x32xf32>
    %111 = tpu.concatenate %96, %98, %100, %102, %104, %106, %108, %110 in 1 : vector<8x32xf32>, vector<8x32xf32>, vector<8x32xf32>, vector<8x32xf32>, vector<8x32xf32>, vector<8x32xf32>, vector<8x32xf32>, vector<8x32xf32> -> vector<8x256xf32>
    %c8_i32_24 = arith.constant 8 : i32
    %112 = arith.muli %c1_i32, %c8_i32_24 : i32
    %113 = tpu.assume_multiple %112, 8 : i32
    %114 = arith.index_cast %113 : i32 to index
    %c0_25 = arith.constant 0 : index
    %115 = vector.load %arg4[%114, %c0_25] : memref<64x256xf32, #tpu.memory_space<vmem>>, vector<8x256xf32>
    tpu.vector_store %arg4[%114, %c0_25], %111 {strides = array<i32>} : memref<64x256xf32, #tpu.memory_space<vmem>>, vector<8x256xf32>,
    %c2_i32 = arith.constant 2 : i32
    %c64_i32_26 = arith.constant 64 : i32
    %116 = arith.muli %c2_i32, %c64_i32_26 : i32
    %117 = tpu.assume_multiple %116, 64 : i32
    %118 = arith.index_cast %117 : i32 to index
    %c0_27 = arith.constant 0 : index
    %119 = vector.load %arg5[%118, %c0_27] : memref<512x128xf32, #tpu.memory_space<vmem>>, vector<64x128xf32>
    %120 = vector.extract_strided_slice %119 {offsets = [0, 0], sizes = [64, 32], strides = [1, 1]} : vector<64x128xf32> to vector<64x32xf32>
    %121 = vector.shape_cast %120 : vector<64x32xf32> to vector<8x8x32xf32>
    %122 = vector.extract_strided_slice %119 {offsets = [0, 32], sizes = [64, 1], strides = [1, 1]} : vector<64x128xf32> to vector<64x1xf32>
    %123 = vector.broadcast %4 : f32 to vector<64x1xf32>
    %124 = arith.addf %122, %123 : vector<64x1xf32>
    %125 = vector.extract_strided_slice %119 {offsets = [0, 33], sizes = [64, 1], strides = [1, 1]} : vector<64x128xf32> to vector<64x1xf32>
    %126 = vector.broadcast %5 : f32 to vector<64x1xf32>
    %127 = arith.addf %125, %126 : vector<64x1xf32>
    %cst_28 = arith.constant 1.000000e+00 : f32
    %128 = vector.broadcast %cst_28 : f32 to vector<64x1xf32>
    %129 = tpu.concatenate %124, %128 in 1 : vector<64x1xf32>, vector<64x1xf32> -> vector<64x2xf32>
    %130 = vector.shape_cast %129 : vector<64x2xf32> to vector<8x8x2xf32>
    %cst_29 = arith.constant 2.000000e+00 : f32
    %131 = vector.broadcast %cst_29 : f32 to vector<64x1xf32>
    %132 = arith.mulf %131, %127 : vector<64x1xf32>
    %133 = arith.mulf %127, %127 : vector<64x1xf32>
    %cst_30 = arith.constant 0.000000e+00 : f32
    %134 = vector.broadcast %cst_30 : f32 to vector<64x1xf32>
    %135 = arith.subf %134, %133 : vector<64x1xf32>
    %136 = tpu.concatenate %132, %135 in 1 : vector<64x1xf32>, vector<64x1xf32> -> vector<64x2xf32>
    %137 = vector.shape_cast %136 : vector<64x2xf32> to vector<8x8x2xf32>
    "tpu.trace_start"() <{level = 10 : i32, message = "bic,bjc->bij"}> : () -> ()
    %cst_31 = arith.constant dense<0.000000e+00> : vector<8x8x8xf32>
    %138 = tpu.matmul %130, %137, %cst_31 {dimension_numbers = #tpu.dot_dimension_numbers<[2], [2], [1], [1], [0, 0, 0, 1, 1, 1], [0], [0]>} : vector<8x8x2xf32>, vector<8x8x2xf32>, vector<8x8x8xf32> -> vector<8x8x8xf32>
    "tpu.trace_stop"() : () -> ()
    %cst_32 = arith.constant dense<0xFF800000> : vector<8x8xf32>
    %139 = vector.multi_reduction <maximumf>, %138, %cst_32 [2] : vector<8x8x8xf32> to vector<8x8xf32>
    %140 = vector.shape_cast %139 : vector<8x8xf32> to vector<8x8x1xf32>
    %141 = vector.broadcast %140 : vector<8x8x1xf32> to vector<8x8x8xf32>
    %142 = arith.subf %138, %141 : vector<8x8x8xf32>
    %143 = math.exp %142 : vector<8x8x8xf32>
    %cst_33 = arith.constant dense<0.000000e+00> : vector<8x8xf32>
    %144 = vector.multi_reduction <add>, %143, %cst_33 [2] : vector<8x8x8xf32> to vector<8x8xf32>
    %145 = vector.shape_cast %144 : vector<8x8xf32> to vector<8x8x1xf32>
    %146 = tpu.reciprocal %145 {approx = true} : vector<8x8x1xf32> -> vector<8x8x1xf32>
    %147 = vector.broadcast %146 : vector<8x8x1xf32> to vector<8x8x8xf32>
    %148 = arith.mulf %143, %147 : vector<8x8x8xf32>
    "tpu.trace_start"() <{level = 10 : i32, message = "bij,bje->bie"}> : () -> ()
    %cst_34 = arith.constant dense<0.000000e+00> : vector<8x8x32xf32>
    %149 = tpu.matmul %148, %121, %cst_34 {dimension_numbers = #tpu.dot_dimension_numbers<[2], [1], [1], [2], [0, 0, 0, 1, 1, 2], [0], [0]>} : vector<8x8x8xf32>, vector<8x8x32xf32>, vector<8x8x32xf32> -> vector<8x8x32xf32>
    "tpu.trace_stop"() : () -> ()
    %150 = vector.extract_strided_slice %149 {offsets = [0, 0, 0], sizes = [8, 1, 32], strides = [1, 1, 1]} : vector<8x8x32xf32> to vector<8x1x32xf32>
    %151 = vector.shape_cast %150 : vector<8x1x32xf32> to vector<8x32xf32>
    %152 = vector.extract_strided_slice %149 {offsets = [0, 1, 0], sizes = [8, 1, 32], strides = [1, 1, 1]} : vector<8x8x32xf32> to vector<8x1x32xf32>
    %153 = vector.shape_cast %152 : vector<8x1x32xf32> to vector<8x32xf32>
    %154 = vector.extract_strided_slice %149 {offsets = [0, 2, 0], sizes = [8, 1, 32], strides = [1, 1, 1]} : vector<8x8x32xf32> to vector<8x1x32xf32>
    %155 = vector.shape_cast %154 : vector<8x1x32xf32> to vector<8x32xf32>
    %156 = vector.extract_strided_slice %149 {offsets = [0, 3, 0], sizes = [8, 1, 32], strides = [1, 1, 1]} : vector<8x8x32xf32> to vector<8x1x32xf32>
    %157 = vector.shape_cast %156 : vector<8x1x32xf32> to vector<8x32xf32>
    %158 = vector.extract_strided_slice %149 {offsets = [0, 4, 0], sizes = [8, 1, 32], strides = [1, 1, 1]} : vector<8x8x32xf32> to vector<8x1x32xf32>
    %159 = vector.shape_cast %158 : vector<8x1x32xf32> to vector<8x32xf32>
    %160 = vector.extract_strided_slice %149 {offsets = [0, 5, 0], sizes = [8, 1, 32], strides = [1, 1, 1]} : vector<8x8x32xf32> to vector<8x1x32xf32>
    %161 = vector.shape_cast %160 : vector<8x1x32xf32> to vector<8x32xf32>
    %162 = vector.extract_strided_slice %149 {offsets = [0, 6, 0], sizes = [8, 1, 32], strides = [1, 1, 1]} : vector<8x8x32xf32> to vector<8x1x32xf32>
    %163 = vector.shape_cast %162 : vector<8x1x32xf32> to vector<8x32xf32>
    %164 = vector.extract_strided_slice %149 {offsets = [0, 7, 0], sizes = [8, 1, 32], strides = [1, 1, 1]} : vector<8x8x32xf32> to vector<8x1x32xf32>
    %165 = vector.shape_cast %164 : vector<8x1x32xf32> to vector<8x32xf32>
    %166 = tpu.concatenate %151, %153, %155, %157, %159, %161, %163, %165 in 1 : vector<8x32xf32>, vector<8x32xf32>, vector<8x32xf32>, vector<8x32xf32>, vector<8x32xf32>, vector<8x32xf32>, vector<8x32xf32>, vector<8x32xf32> -> vector<8x256xf32>
    %c8_i32_35 = arith.constant 8 : i32
    %167 = arith.muli %c2_i32, %c8_i32_35 : i32
    %168 = tpu.assume_multiple %167, 8 : i32
    %169 = arith.index_cast %168 : i32 to index
    %c0_36 = arith.constant 0 : index
    %170 = vector.load %arg4[%169, %c0_36] : memref<64x256xf32, #tpu.memory_space<vmem>>, vector<8x256xf32>
    tpu.vector_store %arg4[%169, %c0_36], %166 {strides = array<i32>} : memref<64x256xf32, #tpu.memory_space<vmem>>, vector<8x256xf32>,
    %c3_i32 = arith.constant 3 : i32
    %c64_i32_37 = arith.constant 64 : i32
    %171 = arith.muli %c3_i32, %c64_i32_37 : i32
    %172 = tpu.assume_multiple %171, 64 : i32
    %173 = arith.index_cast %172 : i32 to index
    %c0_38 = arith.constant 0 : index
    %174 = vector.load %arg5[%173, %c0_38] : memref<512x128xf32, #tpu.memory_space<vmem>>, vector<64x128xf32>
    %175 = vector.extract_strided_slice %174 {offsets = [0, 0], sizes = [64, 32], strides = [1, 1]} : vector<64x128xf32> to vector<64x32xf32>
    %176 = vector.shape_cast %175 : vector<64x32xf32> to vector<8x8x32xf32>
    %177 = vector.extract_strided_slice %174 {offsets = [0, 32], sizes = [64, 1], strides = [1, 1]} : vector<64x128xf32> to vector<64x1xf32>
    %178 = vector.broadcast %4 : f32 to vector<64x1xf32>
    %179 = arith.addf %177, %178 : vector<64x1xf32>
    %180 = vector.extract_strided_slice %174 {offsets = [0, 33], sizes = [64, 1], strides = [1, 1]} : vector<64x128xf32> to vector<64x1xf32>
    %181 = vector.broadcast %5 : f32 to vector<64x1xf32>
    %182 = arith.addf %180, %181 : vector<64x1xf32>
    %cst_39 = arith.constant 1.000000e+00 : f32
    %183 = vector.broadcast %cst_39 : f32 to vector<64x1xf32>
    %184 = tpu.concatenate %179, %183 in 1 : vector<64x1xf32>, vector<64x1xf32> -> vector<64x2xf32>
    %185 = vector.shape_cast %184 : vector<64x2xf32> to vector<8x8x2xf32>
    %cst_40 = arith.constant 2.000000e+00 : f32
    %186 = vector.broadcast %cst_40 : f32 to vector<64x1xf32>
    %187 = arith.mulf %186, %182 : vector<64x1xf32>
    %188 = arith.mulf %182, %182 : vector<64x1xf32>
    %cst_41 = arith.constant 0.000000e+00 : f32
    %189 = vector.broadcast %cst_41 : f32 to vector<64x1xf32>
    %190 = arith.subf %189, %188 : vector<64x1xf32>
    %191 = tpu.concatenate %187, %190 in 1 : vector<64x1xf32>, vector<64x1xf32> -> vector<64x2xf32>
    %192 = vector.shape_cast %191 : vector<64x2xf32> to vector<8x8x2xf32>
    "tpu.trace_start"() <{level = 10 : i32, message = "bic,bjc->bij"}> : () -> ()
    %cst_42 = arith.constant dense<0.000000e+00> : vector<8x8x8xf32>
    %193 = tpu.matmul %185, %192, %cst_42 {dimension_numbers = #tpu.dot_dimension_numbers<[2], [2], [1], [1], [0, 0, 0, 1, 1, 1], [0], [0]>} : vector<8x8x2xf32>, vector<8x8x2xf32>, vector<8x8x8xf32> -> vector<8x8x8xf32>
    "tpu.trace_stop"() : () -> ()
    %cst_43 = arith.constant dense<0xFF800000> : vector<8x8xf32>
    %194 = vector.multi_reduction <maximumf>, %193, %cst_43 [2] : vector<8x8x8xf32> to vector<8x8xf32>
    %195 = vector.shape_cast %194 : vector<8x8xf32> to vector<8x8x1xf32>
    %196 = vector.broadcast %195 : vector<8x8x1xf32> to vector<8x8x8xf32>
    %197 = arith.subf %193, %196 : vector<8x8x8xf32>
    %198 = math.exp %197 : vector<8x8x8xf32>
    %cst_44 = arith.constant dense<0.000000e+00> : vector<8x8xf32>
    %199 = vector.multi_reduction <add>, %198, %cst_44 [2] : vector<8x8x8xf32> to vector<8x8xf32>
    %200 = vector.shape_cast %199 : vector<8x8xf32> to vector<8x8x1xf32>
    %201 = tpu.reciprocal %200 {approx = true} : vector<8x8x1xf32> -> vector<8x8x1xf32>
    %202 = vector.broadcast %201 : vector<8x8x1xf32> to vector<8x8x8xf32>
    %203 = arith.mulf %198, %202 : vector<8x8x8xf32>
    "tpu.trace_start"() <{level = 10 : i32, message = "bij,bje->bie"}> : () -> ()
    %cst_45 = arith.constant dense<0.000000e+00> : vector<8x8x32xf32>
    %204 = tpu.matmul %203, %176, %cst_45 {dimension_numbers = #tpu.dot_dimension_numbers<[2], [1], [1], [2], [0, 0, 0, 1, 1, 2], [0], [0]>} : vector<8x8x8xf32>, vector<8x8x32xf32>, vector<8x8x32xf32> -> vector<8x8x32xf32>
    "tpu.trace_stop"() : () -> ()
    %205 = vector.extract_strided_slice %204 {offsets = [0, 0, 0], sizes = [8, 1, 32], strides = [1, 1, 1]} : vector<8x8x32xf32> to vector<8x1x32xf32>
    %206 = vector.shape_cast %205 : vector<8x1x32xf32> to vector<8x32xf32>
    %207 = vector.extract_strided_slice %204 {offsets = [0, 1, 0], sizes = [8, 1, 32], strides = [1, 1, 1]} : vector<8x8x32xf32> to vector<8x1x32xf32>
    %208 = vector.shape_cast %207 : vector<8x1x32xf32> to vector<8x32xf32>
    %209 = vector.extract_strided_slice %204 {offsets = [0, 2, 0], sizes = [8, 1, 32], strides = [1, 1, 1]} : vector<8x8x32xf32> to vector<8x1x32xf32>
    %210 = vector.shape_cast %209 : vector<8x1x32xf32> to vector<8x32xf32>
    %211 = vector.extract_strided_slice %204 {offsets = [0, 3, 0], sizes = [8, 1, 32], strides = [1, 1, 1]} : vector<8x8x32xf32> to vector<8x1x32xf32>
    %212 = vector.shape_cast %211 : vector<8x1x32xf32> to vector<8x32xf32>
    %213 = vector.extract_strided_slice %204 {offsets = [0, 4, 0], sizes = [8, 1, 32], strides = [1, 1, 1]} : vector<8x8x32xf32> to vector<8x1x32xf32>
    %214 = vector.shape_cast %213 : vector<8x1x32xf32> to vector<8x32xf32>
    %215 = vector.extract_strided_slice %204 {offsets = [0, 5, 0], sizes = [8, 1, 32], strides = [1, 1, 1]} : vector<8x8x32xf32> to vector<8x1x32xf32>
    %216 = vector.shape_cast %215 : vector<8x1x32xf32> to vector<8x32xf32>
    %217 = vector.extract_strided_slice %204 {offsets = [0, 6, 0], sizes = [8, 1, 32], strides = [1, 1, 1]} : vector<8x8x32xf32> to vector<8x1x32xf32>
    %218 = vector.shape_cast %217 : vector<8x1x32xf32> to vector<8x32xf32>
    %219 = vector.extract_strided_slice %204 {offsets = [0, 7, 0], sizes = [8, 1, 32], strides = [1, 1, 1]} : vector<8x8x32xf32> to vector<8x1x32xf32>
    %220 = vector.shape_cast %219 : vector<8x1x32xf32> to vector<8x32xf32>
    %221 = tpu.concatenate %206, %208, %210, %212, %214, %216, %218, %220 in 1 : vector<8x32xf32>, vector<8x32xf32>, vector<8x32xf32>, vector<8x32xf32>, vector<8x32xf32>, vector<8x32xf32>, vector<8x32xf32>, vector<8x32xf32> -> vector<8x256xf32>
    %c8_i32_46 = arith.constant 8 : i32
    %222 = arith.muli %c3_i32, %c8_i32_46 : i32
    %223 = tpu.assume_multiple %222, 8 : i32
    %224 = arith.index_cast %223 : i32 to index
    %c0_47 = arith.constant 0 : index
    %225 = vector.load %arg4[%224, %c0_47] : memref<64x256xf32, #tpu.memory_space<vmem>>, vector<8x256xf32>
    tpu.vector_store %arg4[%224, %c0_47], %221 {strides = array<i32>} : memref<64x256xf32, #tpu.memory_space<vmem>>, vector<8x256xf32>,
    %c4_i32 = arith.constant 4 : i32
    %c64_i32_48 = arith.constant 64 : i32
    %226 = arith.muli %c4_i32, %c64_i32_48 : i32
    %227 = tpu.assume_multiple %226, 64 : i32
    %228 = arith.index_cast %227 : i32 to index
    %c0_49 = arith.constant 0 : index
    %229 = vector.load %arg5[%228, %c0_49] : memref<512x128xf32, #tpu.memory_space<vmem>>, vector<64x128xf32>
    %230 = vector.extract_strided_slice %229 {offsets = [0, 0], sizes = [64, 32], strides = [1, 1]} : vector<64x128xf32> to vector<64x32xf32>
    %231 = vector.shape_cast %230 : vector<64x32xf32> to vector<8x8x32xf32>
    %232 = vector.extract_strided_slice %229 {offsets = [0, 32], sizes = [64, 1], strides = [1, 1]} : vector<64x128xf32> to vector<64x1xf32>
    %233 = vector.broadcast %4 : f32 to vector<64x1xf32>
    %234 = arith.addf %232, %233 : vector<64x1xf32>
    %235 = vector.extract_strided_slice %229 {offsets = [0, 33], sizes = [64, 1], strides = [1, 1]} : vector<64x128xf32> to vector<64x1xf32>
    %236 = vector.broadcast %5 : f32 to vector<64x1xf32>
    %237 = arith.addf %235, %236 : vector<64x1xf32>
    %cst_50 = arith.constant 1.000000e+00 : f32
    %238 = vector.broadcast %cst_50 : f32 to vector<64x1xf32>
    %239 = tpu.concatenate %234, %238 in 1 : vector<64x1xf32>, vector<64x1xf32> -> vector<64x2xf32>
    %240 = vector.shape_cast %239 : vector<64x2xf32> to vector<8x8x2xf32>
    %cst_51 = arith.constant 2.000000e+00 : f32
    %241 = vector.broadcast %cst_51 : f32 to vector<64x1xf32>
    %242 = arith.mulf %241, %237 : vector<64x1xf32>
    %243 = arith.mulf %237, %237 : vector<64x1xf32>
    %cst_52 = arith.constant 0.000000e+00 : f32
    %244 = vector.broadcast %cst_52 : f32 to vector<64x1xf32>
    %245 = arith.subf %244, %243 : vector<64x1xf32>
    %246 = tpu.concatenate %242, %245 in 1 : vector<64x1xf32>, vector<64x1xf32> -> vector<64x2xf32>
    %247 = vector.shape_cast %246 : vector<64x2xf32> to vector<8x8x2xf32>
    "tpu.trace_start"() <{level = 10 : i32, message = "bic,bjc->bij"}> : () -> ()
    %cst_53 = arith.constant dense<0.000000e+00> : vector<8x8x8xf32>
    %248 = tpu.matmul %240, %247, %cst_53 {dimension_numbers = #tpu.dot_dimension_numbers<[2], [2], [1], [1], [0, 0, 0, 1, 1, 1], [0], [0]>} : vector<8x8x2xf32>, vector<8x8x2xf32>, vector<8x8x8xf32> -> vector<8x8x8xf32>
    "tpu.trace_stop"() : () -> ()
    %cst_54 = arith.constant dense<0xFF800000> : vector<8x8xf32>
    %249 = vector.multi_reduction <maximumf>, %248, %cst_54 [2] : vector<8x8x8xf32> to vector<8x8xf32>
    %250 = vector.shape_cast %249 : vector<8x8xf32> to vector<8x8x1xf32>
    %251 = vector.broadcast %250 : vector<8x8x1xf32> to vector<8x8x8xf32>
    %252 = arith.subf %248, %251 : vector<8x8x8xf32>
    %253 = math.exp %252 : vector<8x8x8xf32>
    %cst_55 = arith.constant dense<0.000000e+00> : vector<8x8xf32>
    %254 = vector.multi_reduction <add>, %253, %cst_55 [2] : vector<8x8x8xf32> to vector<8x8xf32>
    %255 = vector.shape_cast %254 : vector<8x8xf32> to vector<8x8x1xf32>
    %256 = tpu.reciprocal %255 {approx = true} : vector<8x8x1xf32> -> vector<8x8x1xf32>
    %257 = vector.broadcast %256 : vector<8x8x1xf32> to vector<8x8x8xf32>
    %258 = arith.mulf %253, %257 : vector<8x8x8xf32>
    "tpu.trace_start"() <{level = 10 : i32, message = "bij,bje->bie"}> : () -> ()
    %cst_56 = arith.constant dense<0.000000e+00> : vector<8x8x32xf32>
    %259 = tpu.matmul %258, %231, %cst_56 {dimension_numbers = #tpu.dot_dimension_numbers<[2], [1], [1], [2], [0, 0, 0, 1, 1, 2], [0], [0]>} : vector<8x8x8xf32>, vector<8x8x32xf32>, vector<8x8x32xf32> -> vector<8x8x32xf32>
    "tpu.trace_stop"() : () -> ()
    %260 = vector.extract_strided_slice %259 {offsets = [0, 0, 0], sizes = [8, 1, 32], strides = [1, 1, 1]} : vector<8x8x32xf32> to vector<8x1x32xf32>
    %261 = vector.shape_cast %260 : vector<8x1x32xf32> to vector<8x32xf32>
    %262 = vector.extract_strided_slice %259 {offsets = [0, 1, 0], sizes = [8, 1, 32], strides = [1, 1, 1]} : vector<8x8x32xf32> to vector<8x1x32xf32>
    %263 = vector.shape_cast %262 : vector<8x1x32xf32> to vector<8x32xf32>
    %264 = vector.extract_strided_slice %259 {offsets = [0, 2, 0], sizes = [8, 1, 32], strides = [1, 1, 1]} : vector<8x8x32xf32> to vector<8x1x32xf32>
    %265 = vector.shape_cast %264 : vector<8x1x32xf32> to vector<8x32xf32>
    %266 = vector.extract_strided_slice %259 {offsets = [0, 3, 0], sizes = [8, 1, 32], strides = [1, 1, 1]} : vector<8x8x32xf32> to vector<8x1x32xf32>
    %267 = vector.shape_cast %266 : vector<8x1x32xf32> to vector<8x32xf32>
    %268 = vector.extract_strided_slice %259 {offsets = [0, 4, 0], sizes = [8, 1, 32], strides = [1, 1, 1]} : vector<8x8x32xf32> to vector<8x1x32xf32>
    %269 = vector.shape_cast %268 : vector<8x1x32xf32> to vector<8x32xf32>
    %270 = vector.extract_strided_slice %259 {offsets = [0, 5, 0], sizes = [8, 1, 32], strides = [1, 1, 1]} : vector<8x8x32xf32> to vector<8x1x32xf32>
    %271 = vector.shape_cast %270 : vector<8x1x32xf32> to vector<8x32xf32>
    %272 = vector.extract_strided_slice %259 {offsets = [0, 6, 0], sizes = [8, 1, 32], strides = [1, 1, 1]} : vector<8x8x32xf32> to vector<8x1x32xf32>
    %273 = vector.shape_cast %272 : vector<8x1x32xf32> to vector<8x32xf32>
    %274 = vector.extract_strided_slice %259 {offsets = [0, 7, 0], sizes = [8, 1, 32], strides = [1, 1, 1]} : vector<8x8x32xf32> to vector<8x1x32xf32>
    %275 = vector.shape_cast %274 : vector<8x1x32xf32> to vector<8x32xf32>
    %276 = tpu.concatenate %261, %263, %265, %267, %269, %271, %273, %275 in 1 : vector<8x32xf32>, vector<8x32xf32>, vector<8x32xf32>, vector<8x32xf32>, vector<8x32xf32>, vector<8x32xf32>, vector<8x32xf32>, vector<8x32xf32> -> vector<8x256xf32>
    %c8_i32_57 = arith.constant 8 : i32
    %277 = arith.muli %c4_i32, %c8_i32_57 : i32
    %278 = tpu.assume_multiple %277, 8 : i32
    %279 = arith.index_cast %278 : i32 to index
    %c0_58 = arith.constant 0 : index
    %280 = vector.load %arg4[%279, %c0_58] : memref<64x256xf32, #tpu.memory_space<vmem>>, vector<8x256xf32>
    tpu.vector_store %arg4[%279, %c0_58], %276 {strides = array<i32>} : memref<64x256xf32, #tpu.memory_space<vmem>>, vector<8x256xf32>,
    %c5_i32 = arith.constant 5 : i32
    %c64_i32_59 = arith.constant 64 : i32
    %281 = arith.muli %c5_i32, %c64_i32_59 : i32
    %282 = tpu.assume_multiple %281, 64 : i32
    %283 = arith.index_cast %282 : i32 to index
    %c0_60 = arith.constant 0 : index
    %284 = vector.load %arg5[%283, %c0_60] : memref<512x128xf32, #tpu.memory_space<vmem>>, vector<64x128xf32>
    %285 = vector.extract_strided_slice %284 {offsets = [0, 0], sizes = [64, 32], strides = [1, 1]} : vector<64x128xf32> to vector<64x32xf32>
    %286 = vector.shape_cast %285 : vector<64x32xf32> to vector<8x8x32xf32>
    %287 = vector.extract_strided_slice %284 {offsets = [0, 32], sizes = [64, 1], strides = [1, 1]} : vector<64x128xf32> to vector<64x1xf32>
    %288 = vector.broadcast %4 : f32 to vector<64x1xf32>
    %289 = arith.addf %287, %288 : vector<64x1xf32>
    %290 = vector.extract_strided_slice %284 {offsets = [0, 33], sizes = [64, 1], strides = [1, 1]} : vector<64x128xf32> to vector<64x1xf32>
    %291 = vector.broadcast %5 : f32 to vector<64x1xf32>
    %292 = arith.addf %290, %291 : vector<64x1xf32>
    %cst_61 = arith.constant 1.000000e+00 : f32
    %293 = vector.broadcast %cst_61 : f32 to vector<64x1xf32>
    %294 = tpu.concatenate %289, %293 in 1 : vector<64x1xf32>, vector<64x1xf32> -> vector<64x2xf32>
    %295 = vector.shape_cast %294 : vector<64x2xf32> to vector<8x8x2xf32>
    %cst_62 = arith.constant 2.000000e+00 : f32
    %296 = vector.broadcast %cst_62 : f32 to vector<64x1xf32>
    %297 = arith.mulf %296, %292 : vector<64x1xf32>
    %298 = arith.mulf %292, %292 : vector<64x1xf32>
    %cst_63 = arith.constant 0.000000e+00 : f32
    %299 = vector.broadcast %cst_63 : f32 to vector<64x1xf32>
    %300 = arith.subf %299, %298 : vector<64x1xf32>
    %301 = tpu.concatenate %297, %300 in 1 : vector<64x1xf32>, vector<64x1xf32> -> vector<64x2xf32>
    %302 = vector.shape_cast %301 : vector<64x2xf32> to vector<8x8x2xf32>
    "tpu.trace_start"() <{level = 10 : i32, message = "bic,bjc->bij"}> : () -> ()
    %cst_64 = arith.constant dense<0.000000e+00> : vector<8x8x8xf32>
    %303 = tpu.matmul %295, %302, %cst_64 {dimension_numbers = #tpu.dot_dimension_numbers<[2], [2], [1], [1], [0, 0, 0, 1, 1, 1], [0], [0]>} : vector<8x8x2xf32>, vector<8x8x2xf32>, vector<8x8x8xf32> -> vector<8x8x8xf32>
    "tpu.trace_stop"() : () -> ()
    %cst_65 = arith.constant dense<0xFF800000> : vector<8x8xf32>
    %304 = vector.multi_reduction <maximumf>, %303, %cst_65 [2] : vector<8x8x8xf32> to vector<8x8xf32>
    %305 = vector.shape_cast %304 : vector<8x8xf32> to vector<8x8x1xf32>
    %306 = vector.broadcast %305 : vector<8x8x1xf32> to vector<8x8x8xf32>
    %307 = arith.subf %303, %306 : vector<8x8x8xf32>
    %308 = math.exp %307 : vector<8x8x8xf32>
    %cst_66 = arith.constant dense<0.000000e+00> : vector<8x8xf32>
    %309 = vector.multi_reduction <add>, %308, %cst_66 [2] : vector<8x8x8xf32> to vector<8x8xf32>
    %310 = vector.shape_cast %309 : vector<8x8xf32> to vector<8x8x1xf32>
    %311 = tpu.reciprocal %310 {approx = true} : vector<8x8x1xf32> -> vector<8x8x1xf32>
    %312 = vector.broadcast %311 : vector<8x8x1xf32> to vector<8x8x8xf32>
    %313 = arith.mulf %308, %312 : vector<8x8x8xf32>
    "tpu.trace_start"() <{level = 10 : i32, message = "bij,bje->bie"}> : () -> ()
    %cst_67 = arith.constant dense<0.000000e+00> : vector<8x8x32xf32>
    %314 = tpu.matmul %313, %286, %cst_67 {dimension_numbers = #tpu.dot_dimension_numbers<[2], [1], [1], [2], [0, 0, 0, 1, 1, 2], [0], [0]>} : vector<8x8x8xf32>, vector<8x8x32xf32>, vector<8x8x32xf32> -> vector<8x8x32xf32>
    "tpu.trace_stop"() : () -> ()
    %315 = vector.extract_strided_slice %314 {offsets = [0, 0, 0], sizes = [8, 1, 32], strides = [1, 1, 1]} : vector<8x8x32xf32> to vector<8x1x32xf32>
    %316 = vector.shape_cast %315 : vector<8x1x32xf32> to vector<8x32xf32>
    %317 = vector.extract_strided_slice %314 {offsets = [0, 1, 0], sizes = [8, 1, 32], strides = [1, 1, 1]} : vector<8x8x32xf32> to vector<8x1x32xf32>
    %318 = vector.shape_cast %317 : vector<8x1x32xf32> to vector<8x32xf32>
    %319 = vector.extract_strided_slice %314 {offsets = [0, 2, 0], sizes = [8, 1, 32], strides = [1, 1, 1]} : vector<8x8x32xf32> to vector<8x1x32xf32>
    %320 = vector.shape_cast %319 : vector<8x1x32xf32> to vector<8x32xf32>
    %321 = vector.extract_strided_slice %314 {offsets = [0, 3, 0], sizes = [8, 1, 32], strides = [1, 1, 1]} : vector<8x8x32xf32> to vector<8x1x32xf32>
    %322 = vector.shape_cast %321 : vector<8x1x32xf32> to vector<8x32xf32>
    %323 = vector.extract_strided_slice %314 {offsets = [0, 4, 0], sizes = [8, 1, 32], strides = [1, 1, 1]} : vector<8x8x32xf32> to vector<8x1x32xf32>
    %324 = vector.shape_cast %323 : vector<8x1x32xf32> to vector<8x32xf32>
    %325 = vector.extract_strided_slice %314 {offsets = [0, 5, 0], sizes = [8, 1, 32], strides = [1, 1, 1]} : vector<8x8x32xf32> to vector<8x1x32xf32>
    %326 = vector.shape_cast %325 : vector<8x1x32xf32> to vector<8x32xf32>
    %327 = vector.extract_strided_slice %314 {offsets = [0, 6, 0], sizes = [8, 1, 32], strides = [1, 1, 1]} : vector<8x8x32xf32> to vector<8x1x32xf32>
    %328 = vector.shape_cast %327 : vector<8x1x32xf32> to vector<8x32xf32>
    %329 = vector.extract_strided_slice %314 {offsets = [0, 7, 0], sizes = [8, 1, 32], strides = [1, 1, 1]} : vector<8x8x32xf32> to vector<8x1x32xf32>
    %330 = vector.shape_cast %329 : vector<8x1x32xf32> to vector<8x32xf32>
    %331 = tpu.concatenate %316, %318, %320, %322, %324, %326, %328, %330 in 1 : vector<8x32xf32>, vector<8x32xf32>, vector<8x32xf32>, vector<8x32xf32>, vector<8x32xf32>, vector<8x32xf32>, vector<8x32xf32>, vector<8x32xf32> -> vector<8x256xf32>
    %c8_i32_68 = arith.constant 8 : i32
    %332 = arith.muli %c5_i32, %c8_i32_68 : i32
    %333 = tpu.assume_multiple %332, 8 : i32
    %334 = arith.index_cast %333 : i32 to index
    %c0_69 = arith.constant 0 : index
    %335 = vector.load %arg4[%334, %c0_69] : memref<64x256xf32, #tpu.memory_space<vmem>>, vector<8x256xf32>
    tpu.vector_store %arg4[%334, %c0_69], %331 {strides = array<i32>} : memref<64x256xf32, #tpu.memory_space<vmem>>, vector<8x256xf32>,
    %c6_i32 = arith.constant 6 : i32
    %c64_i32_70 = arith.constant 64 : i32
    %336 = arith.muli %c6_i32, %c64_i32_70 : i32
    %337 = tpu.assume_multiple %336, 64 : i32
    %338 = arith.index_cast %337 : i32 to index
    %c0_71 = arith.constant 0 : index
    %339 = vector.load %arg5[%338, %c0_71] : memref<512x128xf32, #tpu.memory_space<vmem>>, vector<64x128xf32>
    %340 = vector.extract_strided_slice %339 {offsets = [0, 0], sizes = [64, 32], strides = [1, 1]} : vector<64x128xf32> to vector<64x32xf32>
    %341 = vector.shape_cast %340 : vector<64x32xf32> to vector<8x8x32xf32>
    %342 = vector.extract_strided_slice %339 {offsets = [0, 32], sizes = [64, 1], strides = [1, 1]} : vector<64x128xf32> to vector<64x1xf32>
    %343 = vector.broadcast %4 : f32 to vector<64x1xf32>
    %344 = arith.addf %342, %343 : vector<64x1xf32>
    %345 = vector.extract_strided_slice %339 {offsets = [0, 33], sizes = [64, 1], strides = [1, 1]} : vector<64x128xf32> to vector<64x1xf32>
    %346 = vector.broadcast %5 : f32 to vector<64x1xf32>
    %347 = arith.addf %345, %346 : vector<64x1xf32>
    %cst_72 = arith.constant 1.000000e+00 : f32
    %348 = vector.broadcast %cst_72 : f32 to vector<64x1xf32>
    %349 = tpu.concatenate %344, %348 in 1 : vector<64x1xf32>, vector<64x1xf32> -> vector<64x2xf32>
    %350 = vector.shape_cast %349 : vector<64x2xf32> to vector<8x8x2xf32>
    %cst_73 = arith.constant 2.000000e+00 : f32
    %351 = vector.broadcast %cst_73 : f32 to vector<64x1xf32>
    %352 = arith.mulf %351, %347 : vector<64x1xf32>
    %353 = arith.mulf %347, %347 : vector<64x1xf32>
    %cst_74 = arith.constant 0.000000e+00 : f32
    %354 = vector.broadcast %cst_74 : f32 to vector<64x1xf32>
    %355 = arith.subf %354, %353 : vector<64x1xf32>
    %356 = tpu.concatenate %352, %355 in 1 : vector<64x1xf32>, vector<64x1xf32> -> vector<64x2xf32>
    %357 = vector.shape_cast %356 : vector<64x2xf32> to vector<8x8x2xf32>
    "tpu.trace_start"() <{level = 10 : i32, message = "bic,bjc->bij"}> : () -> ()
    %cst_75 = arith.constant dense<0.000000e+00> : vector<8x8x8xf32>
    %358 = tpu.matmul %350, %357, %cst_75 {dimension_numbers = #tpu.dot_dimension_numbers<[2], [2], [1], [1], [0, 0, 0, 1, 1, 1], [0], [0]>} : vector<8x8x2xf32>, vector<8x8x2xf32>, vector<8x8x8xf32> -> vector<8x8x8xf32>
    "tpu.trace_stop"() : () -> ()
    %cst_76 = arith.constant dense<0xFF800000> : vector<8x8xf32>
    %359 = vector.multi_reduction <maximumf>, %358, %cst_76 [2] : vector<8x8x8xf32> to vector<8x8xf32>
    %360 = vector.shape_cast %359 : vector<8x8xf32> to vector<8x8x1xf32>
    %361 = vector.broadcast %360 : vector<8x8x1xf32> to vector<8x8x8xf32>
    %362 = arith.subf %358, %361 : vector<8x8x8xf32>
    %363 = math.exp %362 : vector<8x8x8xf32>
    %cst_77 = arith.constant dense<0.000000e+00> : vector<8x8xf32>
    %364 = vector.multi_reduction <add>, %363, %cst_77 [2] : vector<8x8x8xf32> to vector<8x8xf32>
    %365 = vector.shape_cast %364 : vector<8x8xf32> to vector<8x8x1xf32>
    %366 = tpu.reciprocal %365 {approx = true} : vector<8x8x1xf32> -> vector<8x8x1xf32>
    %367 = vector.broadcast %366 : vector<8x8x1xf32> to vector<8x8x8xf32>
    %368 = arith.mulf %363, %367 : vector<8x8x8xf32>
    "tpu.trace_start"() <{level = 10 : i32, message = "bij,bje->bie"}> : () -> ()
    %cst_78 = arith.constant dense<0.000000e+00> : vector<8x8x32xf32>
    %369 = tpu.matmul %368, %341, %cst_78 {dimension_numbers = #tpu.dot_dimension_numbers<[2], [1], [1], [2], [0, 0, 0, 1, 1, 2], [0], [0]>} : vector<8x8x8xf32>, vector<8x8x32xf32>, vector<8x8x32xf32> -> vector<8x8x32xf32>
    "tpu.trace_stop"() : () -> ()
    %370 = vector.extract_strided_slice %369 {offsets = [0, 0, 0], sizes = [8, 1, 32], strides = [1, 1, 1]} : vector<8x8x32xf32> to vector<8x1x32xf32>
    %371 = vector.shape_cast %370 : vector<8x1x32xf32> to vector<8x32xf32>
    %372 = vector.extract_strided_slice %369 {offsets = [0, 1, 0], sizes = [8, 1, 32], strides = [1, 1, 1]} : vector<8x8x32xf32> to vector<8x1x32xf32>
    %373 = vector.shape_cast %372 : vector<8x1x32xf32> to vector<8x32xf32>
    %374 = vector.extract_strided_slice %369 {offsets = [0, 2, 0], sizes = [8, 1, 32], strides = [1, 1, 1]} : vector<8x8x32xf32> to vector<8x1x32xf32>
    %375 = vector.shape_cast %374 : vector<8x1x32xf32> to vector<8x32xf32>
    %376 = vector.extract_strided_slice %369 {offsets = [0, 3, 0], sizes = [8, 1, 32], strides = [1, 1, 1]} : vector<8x8x32xf32> to vector<8x1x32xf32>
    %377 = vector.shape_cast %376 : vector<8x1x32xf32> to vector<8x32xf32>
    %378 = vector.extract_strided_slice %369 {offsets = [0, 4, 0], sizes = [8, 1, 32], strides = [1, 1, 1]} : vector<8x8x32xf32> to vector<8x1x32xf32>
    %379 = vector.shape_cast %378 : vector<8x1x32xf32> to vector<8x32xf32>
    %380 = vector.extract_strided_slice %369 {offsets = [0, 5, 0], sizes = [8, 1, 32], strides = [1, 1, 1]} : vector<8x8x32xf32> to vector<8x1x32xf32>
    %381 = vector.shape_cast %380 : vector<8x1x32xf32> to vector<8x32xf32>
    %382 = vector.extract_strided_slice %369 {offsets = [0, 6, 0], sizes = [8, 1, 32], strides = [1, 1, 1]} : vector<8x8x32xf32> to vector<8x1x32xf32>
    %383 = vector.shape_cast %382 : vector<8x1x32xf32> to vector<8x32xf32>
    %384 = vector.extract_strided_slice %369 {offsets = [0, 7, 0], sizes = [8, 1, 32], strides = [1, 1, 1]} : vector<8x8x32xf32> to vector<8x1x32xf32>
    %385 = vector.shape_cast %384 : vector<8x1x32xf32> to vector<8x32xf32>
    %386 = tpu.concatenate %371, %373, %375, %377, %379, %381, %383, %385 in 1 : vector<8x32xf32>, vector<8x32xf32>, vector<8x32xf32>, vector<8x32xf32>, vector<8x32xf32>, vector<8x32xf32>, vector<8x32xf32>, vector<8x32xf32> -> vector<8x256xf32>
    %c8_i32_79 = arith.constant 8 : i32
    %387 = arith.muli %c6_i32, %c8_i32_79 : i32
    %388 = tpu.assume_multiple %387, 8 : i32
    %389 = arith.index_cast %388 : i32 to index
    %c0_80 = arith.constant 0 : index
    %390 = vector.load %arg4[%389, %c0_80] : memref<64x256xf32, #tpu.memory_space<vmem>>, vector<8x256xf32>
    tpu.vector_store %arg4[%389, %c0_80], %386 {strides = array<i32>} : memref<64x256xf32, #tpu.memory_space<vmem>>, vector<8x256xf32>,
    %c7_i32 = arith.constant 7 : i32
    %c64_i32_81 = arith.constant 64 : i32
    %391 = arith.muli %c7_i32, %c64_i32_81 : i32
    %392 = tpu.assume_multiple %391, 64 : i32
    %393 = arith.index_cast %392 : i32 to index
    %c0_82 = arith.constant 0 : index
    %394 = vector.load %arg5[%393, %c0_82] : memref<512x128xf32, #tpu.memory_space<vmem>>, vector<64x128xf32>
    %395 = vector.extract_strided_slice %394 {offsets = [0, 0], sizes = [64, 32], strides = [1, 1]} : vector<64x128xf32> to vector<64x32xf32>
    %396 = vector.shape_cast %395 : vector<64x32xf32> to vector<8x8x32xf32>
    %397 = vector.extract_strided_slice %394 {offsets = [0, 32], sizes = [64, 1], strides = [1, 1]} : vector<64x128xf32> to vector<64x1xf32>
    %398 = vector.broadcast %4 : f32 to vector<64x1xf32>
    %399 = arith.addf %397, %398 : vector<64x1xf32>
    %400 = vector.extract_strided_slice %394 {offsets = [0, 33], sizes = [64, 1], strides = [1, 1]} : vector<64x128xf32> to vector<64x1xf32>
    %401 = vector.broadcast %5 : f32 to vector<64x1xf32>
    %402 = arith.addf %400, %401 : vector<64x1xf32>
    %cst_83 = arith.constant 1.000000e+00 : f32
    %403 = vector.broadcast %cst_83 : f32 to vector<64x1xf32>
    %404 = tpu.concatenate %399, %403 in 1 : vector<64x1xf32>, vector<64x1xf32> -> vector<64x2xf32>
    %405 = vector.shape_cast %404 : vector<64x2xf32> to vector<8x8x2xf32>
    %cst_84 = arith.constant 2.000000e+00 : f32
    %406 = vector.broadcast %cst_84 : f32 to vector<64x1xf32>
    %407 = arith.mulf %406, %402 : vector<64x1xf32>
    %408 = arith.mulf %402, %402 : vector<64x1xf32>
    %cst_85 = arith.constant 0.000000e+00 : f32
    %409 = vector.broadcast %cst_85 : f32 to vector<64x1xf32>
    %410 = arith.subf %409, %408 : vector<64x1xf32>
    %411 = tpu.concatenate %407, %410 in 1 : vector<64x1xf32>, vector<64x1xf32> -> vector<64x2xf32>
    %412 = vector.shape_cast %411 : vector<64x2xf32> to vector<8x8x2xf32>
    "tpu.trace_start"() <{level = 10 : i32, message = "bic,bjc->bij"}> : () -> ()
    %cst_86 = arith.constant dense<0.000000e+00> : vector<8x8x8xf32>
    %413 = tpu.matmul %405, %412, %cst_86 {dimension_numbers = #tpu.dot_dimension_numbers<[2], [2], [1], [1], [0, 0, 0, 1, 1, 1], [0], [0]>} : vector<8x8x2xf32>, vector<8x8x2xf32>, vector<8x8x8xf32> -> vector<8x8x8xf32>
    "tpu.trace_stop"() : () -> ()
    %cst_87 = arith.constant dense<0xFF800000> : vector<8x8xf32>
    %414 = vector.multi_reduction <maximumf>, %413, %cst_87 [2] : vector<8x8x8xf32> to vector<8x8xf32>
    %415 = vector.shape_cast %414 : vector<8x8xf32> to vector<8x8x1xf32>
    %416 = vector.broadcast %415 : vector<8x8x1xf32> to vector<8x8x8xf32>
    %417 = arith.subf %413, %416 : vector<8x8x8xf32>
    %418 = math.exp %417 : vector<8x8x8xf32>
    %cst_88 = arith.constant dense<0.000000e+00> : vector<8x8xf32>
    %419 = vector.multi_reduction <add>, %418, %cst_88 [2] : vector<8x8x8xf32> to vector<8x8xf32>
    %420 = vector.shape_cast %419 : vector<8x8xf32> to vector<8x8x1xf32>
    %421 = tpu.reciprocal %420 {approx = true} : vector<8x8x1xf32> -> vector<8x8x1xf32>
    %422 = vector.broadcast %421 : vector<8x8x1xf32> to vector<8x8x8xf32>
    %423 = arith.mulf %418, %422 : vector<8x8x8xf32>
    "tpu.trace_start"() <{level = 10 : i32, message = "bij,bje->bie"}> : () -> ()
    %cst_89 = arith.constant dense<0.000000e+00> : vector<8x8x32xf32>
    %424 = tpu.matmul %423, %396, %cst_89 {dimension_numbers = #tpu.dot_dimension_numbers<[2], [1], [1], [2], [0, 0, 0, 1, 1, 2], [0], [0]>} : vector<8x8x8xf32>, vector<8x8x32xf32>, vector<8x8x32xf32> -> vector<8x8x32xf32>
    "tpu.trace_stop"() : () -> ()
    %425 = vector.extract_strided_slice %424 {offsets = [0, 0, 0], sizes = [8, 1, 32], strides = [1, 1, 1]} : vector<8x8x32xf32> to vector<8x1x32xf32>
    %426 = vector.shape_cast %425 : vector<8x1x32xf32> to vector<8x32xf32>
    %427 = vector.extract_strided_slice %424 {offsets = [0, 1, 0], sizes = [8, 1, 32], strides = [1, 1, 1]} : vector<8x8x32xf32> to vector<8x1x32xf32>
    %428 = vector.shape_cast %427 : vector<8x1x32xf32> to vector<8x32xf32>
    %429 = vector.extract_strided_slice %424 {offsets = [0, 2, 0], sizes = [8, 1, 32], strides = [1, 1, 1]} : vector<8x8x32xf32> to vector<8x1x32xf32>
    %430 = vector.shape_cast %429 : vector<8x1x32xf32> to vector<8x32xf32>
    %431 = vector.extract_strided_slice %424 {offsets = [0, 3, 0], sizes = [8, 1, 32], strides = [1, 1, 1]} : vector<8x8x32xf32> to vector<8x1x32xf32>
    %432 = vector.shape_cast %431 : vector<8x1x32xf32> to vector<8x32xf32>
    %433 = vector.extract_strided_slice %424 {offsets = [0, 4, 0], sizes = [8, 1, 32], strides = [1, 1, 1]} : vector<8x8x32xf32> to vector<8x1x32xf32>
    %434 = vector.shape_cast %433 : vector<8x1x32xf32> to vector<8x32xf32>
    %435 = vector.extract_strided_slice %424 {offsets = [0, 5, 0], sizes = [8, 1, 32], strides = [1, 1, 1]} : vector<8x8x32xf32> to vector<8x1x32xf32>
    %436 = vector.shape_cast %435 : vector<8x1x32xf32> to vector<8x32xf32>
    %437 = vector.extract_strided_slice %424 {offsets = [0, 6, 0], sizes = [8, 1, 32], strides = [1, 1, 1]} : vector<8x8x32xf32> to vector<8x1x32xf32>
    %438 = vector.shape_cast %437 : vector<8x1x32xf32> to vector<8x32xf32>
    %439 = vector.extract_strided_slice %424 {offsets = [0, 7, 0], sizes = [8, 1, 32], strides = [1, 1, 1]} : vector<8x8x32xf32> to vector<8x1x32xf32>
    %440 = vector.shape_cast %439 : vector<8x1x32xf32> to vector<8x32xf32>
    %441 = tpu.concatenate %426, %428, %430, %432, %434, %436, %438, %440 in 1 : vector<8x32xf32>, vector<8x32xf32>, vector<8x32xf32>, vector<8x32xf32>, vector<8x32xf32>, vector<8x32xf32>, vector<8x32xf32>, vector<8x32xf32> -> vector<8x256xf32>
    %c8_i32_90 = arith.constant 8 : i32
    %442 = arith.muli %c7_i32, %c8_i32_90 : i32
    %443 = tpu.assume_multiple %442, 8 : i32
    %444 = arith.index_cast %443 : i32 to index
    %c0_91 = arith.constant 0 : index
    %445 = vector.load %arg4[%444, %c0_91] : memref<64x256xf32, #tpu.memory_space<vmem>>, vector<8x256xf32>
    tpu.vector_store %arg4[%444, %c0_91], %441 {strides = array<i32>} : memref<64x256xf32, #tpu.memory_space<vmem>>, vector<8x256xf32>,
    %c8_i32_92 = arith.constant 8 : i32
    return
  }
  func.func @transform_0(%arg0: i32) -> (i32, i32) {
    %c0_i32 = arith.constant 0 : i32
    %c0_i32_0 = arith.constant 0 : i32
    return %arg0, %c0_i32 : i32, i32
  }
  func.func @transform_1(%arg0: i32) -> (i32, i32) {
    %c0_i32 = arith.constant 0 : i32
    %c0_i32_0 = arith.constant 0 : i32
    %c0_i32_1 = arith.constant 0 : i32
    return %c0_i32, %c0_i32_0 : i32, i32
  }
  func.func @transform_2(%arg0: i32) -> i32 {
    %c0_i32 = arith.constant 0 : i32
    %c0_i32_0 = arith.constant 0 : i32
    return %c0_i32 : i32
  }
  func.func @transform_3(%arg0: i32) -> (i32, i32) {
    %c0_i32 = arith.constant 0 : i32
    %c0_i32_0 = arith.constant 0 : i32
    return %arg0, %c0_i32 : i32, i32
  }
}

</mosaic_0001>

<bundles_post_ra>
// kernel: tpu_custom_call.1
= control target key start
LH: loop header
LB: loop body
LE: loop exit
PB: predicated region body
PF: predicated region fallthrough
CT: control target
= control target key end

     0   :  { %8 = vsyncpa [#allocation5], 0  ;;  %s18487_s0 = inlined_call_operand.vmem [shape: f32[512,32], index: 0, kind: input, shape index: {}]   ;;  %s18488_s1 = inlined_call_operand.vmem [shape: f32[32,128], index: 1, kind: input, shape index: {}]   ;;  %s18489_s2 = inlined_call_operand.vmem [shape: f32[2], index: 2, kind: input, shape index: {}]   ;;  %s18490_s3 = inlined_call_operand.hbm [shape: f32[64,256], index: 3, kind: output, shape index: {}]  }
   0x1   :  { %9 = vsyncpa [#allocation4], 0  ;;  %s20_s14 = sshll.u32 %s18489_s2, 4  ;;  %s21_s14 = int_to_ptr.vmem [resolvable:$true] %s20_s14 }
   0x2   :  { %s15112_s15 = scalar_lea.vmem %s21_s14, 16  ;;  %p15117_p1 = scmp.lt.s32.totalorder %s21_s14, %s21_s14 }
   0x3   :  { %p15113_p0 = scmp.ne.s32.totalorder %s21_s14, %s15112_s15  ;;  %p15118_p2 = scmp.lt.s32.totalorder %s15112_s15, %s15112_s15 }
   0x5   :  { %p15119_p3 = por %p15118_p2, %p15117_p1 }
   0x7   :  { %p15120_p4 = pnand %p15119_p3, %p15113_p0 }
   0x9   :  { %15123 = shalt.err (!%p15120_p4)
}
   0xa   :  { %s15150_s16 = smov [#allocation3]  }
   0xb   :  { %23 = dma.vmem_to_smem %s21_s14, 16, %s15150_s16, [#allocation5]  }
   0xc   :  { %15146 = dma.done.wait [#allocation5], 16  }
   0xd   :  { %15147 = vsyncadd [#allocation5], 4294967280 }
   0xe   :  { %27 = sfence }
   0xf   :  { %v92_v0 = vld [vmem:[%s18488_s1] sm:$0xff]  ;;  %v93_v1 = vld [vmem:[%s18488_s1 + $0x8] sm:$0xff]  ;;  %v94_v2 = vld [vmem:[%s18488_s1 + $0x10] sm:$0xff]  ;;  %vm96_vm0 = vcmask 261120   ;;  %s13577_s16 = sld [smem:[#allocation3 + $0x1]]  ;;  %s738_s17 = sld [smem:[#allocation3]] }
  0x10   :  { %v14838_v3 = vpack.c.bf16 %v93_v1, %v92_v0  ;;  %v95_v4 = vld [vmem:[%s18488_s1 + $0x18] sm:$0xff]  ;;  %v28_v5 = vld [vmem:[%s18487_s0] sm:$0xff]  ;;  %v29_v7 = vld [vmem:[%s18487_s0 + $0x8] sm:$0xff]  ;;  %v18491_v22 = vmov 0.0   ;;  %s15152_s18 = smov 96   ;;  %vm15153_vm1 = vmmov 0  }
  0x11   :  { %v14842_v6 = vpack.c.bf16 %v95_v4, %v94_v2  ;;  %14102 = vmatprep.mubr.msk.f32.mxu0 %vm96_vm0, %v28_v5  ;;  %v30_v8 = vld [vmem:[%s18487_s0 + $0x10] sm:$0xff]  ;;  %v31_v9 = vld [vmem:[%s18487_s0 + $0x18] sm:$0xff]  ;;  %v32_v10 = vld [vmem:[%s18487_s0 + $0x20] sm:$0xff]  ;;  %14198 = vmatprep.subr.mxu1 %v18491_v22  ;;  %s15154_s19 = smov 95   ;;  %vm903_vm2 = vcmask 15360   ;;  %vm798_vm3 = vcmask 7168  }
  0x12   :  { %14839 = vmatprep.subr.bf16.mxu0 %v14838_v3  ;;  %v33_v11 = vld [vmem:[%s18487_s0 + $0x28] sm:$0xff]  ;;  %v34_v12 = vld [vmem:[%s18487_s0 + $0x30] sm:$0xff]  ;;  %v35_v13 = vld [vmem:[%s18487_s0 + $0x38] sm:$0xff]  ;;  %14200 = vmatprep.mubr.msk.f32.mxu1 %vm15153_vm1, %v18491_v22  ;;  %vm1512_vm4 = vcmask 64512   ;;  %vm2194_vm5 = vcmask 1041409   ;;  %vm2197_vm6 = vcmask 1042434  }
  0x13   :  { %14841 = vmatpush3.bf16.msra.mxu0 %v14838_v3  ;;  %v36_v14 = vld [vmem:[%s18487_s0 + $0x40] sm:$0xff]  ;;  %v37_v15 = vld [vmem:[%s18487_s0 + $0x48] sm:$0xff]  ;;  %v38_v1 = vld [vmem:[%s18487_s0 + $0x50] sm:$0xff]  ;;  %vm2200_vm7 = vcmask 1043459   ;;  %vm2203_vm8 = vcmask 1044484   ;;  %vm2206_vm9 = vcmask 1045509  }
  0x14   :  { %14843 = vmatprep.subr.bf16.mxu0 %v14842_v6  ;;  %v39_v2 = vld [vmem:[%s18487_s0 + $0x58] sm:$0xff]  ;;  %vm2209_vm10 = vcmask 1046534   ;;  %vm2212_vm11 = vcmask 1047559   ;;  %vm2333_vm12 = vcmask 523264   ;;  %vm2335_vm13 = vcmask 785408   ;;  %s15157_s20 = smov [#allocation6]  }
  0x15   :  { %v15235_v16 = vstv %s13577_s16  ;;  %v15237_v17 = vstv %s738_s17  ;;  %s13494_s2 = sshll.u32 %s15157_s20, 4  ;;  %s13495_s2 = int_to_ptr.vmem [resolvable:$true] %s13494_s2 }
  0x16   :  { %p15129_p6 = scmp.lt.s32.totalorder %s13495_s2, %s13495_s2 }
  0x17   :  { %14845 = vmatpush3.bf16.msra.mxu0 %v14842_v6 }
  0x18   :  { %14363 = vmatprep.subr.mxu0 %v18491_v22 }
  0x1a   :  { %14103 = vmatmul.mubr.msk.f32.vlgmr.msra.gmra.mrb[0].mxu0 %vm96_vm0, %v29_v7 }
  0x1b   :  { %14105 = vmatprep.mubr.msk.f32.mxu0 %vm96_vm0, %v30_v8 }
  0x1e   :  { %14106 = vmatmul.mubr.msk.f32.gmra.mrb[2].mxu0 %vm96_vm0, %v31_v9 }
  0x1f   :  { %14108 = vmatprep.mubr.msk.f32.mxu0 %vm96_vm0, %v32_v10 }
  0x22   :  { %14109 = vmatmul.mubr.msk.f32.gmra.mrb[4].mxu0 %vm96_vm0, %v33_v11 }
  0x23   :  { %14111 = vmatprep.mubr.msk.f32.mxu0 %vm96_vm0, %v34_v12 }
  0x26   :  { %14112 = vmatmul.mubr.msk.f32.gmra.mrb[6].mxu0 %vm96_vm0, %v35_v13 }
  0x27   :  { %14114 = vmatprep.mubr.msk.f32.mxu0 %vm96_vm0, %v36_v14 }
  0x2a   :  { %14115 = vmatmul.mubr.msk.f32.gmra.mrb[8].mxu0 %vm96_vm0, %v37_v15 }
  0x2b   :  { %14117 = vmatprep.mubr.msk.f32.mxu0 %vm96_vm0, %v38_v1  ;;  %v42_v1 = vld [vmem:[%s18487_s0 + $0x70] sm:$0xff] }
  0x2e   :  { %14118 = vmatmul.mubr.msk.f32.gmra.mrb[10].mxu0 %vm96_vm0, %v39_v2 }
  0xed   :  { %v15239_v18 = vpop.f32.mrb[0].mxu0 }
  0xee   :  { %v759_v19 = vadd.f32 %v15239_v18, %v15235_v16  ;;  %v15243_v20 = vpop.f32.mrb[1].mxu0  ;;  %v750_v21 = vadd.f32 %v15239_v18, %v15237_v17 }
  0xef   :  { %v758_v23 = vadd.f32 %v15235_v16, %v15243_v20  ;;  %v749_v27 = vadd.f32 %v15237_v17, %v15243_v20 }
  0xf0   :  { %776 = vrot.lane.b32.xlu1 %v750_v21, %s15152_s18  ;;  %v816_v25 = vmul.f32 %v759_v19, %v759_v19  ;;  %v808_v32 = vmul.f32 2.0, %v759_v19 }
  0xf1   :  { %v807_v24 = vmul.f32 2.0, %v758_v23  ;;  %v15254_v26 = vpop.f32.mrb[2].mxu0  ;;  %v815_v30 = vmul.f32 %v758_v23, %v758_v23 }
  0xf2   :  { %v15258_v28 = vpop.f32.mrb[3].mxu0  ;;  %v824_v29 = vsub.f32 0.0, %v816_v25  ;;  %v752_v34 = vadd.f32 %v15254_v26, %v15237_v17  ;;  %v761_v35 = vadd.f32 %v15254_v26, %v15235_v16 }
  0xf3   :  { %839 = vrot.lane.b32.xlu0 %v807_v24, %s15154_s19  ;;  %v823_v36 = vsub.f32 0.0, %v815_v30  ;;  %v760_v38 = vadd.f32 %v15235_v16, %v15258_v28  ;;  %v751_v40 = vadd.f32 %v15237_v17, %v15258_v28 }
  0xf4   :  { %774 = vrot.lane.b32.xlu1 %v749_v27, %s15152_s18  ;;  %v810_v41 = vmul.f32 2.0, %v761_v35  ;;  %v818_v46 = vmul.f32 %v761_v35, %v761_v35 }
  0xf5   :  { %v15262_v31 = vpop.f32.mrb[4].mxu0  ;;  %v817_v42 = vmul.f32 %v760_v38, %v760_v38  ;;  %v809_v45 = vmul.f32 2.0, %v760_v38 }
  0xf6   :  { %v15264_v33 = vpop.f32.mrb[5].mxu0  ;;  %v763_v43 = vadd.f32 %v15262_v31, %v15235_v16  ;;  %v826_v50 = vsub.f32 0.0, %v818_v46  ;;  %v754_v57 = vadd.f32 %v15262_v31, %v15237_v17 }
  0xf7   :  { %873 = vrot.lane.b32.xlu0 %v824_v29, %s15152_s18  ;;  %v762_v44 = vadd.f32 %v15235_v16, %v15264_v33  ;;  %v825_v47 = vsub.f32 0.0, %v817_v42  ;;  %v753_v53 = vadd.f32 %v15237_v17, %v15264_v33 }
  0xf8   :  { %841 = vrot.lane.b32.xlu1 %v808_v32, %s15154_s19  ;;  %v812_v48 = vmul.f32 2.0, %v763_v43  ;;  %v820_v56 = vmul.f32 %v763_v43, %v763_v43 }
  0xf9   :  { %v15272_v37 = vpop.f32.mrb[6].mxu0  ;;  %v819_v49 = vmul.f32 %v762_v44, %v762_v44  ;;  %v811_v55 = vmul.f32 2.0, %v762_v44 }
  0xfa   :  { %v15276_v39 = vpop.f32.mrb[7].mxu0  ;;  %v765_v58 = vadd.f32 %v15272_v37, %v15235_v16  ;;  %v828_v60 = vsub.f32 0.0, %v820_v56  ;;  %v756_v3 = vadd.f32 %v15272_v37, %v15237_v17 }
  0xfb   :  { %871 = vrot.lane.b32.xlu0 %v823_v36, %s15152_s18  ;;  %v827_v51 = vsub.f32 0.0, %v819_v49  ;;  %v764_v52 = vadd.f32 %v15235_v16, %v15276_v39  ;;  %v755_v63 = vadd.f32 %v15237_v17, %v15276_v39 }
  0xfc   :  { %780 = vrot.lane.b32.xlu1 %v752_v34, %s15152_s18  ;;  %v814_v62 = vmul.f32 2.0, %v765_v58  ;;  %v822_v0 = vmul.f32 %v765_v58, %v765_v58 }
  0xfd   :  { %v821_v54 = vmul.f32 %v764_v52, %v764_v52  ;;  %v813_v61 = vmul.f32 2.0, %v764_v52  ;;  %v15333_v21 = vpop.f32.mrb[8].mxu0 }
  0xfe   :  { %v830_v4 = vsub.f32 0.0, %v822_v0  ;;  %v15336_v25 = vpop.f32.mrb[9].mxu0  ;;  %v41_v0 = vld [vmem:[%s18487_s0 + $0x68] sm:$0xff] }
  0xff   :  { %778 = vrot.lane.b32.xlu0 %v751_v40, %s15152_s18  ;;  %v829_v59 = vsub.f32 0.0, %v821_v54  ;;  %v2354_v29 = vadd.f32 %v15237_v17, %v15336_v25  ;;  %v2362_v30 = vadd.f32 %v15235_v16, %v15336_v25 }
 0x100   :  { %845 = vrot.lane.b32.xlu1 %v810_v41, %s15154_s19 }
 0x101   :  { %v2418_v34 = vmul.f32 %v2362_v30, %v2362_v30  ;;  %v2410_v36 = vmul.f32 2.0, %v2362_v30 }
 0x103   :  { %843 = vrot.lane.b32.xlu0 %v809_v45, %s15154_s19  ;;  %v2426_v42 = vsub.f32 0.0, %v2418_v34 }
 0x104   :  { %875 = vrot.lane.b32.xlu1 %v825_v47, %s15152_s18 }
 0x107   :  { %877 = vrot.lane.b32.xlu0 %v826_v50, %s15152_s18 }
 0x108   :  { %849 = vrot.lane.b32.xlu1 %v812_v48, %s15154_s19 }
 0x10b   :  { %782 = vrot.lane.b32.xlu0 %v753_v53, %s15152_s18 }
 0x10c   :  { %879 = vrot.lane.b32.xlu1 %v827_v51, %s15152_s18 }
 0x10f   :  { %847 = vrot.lane.b32.xlu0 %v811_v55, %s15154_s19 }
 0x110   :  { %784 = vrot.lane.b32.xlu1 %v754_v57, %s15152_s18 }
 0x113   :  { %881 = vrot.lane.b32.xlu0 %v828_v60, %s15152_s18 }
 0x114   :  { %883 = vrot.lane.b32.xlu1 %v829_v59, %s15152_s18 }
 0x117   :  { %851 = vrot.lane.b32.xlu0 %v813_v61, %s15154_s19 }
 0x118   :  { %853 = vrot.lane.b32.xlu1 %v814_v62, %s15154_s19 }
 0x11b   :  { %786 = vrot.lane.b32.xlu0 %v755_v63, %s15152_s18  ;;  %v40_v63 = vld [vmem:[%s18487_s0 + $0x60] sm:$0xff] }
 0x11c   :  { %788 = vrot.lane.b32.xlu1 %v756_v3, %s15152_s18  ;;  %14120 = vmatprep.mubr.msk.f32.mxu0 %vm96_vm0, %v40_v63 }
 0x11d   :  { %14121 = vmatmul.mubr.msk.f32.gmra.mrb[12].mxu0 %vm96_vm0, %v41_v0 }
 0x11e   :  { %14123 = vmatprep.mubr.msk.f32.mxu0 %vm96_vm0, %v42_v1 }
 0x11f   :  { %885 = vrot.lane.b32.xlu0 %v830_v4, %s15152_s18 }
 0x120   :  { %2378 = vrot.lane.b32.xlu1 %v2354_v29, %s15152_s18 }
 0x123   :  { %2474 = vrot.lane.b32.xlu0 %v2426_v42, %s15152_s18 }
 0x124   :  { %2442 = vrot.lane.b32.xlu1 %v2410_v36, %s15154_s19 }
 0x162   :  { %v777_v5 = vpop.permute.xlu1 %776 }
 0x163   :  { %v800_v23 = vsel %vm798_vm3, %v777_v5, 1.0 }
 0x165   :  { %v840_v6 = vpop.permute.xlu0 %839 }
 0x166   :  { %v775_v7 = vpop.permute.xlu1 %774 }
 0x167   :  { %v799_v13 = vsel %vm798_vm3, %v775_v7, 1.0 }
 0x169   :  { %v874_v8 = vpop.permute.xlu0 %873 }
 0x16a   :  { %v842_v9 = vpop.permute.xlu1 %841 }
 0x16b   :  { %v896_v15 = vsel %vm798_vm3, %v842_v9, %v874_v8 }
 0x16d   :  { %v872_v10 = vpop.permute.xlu0 %871 }
 0x16e   :  { %v781_v11 = vpop.permute.xlu1 %780  ;;  %v895_v12 = vsel %vm798_vm3, %v840_v6, %v872_v10 }
 0x16f   :  { %14199 = vmatpush3.xpose.msk.msra.mxu1 %vm903_vm2, %v895_v12  ;;  %v802_v44 = vsel %vm798_vm3, %v781_v11, 1.0 }
 0x170   :  { %14203 = vmatprep.subr.mxu1 %v18491_v22 }
 0x171   :  { %v779_v14 = vpop.permute.xlu0 %778 }
 0x172   :  { %14201 = vmatmul.mubr.msk.f32.vlgmr.msra.gmra.mrb[0].mxu1 %vm903_vm2, %v799_v13  ;;  %v846_v19 = vpop.permute.xlu1 %845  ;;  %v801_v38 = vsel %vm798_vm3, %v779_v14, 1.0 }
 0x173   :  { %14204 = vmatpush3.xpose.msk.msra.mxu1 %vm903_vm2, %v896_v15  ;;  %14205 = vmatprep.mubr.msk.f32.mxu1 %vm15153_vm1, %v18491_v22 }
 0x174   :  { %14208 = vmatprep.subr.mxu1 %v18491_v22 }
 0x175   :  { %v844_v24 = vpop.permute.xlu0 %843 }
 0x176   :  { %14206 = vmatmul.mubr.msk.f32.vlgmr.msra.gmra.mrb[2].mxu1 %vm903_vm2, %v800_v23  ;;  %v876_v27 = vpop.permute.xlu1 %875 }
 0x177   :  { %v897_v32 = vsel %vm798_vm3, %v844_v24, %v876_v27  ;;  %14210 = vmatprep.mubr.msk.f32.mxu1 %vm15153_vm1, %v18491_v22 }
 0x178   :  { %14209 = vmatpush3.xpose.msk.msra.mxu1 %vm903_vm2, %v897_v32 }
 0x179   :  { %v878_v35 = vpop.permute.xlu0 %877  ;;  %14213 = vmatprep.subr.mxu1 %v18491_v22 }
 0x17a   :  { %v898_v40 = vsel %vm798_vm3, %v846_v19, %v878_v35  ;;  %v850_v41 = vpop.permute.xlu1 %849 }
 0x17b   :  { %14211 = vmatmul.mubr.msk.f32.vlgmr.msra.gmra.mrb[4].mxu1 %vm903_vm2, %v801_v38  ;;  %v2363_v38 = vadd.f32 %v15333_v21, %v15235_v16 }
 0x17c   :  { %14214 = vmatpush3.xpose.msk.msra.mxu1 %vm903_vm2, %v898_v40  ;;  %14215 = vmatprep.mubr.msk.f32.mxu1 %vm15153_vm1, %v18491_v22 }
 0x17d   :  { %v783_v43 = vpop.permute.xlu0 %782  ;;  %14218 = vmatprep.subr.mxu1 %v18491_v22  ;;  %v2411_v40 = vmul.f32 2.0, %v2363_v38 }
 0x17e   :  { %v880_v45 = vpop.permute.xlu1 %879  ;;  %v803_v49 = vsel %vm798_vm3, %v783_v43, 1.0  ;;  %v15426_v43 = vpop.f32.mrb[10].mxu0 }
 0x17f   :  { %14216 = vmatmul.mubr.msk.f32.vlgmr.msra.gmra.mrb[6].mxu1 %vm903_vm2, %v802_v44  ;;  %v15428_v44 = vpop.f32.mrb[11].mxu0 }
 0x180   :  { %14220 = vmatprep.mubr.msk.f32.mxu1 %vm15153_vm1, %v18491_v22 }
 0x181   :  { %v848_v46 = vpop.permute.xlu0 %847 }
 0x182   :  { %v899_v47 = vsel %vm798_vm3, %v848_v46, %v880_v45  ;;  %v785_v48 = vpop.permute.xlu1 %784 }
 0x183   :  { %14219 = vmatpush3.xpose.msk.msra.mxu1 %vm903_vm2, %v899_v47  ;;  %v804_v53 = vsel %vm798_vm3, %v785_v48, 1.0 }
 0x184   :  { %14223 = vmatprep.subr.mxu1 %v18491_v22 }
 0x185   :  { %v882_v50 = vpop.permute.xlu0 %881 }
 0x186   :  { %v900_v51 = vsel %vm798_vm3, %v850_v41, %v882_v50  ;;  %14221 = vmatmul.mubr.msk.f32.vlgmr.msra.gmra.mrb[8].mxu1 %vm903_vm2, %v803_v49  ;;  %v884_v52 = vpop.permute.xlu1 %883  ;;  %v2419_v41 = vmul.f32 %v2363_v38, %v2363_v38 }
 0x187   :  { %14224 = vmatpush3.xpose.msk.msra.mxu1 %vm903_vm2, %v900_v51  ;;  %14225 = vmatprep.mubr.msk.f32.mxu1 %vm15153_vm1, %v18491_v22 }
 0x188   :  { %14228 = vmatprep.subr.mxu1 %v18491_v22  ;;  %v2427_v42 = vsub.f32 0.0, %v2419_v41  ;;  %v47_v41 = vld [vmem:[%s18487_s0 + $0x98] sm:$0xff] }
 0x189   :  { %v852_v54 = vpop.permute.xlu0 %851 }
 0x18a   :  { %14226 = vmatmul.mubr.msk.f32.vlgmr.msra.gmra.mrb[10].mxu1 %vm903_vm2, %v804_v53  ;;  %v901_v55 = vsel %vm798_vm3, %v852_v54, %v884_v52  ;;  %v854_v56 = vpop.permute.xlu1 %853 }
 0x18b   :  { %14229 = vmatpush3.xpose.msk.msra.mxu1 %vm903_vm2, %v901_v55  ;;  %14230 = vmatprep.mubr.msk.f32.mxu1 %vm15153_vm1, %v18491_v22 }
 0x18c   :  { %14233 = vmatprep.subr.mxu1 %v18491_v22 }
 0x18d   :  { %v787_v57 = vpop.permute.xlu0 %786 }
 0x18e   :  { %v805_v58 = vsel %vm798_vm3, %v787_v57, 1.0  ;;  %v789_v59 = vpop.permute.xlu1 %788 }
 0x18f   :  { %14231 = vmatmul.mubr.msk.f32.vlgmr.msra.gmra.mrb[12].mxu1 %vm903_vm2, %v805_v58  ;;  %v806_v62 = vsel %vm798_vm3, %v789_v59, 1.0 }
 0x190   :  { %14235 = vmatprep.mubr.msk.f32.mxu1 %vm15153_vm1, %v18491_v22 }
 0x191   :  { %v886_v60 = vpop.permute.xlu0 %885 }
 0x192   :  { %v902_v61 = vsel %vm798_vm3, %v854_v56, %v886_v60  ;;  %v15430_v45 = vpop.permute.xlu1 %2378 }
 0x193   :  { %14234 = vmatpush3.xpose.msk.msra.mxu1 %vm903_vm2, %v902_v61 }
 0x194   :  { %14238 = vmatprep.subr.mxu1 %v18491_v22 }
 0x195   :  { %v15432_v46 = vpop.permute.xlu0 %2474 }
 0x196   :  { %14236 = vmatmul.mubr.msk.f32.vlgmr.msra.gmra.mrb[14].mxu1 %vm903_vm2, %v806_v62  ;;  %v15434_v47 = vpop.permute.xlu1 %2442 }
 0x197   :  { %14239 = vmatpush3.msra.mxu1 %v15243_v20  ;;  %14240 = vmatprep.mubr.msk.f32.mxu1 %vm15153_vm1, %v18491_v22  ;;  %v43_v20 = vld [vmem:[%s18487_s0 + $0x78] sm:$0xff] }
 0x198   :  { %14243 = vmatprep.subr.mxu1 %v18491_v22  ;;  %14124 = vmatmul.mubr.msk.f32.gmra.mrb[14].mxu0 %vm96_vm0, %v43_v20 }
 0x1f0   :  { %v15436_v50 = vpop.f32.mrb[12].mxu0 }
 0x1f1   :  { %v15438_v52 = vpop.f32.mrb[13].mxu0 }
 0x245   :  { %v976_v2 = vpop.f32.mrb[0].mxu1 }
 0x246   :  { %v14202_v3 = vpop.f32.mrb[1].mxu1  ;;  %v1513_v4 = vsel %vm1512_vm4, %v976_v2, -inf }
 0x247   :  { %1514 = vmax.xlane.f32.xlu0 %v1513_v4 }
 0x249   :  { %v1052_v5 = vpop.f32.mrb[2].mxu1 }
 0x24a   :  { %v14207_v6 = vpop.f32.mrb[3].mxu1  ;;  %v1516_v7 = vsel %vm1512_vm4, %v1052_v5, -inf }
 0x24b   :  { %1517 = vmax.xlane.f32.xlu1 %v1516_v7 }
 0x24e   :  { %v1128_v8 = vpop.f32.mrb[4].mxu1 }
 0x24f   :  { %v14212_v9 = vpop.f32.mrb[5].mxu1  ;;  %v1519_v10 = vsel %vm1512_vm4, %v1128_v8, -inf }
 0x250   :  { %1520 = vmax.xlane.f32.xlu0 %v1519_v10 }
 0x252   :  { %v1204_v11 = vpop.f32.mrb[6].mxu1 }
 0x253   :  { %v14217_v12 = vpop.f32.mrb[7].mxu1  ;;  %v1522_v13 = vsel %vm1512_vm4, %v1204_v11, -inf }
 0x254   :  { %1523 = vmax.xlane.f32.xlu0 %v1522_v13 }
 0x259   :  { %v1280_v14 = vpop.f32.mrb[8].mxu1 }
 0x25a   :  { %v14222_v15 = vpop.f32.mrb[9].mxu1  ;;  %v1525_v19 = vsel %vm1512_vm4, %v1280_v14, -inf }
 0x25b   :  { %1526 = vmax.xlane.f32.xlu1 %v1525_v19 }
 0x25d   :  { %v1356_v23 = vpop.f32.mrb[10].mxu1 }
 0x25e   :  { %v14227_v24 = vpop.f32.mrb[11].mxu1  ;;  %v1528_v27 = vsel %vm1512_vm4, %v1356_v23, -inf }
 0x25f   :  { %1529 = vmax.xlane.f32.xlu0 %v1528_v27  ;;  %v2364_v24 = vadd.f32 %v15235_v16, %v15428_v44  ;;  %v44_v27 = vld [vmem:[%s18487_s0 + $0x80] sm:$0xff] }
 0x260   :  { %14126 = vmatprep.mubr.msk.f32.mxu0 %vm96_vm0, %v44_v27 }
 0x262   :  { %v15414_v29 = vpop.f32.mrb[12].mxu1 }
 0x263   :  { %v1531_v30 = vsel %vm1512_vm4, %v15414_v29, -inf  ;;  %v14232_v32 = vpop.f32.mrb[13].mxu1 }
 0x264   :  { %1532 = vmax.xlane.f32.xlu1 %v1531_v30  ;;  %v45_v30 = vld [vmem:[%s18487_s0 + $0x88] sm:$0xff]  ;;  %v2412_v32 = vmul.f32 2.0, %v2364_v24 }
 0x265   :  { %14127 = vmatmul.mubr.msk.f32.gmra.mrb[16].mxu0 %vm96_vm0, %v45_v30 }
 0x269   :  { %v15418_v34 = vpop.f32.mrb[14].mxu1 }
 0x26a   :  { %v1534_v35 = vsel %vm1512_vm4, %v15418_v34, -inf  ;;  %v14237_v36 = vpop.f32.mrb[15].mxu1 }
 0x26b   :  { %1535 = vmax.xlane.f32.xlu0 %v1534_v35  ;;  %v15440_v55 = vpop.f32.mrb[14].mxu0 }
 0x26c   :  { %v15442_v57 = vpop.f32.mrb[15].mxu0 }
 0x275   :  { %2444 = vrot.lane.b32.xlu1 %v2411_v40, %s15154_s19  ;;  %v46_v40 = vld [vmem:[%s18487_s0 + $0x90] sm:$0xff] }
 0x276   :  { %14129 = vmatprep.mubr.msk.f32.mxu0 %vm96_vm0, %v46_v40 }
 0x277   :  { %14130 = vmatmul.mubr.msk.f32.gmra.mrb[18].mxu0 %vm96_vm0, %v47_v41 }
 0x281   :  { %2476 = vrot.lane.b32.xlu0 %v2427_v42, %s15152_s18 }
 0x2d4   :  { %v1515_v48 = vpop.xlane.xlu0 %1514 }
 0x2d5   :  { %v1537_v49 = vsub.f32 %v976_v2, %v1515_v48 }
 0x2d7   :  { %v1545_v51 = vmul.f32 1.442695, %v1537_v49 }
 0x2d8   :  { %v1518_v53 = vpop.xlane.xlu1 %1517 }
 0x2d9   :  { %14856 = vpow2.f32 %v1545_v51  ;;  %v1538_v54 = vsub.f32 %v1052_v5, %v1518_v53 }
 0x2db   :  { %v1547_v56 = vmul.f32 1.442695, %v1538_v54 }
 0x2dd   :  { %14858 = vpow2.f32 %v1547_v56  ;;  %v1521_v58 = vpop.xlane.xlu0 %1520  ;;  %v2420_v56 = vmul.f32 %v2364_v24, %v2364_v24 }
 0x2de   :  { %v1539_v59 = vsub.f32 %v1128_v8, %v1521_v58  ;;  %v2365_v58 = vadd.f32 %v15426_v43, %v15235_v16 }
 0x2e0   :  { %v1549_v60 = vmul.f32 1.442695, %v1539_v59  ;;  %v2366_v59 = vadd.f32 %v15235_v16, %v15438_v52 }
 0x2e1   :  { %v1524_v61 = vpop.xlane.xlu0 %1523 }
 0x2e2   :  { %14860 = vpow2.f32 %v1549_v60  ;;  %v1540_v62 = vsub.f32 %v1204_v11, %v1524_v61  ;;  %v2413_v60 = vmul.f32 2.0, %v2365_v58  ;;  %v2422_v61 = vmul.f32 %v2366_v59, %v2366_v59 }
 0x2e3   :  { %v15444_v63 = vpop.eup %14856 }
 0x2e4   :  { %v1551_v0 = vmul.f32 1.442695, %v1540_v62  ;;  %v1561_v1 = vsel %vm1512_vm4, %v15444_v63, 0.0  ;;  %v2357_v62 = vadd.f32 %v15426_v43, %v15237_v17 }
 0x2e5   :  { %1562 = vadd.xlane.f32.xlu1 %v1561_v1  ;;  %v2421_v1 = vmul.f32 %v2365_v58, %v2365_v58 }
 0x2e6   :  { %14862 = vpow2.f32 %v1551_v0  ;;  %v2356_v0 = vadd.f32 %v15237_v17, %v15428_v44 }
 0x2e7   :  { %v15448_v20 = vpop.eup %14858 }
 0x2e8   :  { %v1527_v2 = vpop.xlane.xlu1 %1526  ;;  %v1564_v3 = vsel %vm1512_vm4, %v15448_v20, 0.0 }
 0x2e9   :  { %v1541_v4 = vsub.f32 %v1280_v14, %v1527_v2  ;;  %1565 = vadd.xlane.f32.xlu0 %v1564_v3  ;;  %v2367_v2 = vadd.f32 %v15436_v50, %v15235_v16  ;;  %v2430_v3 = vsub.f32 0.0, %v2422_v61 }
 0x2eb   :  { %v1553_v5 = vmul.f32 1.442695, %v1541_v4  ;;  %v2429_v4 = vsub.f32 0.0, %v2421_v1 }
 0x2ec   :  { %v15452_v6 = vpop.eup %14860  ;;  %v1530_v7 = vpop.xlane.xlu0 %1529 }
 0x2ed   :  { %14864 = vpow2.f32 %v1553_v5  ;;  %v1542_v8 = vsub.f32 %v1356_v23, %v1530_v7  ;;  %v1567_v9 = vsel %vm1512_vm4, %v15452_v6, 0.0  ;;  %v2355_v23 = vadd.f32 %v15333_v21, %v15237_v17 }
 0x2ee   :  { %1568 = vadd.xlane.f32.xlu1 %v1567_v9  ;;  %v2415_v5 = vmul.f32 2.0, %v2367_v2  ;;  %v2368_v7 = vadd.f32 %v15235_v16, %v15442_v57  ;;  %v2359_v9 = vadd.f32 %v15436_v50, %v15237_v17 }
 0x2ef   :  { %v1555_v10 = vmul.f32 1.442695, %v1542_v8  ;;  %v2414_v8 = vmul.f32 2.0, %v2366_v59 }
 0x2f0   :  { %v15456_v11 = vpop.eup %14862  ;;  %v2416_v30 = vmul.f32 2.0, %v2368_v7 }
 0x2f1   :  { %14866 = vpow2.f32 %v1555_v10  ;;  %v1570_v12 = vsel %vm1512_vm4, %v15456_v11, 0.0  ;;  %v1533_v35 = vpop.xlane.xlu1 %1532  ;;  %v2424_v10 = vmul.f32 %v2368_v7, %v2368_v7 }
 0x2f2   :  { %1571 = vadd.xlane.f32.xlu0 %v1570_v12  ;;  %v1543_v36 = vsub.f32 %v15414_v29, %v1533_v35  ;;  %v2358_v12 = vadd.f32 %v15237_v17, %v15438_v52  ;;  %v2360_v35 = vadd.f32 %v15237_v17, %v15442_v57 }
 0x2f4   :  { %v1557_v42 = vmul.f32 1.442695, %v1543_v36 }
 0x2f5   :  { %v15539_v40 = vpop.permute.xlu1 %2444 }
 0x2f6   :  { %14868 = vpow2.f32 %v1557_v42 }
 0x2f7   :  { %v15460_v13 = vpop.eup %14864 }
 0x2f8   :  { %v1573_v14 = vsel %vm1512_vm4, %v15460_v13, 0.0  ;;  %v1536_v38 = vpop.xlane.xlu0 %1535 }
 0x2f9   :  { %1574 = vadd.xlane.f32.xlu1 %v1573_v14  ;;  %v1544_v48 = vsub.f32 %v15418_v34, %v1536_v38  ;;  %v2428_v34 = vsub.f32 0.0, %v2420_v56  ;;  %v2423_v14 = vmul.f32 %v2367_v2, %v2367_v2 }
 0x2fb   :  { %v15464_v15 = vpop.eup %14866  ;;  %v1559_v49 = vmul.f32 1.442695, %v1544_v48  ;;  %v2431_v24 = vsub.f32 0.0, %v2423_v14 }
 0x2fc   :  { %v1576_v19 = vsel %vm1512_vm4, %v15464_v15, 0.0  ;;  %v15541_v41 = vpop.permute.xlu0 %2476 }
 0x2fd   :  { %1577 = vadd.xlane.f32.xlu0 %v1576_v19  ;;  %14870 = vpow2.f32 %v1559_v49  ;;  %v2369_v19 = vadd.f32 %v15440_v55, %v15235_v16 }
 0x2ff   :  { %v2417_v27 = vmul.f32 2.0, %v2369_v19  ;;  %v2425_v36 = vmul.f32 %v2369_v19, %v2369_v19 }
 0x300   :  { %v15492_v29 = vpop.eup %14868 }
 0x301   :  { %v1579_v51 = vsel %vm1512_vm4, %v15492_v29, 0.0  ;;  %v2433_v38 = vsub.f32 0.0, %v2425_v36 }
 0x307   :  { %v15496_v53 = vpop.eup %14870 }
 0x308   :  { %v1582_v54 = vsel %vm1512_vm4, %v15496_v53, 0.0 }
 0x30a   :  { %2380 = vrot.lane.b32.xlu1 %v2355_v23, %s15152_s18  ;;  %v2432_v23 = vsub.f32 0.0, %v2424_v10  ;;  %v2499_v10 = vsel %vm798_vm3, %v15539_v40, %v15541_v41 }
 0x313   :  { %2446 = vrot.lane.b32.xlu0 %v2412_v32, %s15154_s19  ;;  %v2361_v32 = vadd.f32 %v15440_v55, %v15237_v17 }
 0x32e   :  { %1580 = vadd.xlane.f32.xlu1 %v1579_v51 }
 0x332   :  { %1583 = vadd.xlane.f32.xlu0 %v1582_v54 }
 0x33f   :  { %2478 = vrot.lane.b32.xlu1 %v2428_v34, %s15152_s18 }
 0x343   :  { %2448 = vrot.lane.b32.xlu1 %v2413_v60, %s15154_s19 }
 0x347   :  { %2384 = vrot.lane.b32.xlu1 %v2357_v62, %s15152_s18 }
 0x348   :  { %2382 = vrot.lane.b32.xlu0 %v2356_v0, %s15152_s18 }
 0x34b   :  { %2482 = vrot.lane.b32.xlu1 %v2430_v3, %s15152_s18 }
 0x34c   :  { %2480 = vrot.lane.b32.xlu0 %v2429_v4, %s15152_s18 }
 0x34f   :  { %2452 = vrot.lane.b32.xlu1 %v2415_v5, %s15154_s19 }
 0x350   :  { %2450 = vrot.lane.b32.xlu0 %v2414_v8, %s15154_s19 }
 0x353   :  { %2388 = vrot.lane.b32.xlu1 %v2359_v9, %s15152_s18 }
 0x354   :  { %2386 = vrot.lane.b32.xlu0 %v2358_v12, %s15152_s18 }
 0x357   :  { %2486 = vrot.lane.b32.xlu1 %v2432_v23, %s15152_s18 }
 0x358   :  { %2484 = vrot.lane.b32.xlu0 %v2431_v24, %s15152_s18 }
 0x35b   :  { %2456 = vrot.lane.b32.xlu1 %v2417_v27, %s15154_s19 }
 0x35c   :  { %2454 = vrot.lane.b32.xlu0 %v2416_v30, %s15154_s19 }
 0x35f   :  { %2392 = vrot.lane.b32.xlu1 %v2361_v32, %s15152_s18 }
 0x360   :  { %2390 = vrot.lane.b32.xlu0 %v2360_v35, %s15152_s18 }
 0x364   :  { %2488 = vrot.lane.b32.xlu0 %v2433_v38, %s15152_s18  ;;  %v15626_v38 = vpop.f32.mrb[16].mxu0 }
 0x372   :  { %v1563_v42 = vpop.xlane.xlu1 %1562 }
 0x373   :  { %14872 = vrcp.f32 %v1563_v42  ;;  %v15630_v42 = vpop.f32.mrb[17].mxu0 }
 0x376   :  { %v1566_v48 = vpop.xlane.xlu0 %1565 }
 0x377   :  { %14874 = vrcp.f32 %v1566_v48 }
 0x37b   :  { %v1569_v49 = vpop.xlane.xlu1 %1568 }
 0x37c   :  { %14876 = vrcp.f32 %v1569_v49 }
 0x37d   :  { %v14873_v51 = vpop.eup %14872 }
 0x37e   :  { %v1593_v54 = vmul.f32 %v14873_v51, %v15444_v63 }
 0x37f   :  { %v1572_v56 = vpop.xlane.xlu0 %1571 }
 0x380   :  { %14878 = vrcp.f32 %v1572_v56  ;;  %14241 = vmatmul.mubr.msk.f32.vlgmr.msra.gmra.mrb[16].mxu1 %vm1512_vm4, %v1593_v54  ;;  %v3954_v54 = vadd.f32 %v15235_v16, %v15630_v42 }
 0x381   :  { %v14875_v58 = vpop.eup %14874  ;;  %14244 = vmatpush3.msra.mxu1 %v15239_v18  ;;  %14245 = vmatprep.mubr.msk.f32.mxu1 %vm15153_vm1, %v18491_v22 }
 0x382   :  { %14248 = vmatprep.subr.mxu1 %v18491_v22  ;;  %v1594_v34 = vmul.f32 %v14875_v58, %v15448_v20 }
 0x384   :  { %14246 = vmatmul.mubr.msk.f32.vlgmr.msra.gmra.mrb[18].mxu1 %vm1512_vm4, %v1594_v34 }
 0x385   :  { %14249 = vmatpush3.msra.mxu1 %v15258_v28  ;;  %14250 = vmatprep.mubr.msk.f32.mxu1 %vm15153_vm1, %v18491_v22 }
 0x386   :  { %v14877_v63 = vpop.eup %14876  ;;  %v1575_v59 = vpop.xlane.xlu1 %1574  ;;  %14253 = vmatprep.subr.mxu1 %v18491_v22 }
 0x387   :  { %14880 = vrcp.f32 %v1575_v59  ;;  %v1595_v18 = vmul.f32 %v14877_v63, %v15452_v6  ;;  %v3955_v63 = vadd.f32 %v15626_v38, %v15235_v16  ;;  %v4002_v59 = vmul.f32 2.0, %v3954_v54 }
 0x389   :  { %14251 = vmatmul.mubr.msk.f32.vlgmr.msra.gmra.mrb[20].mxu1 %vm1512_vm4, %v1595_v18  ;;  %v4010_v18 = vmul.f32 %v3954_v54, %v3954_v54  ;;  %4034 = vrot.lane.b32.xlu1 %v4002_v59, %s15154_s19  ;;  %v76_v54 = vld [vmem:[%s18487_s0 + $0x180] sm:$0xff]  ;;  %v81_v59 = vld [vmem:[%s18487_s0 + $0x1a8] sm:$0xff] }
 0x38a   :  { %v14879_v60 = vpop.eup %14878  ;;  %14254 = vmatpush3.msra.mxu1 %v15254_v26  ;;  %v1578_v20 = vpop.xlane.xlu0 %1577  ;;  %14255 = vmatprep.mubr.msk.f32.mxu1 %vm15153_vm1, %v18491_v22 }
 0x38b   :  { %14882 = vrcp.f32 %v1578_v20  ;;  %14258 = vmatprep.subr.mxu1 %v18491_v22  ;;  %v1596_v28 = vmul.f32 %v14879_v60, %v15456_v11  ;;  %v2381_v11 = vpop.permute.xlu1 %2380  ;;  %v48_v60 = vld [vmem:[%s18487_s0 + $0xa0] sm:$0xff] }
 0x38c   :  { %14132 = vmatprep.mubr.msk.f32.mxu0 %vm96_vm0, %v48_v60  ;;  %v82_v60 = vld [vmem:[%s18487_s0 + $0x1b0] sm:$0xff] }
 0x38d   :  { %14256 = vmatmul.mubr.msk.f32.vlgmr.msra.gmra.mrb[22].mxu1 %vm1512_vm4, %v1596_v28  ;;  %v4003_v28 = vmul.f32 2.0, %v3955_v63 }
 0x38e   :  { %14259 = vmatpush3.msra.mxu1 %v15264_v33  ;;  %14260 = vmatprep.mubr.msk.f32.mxu1 %vm15153_vm1, %v18491_v22 }
 0x38f   :  { %14263 = vmatprep.subr.mxu1 %v18491_v22  ;;  %4036 = vrot.lane.b32.xlu1 %v4003_v28, %s15154_s19 }
 0x391   :  { %v14881_v6 = vpop.eup %14880 }
 0x392   :  { %v1597_v26 = vmul.f32 %v14881_v6, %v15460_v13  ;;  %v2447_v13 = vpop.permute.xlu0 %2446  ;;  %v4011_v6 = vmul.f32 %v3955_v63, %v3955_v63  ;;  %v80_v63 = vld [vmem:[%s18487_s0 + $0x1a0] sm:$0xff] }
 0x394   :  { %14261 = vmatmul.mubr.msk.f32.vlgmr.msra.gmra.mrb[24].mxu1 %vm1512_vm4, %v1597_v26  ;;  %v4018_v26 = vsub.f32 0.0, %v4010_v18 }
 0x395   :  { %v14883_v61 = vpop.eup %14882  ;;  %14264 = vmatpush3.msra.mxu1 %v15262_v31  ;;  %14265 = vmatprep.mubr.msk.f32.mxu1 %vm15153_vm1, %v18491_v22 }
 0x396   :  { %14268 = vmatprep.subr.mxu1 %v18491_v22  ;;  %v1598_v33 = vmul.f32 %v14883_v61, %v15464_v15  ;;  %v15659_v61 = vpop.f32.mrb[18].mxu0  ;;  %4066 = vrot.lane.b32.xlu0 %v4018_v26, %s15152_s18 }
 0x398   :  { %14266 = vmatmul.mubr.msk.f32.vlgmr.msra.gmra.mrb[26].mxu1 %vm1512_vm4, %v1598_v33  ;;  %v49_v33 = vld [vmem:[%s18487_s0 + $0xa8] sm:$0xff] }
 0x399   :  { %14269 = vmatpush3.msra.mxu1 %v15276_v39  ;;  %14270 = vmatprep.mubr.msk.f32.mxu1 %vm15153_vm1, %v18491_v22 }
 0x39a   :  { %14273 = vmatprep.subr.mxu1 %v18491_v22  ;;  %14133 = vmatmul.mubr.msk.f32.gmra.mrb[20].mxu0 %vm96_vm0, %v49_v33  ;;  %v83_v33 = vld [vmem:[%s18487_s0 + $0x1b8] sm:$0xff] }
 0x3bb   :  { %v1581_v62 = vpop.xlane.xlu1 %1580 }
 0x3bc   :  { %14884 = vrcp.f32 %v1581_v62  ;;  %v3946_v62 = vadd.f32 %v15237_v17, %v15630_v42 }
 0x3be   :  { %3970 = vrot.lane.b32.xlu0 %v3946_v62, %s15152_s18 }
 0x3bf   :  { %v2479_v31 = vpop.permute.xlu1 %2478  ;;  %v1584_v0 = vpop.xlane.xlu0 %1583 }
 0x3c0   :  { %14886 = vrcp.f32 %v1584_v0  ;;  %v2500_v14 = vsel %vm798_vm3, %v2447_v13, %v2479_v31  ;;  %v50_v13 = vld [vmem:[%s18487_s0 + $0xb0] sm:$0xff]  ;;  %v4019_v31 = vsub.f32 0.0, %v4011_v6 }
 0x3c1   :  { %14135 = vmatprep.mubr.msk.f32.mxu0 %vm96_vm0, %v50_v13 }
 0x3c2   :  { %4068 = vrot.lane.b32.xlu1 %v4019_v31, %s15152_s18 }
 0x3c3   :  { %v2383_v1 = vpop.permute.xlu0 %2382  ;;  %v2449_v2 = vpop.permute.xlu1 %2448 }
 0x3c4   :  { %v2404_v19 = vsel %vm798_vm3, %v2383_v1, 1.0  ;;  %v51_v1 = vld [vmem:[%s18487_s0 + $0xb8] sm:$0xff] }
 0x3c5   :  { %14136 = vmatmul.mubr.msk.f32.gmra.mrb[22].mxu0 %vm96_vm0, %v51_v1 }
 0x3c6   :  { %v14885_v3 = vpop.eup %14884 }
 0x3c7   :  { %v2481_v15 = vpop.permute.xlu0 %2480  ;;  %v1599_v4 = vmul.f32 %v14885_v3, %v15492_v29  ;;  %v2385_v5 = vpop.permute.xlu1 %2384  ;;  %v2498_v29 = vsel %vm798_vm3, %v15434_v47, %v15432_v46  ;;  %v2403_v46 = vsel %vm798_vm3, %v2381_v11, 1.0  ;;  %v3947_v3 = vadd.f32 %v15626_v38, %v15237_v17 }
 0x3c8   :  { %v2501_v24 = vsel %vm798_vm3, %v2449_v2, %v2481_v15  ;;  %v2405_v30 = vsel %vm798_vm3, %v2385_v5, 1.0  ;;  %v15664_v11 = vpop.f32.mrb[19].mxu0  ;;  %v52_v2 = vld [vmem:[%s18487_s0 + $0xc0] sm:$0xff]  ;;  %v3957_v15 = vadd.f32 %v15659_v61, %v15235_v16 }
 0x3c9   :  { %14271 = vmatmul.mubr.msk.f32.vlgmr.msra.gmra.mrb[28].mxu1 %vm1512_vm4, %v1599_v4  ;;  %v3956_v0 = vadd.f32 %v15235_v16, %v15664_v11  ;;  %14138 = vmatprep.mubr.msk.f32.mxu0 %vm96_vm0, %v52_v2 }
 0x3ca   :  { %v14887_v39 = vpop.eup %14886  ;;  %14274 = vmatpush3.msra.mxu1 %v15272_v37  ;;  %14275 = vmatprep.mubr.msk.f32.mxu1 %vm15153_vm1, %v18491_v22  ;;  %v4005_v5 = vmul.f32 2.0, %v3957_v15 }
 0x3cb   :  { %v1600_v7 = vmul.f32 %v14887_v39, %v15496_v53  ;;  %14278 = vmatprep.subr.mxu1 %v18491_v22  ;;  %v2451_v8 = vpop.permute.xlu0 %2450  ;;  %v2483_v9 = vpop.permute.xlu1 %2482  ;;  %v2402_v53 = vsel %vm798_vm3, %v15430_v45, 1.0  ;;  %v4012_v4 = vmul.f32 %v3956_v0, %v3956_v0  ;;  %v53_v39 = vld [vmem:[%s18487_s0 + $0xc8] sm:$0xff]  ;;  %3972 = vrot.lane.b32.xlu1 %v3947_v3, %s15152_s18 }
 0x3cc   :  { %v2502_v32 = vsel %vm798_vm3, %v2451_v8, %v2483_v9  ;;  %14139 = vmatmul.mubr.msk.f32.gmra.mrb[24].mxu0 %vm96_vm0, %v53_v39  ;;  %v4013_v8 = vmul.f32 %v3957_v15, %v3957_v15 }
 0x3cd   :  { %14276 = vmatmul.mubr.msk.f32.vlgmr.msra.gmra.mrb[30].mxu1 %vm1512_vm4, %v1600_v7  ;;  %v4020_v7 = vsub.f32 0.0, %v4012_v4 }
 0x3ce   :  { %14280 = vmatprep.mubr.msk.f32.mxu1 %vm15153_vm1, %v18491_v22  ;;  %v4021_v9 = vsub.f32 0.0, %v4013_v8 }
 0x3cf   :  { %v2387_v37 = vpop.permute.xlu0 %2386  ;;  %v2453_v12 = vpop.permute.xlu1 %2452  ;;  %4070 = vrot.lane.b32.xlu1 %v4020_v7, %s15152_s18 }
 0x3d0   :  { %v2406_v36 = vsel %vm798_vm3, %v2387_v37, 1.0  ;;  %v55_v37 = vld [vmem:[%s18487_s0 + $0xd8] sm:$0xff] }
 0x3d1   :  { %14279 = vmatpush3.xpose.msk.msra.mxu1 %vm903_vm2, %v2498_v29  ;;  %v54_v29 = vld [vmem:[%s18487_s0 + $0xd0] sm:$0xff] }
 0x3d2   :  { %14283 = vmatprep.subr.mxu1 %v18491_v22  ;;  %14141 = vmatprep.mubr.msk.f32.mxu0 %vm96_vm0, %v54_v29 }
 0x3d3   :  { %v2485_v47 = vpop.permute.xlu0 %2484  ;;  %v2389_v45 = vpop.permute.xlu1 %2388  ;;  %4072 = vrot.lane.b32.xlu1 %v4021_v9, %s15152_s18  ;;  %14142 = vmatmul.mubr.msk.f32.gmra.mrb[26].mxu0 %vm96_vm0, %v55_v37 }
 0x3d4   :  { %14281 = vmatmul.mubr.msk.f32.vlgmr.msra.gmra.mrb[32].mxu1 %vm903_vm2, %v2402_v53  ;;  %v2503_v40 = vsel %vm798_vm3, %v2453_v12, %v2485_v47  ;;  %v2407_v49 = vsel %vm798_vm3, %v2389_v45, 1.0  ;;  %v56_v53 = vld [vmem:[%s18487_s0 + $0xe0] sm:$0xff]  ;;  %v58_v12 = vld [vmem:[%s18487_s0 + $0xf0] sm:$0xff] }
 0x3d5   :  { %14284 = vmatpush3.xpose.msk.msra.mxu1 %vm903_vm2, %v2499_v10  ;;  %14285 = vmatprep.mubr.msk.f32.mxu1 %vm15153_vm1, %v18491_v22  ;;  %v57_v10 = vld [vmem:[%s18487_s0 + $0xe8] sm:$0xff]  ;;  %v60_v47 = vld [vmem:[%s18487_s0 + $0x100] sm:$0xff]  ;;  %v62_v45 = vld [vmem:[%s18487_s0 + $0x110] sm:$0xff] }
 0x3d6   :  { %14288 = vmatprep.subr.mxu1 %v18491_v22  ;;  %14144 = vmatprep.mubr.msk.f32.mxu0 %vm96_vm0, %v56_v53 }
 0x3d7   :  { %v2455_v23 = vpop.permute.xlu0 %2454  ;;  %v2487_v27 = vpop.permute.xlu1 %2486  ;;  %14145 = vmatmul.mubr.msk.f32.gmra.mrb[28].mxu0 %vm96_vm0, %v57_v10  ;;  %v84_v10 = vld [vmem:[%s18487_s0 + $0x1c0] sm:$0xff] }
 0x3d8   :  { %14286 = vmatmul.mubr.msk.f32.vlgmr.msra.gmra.mrb[34].mxu1 %vm903_vm2, %v2403_v46  ;;  %v2504_v48 = vsel %vm798_vm3, %v2455_v23, %v2487_v27  ;;  %14147 = vmatprep.mubr.msk.f32.mxu0 %vm96_vm0, %v58_v12  ;;  %v59_v46 = vld [vmem:[%s18487_s0 + $0xf8] sm:$0xff]  ;;  %v64_v23 = vld [vmem:[%s18487_s0 + $0x120] sm:$0xff]  ;;  %v66_v27 = vld [vmem:[%s18487_s0 + $0x130] sm:$0xff] }
 0x3d9   :  { %14289 = vmatpush3.xpose.msk.msra.mxu1 %vm903_vm2, %v2500_v14  ;;  %14290 = vmatprep.mubr.msk.f32.mxu1 %vm15153_vm1, %v18491_v22  ;;  %v61_v14 = vld [vmem:[%s18487_s0 + $0x108] sm:$0xff] }
 0x3da   :  { %14293 = vmatprep.subr.mxu1 %v18491_v22  ;;  %v85_v12 = vld [vmem:[%s18487_s0 + $0x1c8] sm:$0xff] }
 0x3db   :  { %v2391_v35 = vpop.permute.xlu0 %2390  ;;  %v2457_v41 = vpop.permute.xlu1 %2456  ;;  %14148 = vmatmul.mubr.msk.f32.gmra.mrb[30].mxu0 %vm96_vm0, %v59_v46  ;;  %v86_v46 = vld [vmem:[%s18487_s0 + $0x1d0] sm:$0xff] }
 0x3dc   :  { %14291 = vmatmul.mubr.msk.f32.vlgmr.msra.gmra.mrb[36].mxu1 %vm903_vm2, %v2404_v19  ;;  %v2408_v56 = vsel %vm798_vm3, %v2391_v35, 1.0  ;;  %14150 = vmatprep.mubr.msk.f32.mxu0 %vm96_vm0, %v60_v47  ;;  %v63_v19 = vld [vmem:[%s18487_s0 + $0x118] sm:$0xff]  ;;  %v69_v35 = vld [vmem:[%s18487_s0 + $0x148] sm:$0xff] }
 0x3dd   :  { %14294 = vmatpush3.xpose.msk.msra.mxu1 %vm903_vm2, %v2501_v24  ;;  %14295 = vmatprep.mubr.msk.f32.mxu1 %vm15153_vm1, %v18491_v22  ;;  %v65_v24 = vld [vmem:[%s18487_s0 + $0x128] sm:$0xff] }
 0x3de   :  { %14298 = vmatprep.subr.mxu1 %v18491_v22 }
 0x3df   :  { %v2489_v51 = vpop.permute.xlu0 %2488  ;;  %v2393_v34 = vpop.permute.xlu1 %2392  ;;  %14151 = vmatmul.mubr.msk.f32.gmra.mrb[32].mxu0 %vm96_vm0, %v61_v14 }
 0x3e0   :  { %14296 = vmatmul.mubr.msk.f32.vlgmr.msra.gmra.mrb[38].mxu1 %vm903_vm2, %v2405_v30  ;;  %v2505_v58 = vsel %vm798_vm3, %v2457_v41, %v2489_v51  ;;  %v2409_v20 = vsel %vm798_vm3, %v2393_v34, 1.0  ;;  %14153 = vmatprep.mubr.msk.f32.mxu0 %vm96_vm0, %v62_v45  ;;  %v67_v30 = vld [vmem:[%s18487_s0 + $0x138] sm:$0xff]  ;;  %v72_v41 = vld [vmem:[%s18487_s0 + $0x160] sm:$0xff] }
 0x3e1   :  { %14299 = vmatpush3.xpose.msk.msra.mxu1 %vm903_vm2, %v2502_v32  ;;  %14300 = vmatprep.mubr.msk.f32.mxu1 %vm15153_vm1, %v18491_v22  ;;  %v68_v32 = vld [vmem:[%s18487_s0 + $0x140] sm:$0xff]  ;;  %v75_v51 = vld [vmem:[%s18487_s0 + $0x178] sm:$0xff] }
 0x3e2   :  { %14303 = vmatprep.subr.mxu1 %v18491_v22  ;;  %v79_v34 = vld [vmem:[%s18487_s0 + $0x198] sm:$0xff] }
 0x3e3   :  { %14154 = vmatmul.mubr.msk.f32.gmra.mrb[34].mxu0 %vm96_vm0, %v63_v19 }
 0x3e4   :  { %14301 = vmatmul.mubr.msk.f32.vlgmr.msra.gmra.mrb[40].mxu1 %vm903_vm2, %v2406_v36  ;;  %14156 = vmatprep.mubr.msk.f32.mxu0 %vm96_vm0, %v64_v23  ;;  %v70_v36 = vld [vmem:[%s18487_s0 + $0x150] sm:$0xff] }
 0x3e5   :  { %14304 = vmatpush3.xpose.msk.msra.mxu1 %vm903_vm2, %v2503_v40  ;;  %14305 = vmatprep.mubr.msk.f32.mxu1 %vm15153_vm1, %v18491_v22  ;;  %v71_v40 = vld [vmem:[%s18487_s0 + $0x158] sm:$0xff] }
 0x3e6   :  { %14308 = vmatprep.subr.mxu1 %v18491_v22 }
 0x3e7   :  { %14157 = vmatmul.mubr.msk.f32.gmra.mrb[36].mxu0 %vm96_vm0, %v65_v24 }
 0x3e8   :  { %14306 = vmatmul.mubr.msk.f32.vlgmr.msra.gmra.mrb[42].mxu1 %vm903_vm2, %v2407_v49  ;;  %14159 = vmatprep.mubr.msk.f32.mxu0 %vm96_vm0, %v66_v27  ;;  %v74_v49 = vld [vmem:[%s18487_s0 + $0x170] sm:$0xff] }
 0x3e9   :  { %14309 = vmatpush3.xpose.msk.msra.mxu1 %vm903_vm2, %v2504_v48  ;;  %14310 = vmatprep.mubr.msk.f32.mxu1 %vm15153_vm1, %v18491_v22  ;;  %v73_v48 = vld [vmem:[%s18487_s0 + $0x168] sm:$0xff] }
 0x3ea   :  { %14313 = vmatprep.subr.mxu1 %v18491_v22 }
 0x3eb   :  { %14160 = vmatmul.mubr.msk.f32.gmra.mrb[38].mxu0 %vm96_vm0, %v67_v30 }
 0x3ec   :  { %14311 = vmatmul.mubr.msk.f32.vlgmr.msra.gmra.mrb[44].mxu1 %vm903_vm2, %v2408_v56  ;;  %14162 = vmatprep.mubr.msk.f32.mxu0 %vm96_vm0, %v68_v32  ;;  %v77_v56 = vld [vmem:[%s18487_s0 + $0x188] sm:$0xff] }
 0x3ed   :  { %14314 = vmatpush3.xpose.msk.msra.mxu1 %vm903_vm2, %v2505_v58  ;;  %14315 = vmatprep.mubr.msk.f32.mxu1 %vm15153_vm1, %v18491_v22  ;;  %v78_v58 = vld [vmem:[%s18487_s0 + $0x190] sm:$0xff] }
 0x3ee   :  { %14318 = vmatprep.subr.mxu1 %v18491_v22 }
 0x3ef   :  { %14163 = vmatmul.mubr.msk.f32.gmra.mrb[40].mxu0 %vm96_vm0, %v69_v35  ;;  %v87_v35 = vld [vmem:[%s18487_s0 + $0x1d8] sm:$0xff] }
 0x3f0   :  { %14316 = vmatmul.mubr.msk.f32.vlgmr.msra.gmra.mrb[46].mxu1 %vm903_vm2, %v2409_v20  ;;  %14165 = vmatprep.mubr.msk.f32.mxu0 %vm96_vm0, %v70_v36 }
 0x3f1   :  { %14319 = vmatpush3.msra.mxu1 %v15336_v25  ;;  %14320 = vmatprep.mubr.msk.f32.mxu1 %vm15153_vm1, %v18491_v22  ;;  %v4004_v25 = vmul.f32 2.0, %v3956_v0 }
 0x3f2   :  { %14323 = vmatprep.subr.mxu1 %v18491_v22 }
 0x3f3   :  { %4038 = vrot.lane.b32.xlu0 %v4004_v25, %s15154_s19  ;;  %14166 = vmatmul.mubr.msk.f32.gmra.mrb[42].mxu0 %vm96_vm0, %v71_v40 }
 0x3f4   :  { %14168 = vmatprep.mubr.msk.f32.mxu0 %vm96_vm0, %v72_v41 }
 0x3f7   :  { %4040 = vrot.lane.b32.xlu0 %v4005_v5, %s15154_s19  ;;  %14169 = vmatmul.mubr.msk.f32.gmra.mrb[44].mxu0 %vm96_vm0, %v73_v48 }
 0x3f8   :  { %14171 = vmatprep.mubr.msk.f32.mxu0 %vm96_vm0, %v74_v49  ;;  %v88_v49 = vld [vmem:[%s18487_s0 + $0x1e0] sm:$0xff] }
 0x3fb   :  { %14172 = vmatmul.mubr.msk.f32.gmra.mrb[46].mxu0 %vm96_vm0, %v75_v51 }
 0x3fc   :  { %14174 = vmatprep.mubr.msk.f32.mxu0 %vm96_vm0, %v76_v54 }
 0x3ff   :  { %14175 = vmatmul.mubr.msk.f32.gmra.mrb[48].mxu0 %vm96_vm0, %v77_v56 }
 0x400   :  { %14177 = vmatprep.mubr.msk.f32.mxu0 %vm96_vm0, %v78_v58 }
 0x403   :  { %14178 = vmatmul.mubr.msk.f32.gmra.mrb[50].mxu0 %vm96_vm0, %v79_v34  ;;  %v15856_v34 = vpop.permute.xlu1 %4034 }
 0x404   :  { %14180 = vmatprep.mubr.msk.f32.mxu0 %vm96_vm0, %v80_v63 }
 0x407   :  { %14181 = vmatmul.mubr.msk.f32.gmra.mrb[52].mxu0 %vm96_vm0, %v81_v59 }
 0x408   :  { %14183 = vmatprep.mubr.msk.f32.mxu0 %vm96_vm0, %v82_v60 }
 0x40b   :  { %14184 = vmatmul.mubr.msk.f32.gmra.mrb[54].mxu0 %vm96_vm0, %v83_v33 }
 0x40c   :  { %14186 = vmatprep.mubr.msk.f32.mxu0 %vm96_vm0, %v84_v10 }
 0x40f   :  { %14187 = vmatmul.mubr.msk.f32.gmra.mrb[56].mxu0 %vm96_vm0, %v85_v12 }
 0x410   :  { %14189 = vmatprep.mubr.msk.f32.mxu0 %vm96_vm0, %v86_v46 }
 0x413   :  { %14190 = vmatmul.mubr.msk.f32.gmra.mrb[58].mxu0 %vm96_vm0, %v87_v35 }
 0x414   :  { %14192 = vmatprep.mubr.msk.f32.mxu0 %vm96_vm0, %v88_v49 }
 0x453   :  { %v1670_v18 = vpop.f32.mrb[16].mxu1 }
 0x454   :  { %v14242_v20 = vpop.f32.mrb[17].mxu1  ;;  %v2215_v28 = vrot.slane %v1670_v18, 1  ;;  %v2232_v6 = vrot.slane %v1670_v18, 2  ;;  %v2249_v26 = vrot.slane %v1670_v18, 3  ;;  %v2266_v13 = vrot.slane %v1670_v18, 4 }
 0x455   :  { %v2281_v62 = vrot.slane %v1670_v18, 5  ;;  %v2298_v31 = vrot.slane %v1670_v18, 6  ;;  %v2315_v0 = vrot.slane %v1670_v18, 7 }
 0x457   :  { %v1743_v1 = vpop.f32.mrb[18].mxu1 }
 0x458   :  { %v2193_v2 = vrot.slane %v1743_v1, 7  ;;  %v2233_v25 = vrot.slane %v1743_v1, 1  ;;  %v2250_v3 = vrot.slane %v1743_v1, 2  ;;  %v2267_v15 = vrot.slane %v1743_v1, 3  ;;  %v14247_v4 = vpop.f32.mrb[19].mxu1 }
 0x459   :  { %v2282_v39 = vrot.slane %v1743_v1, 4  ;;  %v2299_v5 = vrot.slane %v1743_v1, 5  ;;  %v2316_v7 = vrot.slane %v1743_v1, 6  ;;  %v2216_v8 = vsel %vm2194_vm5, %v1743_v1, %v2215_v28 }
 0x45a   :  { %v2251_v9 = vsel %vm2194_vm5, %v2250_v3, %v2249_v26  ;;  %v2234_v29 = vsel %vm2194_vm5, %v2233_v25, %v2232_v6  ;;  %v2195_v37 = vsel %vm2194_vm5, %v2193_v2, %v1670_v18  ;;  %v2268_v53 = vsel %vm2194_vm5, %v2267_v15, %v2266_v13  ;;  %v89_v13 = vld [vmem:[%s18487_s0 + $0x1e8] sm:$0xff]  ;;  %v90_v25 = vld [vmem:[%s18487_s0 + $0x1f0] sm:$0xff] }
 0x45b   :  { %v2283_v47 = vsel %vm2194_vm5, %v2282_v39, %v2281_v62  ;;  %v2317_v14 = vsel %vm2194_vm5, %v2316_v7, %v2315_v0  ;;  %v2300_v45 = vsel %vm2194_vm5, %v2299_v5, %v2298_v31  ;;  %v15868_v62 = vpop.permute.xlu0 %4066  ;;  %v4037_v39 = vpop.permute.xlu1 %4036  ;;  %14193 = vmatmul.mubr.msk.f32.gmra.mrb[60].mxu0 %vm96_vm0, %v89_v13 }
 0x45c   :  { %v1816_v19 = vpop.f32.mrb[20].mxu1  ;;  %14195 = vmatprep.mubr.msk.f32.mxu0 %vm96_vm0, %v90_v25 }
 0x45d   :  { %v14252_v23 = vpop.f32.mrb[21].mxu1  ;;  %v2217_v24 = vrot.slane %v1816_v19, 7  ;;  %v2252_v27 = vrot.slane %v1816_v19, 1  ;;  %v2284_v30 = vrot.slane %v1816_v19, 3  ;;  %v2235_v32 = vsel %vm2197_vm6, %v1816_v19, %v2234_v29  ;;  %v91_v29 = vld [vmem:[%s18487_s0 + $0x1f8] sm:$0xff]  ;;  %s15155_s0 = smov 32  }
 0x45e   :  { %v2318_v36 = vrot.slane %v1816_v19, 5  ;;  %v2301_v40 = vrot.slane %v1816_v19, 4  ;;  %v2196_v41 = vrot.slane %v1816_v19, 6  ;;  %v2269_v48 = vrot.slane %v1816_v19, 2 }
 0x45f   :  { %v2218_v51 = vsel %vm2197_vm6, %v2217_v24, %v2216_v8  ;;  %v2253_v54 = vsel %vm2197_vm6, %v2252_v27, %v2251_v9  ;;  %v2285_v56 = vsel %vm2197_vm6, %v2284_v30, %v2283_v47  ;;  %v4069_v12 = vpop.permute.xlu1 %4068  ;;  %14196 = vmatmul.mubr.msk.f32.gmra.mrb[62].mxu0 %vm96_vm0, %v91_v29 }
 0x460   :  { %v1889_v58 = vpop.f32.mrb[22].mxu1  ;;  %v2319_v63 = vsel %vm2197_vm6, %v2318_v36, %v2317_v14  ;;  %v2302_v59 = vsel %vm2197_vm6, %v2301_v40, %v2300_v45  ;;  %v2198_v18 = vsel %vm2197_vm6, %v2196_v41, %v2195_v37  ;;  %v2270_v60 = vsel %vm2197_vm6, %v2269_v48, %v2268_v53  ;;  %v15885_v53 = vpop.permute.xlu0 %3970  ;;  %14365 = vmatprep.mubr.msk.f32.mxu0 %vm15153_vm1, %v18491_v22 }
 0x461   :  { %v14257_v20 = vpop.f32.mrb[23].mxu1  ;;  %v2219_v28 = vrot.slane %v1889_v58, 6  ;;  %v2254_v6 = vsel %vm2200_vm7, %v1889_v58, %v2253_v54  ;;  %v2286_v26 = vrot.slane %v1889_v58, 2  ;;  %v2236_v33 = vrot.slane %v1889_v58, 7 }
 0x462   :  { %v2320_v31 = vrot.slane %v1889_v58, 4  ;;  %v2303_v0 = vrot.slane %v1889_v58, 3  ;;  %v2199_v1 = vrot.slane %v1889_v58, 5  ;;  %v2271_v2 = vrot.slane %v1889_v58, 1 }
 0x463   :  { %v2220_v3 = vsel %vm2200_vm7, %v2219_v28, %v2218_v51  ;;  %v2287_v15 = vsel %vm2200_vm7, %v2286_v26, %v2285_v56  ;;  %v2237_v4 = vsel %vm2200_vm7, %v2236_v33, %v2235_v32  ;;  %v4091_v19 = vsel %vm798_vm3, %v4037_v39, %v4069_v12  ;;  %v3973_v56 = vpop.permute.xlu1 %3972 }
 0x464   :  { %v2321_v5 = vsel %vm2200_vm7, %v2320_v31, %v2319_v63  ;;  %v2304_v7 = vsel %vm2200_vm7, %v2303_v0, %v2302_v59  ;;  %v2201_v8 = vsel %vm2200_vm7, %v2199_v1, %v2198_v18  ;;  %v2272_v9 = vsel %vm2200_vm7, %v2271_v2, %v2270_v60  ;;  %14364 = vmatpush3.xpose.msk.msra.mxu0 %vm903_vm2, %v4091_v19 }
 0x465   :  { %v15895_v40 = vpop.permute.xlu0 %4038  ;;  %14373 = vmatprep.subr.mxu0 %v18491_v22  ;;  %v3995_v60 = vsel %vm798_vm3, %v3973_v56, 1.0 }
 0x467   :  { %v1962_v37 = vpop.f32.mrb[24].mxu1  ;;  %14366 = vmatmul.mubr.msk.f32.vlgmr.msra.gmra.mrb[64].mxu0 %vm903_vm2, %v3995_v60 }
 0x468   :  { %v14262_v10 = vpop.f32.mrb[25].mxu1  ;;  %v2221_v46 = vrot.slane %v1962_v37, 5  ;;  %v2255_v47 = vrot.slane %v1962_v37, 7  ;;  %v2288_v14 = vrot.slane %v1962_v37, 1  ;;  %v2238_v45 = vrot.slane %v1962_v37, 6  ;;  %14375 = vmatprep.mubr.msk.f32.mxu0 %vm15153_vm1, %v18491_v22 }
 0x469   :  { %v2322_v23 = vrot.slane %v1962_v37, 3  ;;  %v2305_v24 = vrot.slane %v1962_v37, 2  ;;  %v2202_v27 = vrot.slane %v1962_v37, 4  ;;  %v2273_v31 = vsel %vm2203_vm8, %v1962_v37, %v2272_v9 }
 0x46a   :  { %v2222_v30 = vsel %vm2203_vm8, %v2221_v46, %v2220_v3  ;;  %v2256_v32 = vsel %vm2203_vm8, %v2255_v47, %v2254_v6  ;;  %v2289_v35 = vsel %vm2203_vm8, %v2288_v14, %v2287_v15  ;;  %v2239_v41 = vsel %vm2203_vm8, %v2238_v45, %v2237_v4  ;;  %v15914_v3 = vpop.permute.xlu1 %4070  ;;  %v4041_v4 = vpop.permute.xlu0 %4040 }
 0x46b   :  { %v2035_v36 = vpop.f32.mrb[26].mxu1  ;;  %v2323_v48 = vsel %vm2203_vm8, %v2322_v23, %v2321_v5  ;;  %v2306_v49 = vsel %vm2203_vm8, %v2305_v24, %v2304_v7  ;;  %v2204_v51 = vsel %vm2203_vm8, %v2202_v27, %v2201_v8 }
 0x46c   :  { %v14267_v54 = vpop.f32.mrb[27].mxu1  ;;  %v2223_v58 = vrot.slane %v2035_v36, 4  ;;  %v2257_v63 = vrot.slane %v2035_v36, 6  ;;  %v2290_v59 = vsel %vm2206_vm9, %v2035_v36, %v2289_v35  ;;  %v2240_v18 = vrot.slane %v2035_v36, 5 }
 0x46d   :  { %v2324_v20 = vrot.slane %v2035_v36, 2  ;;  %v2307_v28 = vrot.slane %v2035_v36, 1  ;;  %v2205_v6 = vrot.slane %v2035_v36, 3  ;;  %v2274_v25 = vrot.slane %v2035_v36, 7 }
 0x46e   :  { %v2224_v26 = vsel %vm2206_vm9, %v2223_v58, %v2222_v30  ;;  %v2258_v33 = vsel %vm2206_vm9, %v2257_v63, %v2256_v32  ;;  %v2241_v13 = vsel %vm2206_vm9, %v2240_v18, %v2239_v41  ;;  %v4073_v39 = vpop.permute.xlu1 %4072 }
 0x46f   :  { %v2325_v0 = vsel %vm2206_vm9, %v2324_v20, %v2323_v48  ;;  %v2308_v1 = vsel %vm2206_vm9, %v2307_v28, %v2306_v49  ;;  %v2207_v2 = vsel %vm2206_vm9, %v2205_v6, %v2204_v51  ;;  %v2275_v15 = vsel %vm2206_vm9, %v2274_v25, %v2273_v31 }
 0x470   :  { %v4093_v5 = vsel %vm798_vm3, %v4041_v4, %v4073_v39 }
 0x471   :  { %14374 = vmatpush3.xpose.msk.msra.mxu0 %vm903_vm2, %v4093_v5 }
 0x472   :  { %14383 = vmatprep.subr.mxu0 %v18491_v22 }
 0x49c   :  { %v2108_v7 = vpop.f32.mrb[28].mxu1 }
 0x49d   :  { %v14272_v8 = vpop.f32.mrb[29].mxu1  ;;  %v2225_v9 = vrot.slane %v2108_v7, 3  ;;  %v2259_v29 = vrot.slane %v2108_v7, 5  ;;  %v2291_v37 = vrot.slane %v2108_v7, 7  ;;  %v2242_v10 = vrot.slane %v2108_v7, 4 }
 0x49e   :  { %v2326_v12 = vrot.slane %v2108_v7, 1  ;;  %v2309_v46 = vsel %vm2209_vm10, %v2108_v7, %v2308_v1  ;;  %v2208_v47 = vrot.slane %v2108_v7, 2  ;;  %v2276_v14 = vrot.slane %v2108_v7, 6 }
 0x49f   :  { %v2226_v45 = vsel %vm2209_vm10, %v2225_v9, %v2224_v26  ;;  %v2260_v19 = vsel %vm2209_vm10, %v2259_v29, %v2258_v33  ;;  %v2292_v23 = vsel %vm2209_vm10, %v2291_v37, %v2290_v59  ;;  %v2243_v24 = vsel %vm2209_vm10, %v2242_v10, %v2241_v13 }
 0x4a0   :  { %v2181_v27 = vpop.f32.mrb[30].mxu1  ;;  %v2327_v30 = vsel %vm2209_vm10, %v2326_v12, %v2325_v0  ;;  %v2210_v32 = vsel %vm2209_vm10, %v2208_v47, %v2207_v2  ;;  %v2277_v35 = vsel %vm2209_vm10, %v2276_v14, %v2275_v15 }
 0x4a1   :  { %v14277_v36 = vpop.f32.mrb[31].mxu1  ;;  %v2227_v41 = vrot.slane %v2181_v27, 2  ;;  %v2261_v48 = vrot.slane %v2181_v27, 4  ;;  %v2293_v49 = vrot.slane %v2181_v27, 6  ;;  %v2244_v51 = vrot.slane %v2181_v27, 3 }
 0x4a2   :  { %v15929_v54 = vsel %vm2212_vm11, %v2181_v27, %v2327_v30  ;;  %v2310_v56 = vrot.slane %v2181_v27, 7  ;;  %v2211_v58 = vrot.slane %v2181_v27, 1  ;;  %v2278_v63 = vrot.slane %v2181_v27, 5  ;;  %v15990_v30 = vpop.f32.mrb[20].mxu0 }
 0x4a3   :  { %18514 = vst [vmem:[#allocation9_spill] sm:$0xff] %v15929_v54  ;;  %v15932_v59 = vsel %vm2212_vm11, %v2227_v41, %v2226_v45  ;;  %v15935_v18 = vsel %vm2212_vm11, %v2261_v48, %v2260_v19  ;;  %v15938_v60 = vsel %vm2212_vm11, %v2293_v49, %v2292_v23  ;;  %v15941_v20 = vsel %vm2212_vm11, %v2244_v51, %v2243_v24 }
 0x4a4   :  { %18515 = vst [vmem:[#allocation10_spill] sm:$0xff] %v15932_v59  ;;  %18516 = vst [vmem:[#allocation11_spill] sm:$0xff] %v15935_v18  ;;  %v15944_v28 = vsel %vm2212_vm11, %v2310_v56, %v2309_v46  ;;  %v15947_v6 = vsel %vm2212_vm11, %v2211_v58, %v2210_v32  ;;  %v15950_v26 = vsel %vm2212_vm11, %v2278_v63, %v2277_v35  ;;  %v15992_v32 = vpop.f32.mrb[21].mxu0 }
 0x4a5   :  { %18517 = vst [vmem:[#allocation12_spill] sm:$0xff] %v15938_v60  ;;  %18518 = vst [vmem:[#allocation13_spill] sm:$0xff] %v15941_v20  ;;  %v3949_v24 = vadd.f32 %v15659_v61, %v15237_v17  ;;  %v3948_v27 = vadd.f32 %v15237_v17, %v15664_v11  ;;  %v15994_v35 = vpop.f32.mrb[22].mxu0 }
 0x4a6   :  { %18519 = vst [vmem:[#allocation14_spill] sm:$0xff] %v15944_v28  ;;  %18520 = vst [vmem:[#allocation15_spill] sm:$0xff] %v15947_v6  ;;  %v15996_v36 = vpop.f32.mrb[23].mxu0 }
 0x4a7   :  { %18521 = vst [vmem:[#allocation16_spill] sm:$0xff] %v15950_v26  ;;  %v15952_v33 = vpop.f32.mrb[32].mxu1  ;;  %v15998_v41 = vpop.f32.mrb[24].mxu0 }
 0x4a8   :  { %v14282_v13 = vpop.f32.mrb[33].mxu1  ;;  %v3114_v31 = vsel %vm1512_vm4, %v15952_v33, -inf  ;;  %v16000_v48 = vpop.f32.mrb[25].mxu0 }
 0x4a9   :  { %3115 = vmax.xlane.f32.xlu0 %v3114_v31  ;;  %v16002_v49 = vpop.f32.mrb[26].mxu0 }
 0x4aa   :  { %v16004_v51 = vpop.f32.mrb[27].mxu0 }
 0x4ab   :  { %v15956_v0 = vpop.f32.mrb[34].mxu1  ;;  %v16006_v56 = vpop.f32.mrb[28].mxu0 }
 0x4ac   :  { %v14287_v1 = vpop.f32.mrb[35].mxu1  ;;  %v3117_v2 = vsel %vm1512_vm4, %v15956_v0, -inf  ;;  %v16008_v58 = vpop.f32.mrb[29].mxu0 }
 0x4ad   :  { %3118 = vmax.xlane.f32.xlu1 %v3117_v2 }
 0x4ae   :  { %v16010_v63 = vpop.f32.mrb[30].mxu0 }
 0x4af   :  { %v15960_v25 = vpop.f32.mrb[36].mxu1  ;;  %v16012_v13 = vpop.f32.mrb[31].mxu0 }
 0x4b0   :  { %v14292_v15 = vpop.f32.mrb[37].mxu1  ;;  %v3120_v4 = vsel %vm1512_vm4, %v15960_v25, -inf }
 0x4b1   :  { %3121 = vmax.xlane.f32.xlu0 %v3120_v4 }
 0x4b2   :  { %v16014_v31 = vpop.f32.mrb[32].mxu0 }
 0x4b3   :  { %v15964_v39 = vpop.f32.mrb[38].mxu1  ;;  %v16016_v1 = vpop.f32.mrb[33].mxu0 }
 0x4b4   :  { %v14297_v5 = vpop.f32.mrb[39].mxu1  ;;  %v3123_v7 = vsel %vm1512_vm4, %v15964_v39, -inf }
 0x4b5   :  { %3124 = vmax.xlane.f32.xlu0 %v3123_v7 }
 0x4b6   :  { %v16018_v2 = vpop.f32.mrb[34].mxu0 }
 0x4b7   :  { %v15968_v8 = vpop.f32.mrb[40].mxu1  ;;  %v16020_v15 = vpop.f32.mrb[35].mxu0 }
 0x4b8   :  { %v14302_v9 = vpop.f32.mrb[41].mxu1  ;;  %v3126_v29 = vsel %vm1512_vm4, %v15968_v8, -inf }
 0x4b9   :  { %3127 = vmax.xlane.f32.xlu1 %v3126_v29 }
 0x4ba   :  { %v16022_v4 = vpop.f32.mrb[36].mxu0 }
 0x4bb   :  { %v15972_v37 = vpop.f32.mrb[42].mxu1  ;;  %v16024_v5 = vpop.f32.mrb[37].mxu0 }
 0x4bc   :  { %v14307_v10 = vpop.f32.mrb[43].mxu1  ;;  %v3129_v12 = vsel %vm1512_vm4, %v15972_v37, -inf }
 0x4bd   :  { %3130 = vmax.xlane.f32.xlu0 %v3129_v12 }
 0x4be   :  { %v16026_v7 = vpop.f32.mrb[38].mxu0 }
 0x4bf   :  { %v15976_v46 = vpop.f32.mrb[44].mxu1  ;;  %v16028_v9 = vpop.f32.mrb[39].mxu0 }
 0x4c0   :  { %v3132_v47 = vsel %vm1512_vm4, %v15976_v46, -inf  ;;  %v14312_v14 = vpop.f32.mrb[45].mxu1 }
 0x4c1   :  { %3133 = vmax.xlane.f32.xlu1 %v3132_v47 }
 0x4c2   :  { %v16030_v29 = vpop.f32.mrb[40].mxu0 }
 0x4c3   :  { %v15980_v45 = vpop.f32.mrb[46].mxu1  ;;  %v16032_v10 = vpop.f32.mrb[41].mxu0 }
 0x4c4   :  { %v3135_v19 = vsel %vm1512_vm4, %v15980_v45, -inf  ;;  %v14317_v23 = vpop.f32.mrb[47].mxu1 }
 0x4c5   :  { %3136 = vmax.xlane.f32.xlu0 %v3135_v19 }
 0x4c6   :  { %v16034_v12 = vpop.f32.mrb[42].mxu0 }
 0x4c7   :  { %v16036_v47 = vpop.f32.mrb[43].mxu0 }
 0x4ca   :  { %v16038_v14 = vpop.f32.mrb[44].mxu0 }
 0x4cb   :  { %18522 = vst [vmem:[#allocation17_spill] sm:$0xff] %v16038_v14  ;;  %v16040_v19 = vpop.f32.mrb[45].mxu0 }
 0x4cc   :  { %18523 = vst [vmem:[#allocation18_spill] sm:$0xff] %v16040_v19 }
 0x4ce   :  { %v16042_v23 = vpop.f32.mrb[46].mxu0 }
 0x4cf   :  { %18524 = vst [vmem:[#allocation19_spill] sm:$0xff] %v16042_v23 }
 0x4d2   :  { %3976 = vrot.lane.b32.xlu1 %v3949_v24, %s15152_s18  ;;  %v16044_v24 = vpop.f32.mrb[47].mxu0 }
 0x4d3   :  { %18525 = vst [vmem:[#allocation20_spill] sm:$0xff] %v16044_v24 }
 0x4db   :  { %3974 = vrot.lane.b32.xlu0 %v3948_v27, %s15152_s18  ;;  %v16046_v27 = vpop.f32.mrb[48].mxu0 }
 0x4dc   :  { %18526 = vst [vmem:[#allocation21_spill] sm:$0xff] %v16046_v27  ;;  %v16048_v22 = vpop.f32.mrb[49].mxu0 }
 0x4dd   :  { %18527 = vst [vmem:[#allocation22_spill] sm:$0xff] %v16048_v22  ;;  %v16050_v26 = vpop.f32.mrb[50].mxu0 }
 0x4de   :  { %18528 = vst [vmem:[#allocation23_spill] sm:$0xff] %v16050_v26  ;;  %v16052_v6 = vpop.f32.mrb[51].mxu0 }
 0x4df   :  { %18529 = vst [vmem:[#allocation24_spill] sm:$0xff] %v16052_v6  ;;  %v16054_v28 = vpop.f32.mrb[52].mxu0 }
 0x4e0   :  { %18530 = vst [vmem:[#allocation25_spill] sm:$0xff] %v16054_v28  ;;  %v16056_v54 = vpop.f32.mrb[53].mxu0 }
 0x4e1   :  { %18531 = vst [vmem:[#allocation26_spill] sm:$0xff] %v16056_v54  ;;  %v16058_v60 = vpop.f32.mrb[54].mxu0 }
 0x4e2   :  { %18532 = vst [vmem:[#allocation27_spill] sm:$0xff] %v16058_v60  ;;  %v16061_v59 = vpop.f32.mrb[55].mxu0 }
 0x4e3   :  { %18533 = vst [vmem:[#allocation28_spill] sm:$0xff] %v16061_v59  ;;  %v16063_v23 = vpop.f32.mrb[56].mxu0 }
 0x4e4   :  { %18534 = vst [vmem:[#allocation29_spill] sm:$0xff] %v16063_v23  ;;  %v16065_v24 = vpop.f32.mrb[57].mxu0 }
 0x4e5   :  { %18535 = vst [vmem:[#allocation30_spill] sm:$0xff] %v16065_v24 }
 0x4e6   :  { %v16067_v26 = vpop.f32.mrb[58].mxu0 }
 0x4e7   :  { %18536 = vst [vmem:[#allocation31_spill] sm:$0xff] %v16067_v26  ;;  %v16070_v6 = vpop.f32.mrb[59].mxu0 }
 0x4e8   :  { %18537 = vst [vmem:[#allocation32_spill] sm:$0xff] %v16070_v6 }
 0x52e   :  { %v16072_v54 = vpop.f32.mrb[60].mxu0 }
 0x52f   :  { %18538 = vst [vmem:[#allocation33_spill] sm:$0xff] %v16072_v54  ;;  %v16074_v14 = vpop.f32.mrb[61].mxu0 }
 0x530   :  { %18539 = vst [vmem:[#allocation34_spill] sm:$0xff] %v16074_v14 }
 0x536   :  { %v3116_v20 = vpop.xlane.xlu0 %3115 }
 0x537   :  { %v3138_v18 = vsub.f32 %v15952_v33, %v3116_v20  ;;  %v16076_v33 = vpop.f32.mrb[62].mxu0 }
 0x538   :  { %18540 = vst [vmem:[#allocation35_spill] sm:$0xff] %v16076_v33  ;;  %v16079_v23 = vpop.f32.mrb[63].mxu0 }
 0x539   :  { %v3146_v27 = vmul.f32 1.442695, %v3138_v18  ;;  %18541 = vst [vmem:[#allocation36_spill] sm:$0xff] %v16079_v23 }
 0x53a   :  { %v3119_v22 = vpop.xlane.xlu1 %3118  ;;  %v16081_v26 = vpop.f32.mrb[64].mxu0 }
 0x53b   :  { %14888 = vpow2.f32 %v3146_v27  ;;  %v3139_v28 = vsub.f32 %v15956_v0, %v3119_v22  ;;  %v14367_v22 = vpop.f32.mrb[65].mxu0 }
 0x53d   :  { %v3148_v60 = vmul.f32 1.442695, %v3139_v28 }
 0x53e   :  { %v3122_v20 = vpop.xlane.xlu0 %3121 }
 0x53f   :  { %14890 = vpow2.f32 %v3148_v60  ;;  %v3140_v18 = vsub.f32 %v15960_v25, %v3122_v20 }
 0x541   :  { %v3150_v24 = vmul.f32 1.442695, %v3140_v18 }
 0x542   :  { %v3125_v27 = vpop.xlane.xlu0 %3124 }
 0x543   :  { %14892 = vpow2.f32 %v3150_v24  ;;  %v3141_v0 = vsub.f32 %v15964_v39, %v3125_v27 }
 0x545   :  { %v16084_v54 = vpop.eup %14888  ;;  %v3152_v28 = vmul.f32 1.442695, %v3141_v0 }
 0x546   :  { %v3128_v14 = vpop.xlane.xlu1 %3127  ;;  %v3162_v33 = vsel %vm1512_vm4, %v16084_v54, 0.0 }
 0x547   :  { %14894 = vpow2.f32 %v3152_v28  ;;  %v3142_v60 = vsub.f32 %v15968_v8, %v3128_v14  ;;  %3163 = vadd.xlane.f32.xlu1 %v3162_v33 }
 0x549   :  { %v16089_v25 = vpop.eup %14890  ;;  %v3154_v20 = vmul.f32 1.442695, %v3142_v60 }
 0x54a   :  { %v3131_v18 = vpop.xlane.xlu0 %3130  ;;  %v3165_v24 = vsel %vm1512_vm4, %v16089_v25, 0.0 }
 0x54b   :  { %14896 = vpow2.f32 %v3154_v20  ;;  %v3143_v39 = vsub.f32 %v15972_v37, %v3131_v18  ;;  %3166 = vadd.xlane.f32.xlu0 %v3165_v24  ;;  %v18542_v20 = vmov 0.0  }
 0x54d   :  { %v16094_v27 = vpop.eup %14892  ;;  %v3156_v22 = vmul.f32 1.442695, %v3143_v39 }
 0x54e   :  { %v3134_v0 = vpop.xlane.xlu1 %3133  ;;  %v3168_v28 = vsel %vm1512_vm4, %v16094_v27, 0.0 }
 0x54f   :  { %14898 = vpow2.f32 %v3156_v22  ;;  %3169 = vadd.xlane.f32.xlu1 %v3168_v28  ;;  %v3958_v22 = vadd.f32 %v15235_v16, %v15992_v32 }
 0x551   :  { %v16098_v8 = vpop.eup %14894  ;;  %v4014_v28 = vmul.f32 %v3958_v22, %v3958_v22 }
 0x552   :  { %v3977_v14 = vpop.permute.xlu1 %3976  ;;  %v3171_v33 = vsel %vm1512_vm4, %v16098_v8, 0.0  ;;  %v3137_v23 = vpop.xlane.xlu0 %3136 }
 0x553   :  { %v3997_v60 = vsel %vm798_vm3, %v3977_v14, 1.0  ;;  %3172 = vadd.xlane.f32.xlu0 %v3171_v33  ;;  %v4022_v14 = vsub.f32 0.0, %v4014_v28  ;;  %v4006_v33 = vmul.f32 2.0, %v3958_v22  ;;  %v3145_v6 = vsub.f32 %v15980_v45, %v3137_v23 }
 0x554   :  { %14376 = vmatmul.mubr.msk.f32.vlgmr.msra.gmra.mrb[66].mxu0 %vm903_vm2, %v3997_v60  ;;  %v3144_v60 = vsub.f32 %v15976_v46, %v3134_v0  ;;  %v3959_v46 = vadd.f32 %v15990_v30, %v15235_v16  ;;  %v3961_v45 = vadd.f32 %v15994_v35, %v15235_v16 }
 0x555   :  { %v16104_v37 = vpop.eup %14896  ;;  %14385 = vmatprep.mubr.msk.f32.mxu0 %vm15153_vm1, %v18542_v20  ;;  %v3160_v59 = vmul.f32 1.442695, %v3145_v6  ;;  %v3960_v6 = vadd.f32 %v15235_v16, %v15996_v36 }
 0x556   :  { %v3174_v18 = vsel %vm1512_vm4, %v16104_v37, 0.0  ;;  %v4015_v0 = vmul.f32 %v3959_v46, %v3959_v46 }
 0x557   :  { %3175 = vadd.xlane.f32.xlu1 %v3174_v18  ;;  %v3158_v18 = vmul.f32 1.442695, %v3144_v60  ;;  %v4016_v23 = vmul.f32 %v3960_v6, %v3960_v6  ;;  %v4007_v60 = vmul.f32 2.0, %v3959_v46  ;;  %v3952_v46 = vadd.f32 %v15237_v17, %v15996_v36 }
 0x559   :  { %v16110_v24 = vpop.eup %14898  ;;  %14900 = vpow2.f32 %v3158_v18 }
 0x55a   :  { %v3177_v39 = vsel %vm1512_vm4, %v16110_v24, 0.0  ;;  %14902 = vpow2.f32 %v3160_v59  ;;  %v4023_v59 = vsub.f32 0.0, %v4015_v0  ;;  %v3953_v0 = vadd.f32 %v15994_v35, %v15237_v17 }
 0x55b   :  { %3178 = vadd.xlane.f32.xlu0 %v3177_v39 }
 0x563   :  { %v16120_v39 = vpop.eup %14900 }
 0x564   :  { %v3180_v19 = vsel %vm1512_vm4, %v16120_v39, 0.0  ;;  %v16124_v28 = vpop.eup %14902 }
 0x565   :  { %v3183_v22 = vsel %vm1512_vm4, %v16124_v28, 0.0 }
 0x568   :  { %4074 = vrot.lane.b32.xlu1 %v4022_v14, %s15152_s18  ;;  %v4017_v14 = vmul.f32 %v3961_v45, %v3961_v45 }
 0x56a   :  { %v4025_v18 = vsub.f32 0.0, %v4017_v14  ;;  %v16154_v14 = vpop.permute.xlu0 %3974 }
 0x571   :  { %4042 = vrot.lane.b32.xlu0 %v4006_v33, %s15154_s19  ;;  %v4024_v33 = vsub.f32 0.0, %v4016_v23  ;;  %v4009_v23 = vmul.f32 2.0, %v3961_v45  ;;  %v16158_v45 = vadd.f32 %v15235_v16, %v16000_v48 }
 0x58c   :  { %3181 = vadd.xlane.f32.xlu1 %v3180_v19  ;;  %v3951_v19 = vadd.f32 %v15990_v30, %v15237_v17 }
 0x590   :  { %3184 = vadd.xlane.f32.xlu0 %v3183_v22  ;;  %v3950_v22 = vadd.f32 %v15237_v17, %v15992_v32 }
 0x59d   :  { %4076 = vrot.lane.b32.xlu1 %v4023_v59, %s15152_s18  ;;  %v4008_v59 = vmul.f32 2.0, %v3960_v6 }
 0x5a1   :  { %3980 = vrot.lane.b32.xlu1 %v3951_v19, %s15152_s18  ;;  %v4709_v19 = vsel %vm1512_vm4, %v16081_v26, -inf }
 0x5a5   :  { %4078 = vrot.lane.b32.xlu1 %v4024_v33, %s15152_s18 }
 0x5a6   :  { %4044 = vrot.lane.b32.xlu0 %v4007_v60, %s15154_s19 }
 0x5a9   :  { %4080 = vrot.lane.b32.xlu1 %v4025_v18, %s15152_s18  ;;  %v16162_v18 = vadd.f32 %v15998_v41, %v15235_v16 }
 0x5aa   :  { %3978 = vrot.lane.b32.xlu0 %v3950_v22, %s15152_s18  ;;  %v5594_v22 = vmul.f32 2.0, %v16158_v45 }
 0x5ad   :  { %3984 = vrot.lane.b32.xlu1 %v3953_v0, %s15152_s18 }
 0x5ae   :  { %4046 = vrot.lane.b32.xlu0 %v4008_v59, %s15154_s19 }
 0x5b2   :  { %4048 = vrot.lane.b32.xlu0 %v4009_v23, %s15154_s19 }
 0x5b6   :  { %3982 = vrot.lane.b32.xlu0 %v3952_v46, %s15152_s18  ;;  %v5595_v46 = vmul.f32 2.0, %v16162_v18 }
 0x5d1   :  { %4710 = vmax.xlane.f32.xlu1 %v4709_v19 }
 0x5d4   :  { %v3164_v6 = vpop.xlane.xlu1 %3163 }
 0x5d5   :  { %14904 = vrcp.f32 %v3164_v6 }
 0x5d8   :  { %v3167_v33 = vpop.xlane.xlu0 %3166 }
 0x5d9   :  { %14906 = vrcp.f32 %v3167_v33 }
 0x5dc   :  { %v3170_v60 = vpop.xlane.xlu1 %3169 }
 0x5dd   :  { %14908 = vrcp.f32 %v3170_v60 }
 0x5df   :  { %v14905_v0 = vpop.eup %14904 }
 0x5e0   :  { %v3173_v59 = vpop.xlane.xlu0 %3172  ;;  %v3194_v23 = vmul.f32 %v14905_v0, %v16084_v54 }
 0x5e1   :  { %14910 = vrcp.f32 %v3173_v59 }
 0x5e2   :  { %14321 = vmatmul.mubr.msk.f32.vlgmr.msra.gmra.mrb[48].mxu1 %vm1512_vm4, %v3194_v23  ;;  %5626 = vrot.lane.b32.xlu1 %v5594_v22, %s15154_s19 }
 0x5e3   :  { %v14907_v19 = vpop.eup %14906  ;;  %14324 = vmatpush3.msra.mxu1 %v15333_v21  ;;  %14325 = vmatprep.mubr.msk.f32.mxu1 %vm15153_vm1, %v18542_v20 }
 0x5e4   :  { %v3176_v6 = vpop.xlane.xlu1 %3175  ;;  %14328 = vmatprep.subr.mxu1 %v18542_v20  ;;  %v3195_v33 = vmul.f32 %v14907_v19, %v16089_v25 }
 0x5e5   :  { %14912 = vrcp.f32 %v3176_v6 }
 0x5e6   :  { %14326 = vmatmul.mubr.msk.f32.vlgmr.msra.gmra.mrb[50].mxu1 %vm1512_vm4, %v3195_v33  ;;  %5628 = vrot.lane.b32.xlu1 %v5595_v46, %s15154_s19 }
 0x5e7   :  { %v14909_v54 = vpop.eup %14908  ;;  %14329 = vmatpush3.msra.mxu1 %v15428_v44  ;;  %14330 = vmatprep.mubr.msk.f32.mxu1 %vm15153_vm1, %v18542_v20 }
 0x5e8   :  { %v3179_v21 = vpop.xlane.xlu0 %3178  ;;  %14333 = vmatprep.subr.mxu1 %v18542_v20  ;;  %v3196_v60 = vmul.f32 %v14909_v54, %v16094_v27 }
 0x5e9   :  { %14914 = vrcp.f32 %v3179_v21 }
 0x5ea   :  { %14331 = vmatmul.mubr.msk.f32.vlgmr.msra.gmra.mrb[52].mxu1 %vm1512_vm4, %v3196_v60 }
 0x5eb   :  { %v14911_v25 = vpop.eup %14910  ;;  %14334 = vmatpush3.msra.mxu1 %v15426_v43  ;;  %14335 = vmatprep.mubr.msk.f32.mxu1 %vm15153_vm1, %v18542_v20 }
 0x5ec   :  { %14338 = vmatprep.subr.mxu1 %v18542_v20  ;;  %v3197_v44 = vmul.f32 %v14911_v25, %v16098_v8 }
 0x5ee   :  { %14336 = vmatmul.mubr.msk.f32.vlgmr.msra.gmra.mrb[54].mxu1 %vm1512_vm4, %v3197_v44 }
 0x5ef   :  { %v14913_v22 = vpop.eup %14912  ;;  %14339 = vmatpush3.msra.mxu1 %v15438_v52  ;;  %14340 = vmatprep.mubr.msk.f32.mxu1 %vm15153_vm1, %v18542_v20  ;;  %v4075_v52 = vpop.permute.xlu1 %4074 }
 0x5f0   :  { %14343 = vmatprep.subr.mxu1 %v18542_v20  ;;  %v3198_v27 = vmul.f32 %v14913_v22, %v16104_v37  ;;  %v4043_v37 = vpop.permute.xlu0 %4042 }
 0x5f2   :  { %14341 = vmatmul.mubr.msk.f32.vlgmr.msra.gmra.mrb[56].mxu1 %vm1512_vm4, %v3198_v27 }
 0x5f3   :  { %v14915_v43 = vpop.eup %14914  ;;  %14344 = vmatpush3.msra.mxu1 %v15436_v50  ;;  %14345 = vmatprep.mubr.msk.f32.mxu1 %vm15153_vm1, %v18542_v20 }
 0x5f4   :  { %14348 = vmatprep.subr.mxu1 %v18542_v20  ;;  %v3199_v8 = vmul.f32 %v14915_v43, %v16110_v24 }
 0x5f6   :  { %14346 = vmatmul.mubr.msk.f32.vlgmr.msra.gmra.mrb[58].mxu1 %vm1512_vm4, %v3199_v8 }
 0x5f7   :  { %14349 = vmatpush3.msra.mxu1 %v15442_v57  ;;  %14350 = vmatprep.mubr.msk.f32.mxu1 %vm15153_vm1, %v18542_v20 }
 0x5f8   :  { %14353 = vmatprep.subr.mxu1 %v18542_v20 }
 0x619   :  { %v3182_v0 = vpop.xlane.xlu1 %3181 }
 0x61a   :  { %14916 = vrcp.f32 %v3182_v0  ;;  %v3994_v0 = vsel %vm798_vm3, %v15885_v53, 1.0 }
 0x61d   :  { %v4077_v50 = vpop.permute.xlu1 %4076  ;;  %v3185_v59 = vpop.xlane.xlu0 %3184 }
 0x61e   :  { %14918 = vrcp.f32 %v3185_v59 }
 0x621   :  { %v3981_v23 = vpop.permute.xlu1 %3980  ;;  %v4045_v46 = vpop.permute.xlu0 %4044 }
 0x622   :  { %v4095_v24 = vsel %vm798_vm3, %v4045_v46, %v4077_v50  ;;  %v3999_v57 = vsel %vm798_vm3, %v3981_v23, 1.0  ;;  %v4092_v50 = vsel %vm798_vm3, %v15895_v40, %v15914_v3 }
 0x623   :  { %14384 = vmatpush3.xpose.msk.msra.mxu0 %vm903_vm2, %v4095_v24 }
 0x624   :  { %v14917_v19 = vpop.eup %14916  ;;  %14393 = vmatprep.subr.mxu0 %v18542_v20 }
 0x625   :  { %v3979_v6 = vpop.permute.xlu0 %3978  ;;  %v3200_v33 = vmul.f32 %v14917_v19, %v16120_v39  ;;  %v4079_v54 = vpop.permute.xlu1 %4078 }
 0x626   :  { %14386 = vmatmul.mubr.msk.f32.vlgmr.msra.gmra.mrb[68].mxu0 %vm903_vm2, %v3999_v57 }
 0x627   :  { %14351 = vmatmul.mubr.msk.f32.vlgmr.msra.gmra.mrb[60].mxu1 %vm1512_vm4, %v3200_v33  ;;  %v16211_v21 = vpop.f32.mrb[66].mxu0  ;;  %14395 = vmatprep.mubr.msk.f32.mxu0 %vm15153_vm1, %v18542_v20 }
 0x628   :  { %v14919_v60 = vpop.eup %14918  ;;  %14354 = vmatpush3.msra.mxu1 %v15440_v55  ;;  %v14377_v25 = vpop.f32.mrb[67].mxu0  ;;  %14355 = vmatprep.mubr.msk.f32.mxu1 %vm15153_vm1, %v18542_v20  ;;  %v4090_v55 = vsel %vm798_vm3, %v15856_v34, %v15868_v62  ;;  %v3996_v34 = vsel %vm798_vm3, %v16154_v14, 1.0  ;;  %v4094_v62 = vsel %vm798_vm3, %v4043_v37, %v4075_v52 }
 0x629   :  { %v4047_v44 = vpop.permute.xlu0 %4046  ;;  %v3201_v39 = vmul.f32 %v14919_v60, %v16124_v28  ;;  %14358 = vmatprep.subr.mxu1 %v18542_v20  ;;  %v4081_v22 = vpop.permute.xlu1 %4080 }
 0x62a   :  { %v4096_v53 = vsel %vm798_vm3, %v4047_v44, %v4079_v54 }
 0x62b   :  { %14356 = vmatmul.mubr.msk.f32.vlgmr.msra.gmra.mrb[62].mxu1 %vm1512_vm4, %v3201_v39 }
 0x62c   :  { %14360 = vmatprep.mubr.msk.f32.mxu1 %vm15153_vm1, %v18542_v20 }
 0x62d   :  { %v4049_v27 = vpop.permute.xlu0 %4048  ;;  %v3985_v43 = vpop.permute.xlu1 %3984 }
 0x62e   :  { %v4097_v8 = vsel %vm798_vm3, %v4049_v27, %v4081_v22  ;;  %v4001_v28 = vsel %vm798_vm3, %v3985_v43, 1.0 }
 0x62f   :  { %14359 = vmatpush3.xpose.msk.msra.mxu1 %vm903_vm2, %v4090_v55  ;;  %14394 = vmatpush3.xpose.msk.msra.mxu0 %vm903_vm2, %v4097_v8 }
 0x630   :  { %14368 = vmatprep.subr.mxu1 %v18542_v20  ;;  %14403 = vmatprep.subr.mxu0 %v18542_v20 }
 0x631   :  { %v3983_v40 = vpop.permute.xlu0 %3982 }
 0x632   :  { %14361 = vmatmul.mubr.msk.f32.vlgmr.msra.gmra.mrb[64].mxu1 %vm903_vm2, %v3994_v0  ;;  %14396 = vmatmul.mubr.msk.f32.vlgmr.msra.gmra.mrb[70].mxu0 %vm903_vm2, %v4001_v28  ;;  %v4000_v3 = vsel %vm798_vm3, %v3983_v40, 1.0 }
 0x633   :  { %14369 = vmatpush3.xpose.msk.msra.mxu1 %vm903_vm2, %v4092_v50  ;;  %14404 = vmatpush3.msra.mxu0 %v15626_v38  ;;  %v3998_v38 = vsel %vm798_vm3, %v3979_v6, 1.0 }
 0x634   :  { %14370 = vmatprep.mubr.msk.f32.mxu1 %vm15153_vm1, %v18542_v20  ;;  %14378 = vmatprep.subr.mxu1 %v18542_v20 }
 0x635   :  { %14405 = vmatprep.mubr.msk.f32.mxu0 %vm15153_vm1, %v18542_v20  ;;  %14413 = vmatprep.subr.mxu0 %v18542_v20 }
 0x636   :  { %14371 = vmatmul.mubr.msk.f32.vlgmr.msra.gmra.mrb[66].mxu1 %vm903_vm2, %v3996_v34 }
 0x637   :  { %14379 = vmatpush3.xpose.msk.msra.mxu1 %vm903_vm2, %v4094_v62  ;;  %14380 = vmatprep.mubr.msk.f32.mxu1 %vm15153_vm1, %v18542_v20 }
 0x638   :  { %14388 = vmatprep.subr.mxu1 %v18542_v20 }
 0x63a   :  { %14381 = vmatmul.mubr.msk.f32.vlgmr.msra.gmra.mrb[68].mxu1 %vm903_vm2, %v3998_v38 }
 0x63b   :  { %14389 = vmatpush3.xpose.msk.msra.mxu1 %vm903_vm2, %v4096_v53  ;;  %14390 = vmatprep.mubr.msk.f32.mxu1 %vm15153_vm1, %v18542_v20 }
 0x63c   :  { %14398 = vmatprep.subr.mxu1 %v18542_v20 }
 0x63e   :  { %14391 = vmatmul.mubr.msk.f32.vlgmr.msra.gmra.mrb[70].mxu1 %vm903_vm2, %v4000_v3 }
 0x63f   :  { %14399 = vmatpush3.msra.mxu1 %v15630_v42  ;;  %14400 = vmatprep.mubr.msk.f32.mxu1 %vm15153_vm1, %v18542_v20 }
 0x640   :  { %14408 = vmatprep.subr.mxu1 %v18542_v20 }
 0x6b5   :  { %v3271_v14 = vpop.f32.mrb[48].mxu1 }
 0x6b6   :  { %v14322_v52 = vpop.f32.mrb[49].mxu1  ;;  %v3809_v37 = vrot.slane %v3271_v14, 1  ;;  %v3826_v59 = vrot.slane %v3271_v14, 2  ;;  %v3843_v23 = vrot.slane %v3271_v14, 3  ;;  %v3860_v46 = vrot.slane %v3271_v14, 4 }
 0x6b7   :  { %v3875_v24 = vrot.slane %v3271_v14, 5  ;;  %v3892_v19 = vrot.slane %v3271_v14, 6  ;;  %v3909_v57 = vrot.slane %v3271_v14, 7 }
 0x6b9   :  { %v3344_v6 = vpop.f32.mrb[50].mxu1 }
 0x6ba   :  { %v3794_v33 = vrot.slane %v3344_v6, 7  ;;  %v3827_v54 = vrot.slane %v3344_v6, 1  ;;  %v3844_v60 = vrot.slane %v3344_v6, 2  ;;  %v3861_v25 = vrot.slane %v3344_v6, 3  ;;  %v14327_v42 = vpop.f32.mrb[51].mxu1 }
 0x6bb   :  { %v3876_v44 = vrot.slane %v3344_v6, 4  ;;  %v3893_v39 = vrot.slane %v3344_v6, 5  ;;  %v3910_v22 = vrot.slane %v3344_v6, 6  ;;  %v3810_v27 = vsel %vm2194_vm5, %v3344_v6, %v3809_v37 }
 0x6bc   :  { %v3828_v43 = vsel %vm2194_vm5, %v3827_v54, %v3826_v59  ;;  %v3845_v55 = vsel %vm2194_vm5, %v3844_v60, %v3843_v23  ;;  %v3795_v8 = vsel %vm2194_vm5, %v3794_v33, %v3271_v14  ;;  %v3862_v28 = vsel %vm2194_vm5, %v3861_v25, %v3860_v46 }
 0x6bd   :  { %v3417_v0 = vpop.f32.mrb[52].mxu1  ;;  %v3877_v50 = vsel %vm2194_vm5, %v3876_v44, %v3875_v24  ;;  %v3911_v34 = vsel %vm2194_vm5, %v3910_v22, %v3909_v57  ;;  %v3894_v62 = vsel %vm2194_vm5, %v3893_v39, %v3892_v19 }
 0x6be   :  { %v14332_v38 = vpop.f32.mrb[53].mxu1  ;;  %v3829_v53 = vsel %vm2197_vm6, %v3417_v0, %v3828_v43  ;;  %v3811_v40 = vrot.slane %v3417_v0, 7  ;;  %v3878_v3 = vrot.slane %v3417_v0, 3  ;;  %v3846_v52 = vrot.slane %v3417_v0, 1 }
 0x6bf   :  { %v3912_v37 = vrot.slane %v3417_v0, 5  ;;  %v3895_v59 = vrot.slane %v3417_v0, 4  ;;  %v3796_v23 = vrot.slane %v3417_v0, 6  ;;  %v3863_v6 = vrot.slane %v3417_v0, 2 }
 0x6c0   :  { %v3812_v14 = vsel %vm2197_vm6, %v3811_v40, %v3810_v27  ;;  %v3879_v46 = vsel %vm2197_vm6, %v3878_v3, %v3877_v50  ;;  %v3847_v24 = vsel %vm2197_vm6, %v3846_v52, %v3845_v55 }
 0x6c1   :  { %v3490_v33 = vpop.f32.mrb[54].mxu1  ;;  %v3913_v57 = vsel %vm2197_vm6, %v3912_v37, %v3911_v34  ;;  %v3896_v19 = vsel %vm2197_vm6, %v3895_v59, %v3894_v62  ;;  %v3797_v54 = vsel %vm2197_vm6, %v3796_v23, %v3795_v8  ;;  %v3864_v60 = vsel %vm2197_vm6, %v3863_v6, %v3862_v28 }
 0x6c2   :  { %v14337_v25 = vpop.f32.mrb[55].mxu1  ;;  %v3830_v42 = vrot.slane %v3490_v33, 7  ;;  %v3813_v44 = vrot.slane %v3490_v33, 6  ;;  %v3880_v39 = vrot.slane %v3490_v33, 2  ;;  %v3848_v22 = vsel %vm2200_vm7, %v3490_v33, %v3847_v24 }
 0x6c3   :  { %v3914_v27 = vrot.slane %v3490_v33, 4  ;;  %v3897_v43 = vrot.slane %v3490_v33, 3  ;;  %v3798_v0 = vrot.slane %v3490_v33, 5  ;;  %v3865_v50 = vrot.slane %v3490_v33, 1 }
 0x6c4   :  { %v3831_v55 = vsel %vm2200_vm7, %v3830_v42, %v3829_v53  ;;  %v3814_v34 = vsel %vm2200_vm7, %v3813_v44, %v3812_v14  ;;  %v3881_v62 = vsel %vm2200_vm7, %v3880_v39, %v3879_v46 }
 0x6c5   :  { %v3563_v38 = vpop.f32.mrb[56].mxu1  ;;  %v3915_v8 = vsel %vm2200_vm7, %v3914_v27, %v3913_v57  ;;  %v3898_v28 = vsel %vm2200_vm7, %v3897_v43, %v3896_v19  ;;  %v3799_v40 = vsel %vm2200_vm7, %v3798_v0, %v3797_v54  ;;  %v3866_v3 = vsel %vm2200_vm7, %v3865_v50, %v3864_v60 }
 0x6c6   :  { %v14342_v52 = vpop.f32.mrb[57].mxu1  ;;  %v3832_v37 = vrot.slane %v3563_v38, 6  ;;  %v3815_v59 = vrot.slane %v3563_v38, 5  ;;  %v3882_v23 = vrot.slane %v3563_v38, 1  ;;  %v3849_v6 = vrot.slane %v3563_v38, 7 }
 0x6c7   :  { %v3916_v24 = vrot.slane %v3563_v38, 3  ;;  %v3899_v53 = vrot.slane %v3563_v38, 2  ;;  %v3800_v33 = vrot.slane %v3563_v38, 4  ;;  %v3867_v14 = vsel %vm2203_vm8, %v3563_v38, %v3866_v3 }
 0x6c8   :  { %v3833_v46 = vsel %vm2203_vm8, %v3832_v37, %v3831_v55  ;;  %v3816_v57 = vsel %vm2203_vm8, %v3815_v59, %v3814_v34  ;;  %v3883_v19 = vsel %vm2203_vm8, %v3882_v23, %v3881_v62  ;;  %v3850_v54 = vsel %vm2203_vm8, %v3849_v6, %v3848_v22 }
 0x6c9   :  { %v3636_v25 = vpop.f32.mrb[58].mxu1  ;;  %v3917_v60 = vsel %vm2203_vm8, %v3916_v24, %v3915_v8  ;;  %v3900_v42 = vsel %vm2203_vm8, %v3899_v53, %v3898_v28  ;;  %v3801_v44 = vsel %vm2203_vm8, %v3800_v33, %v3799_v40 }
 0x6ca   :  { %v14347_v39 = vpop.f32.mrb[59].mxu1  ;;  %v3834_v27 = vrot.slane %v3636_v25, 5  ;;  %v3817_v43 = vrot.slane %v3636_v25, 4  ;;  %v3884_v0 = vsel %vm2206_vm9, %v3636_v25, %v3883_v19  ;;  %v3851_v50 = vrot.slane %v3636_v25, 6 }
 0x6cb   :  { %v3918_v55 = vrot.slane %v3636_v25, 2  ;;  %v3901_v38 = vrot.slane %v3636_v25, 1  ;;  %v3802_v34 = vrot.slane %v3636_v25, 3  ;;  %v3868_v3 = vrot.slane %v3636_v25, 7 }
 0x6cc   :  { %v3835_v62 = vsel %vm2206_vm9, %v3834_v27, %v3833_v46  ;;  %v3818_v22 = vsel %vm2206_vm9, %v3817_v43, %v3816_v57  ;;  %v3852_v8 = vsel %vm2206_vm9, %v3851_v50, %v3850_v54 }
 0x6cd   :  { %v3919_v28 = vsel %vm2206_vm9, %v3918_v55, %v3917_v60  ;;  %v3902_v40 = vsel %vm2206_vm9, %v3901_v38, %v3900_v42  ;;  %v3803_v52 = vsel %vm2206_vm9, %v3802_v34, %v3801_v44  ;;  %v3869_v37 = vsel %vm2206_vm9, %v3868_v3, %v3867_v14 }
 0x6f9   :  { %v16308_v59 = vpop.f32.mrb[68].mxu0 }
 0x6fa   :  { %v3709_v23 = vpop.f32.mrb[60].mxu1  ;;  %v14387_v6 = vpop.f32.mrb[69].mxu0 }
 0x6fb   :  { %v14352_v24 = vpop.f32.mrb[61].mxu1  ;;  %v3836_v53 = vrot.slane %v3709_v23, 4  ;;  %v3819_v33 = vrot.slane %v3709_v23, 3  ;;  %v3885_v46 = vrot.slane %v3709_v23, 7  ;;  %v3853_v19 = vrot.slane %v3709_v23, 5 }
 0x6fc   :  { %v3920_v57 = vrot.slane %v3709_v23, 1  ;;  %v3903_v54 = vsel %vm2209_vm10, %v3709_v23, %v3902_v40  ;;  %v3804_v25 = vrot.slane %v3709_v23, 2  ;;  %v3870_v60 = vrot.slane %v3709_v23, 6  ;;  %v4711_v24 = vpop.xlane.xlu1 %4710 }
 0x6fd   :  { %v3837_v42 = vsel %vm2209_vm10, %v3836_v53, %v3835_v62  ;;  %v3820_v44 = vsel %vm2209_vm10, %v3819_v33, %v3818_v22  ;;  %v3886_v14 = vsel %vm2209_vm10, %v3885_v46, %v3884_v0  ;;  %v3854_v39 = vsel %vm2209_vm10, %v3853_v19, %v3852_v8 }
 0x6fe   :  { %v3782_v27 = vpop.f32.mrb[62].mxu1  ;;  %v3921_v43 = vsel %vm2209_vm10, %v3920_v57, %v3919_v28  ;;  %v3805_v50 = vsel %vm2209_vm10, %v3804_v25, %v3803_v52  ;;  %v3871_v55 = vsel %vm2209_vm10, %v3870_v60, %v3869_v37  ;;  %v4731_v19 = vsub.f32 %v16081_v26, %v4711_v24 }
 0x6ff   :  { %v14357_v38 = vpop.f32.mrb[63].mxu1  ;;  %v3838_v34 = vrot.slane %v3782_v27, 3  ;;  %v3821_v3 = vrot.slane %v3782_v27, 2  ;;  %v3887_v40 = vrot.slane %v3782_v27, 6  ;;  %v3855_v23 = vrot.slane %v3782_v27, 4 }
 0x700   :  { %v16319_v62 = vsel %vm2212_vm11, %v3782_v27, %v3921_v43  ;;  %v3904_v22 = vrot.slane %v3782_v27, 7  ;;  %v3806_v6 = vrot.slane %v3782_v27, 1  ;;  %v3872_v0 = vrot.slane %v3782_v27, 5 }
 0x701   :  { %v16322_v8 = vsel %vm2212_vm11, %v3838_v34, %v3837_v42  ;;  %v16325_v28 = vsel %vm2212_vm11, %v3821_v3, %v3820_v44  ;;  %v16328_v52 = vsel %vm2212_vm11, %v3887_v40, %v3886_v14  ;;  %v16331_v37 = vsel %vm2212_vm11, %v3855_v23, %v3854_v39 }
 0x702   :  { %v16334_v53 = vsel %vm2212_vm11, %v3904_v22, %v3903_v54  ;;  %v16337_v33 = vsel %vm2212_vm11, %v3806_v6, %v3805_v50  ;;  %v16340_v46 = vsel %vm2212_vm11, %v3872_v0, %v3871_v55  ;;  %v4740_v14 = vmul.f32 1.442695, %v4731_v19 }
 0x703   :  { %18543 = vst [vmem:[#allocation37_spill] sm:$0xff] %v16337_v33  ;;  %18544 = vst [vmem:[#allocation38_spill] sm:$0xff] %v16340_v46  ;;  %v4715_v26 = vsel %vm1512_vm4, %v16211_v21, -inf  ;;  %v4721_v3 = vsel %vm1512_vm4, %v16308_v59, -inf  ;;  %v5603_v22 = vmul.f32 %v16162_v18, %v16162_v18  ;;  %v16367_v19 = vadd.f32 %v15235_v16, %v16004_v51 }
 0x704   :  { %14920 = vpow2.f32 %v4740_v14  ;;  %v16373_v18 = vadd.f32 %v16002_v49, %v15235_v16 }
 0x705   :  { %v4170_v57 = vpop.f32.mrb[64].mxu1  ;;  %v16343_v25 = vpop.f32.mrb[70].mxu0  ;;  %v5611_v0 = vsub.f32 0.0, %v5603_v22 }
 0x706   :  { %v14362_v60 = vpop.f32.mrb[65].mxu1  ;;  %v4706_v42 = vsel %vm1512_vm4, %v4170_v57, -inf  ;;  %v14397_v44 = vpop.f32.mrb[71].mxu0  ;;  %v4727_v40 = vsel %vm1512_vm4, %v16343_v25, -inf }
 0x707   :  { %4707 = vmax.xlane.f32.xlu0 %v4706_v42  ;;  %v5539_v60 = vadd.f32 %v15998_v41, %v15237_v17  ;;  %v5604_v42 = vmul.f32 %v16367_v19, %v16367_v19  ;;  %v5605_v44 = vmul.f32 %v16373_v18, %v16373_v18  ;;  %v16399_v22 = vpop.permute.xlu1 %5626 }
 0x709   :  { %v4322_v39 = vpop.f32.mrb[66].mxu1  ;;  %v5612_v14 = vsub.f32 0.0, %v5604_v42 }
 0x70a   :  { %v14372_v54 = vpop.f32.mrb[67].mxu1  ;;  %v4712_v27 = vsel %vm1512_vm4, %v4322_v39, -inf }
 0x70b   :  { %4713 = vmax.xlane.f32.xlu0 %v4712_v27  ;;  %v5613_v54 = vsub.f32 0.0, %v5605_v44  ;;  %v16383_v27 = vadd.f32 %v15235_v16, %v16008_v58 }
 0x70d   :  { %v4474_v43 = vpop.f32.mrb[68].mxu1 }
 0x70e   :  { %v14382_v50 = vpop.f32.mrb[69].mxu1  ;;  %v4718_v55 = vsel %vm1512_vm4, %v4474_v43, -inf  ;;  %v16356_v23 = vpop.eup %14920 }
 0x70f   :  { %4719 = vmax.xlane.f32.xlu1 %v4718_v55  ;;  %4716 = vmax.xlane.f32.xlu0 %v4715_v26  ;;  %v4757_v6 = vsel %vm1512_vm4, %v16356_v23, 0.0  ;;  %v5541_v50 = vadd.f32 %v16002_v49, %v15237_v17  ;;  %v16390_v55 = vadd.f32 %v16006_v56, %v15235_v16  ;;  %v5606_v26 = vmul.f32 %v16383_v27, %v16383_v27 }
 0x711   :  { %v16350_v38 = vpop.f32.mrb[70].mxu1 }
 0x712   :  { %v14392_v34 = vpop.f32.mrb[71].mxu1  ;;  %v4724_v24 = vsel %vm1512_vm4, %v16350_v38, -inf }
 0x713   :  { %4722 = vmax.xlane.f32.xlu0 %v4721_v3  ;;  %v5607_v34 = vmul.f32 %v16390_v55, %v16390_v55  ;;  %v5614_v3 = vsub.f32 0.0, %v5606_v26 }
 0x717   :  { %4728 = vmax.xlane.f32.xlu0 %v4727_v40  ;;  %v5615_v40 = vsub.f32 0.0, %v5607_v34 }
 0x71b   :  { %4758 = vadd.xlane.f32.xlu0 %v4757_v6 }
 0x720   :  { %5660 = vrot.lane.b32.xlu1 %v5611_v0, %s15152_s18 }
 0x744   :  { %4725 = vmax.xlane.f32.xlu1 %v4724_v24 }
 0x755   :  { %5564 = vrot.lane.b32.xlu1 %v5539_v60, %s15152_s18  ;;  %v16401_v60 = vpop.permute.xlu1 %5628 }
 0x759   :  { %5662 = vrot.lane.b32.xlu1 %v5612_v14, %s15152_s18 }
 0x75d   :  { %5664 = vrot.lane.b32.xlu1 %v5613_v54, %s15152_s18 }
 0x761   :  { %5568 = vrot.lane.b32.xlu1 %v5541_v50, %s15152_s18 }
 0x765   :  { %5666 = vrot.lane.b32.xlu1 %v5614_v3, %s15152_s18 }
 0x769   :  { %5668 = vrot.lane.b32.xlu1 %v5615_v40, %s15152_s18 }
 0x794   :  { %v4708_v6 = vpop.xlane.xlu0 %4707 }
 0x795   :  { %v4730_v0 = vsub.f32 %v4170_v57, %v4708_v6 }
 0x797   :  { %v4738_v24 = vmul.f32 1.442695, %v4730_v0 }
 0x798   :  { %v4714_v42 = vpop.xlane.xlu0 %4713 }
 0x799   :  { %14922 = vpow2.f32 %v4738_v24  ;;  %v4732_v44 = vsub.f32 %v4322_v39, %v4714_v42 }
 0x79b   :  { %v4742_v14 = vmul.f32 1.442695, %v4732_v44 }
 0x79c   :  { %v4720_v54 = vpop.xlane.xlu1 %4719  ;;  %v4717_v50 = vpop.xlane.xlu0 %4716 }
 0x79d   :  { %14924 = vpow2.f32 %v4742_v14  ;;  %v4734_v26 = vsub.f32 %v4474_v43, %v4720_v54  ;;  %v4733_v3 = vsub.f32 %v16211_v21, %v4717_v50 }
 0x79f   :  { %v4746_v34 = vmul.f32 1.442695, %v4734_v26  ;;  %v4744_v46 = vmul.f32 1.442695, %v4733_v3 }
 0x7a0   :  { %v4723_v40 = vpop.xlane.xlu0 %4722 }
 0x7a1   :  { %14926 = vpow2.f32 %v4746_v34  ;;  %v4735_v33 = vsub.f32 %v16308_v59, %v4723_v40  ;;  %v5602_v40 = vmul.f32 %v16158_v45, %v16158_v45  ;;  %v5597_v45 = vmul.f32 2.0, %v16373_v18 }
 0x7a2   :  { %14928 = vpow2.f32 %v4744_v46  ;;  %v5542_v18 = vadd.f32 %v15237_v17, %v16008_v58 }
 0x7a3   :  { %v16405_v57 = vpop.eup %14922  ;;  %v4748_v6 = vmul.f32 1.442695, %v4735_v33 }
 0x7a4   :  { %v4729_v0 = vpop.xlane.xlu0 %4728  ;;  %v4754_v39 = vsel %vm1512_vm4, %v16405_v57, 0.0 }
 0x7a5   :  { %14930 = vpow2.f32 %v4748_v6  ;;  %v4737_v24 = vsub.f32 %v16343_v25, %v4729_v0  ;;  %4755 = vadd.xlane.f32.xlu1 %v4754_v39  ;;  %v5610_v6 = vsub.f32 0.0, %v5602_v40  ;;  %v16439_v0 = vpop.permute.xlu1 %5660 }
 0x7a7   :  { %v16410_v43 = vpop.eup %14924  ;;  %v4752_v21 = vmul.f32 1.442695, %v4737_v24 }
 0x7a8   :  { %v4759_v42 = vpop.xlane.xlu0 %4758  ;;  %v4760_v44 = vsel %vm1512_vm4, %v16410_v43, 0.0 }
 0x7a9   :  { %14932 = vpow2.f32 %v4752_v21  ;;  %4761 = vadd.xlane.f32.xlu1 %v4760_v44  ;;  %v5598_v44 = vmul.f32 2.0, %v16383_v27  ;;  %v5553_v27 = vadd.f32 %v16010_v63, %v15235_v16 }
 0x7aa   :  { %14934 = vrcp.f32 %v4759_v42  ;;  %v5540_v42 = vadd.f32 %v15237_v17, %v16004_v51 }
 0x7ab   :  { %v16414_v59 = vpop.eup %14926  ;;  %v5609_v40 = vmul.f32 %v5553_v27, %v5553_v27 }
 0x7ac   :  { %v16416_v33 = vpop.eup %14928  ;;  %v4766_v46 = vsel %vm1512_vm4, %v16414_v59, 0.0 }
 0x7ad   :  { %4767 = vadd.xlane.f32.xlu1 %v4766_v46  ;;  %v4763_v25 = vsel %vm1512_vm4, %v16416_v33, 0.0 }
 0x7ae   :  { %4764 = vadd.xlane.f32.xlu0 %v4763_v25  ;;  %v5552_v25 = vadd.f32 %v15235_v16, %v16012_v13 }
 0x7af   :  { %v16422_v14 = vpop.eup %14930 }
 0x7b0   :  { %v4769_v54 = vsel %vm1512_vm4, %v16422_v14, 0.0 }
 0x7b2   :  { %4770 = vadd.xlane.f32.xlu0 %v4769_v54  ;;  %v5600_v54 = vmul.f32 2.0, %v5552_v25 }
 0x7b3   :  { %v16426_v50 = vpop.eup %14932 }
 0x7b4   :  { %v14935_v26 = vpop.eup %14934  ;;  %v4775_v3 = vsel %vm1512_vm4, %v16426_v50, 0.0 }
 0x7b5   :  { %v4787_v34 = vmul.f32 %v14935_v26, %v16356_v23  ;;  %v5538_v23 = vadd.f32 %v15237_v17, %v16000_v48  ;;  %v5601_v26 = vmul.f32 2.0, %v5553_v27 }
 0x7b6   :  { %4776 = vadd.xlane.f32.xlu0 %v4775_v3  ;;  %v5608_v3 = vmul.f32 %v5552_v25, %v5552_v25 }
 0x7b7   :  { %14406 = vmatmul.mubr.msk.f32.vlgmr.msra.gmra.mrb[72].mxu0 %vm1512_vm4, %v4787_v34  ;;  %v5544_v34 = vadd.f32 %v15237_v17, %v16012_v13 }
 0x7b8   :  { %14414 = vmatpush3.msra.mxu0 %v15659_v61  ;;  %14415 = vmatprep.mubr.msk.f32.mxu0 %vm15153_vm1, %v18542_v20  ;;  %v5596_v61 = vmul.f32 2.0, %v16367_v19  ;;  %v5599_v19 = vmul.f32 2.0, %v16390_v55  ;;  %v5543_v55 = vadd.f32 %v16006_v56, %v15237_v17 }
 0x7b9   :  { %14423 = vmatprep.subr.mxu0 %v18542_v20 }
 0x7cc   :  { %5658 = vrot.lane.b32.xlu0 %v5610_v6, %s15152_s18  ;;  %v5616_v6 = vsub.f32 0.0, %v5608_v3 }
 0x7d0   :  { %5562 = vrot.lane.b32.xlu0 %v5538_v23, %s15152_s18  ;;  %v5617_v23 = vsub.f32 0.0, %v5609_v40 }
 0x7d1   :  { %v4726_v39 = vpop.xlane.xlu1 %4725 }
 0x7d2   :  { %v4736_v24 = vsub.f32 %v16350_v38, %v4726_v39  ;;  %v5545_v39 = vadd.f32 %v16010_v63, %v15237_v17 }
 0x7d4   :  { %v4750_v21 = vmul.f32 1.442695, %v4736_v24  ;;  %5630 = vrot.lane.b32.xlu0 %v5596_v61, %s15154_s19 }
 0x7d5   :  { %v5565_v61 = vpop.permute.xlu1 %5564 }
 0x7d6   :  { %14936 = vpow2.f32 %v4750_v21 }
 0x7d8   :  { %5632 = vrot.lane.b32.xlu0 %v5597_v45, %s15154_s19 }
 0x7d9   :  { %v16480_v24 = vpop.permute.xlu1 %5662 }
 0x7dc   :  { %5566 = vrot.lane.b32.xlu0 %v5540_v42, %s15152_s18 }
 0x7dd   :  { %v5665_v21 = vpop.permute.xlu1 %5664 }
 0x7e0   :  { %v16453_v46 = vpop.eup %14936  ;;  %5634 = vrot.lane.b32.xlu0 %v5598_v44, %s15154_s19 }
 0x7e1   :  { %v4772_v38 = vsel %vm1512_vm4, %v16453_v46, 0.0  ;;  %v16482_v45 = vpop.permute.xlu1 %5568 }
 0x7e2   :  { %4773 = vadd.xlane.f32.xlu1 %v4772_v38 }
 0x7e4   :  { %5636 = vrot.lane.b32.xlu0 %v5599_v19, %s15154_s19 }
 0x7e5   :  { %v16484_v42 = vpop.permute.xlu1 %5666 }
 0x7e8   :  { %5570 = vrot.lane.b32.xlu0 %v5542_v18, %s15152_s18 }
 0x7e9   :  { %v16486_v44 = vpop.permute.xlu1 %5668 }
 0x7ec   :  { %5638 = vrot.lane.b32.xlu0 %v5600_v54, %s15154_s19 }
 0x7f0   :  { %5640 = vrot.lane.b32.xlu0 %v5601_v26, %s15154_s19 }
 0x7f3   :  { %5572 = vrot.lane.b32.xlu1 %v5543_v55, %s15152_s18 }
 0x7f4   :  { %5574 = vrot.lane.b32.xlu0 %v5544_v34, %s15152_s18 }
 0x7f7   :  { %5670 = vrot.lane.b32.xlu1 %v5616_v6, %s15152_s18 }
 0x7fb   :  { %5672 = vrot.lane.b32.xlu1 %v5617_v23, %s15152_s18 }
 0x7ff   :  { %5576 = vrot.lane.b32.xlu1 %v5545_v39, %s15152_s18  ;;  %v5683_v39 = vsel %vm798_vm3, %v16401_v60, %v16439_v0  ;;  %v5589_v60 = vsel %vm798_vm3, %v16482_v45, 1.0 }
 0x832   :  { %v4756_v38 = vpop.xlane.xlu1 %4755 }
 0x833   :  { %14938 = vrcp.f32 %v4756_v38 }
 0x836   :  { %v4762_v19 = vpop.xlane.xlu1 %4761 }
 0x837   :  { %14940 = vrcp.f32 %v4762_v19 }
 0x83a   :  { %v4768_v18 = vpop.xlane.xlu1 %4767 }
 0x83b   :  { %14942 = vrcp.f32 %v4768_v18  ;;  %v4765_v25 = vpop.xlane.xlu0 %4764 }
 0x83c   :  { %14944 = vrcp.f32 %v4765_v25 }
 0x83d   :  { %v14939_v27 = vpop.eup %14938 }
 0x83e   :  { %v4786_v54 = vmul.f32 %v14939_v27, %v16405_v57 }
 0x83f   :  { %v4771_v26 = vpop.xlane.xlu0 %4770 }
 0x840   :  { %14946 = vrcp.f32 %v4771_v26  ;;  %14401 = vmatmul.mubr.msk.f32.vlgmr.msra.gmra.mrb[72].mxu1 %vm1512_vm4, %v4786_v54 }
 0x841   :  { %v14941_v55 = vpop.eup %14940  ;;  %14409 = vmatpush3.msra.mxu1 %v15664_v11  ;;  %14410 = vmatprep.mubr.msk.f32.mxu1 %vm15153_vm1, %v18542_v20 }
 0x842   :  { %14418 = vmatprep.subr.mxu1 %v18542_v20  ;;  %v4788_v3 = vmul.f32 %v14941_v55, %v16410_v43 }
 0x843   :  { %v4777_v34 = vpop.xlane.xlu0 %4776 }
 0x844   :  { %14948 = vrcp.f32 %v4777_v34  ;;  %14411 = vmatmul.mubr.msk.f32.vlgmr.msra.gmra.mrb[74].mxu1 %vm1512_vm4, %v4788_v3 }
 0x845   :  { %v14943_v40 = vpop.eup %14942  ;;  %14419 = vmatpush3.msra.mxu1 %v15992_v32  ;;  %14420 = vmatprep.mubr.msk.f32.mxu1 %vm15153_vm1, %v18542_v20 }
 0x846   :  { %v14945_v57 = vpop.eup %14944  ;;  %14428 = vmatprep.subr.mxu1 %v18542_v20  ;;  %v4790_v11 = vmul.f32 %v14943_v40, %v16414_v59 }
 0x847   :  { %v5659_v6 = vpop.permute.xlu0 %5658  ;;  %v4789_v23 = vmul.f32 %v14945_v57, %v16416_v33 }
 0x848   :  { %14421 = vmatmul.mubr.msk.f32.vlgmr.msra.gmra.mrb[76].mxu1 %vm1512_vm4, %v4790_v11  ;;  %v5682_v40 = vsel %vm798_vm3, %v16399_v22, %v5659_v6 }
 0x849   :  { %14416 = vmatmul.mubr.msk.f32.vlgmr.msra.gmra.mrb[74].mxu0 %vm1512_vm4, %v4789_v23  ;;  %14429 = vmatpush3.msra.mxu1 %v15996_v36 }
 0x84a   :  { %v14947_v43 = vpop.eup %14946  ;;  %14424 = vmatpush3.msra.mxu0 %v15990_v30  ;;  %14425 = vmatprep.mubr.msk.f32.mxu0 %vm15153_vm1, %v18542_v20 }
 0x84b   :  { %v5563_v32 = vpop.permute.xlu0 %5562  ;;  %14433 = vmatprep.subr.mxu0 %v18542_v20  ;;  %v4791_v59 = vmul.f32 %v14947_v43, %v16422_v14  ;;  %14430 = vmatprep.mubr.msk.f32.mxu1 %vm15153_vm1, %v18542_v20 }
 0x84c   :  { %14438 = vmatprep.subr.mxu1 %v18542_v20 }
 0x84d   :  { %14426 = vmatmul.mubr.msk.f32.vlgmr.msra.gmra.mrb[76].mxu0 %vm1512_vm4, %v4791_v59 }
 0x84e   :  { %v14949_v33 = vpop.eup %14948  ;;  %14434 = vmatpush3.msra.mxu0 %v15994_v35  ;;  %14435 = vmatprep.mubr.msk.f32.mxu0 %vm15153_vm1, %v18542_v20  ;;  %v5587_v35 = vsel %vm798_vm3, %v5565_v61, 1.0 }
 0x84f   :  { %v5631_v30 = vpop.permute.xlu0 %5630  ;;  %v4793_v36 = vmul.f32 %v14949_v33, %v16426_v50  ;;  %14443 = vmatprep.subr.mxu0 %v18542_v20 }
 0x850   :  { %v5684_v22 = vsel %vm798_vm3, %v5631_v30, %v16480_v24 }
 0x851   :  { %14436 = vmatmul.mubr.msk.f32.vlgmr.msra.gmra.mrb[78].mxu0 %vm1512_vm4, %v4793_v36 }
 0x852   :  { %14445 = vmatprep.mubr.msk.f32.mxu0 %vm15153_vm1, %v18542_v20 }
 0x853   :  { %v5633_v14 = vpop.permute.xlu0 %5632 }
 0x854   :  { %v5685_v50 = vsel %vm798_vm3, %v5633_v14, %v5665_v21 }
 0x855   :  { %14444 = vmatpush3.xpose.msk.msra.mxu0 %vm903_vm2, %v5683_v39 }
 0x856   :  { %14453 = vmatprep.subr.mxu0 %v18542_v20 }
 0x857   :  { %v5567_v38 = vpop.permute.xlu0 %5566 }
 0x858   :  { %14446 = vmatmul.mubr.msk.f32.vlgmr.msra.gmra.mrb[80].mxu0 %vm903_vm2, %v5587_v35  ;;  %v5588_v6 = vsel %vm798_vm3, %v5567_v38, 1.0 }
 0x859   :  { %14454 = vmatpush3.xpose.msk.msra.mxu0 %vm903_vm2, %v5685_v50  ;;  %14455 = vmatprep.mubr.msk.f32.mxu0 %vm15153_vm1, %v18542_v20 }
 0x85a   :  { %14463 = vmatprep.subr.mxu0 %v18542_v20 }
 0x85b   :  { %v5635_v0 = vpop.permute.xlu0 %5634 }
 0x85c   :  { %14456 = vmatmul.mubr.msk.f32.vlgmr.msra.gmra.mrb[82].mxu0 %vm903_vm2, %v5589_v60  ;;  %v5686_v24 = vsel %vm798_vm3, %v5635_v0, %v16484_v42 }
 0x85d   :  { %14465 = vmatprep.mubr.msk.f32.mxu0 %vm15153_vm1, %v18542_v20 }
 0x85f   :  { %v5637_v61 = vpop.permute.xlu0 %5636 }
 0x860   :  { %v5687_v21 = vsel %vm798_vm3, %v5637_v61, %v16486_v44 }
 0x861   :  { %14464 = vmatpush3.xpose.msk.msra.mxu0 %vm903_vm2, %v5687_v21 }
 0x862   :  { %14473 = vmatprep.subr.mxu0 %v18542_v20 }
 0x863   :  { %v5571_v19 = vpop.permute.xlu0 %5570 }
 0x867   :  { %v5639_v27 = vpop.permute.xlu0 %5638 }
 0x86b   :  { %v5641_v55 = vpop.permute.xlu0 %5640 }
 0x86f   :  { %v4774_v18 = vpop.xlane.xlu1 %4773  ;;  %v5575_v23 = vpop.permute.xlu0 %5574 }
 0x870   :  { %14950 = vrcp.f32 %v4774_v18  ;;  %v5592_v59 = vsel %vm798_vm3, %v5575_v23, 1.0 }
 0x873   :  { %v5573_v25 = vpop.permute.xlu1 %5572 }
 0x874   :  { %v5591_v45 = vsel %vm798_vm3, %v5573_v25, 1.0 }
 0x875   :  { %14466 = vmatmul.mubr.msk.f32.vlgmr.msra.gmra.mrb[84].mxu0 %vm903_vm2, %v5591_v45 }
 0x876   :  { %14475 = vmatprep.mubr.msk.f32.mxu0 %vm15153_vm1, %v18542_v20 }
 0x877   :  { %v5671_v54 = vpop.permute.xlu1 %5670 }
 0x878   :  { %v5688_v43 = vsel %vm798_vm3, %v5639_v27, %v5671_v54 }
 0x87a   :  { %v14951_v26 = vpop.eup %14950 }
 0x87b   :  { %v5673_v44 = vpop.permute.xlu1 %5672  ;;  %v4792_v3 = vmul.f32 %v14951_v26, %v16453_v46  ;;  %v5586_v46 = vsel %vm798_vm3, %v5563_v32, 1.0 }
 0x87c   :  { %v5689_v34 = vsel %vm798_vm3, %v5641_v55, %v5673_v44 }
 0x87d   :  { %14431 = vmatmul.mubr.msk.f32.vlgmr.msra.gmra.mrb[78].mxu1 %vm1512_vm4, %v4792_v3  ;;  %14474 = vmatpush3.xpose.msk.msra.mxu0 %vm903_vm2, %v5689_v34 }
 0x87e   :  { %14439 = vmatpush3.xpose.msk.msra.mxu1 %vm903_vm2, %v5682_v40  ;;  %14440 = vmatprep.mubr.msk.f32.mxu1 %vm15153_vm1, %v18542_v20 }
 0x87f   :  { %v5577_v57 = vpop.permute.xlu1 %5576  ;;  %14448 = vmatprep.subr.mxu1 %v18542_v20  ;;  %14483 = vmatprep.subr.mxu0 %v18542_v20 }
 0x880   :  { %v5593_v11 = vsel %vm798_vm3, %v5577_v57, 1.0 }
 0x881   :  { %14441 = vmatmul.mubr.msk.f32.vlgmr.msra.gmra.mrb[80].mxu1 %vm903_vm2, %v5586_v46  ;;  %14476 = vmatmul.mubr.msk.f32.vlgmr.msra.gmra.mrb[86].mxu0 %vm903_vm2, %v5593_v11 }
 0x882   :  { %14449 = vmatpush3.xpose.msk.msra.mxu1 %vm903_vm2, %v5684_v22  ;;  %14484 = vmatpush3.msra.mxu0 %v15998_v41  ;;  %v5590_v41 = vsel %vm798_vm3, %v5571_v19, 1.0 }
 0x883   :  { %14450 = vmatprep.mubr.msk.f32.mxu1 %vm15153_vm1, %v18542_v20  ;;  %14458 = vmatprep.subr.mxu1 %v18542_v20 }
 0x884   :  { %14485 = vmatprep.mubr.msk.f32.mxu0 %vm15153_vm1, %v18542_v20  ;;  %14493 = vmatprep.subr.mxu0 %v18542_v20 }
 0x885   :  { %14451 = vmatmul.mubr.msk.f32.vlgmr.msra.gmra.mrb[82].mxu1 %vm903_vm2, %v5588_v6 }
 0x886   :  { %14459 = vmatpush3.xpose.msk.msra.mxu1 %vm903_vm2, %v5686_v24  ;;  %14460 = vmatprep.mubr.msk.f32.mxu1 %vm15153_vm1, %v18542_v20 }
 0x887   :  { %14468 = vmatprep.subr.mxu1 %v18542_v20 }
 0x889   :  { %14461 = vmatmul.mubr.msk.f32.vlgmr.msra.gmra.mrb[84].mxu1 %vm903_vm2, %v5590_v41 }
 0x88a   :  { %v4936_v32 = vpop.f32.mrb[72].mxu0  ;;  %14469 = vmatpush3.xpose.msk.msra.mxu1 %vm903_vm2, %v5688_v43  ;;  %14470 = vmatprep.mubr.msk.f32.mxu1 %vm15153_vm1, %v18542_v20 }
 0x88b   :  { %v14407_v42 = vpop.f32.mrb[73].mxu0  ;;  %14478 = vmatprep.subr.mxu1 %v18542_v20  ;;  %v5386_v33 = vrot.slane %v4936_v32, 7  ;;  %v5419_v30 = vrot.slane %v4936_v32, 1  ;;  %v5436_v36 = vrot.slane %v4936_v32, 2  ;;  %v5453_v14 = vrot.slane %v4936_v32, 3 }
 0x88c   :  { %v5468_v39 = vrot.slane %v4936_v32, 4  ;;  %v5485_v35 = vrot.slane %v4936_v32, 5  ;;  %v5502_v38 = vrot.slane %v4936_v32, 6 }
 0x88d   :  { %14471 = vmatmul.mubr.msk.f32.vlgmr.msra.gmra.mrb[86].mxu1 %vm903_vm2, %v5592_v59 }
 0x88e   :  { %14479 = vmatpush3.msra.mxu1 %v16000_v48  ;;  %14480 = vmatprep.mubr.msk.f32.mxu1 %vm15153_vm1, %v18542_v20 }
 0x88f   :  { %14488 = vmatprep.subr.mxu1 %v18542_v20 }
 0x913   :  { %v4863_v50 = vpop.f32.mrb[72].mxu1 }
 0x914   :  { %v5401_v60 = vrot.slane %v4863_v50, 1  ;;  %v5418_v0 = vrot.slane %v4863_v50, 2  ;;  %v5435_v61 = vrot.slane %v4863_v50, 3  ;;  %v5452_v21 = vrot.slane %v4863_v50, 4  ;;  %v14402_v19 = vpop.f32.mrb[73].mxu1 }
 0x915   :  { %v5467_v18 = vrot.slane %v4863_v50, 5  ;;  %v5484_v48 = vrot.slane %v4863_v50, 6  ;;  %v5501_v25 = vrot.slane %v4863_v50, 7  ;;  %v5387_v45 = vsel %vm2194_vm5, %v5386_v33, %v4863_v50 }
 0x916   :  { %v5420_v27 = vsel %vm2194_vm5, %v5419_v30, %v5418_v0  ;;  %v5402_v54 = vsel %vm2194_vm5, %v4936_v32, %v5401_v60  ;;  %v5437_v26 = vsel %vm2194_vm5, %v5436_v36, %v5435_v61  ;;  %v5454_v55 = vsel %vm2194_vm5, %v5453_v14, %v5452_v21 }
 0x917   :  { %v5009_v44 = vpop.f32.mrb[74].mxu1  ;;  %v5469_v3 = vsel %vm2194_vm5, %v5468_v39, %v5467_v18  ;;  %v5486_v34 = vsel %vm2194_vm5, %v5485_v35, %v5484_v48  ;;  %v5503_v40 = vsel %vm2194_vm5, %v5502_v38, %v5501_v25 }
 0x918   :  { %v14412_v57 = vpop.f32.mrb[75].mxu1  ;;  %v5421_v46 = vsel %vm2197_vm6, %v5009_v44, %v5420_v27  ;;  %v5403_v11 = vrot.slane %v5009_v44, 7  ;;  %v5470_v22 = vrot.slane %v5009_v44, 3  ;;  %v5438_v6 = vrot.slane %v5009_v44, 1 }
 0x919   :  { %v5487_v24 = vrot.slane %v5009_v44, 4  ;;  %v5504_v41 = vrot.slane %v5009_v44, 5  ;;  %v5388_v23 = vrot.slane %v5009_v44, 6  ;;  %v5455_v43 = vrot.slane %v5009_v44, 2 }
 0x91a   :  { %v5404_v32 = vsel %vm2197_vm6, %v5403_v11, %v5402_v54  ;;  %v5471_v42 = vsel %vm2197_vm6, %v5470_v22, %v5469_v3  ;;  %v5439_v59 = vsel %vm2197_vm6, %v5438_v6, %v5437_v26 }
 0x91b   :  { %v5155_v33 = vpop.f32.mrb[76].mxu1  ;;  %v5488_v30 = vsel %vm2197_vm6, %v5487_v24, %v5486_v34  ;;  %v5505_v36 = vsel %vm2197_vm6, %v5504_v41, %v5503_v40  ;;  %v5389_v14 = vsel %vm2197_vm6, %v5388_v23, %v5387_v45  ;;  %v5456_v39 = vsel %vm2197_vm6, %v5455_v43, %v5454_v55 }
 0x91c   :  { %v5082_v35 = vpop.f32.mrb[74].mxu0  ;;  %v14422_v38 = vpop.f32.mrb[77].mxu1  ;;  %v5424_v50 = vrot.slane %v5155_v33, 6  ;;  %v5407_v60 = vrot.slane %v5155_v33, 5  ;;  %v5474_v0 = vrot.slane %v5155_v33, 1  ;;  %v5441_v61 = vrot.slane %v5155_v33, 7 }
 0x91d   :  { %v14417_v21 = vpop.f32.mrb[75].mxu0  ;;  %v5422_v19 = vrot.slane %v5082_v35, 7  ;;  %v5405_v18 = vrot.slane %v5082_v35, 6  ;;  %v5472_v48 = vrot.slane %v5082_v35, 2  ;;  %v5440_v25 = vsel %vm2200_vm7, %v5082_v35, %v5439_v59 }
 0x91e   :  { %v5442_v27 = vsel %vm2203_vm8, %v5441_v61, %v5440_v25  ;;  %v5489_v54 = vrot.slane %v5082_v35, 3  ;;  %v5491_v26 = vrot.slane %v5155_v33, 2  ;;  %v5506_v44 = vrot.slane %v5082_v35, 4 }
 0x91f   :  { %v5423_v45 = vsel %vm2200_vm7, %v5422_v19, %v5421_v46  ;;  %v5406_v55 = vsel %vm2200_vm7, %v5405_v18, %v5404_v32  ;;  %v5473_v3 = vsel %vm2200_vm7, %v5472_v48, %v5471_v42  ;;  %v5508_v34 = vrot.slane %v5155_v33, 3 }
 0x920   :  { %v5228_v40 = vpop.f32.mrb[76].mxu0  ;;  %v5425_v57 = vsel %vm2203_vm8, %v5424_v50, %v5423_v45  ;;  %v5408_v11 = vsel %vm2203_vm8, %v5407_v60, %v5406_v55  ;;  %v5475_v22 = vsel %vm2203_vm8, %v5474_v0, %v5473_v3  ;;  %v5490_v6 = vsel %vm2200_vm7, %v5489_v54, %v5488_v30 }
 0x921   :  { %v14427_v24 = vpop.f32.mrb[77].mxu0  ;;  %v5426_v41 = vrot.slane %v5228_v40, 5  ;;  %v5409_v23 = vrot.slane %v5228_v40, 4  ;;  %v5476_v43 = vsel %vm2206_vm9, %v5228_v40, %v5475_v22  ;;  %v5443_v46 = vrot.slane %v5228_v40, 6 }
 0x922   :  { %v5492_v32 = vsel %vm2203_vm8, %v5491_v26, %v5490_v6  ;;  %v5493_v59 = vrot.slane %v5228_v40, 1  ;;  %v5507_v42 = vsel %vm2200_vm7, %v5506_v44, %v5505_v36  ;;  %v5510_v38 = vrot.slane %v5228_v40, 2 }
 0x923   :  { %v5427_v50 = vsel %vm2206_vm9, %v5426_v41, %v5425_v57  ;;  %v5410_v60 = vsel %vm2206_vm9, %v5409_v23, %v5408_v11  ;;  %v5444_v0 = vsel %vm2206_vm9, %v5443_v46, %v5442_v27  ;;  %v5509_v30 = vsel %vm2203_vm8, %v5508_v34, %v5507_v42 }
 0x924   :  { %v16625_v61 = vpop.f32.mrb[78].mxu0  ;;  %v5494_v21 = vsel %vm2206_vm9, %v5493_v59, %v5492_v32  ;;  %v5511_v19 = vsel %vm2206_vm9, %v5510_v38, %v5509_v30  ;;  %v5390_v18 = vrot.slane %v5082_v35, 5  ;;  %v5392_v48 = vrot.slane %v5155_v33, 4 }
 0x925   :  { %v14437_v25 = vpop.f32.mrb[79].mxu0  ;;  %v5394_v54 = vrot.slane %v5228_v40, 3  ;;  %v5457_v44 = vrot.slane %v5082_v35, 1  ;;  %v5460_v45 = vrot.slane %v5228_v40, 7  ;;  %v16643_v35 = vadd.f32 %v15235_v16, %v16016_v1 }
 0x926   :  { %v5391_v36 = vsel %vm2200_vm7, %v5390_v18, %v5389_v14  ;;  %v5430_v23 = vrot.slane %v16625_v61, 3  ;;  %v5413_v46 = vrot.slane %v16625_v61, 2  ;;  %v5479_v59 = vrot.slane %v16625_v61, 6 }
 0x927   :  { %v5393_v26 = vsel %vm2203_vm8, %v5392_v48, %v5391_v36  ;;  %v5458_v55 = vsel %vm2200_vm7, %v5457_v44, %v5456_v39  ;;  %v7139_v39 = vadd.f32 %v16014_v31, %v15235_v16  ;;  %v5447_v42 = vrot.slane %v16625_v61, 4 }
 0x928   :  { %v5395_v27 = vsel %vm2206_vm9, %v5394_v54, %v5393_v26  ;;  %v5459_v3 = vsel %vm2203_vm8, %v5155_v33, %v5458_v55  ;;  %v7186_v33 = vmul.f32 2.0, %v16643_v35  ;;  %v5496_v38 = vrot.slane %v16625_v61, 7 }
 0x929   :  { %v5461_v57 = vsel %vm2206_vm9, %v5460_v45, %v5459_v3  ;;  %v7187_v40 = vmul.f32 2.0, %v7139_v39  ;;  %v5398_v30 = vrot.slane %v16625_v61, 1 }
 0x92b   :  { %v16634_v34 = vpop.f32.mrb[80].mxu0 }
 0x92c   :  { %v14447_v11 = vpop.f32.mrb[81].mxu0  ;;  %v6301_v22 = vsel %vm1512_vm4, %v16634_v34, -inf }
 0x92d   :  { %6302 = vmax.xlane.f32.xlu1 %v6301_v22 }
 0x92f   :  { %v16639_v14 = vpop.f32.mrb[82].mxu0 }
 0x930   :  { %v14457_v6 = vpop.f32.mrb[83].mxu0 }
 0x93e   :  { %7218 = vrot.lane.b32.xlu1 %v7186_v33, %s15154_s19 }
 0x942   :  { %7220 = vrot.lane.b32.xlu1 %v7187_v40, %s15154_s19 }
 0x948   :  { %v16650_v24 = vpop.f32.mrb[84].mxu0 }
 0x949   :  { %v14467_v41 = vpop.f32.mrb[85].mxu0 }
 0x950   :  { %v5301_v32 = vpop.f32.mrb[78].mxu1 }
 0x951   :  { %v14432_v18 = vpop.f32.mrb[79].mxu1  ;;  %v5428_v48 = vrot.slane %v5301_v32, 4  ;;  %v5411_v25 = vrot.slane %v5301_v32, 3  ;;  %v5477_v36 = vrot.slane %v5301_v32, 7  ;;  %v5445_v54 = vrot.slane %v5301_v32, 5 }
 0x952   :  { %v5495_v26 = vsel %vm2209_vm10, %v5301_v32, %v5494_v21  ;;  %v5512_v44 = vrot.slane %v5301_v32, 1  ;;  %v5396_v45 = vrot.slane %v5301_v32, 2  ;;  %v5462_v55 = vrot.slane %v5301_v32, 6 }
 0x953   :  { %v5429_v3 = vsel %vm2209_vm10, %v5428_v48, %v5427_v50  ;;  %v5412_v11 = vsel %vm2209_vm10, %v5411_v25, %v5410_v60  ;;  %v5478_v22 = vsel %vm2209_vm10, %v5477_v36, %v5476_v43  ;;  %v5446_v6 = vsel %vm2209_vm10, %v5445_v54, %v5444_v0 }
 0x954   :  { %v16663_v33 = vpop.f32.mrb[80].mxu1  ;;  %v16665_v40 = vpop.f32.mrb[86].mxu0  ;;  %v16668_v41 = vsel %vm2212_vm11, %v5430_v23, %v5429_v3  ;;  %v16671_v21 = vsel %vm2212_vm11, %v5413_v46, %v5412_v11  ;;  %v16674_v32 = vsel %vm2212_vm11, %v5479_v59, %v5478_v22  ;;  %v16677_v50 = vsel %vm2212_vm11, %v5447_v42, %v5446_v6 }
 0x955   :  { %v14442_v60 = vpop.f32.mrb[81].mxu1  ;;  %v14477_v43 = vpop.f32.mrb[87].mxu0  ;;  %v6298_v0 = vsel %vm1512_vm4, %v16663_v33, -inf  ;;  %v16682_v18 = vsel %vm2212_vm11, %v5496_v38, %v5495_v26  ;;  %v5513_v23 = vsel %vm2209_vm10, %v5512_v44, %v5511_v19  ;;  %v5464_v48 = vrot.slane %v16625_v61, 5 }
 0x956   :  { %6299 = vmax.xlane.f32.xlu0 %v6298_v0  ;;  %v16688_v46 = vsel %vm2212_vm11, %v16625_v61, %v5513_v23  ;;  %v5397_v59 = vsel %vm2209_vm10, %v5396_v45, %v5395_v27  ;;  %v5463_v42 = vsel %vm2209_vm10, %v5462_v55, %v5461_v57  ;;  %v6307_v61 = vsel %vm1512_vm4, %v16639_v14, -inf }
 0x957   :  { %18545 = vst [vmem:[#allocation39_spill] sm:$0xff] %v16688_v46  ;;  %v16693_v25 = vsel %vm2212_vm11, %v5398_v30, %v5397_v59  ;;  %v16696_v36 = vsel %vm2212_vm11, %v5464_v48, %v5463_v42  ;;  %v6313_v30 = vsel %vm1512_vm4, %v16650_v24, -inf  ;;  %v6319_v55 = vsel %vm1512_vm4, %v16665_v40, -inf }
 0x958   :  { %18546 = vst [vmem:[#allocation40_spill] sm:$0xff] %v16693_v25  ;;  %18547 = vst [vmem:[#allocation41_spill] sm:$0xff] %v16696_v36  ;;  %v5914_v38 = vpop.f32.mrb[82].mxu1  ;;  %v7195_v3 = vmul.f32 %v7139_v39, %v7139_v39  ;;  %v16716_v6 = vadd.f32 %v15235_v16, %v16020_v15  ;;  %v7131_v60 = vadd.f32 %v16014_v31, %v15237_v17 }
 0x959   :  { %v14452_v54 = vpop.f32.mrb[83].mxu1  ;;  %v6304_v19 = vsel %vm1512_vm4, %v5914_v38, -inf  ;;  %v16722_v43 = vadd.f32 %v16018_v2, %v15235_v16  ;;  %v16732_v59 = vadd.f32 %v15235_v16, %v16024_v5  ;;  %v7133_v42 = vadd.f32 %v16018_v2, %v15237_v17 }
 0x95a   :  { %6305 = vmax.xlane.f32.xlu0 %v6304_v19  ;;  %v7203_v11 = vsub.f32 0.0, %v7195_v3  ;;  %v7196_v39 = vmul.f32 %v16716_v6, %v16716_v6  ;;  %v16739_v54 = vadd.f32 %v16022_v4, %v15235_v16 }
 0x95b   :  { %v7197_v0 = vmul.f32 %v16722_v43, %v16722_v43  ;;  %v7198_v19 = vmul.f32 %v16732_v59, %v16732_v59 }
 0x95c   :  { %v16699_v26 = vpop.f32.mrb[84].mxu1  ;;  %v7204_v23 = vsub.f32 0.0, %v7196_v39 }
 0x95d   :  { %v14462_v44 = vpop.f32.mrb[85].mxu1  ;;  %v6310_v45 = vsel %vm1512_vm4, %v16699_v26, -inf  ;;  %v7205_v48 = vsub.f32 0.0, %v7197_v0 }
 0x95e   :  { %6308 = vmax.xlane.f32.xlu0 %v6307_v61  ;;  %v7199_v44 = vmul.f32 %v16739_v54, %v16739_v54  ;;  %v7206_v61 = vsub.f32 0.0, %v7198_v19 }
 0x960   :  { %v16703_v27 = vpop.f32.mrb[86].mxu1 }
 0x961   :  { %v14472_v57 = vpop.f32.mrb[87].mxu1  ;;  %v6316_v22 = vsel %vm1512_vm4, %v16703_v27, -inf }
 0x962   :  { %6314 = vmax.xlane.f32.xlu0 %v6313_v30 }
 0x966   :  { %6311 = vmax.xlane.f32.xlu1 %v6310_v45  ;;  %6320 = vmax.xlane.f32.xlu0 %v6319_v55  ;;  %v7207_v55 = vsub.f32 0.0, %v7199_v44 }
 0x977   :  { %7252 = vrot.lane.b32.xlu1 %v7203_v11, %s15152_s18 }
 0x99b   :  { %6317 = vmax.xlane.f32.xlu1 %v6316_v22 }
 0x9ac   :  { %7156 = vrot.lane.b32.xlu1 %v7131_v60, %s15152_s18 }
 0x9b0   :  { %7254 = vrot.lane.b32.xlu1 %v7204_v23, %s15152_s18 }
 0x9b4   :  { %7256 = vrot.lane.b32.xlu1 %v7205_v48, %s15152_s18 }
 0x9b8   :  { %7160 = vrot.lane.b32.xlu1 %v7133_v42, %s15152_s18 }
 0x9ba   :  { %v6303_v57 = vpop.xlane.xlu1 %6302 }
 0x9bb   :  { %v6323_v30 = vsub.f32 %v16634_v34, %v6303_v57 }
 0x9bc   :  { %7258 = vrot.lane.b32.xlu1 %v7206_v61, %s15152_s18 }
 0x9bd   :  { %v6332_v45 = vmul.f32 1.442695, %v6323_v30 }
 0x9be   :  { %v16754_v23 = vpop.permute.xlu1 %7218 }
 0x9bf   :  { %14952 = vpow2.f32 %v6332_v45 }
 0x9c0   :  { %7260 = vrot.lane.b32.xlu1 %v7207_v55, %s15152_s18 }
 0x9c2   :  { %v16757_v61 = vpop.permute.xlu1 %7220 }
 0x9c9   :  { %v16749_v3 = vpop.eup %14952 }
 0x9ca   :  { %v6349_v11 = vsel %vm1512_vm4, %v16749_v3, 0.0 }
 0x9cb   :  { %6350 = vadd.xlane.f32.xlu0 %v6349_v11 }
 0x9e3   :  { %v6300_v22 = vpop.xlane.xlu0 %6299 }
 0x9e4   :  { %v6322_v60 = vsub.f32 %v16663_v33, %v6300_v22 }
 0x9e6   :  { %v6330_v39 = vmul.f32 1.442695, %v6322_v60 }
 0x9e7   :  { %v6306_v0 = vpop.xlane.xlu0 %6305 }
 0x9e8   :  { %14954 = vpow2.f32 %v6330_v39  ;;  %v6324_v34 = vsub.f32 %v5914_v38, %v6306_v0 }
 0x9ea   :  { %v6334_v48 = vmul.f32 1.442695, %v6324_v34 }
 0x9eb   :  { %v6309_v42 = vpop.xlane.xlu0 %6308 }
 0x9ec   :  { %14956 = vpow2.f32 %v6334_v48  ;;  %v6325_v19 = vsub.f32 %v16639_v14, %v6309_v42 }
 0x9ee   :  { %v6336_v44 = vmul.f32 1.442695, %v6325_v19 }
 0x9ef   :  { %v6315_v57 = vpop.xlane.xlu0 %6314 }
 0x9f0   :  { %14958 = vpow2.f32 %v6336_v44  ;;  %v6327_v30 = vsub.f32 %v16650_v24, %v6315_v57 }
 0x9f2   :  { %v16760_v45 = vpop.eup %14954  ;;  %v6340_v33 = vmul.f32 1.442695, %v6327_v30  ;;  %v7194_v30 = vmul.f32 %v16643_v35, %v16643_v35  ;;  %v7132_v35 = vadd.f32 %v15237_v17, %v16020_v15 }
 0x9f3   :  { %v6312_v55 = vpop.xlane.xlu1 %6311  ;;  %v6321_v11 = vpop.xlane.xlu0 %6320  ;;  %v6346_v38 = vsel %vm1512_vm4, %v16760_v45, 0.0 }
 0x9f4   :  { %14960 = vpow2.f32 %v6340_v33  ;;  %v6326_v22 = vsub.f32 %v16699_v26, %v6312_v55  ;;  %v6329_v14 = vsub.f32 %v16665_v40, %v6321_v11  ;;  %6347 = vadd.xlane.f32.xlu1 %v6346_v38  ;;  %v7202_v33 = vsub.f32 0.0, %v7194_v30 }
 0x9f5   :  { %v7130_v55 = vadd.f32 %v15237_v17, %v16016_v1  ;;  %v7188_v11 = vmul.f32 2.0, %v16716_v6  ;;  %v7191_v6 = vmul.f32 2.0, %v16739_v54  ;;  %v7135_v30 = vadd.f32 %v16022_v4, %v15237_v17 }
 0x9f6   :  { %v16766_v60 = vpop.eup %14956  ;;  %v6338_v39 = vmul.f32 1.442695, %v6326_v22  ;;  %v6344_v0 = vmul.f32 1.442695, %v6329_v14  ;;  %v7189_v22 = vmul.f32 2.0, %v16722_v43  ;;  %v7134_v43 = vadd.f32 %v15237_v17, %v16024_v5 }
 0x9f7   :  { %v6352_v24 = vsel %vm1512_vm4, %v16766_v60, 0.0  ;;  %v16794_v38 = vpop.permute.xlu1 %7252 }
 0x9f8   :  { %14962 = vpow2.f32 %v6338_v39  ;;  %6353 = vadd.xlane.f32.xlu1 %v6352_v24  ;;  %v7190_v24 = vmul.f32 2.0, %v16732_v59  ;;  %v7145_v59 = vadd.f32 %v16026_v7, %v15235_v16 }
 0x9f9   :  { %14964 = vpow2.f32 %v6344_v0 }
 0x9fa   :  { %v16770_v34 = vpop.eup %14958  ;;  %v7193_v54 = vmul.f32 2.0, %v7145_v59 }
 0x9fb   :  { %v6355_v48 = vsel %vm1512_vm4, %v16770_v34, 0.0 }
 0x9fc   :  { %6356 = vadd.xlane.f32.xlu0 %v6355_v48  ;;  %v7144_v48 = vadd.f32 %v15235_v16, %v16028_v9 }
 0x9fe   :  { %v16774_v26 = vpop.eup %14960 }
 0x9ff   :  { %v6361_v40 = vsel %vm1512_vm4, %v16774_v26, 0.0 }
 0xa00   :  { %6362 = vadd.xlane.f32.xlu0 %v6361_v40 }
 0xa02   :  { %v16778_v42 = vpop.eup %14962 }
 0xa03   :  { %v16780_v19 = vpop.eup %14964  ;;  %v6358_v44 = vsel %vm1512_vm4, %v16778_v42, 0.0 }
 0xa04   :  { %6359 = vadd.xlane.f32.xlu1 %v6358_v44  ;;  %v6367_v57 = vsel %vm1512_vm4, %v16780_v19, 0.0  ;;  %v7192_v44 = vmul.f32 2.0, %v7144_v48 }
 0xa05   :  { %6368 = vadd.xlane.f32.xlu0 %v6367_v57  ;;  %v7136_v57 = vadd.f32 %v15237_v17, %v16028_v9 }
 0xa1b   :  { %7250 = vrot.lane.b32.xlu0 %v7202_v33, %s15152_s18  ;;  %v7200_v33 = vmul.f32 %v7144_v48, %v7144_v48 }
 0xa1f   :  { %7154 = vrot.lane.b32.xlu0 %v7130_v55, %s15152_s18  ;;  %v7201_v55 = vmul.f32 %v7145_v59, %v7145_v59 }
 0xa23   :  { %7222 = vrot.lane.b32.xlu0 %v7188_v11, %s15154_s19  ;;  %v7208_v11 = vsub.f32 0.0, %v7200_v33 }
 0xa27   :  { %7224 = vrot.lane.b32.xlu0 %v7189_v22, %s15154_s19  ;;  %v7209_v22 = vsub.f32 0.0, %v7201_v55 }
 0xa28   :  { %v6318_v14 = vpop.xlane.xlu1 %6317 }
 0xa29   :  { %v6328_v39 = vsub.f32 %v16703_v27, %v6318_v14  ;;  %v7137_v14 = vadd.f32 %v16026_v7, %v15237_v17 }
 0xa2b   :  { %v6342_v0 = vmul.f32 1.442695, %v6328_v39  ;;  %7158 = vrot.lane.b32.xlu0 %v7132_v35, %s15152_s18 }
 0xa2c   :  { %v16830_v39 = vpop.permute.xlu1 %7156 }
 0xa2d   :  { %14966 = vpow2.f32 %v6342_v0 }
 0xa2f   :  { %7226 = vrot.lane.b32.xlu0 %v7190_v24, %s15154_s19 }
 0xa33   :  { %7228 = vrot.lane.b32.xlu0 %v7191_v6, %s15154_s19  ;;  %v16833_v6 = vpop.permute.xlu1 %7254 }
 0xa37   :  { %v16810_v40 = vpop.eup %14966  ;;  %7162 = vrot.lane.b32.xlu0 %v7134_v43, %s15152_s18  ;;  %v7257_v43 = vpop.permute.xlu1 %7256 }
 0xa38   :  { %v6364_v27 = vsel %vm1512_vm4, %v16810_v40, 0.0 }
 0xa39   :  { %6365 = vadd.xlane.f32.xlu1 %v6364_v27 }
 0xa3b   :  { %7230 = vrot.lane.b32.xlu0 %v7192_v44, %s15154_s19  ;;  %v16840_v48 = vpop.permute.xlu1 %7160 }
 0xa3f   :  { %7232 = vrot.lane.b32.xlu0 %v7193_v54, %s15154_s19  ;;  %v16842_v27 = vpop.permute.xlu1 %7258 }
 0xa43   :  { %7166 = vrot.lane.b32.xlu0 %v7136_v57, %s15152_s18  ;;  %v16844_v59 = vpop.permute.xlu1 %7260 }
 0xa4a   :  { %7164 = vrot.lane.b32.xlu1 %v7135_v30, %s15152_s18 }
 0xa4e   :  { %7262 = vrot.lane.b32.xlu1 %v7208_v11, %s15152_s18 }
 0xa52   :  { %7264 = vrot.lane.b32.xlu1 %v7209_v22, %s15152_s18 }
 0xa56   :  { %7168 = vrot.lane.b32.xlu1 %v7137_v14, %s15152_s18 }
 0xa58   :  { %v6351_v35 = vpop.xlane.xlu0 %6350 }
 0xa59   :  { %14968 = vrcp.f32 %v6351_v35 }
 0xa63   :  { %v14969_v0 = vpop.eup %14968 }
 0xa64   :  { %v6379_v24 = vmul.f32 %v14969_v0, %v16749_v3 }
 0xa66   :  { %14486 = vmatmul.mubr.msk.f32.vlgmr.msra.gmra.mrb[88].mxu0 %vm1512_vm4, %v6379_v24 }
 0xa67   :  { %14494 = vmatpush3.msra.mxu0 %v16002_v49  ;;  %14495 = vmatprep.mubr.msk.f32.mxu0 %vm15153_vm1, %v18542_v20 }
 0xa68   :  { %14503 = vmatprep.subr.mxu0 %v18542_v20 }
 0xa81   :  { %v6348_v44 = vpop.xlane.xlu1 %6347 }
 0xa82   :  { %14970 = vrcp.f32 %v6348_v44 }
 0xa85   :  { %v6354_v3 = vpop.xlane.xlu1 %6353 }
 0xa86   :  { %14972 = vrcp.f32 %v6354_v3 }
 0xa89   :  { %v6357_v54 = vpop.xlane.xlu0 %6356 }
 0xa8a   :  { %14974 = vrcp.f32 %v6357_v54 }
 0xa8c   :  { %v14971_v57 = vpop.eup %14970 }
 0xa8d   :  { %v6363_v49 = vpop.xlane.xlu0 %6362  ;;  %v6378_v30 = vmul.f32 %v14971_v57, %v16760_v45 }
 0xa8e   :  { %14976 = vrcp.f32 %v6363_v49 }
 0xa8f   :  { %14481 = vmatmul.mubr.msk.f32.vlgmr.msra.gmra.mrb[88].mxu1 %vm1512_vm4, %v6378_v30 }
 0xa90   :  { %v14973_v33 = vpop.eup %14972  ;;  %14489 = vmatpush3.msra.mxu1 %v16004_v51  ;;  %14490 = vmatprep.mubr.msk.f32.mxu1 %vm15153_vm1, %v18542_v20 }
 0xa91   :  { %v6360_v55 = vpop.xlane.xlu1 %6359  ;;  %14498 = vmatprep.subr.mxu1 %v18542_v20  ;;  %v6380_v11 = vmul.f32 %v14973_v33, %v16766_v60 }
 0xa92   :  { %14978 = vrcp.f32 %v6360_v55  ;;  %v6369_v22 = vpop.xlane.xlu0 %6368 }
 0xa93   :  { %14980 = vrcp.f32 %v6369_v22  ;;  %14491 = vmatmul.mubr.msk.f32.vlgmr.msra.gmra.mrb[90].mxu1 %vm1512_vm4, %v6380_v11 }
 0xa94   :  { %v14975_v45 = vpop.eup %14974  ;;  %14499 = vmatpush3.msra.mxu1 %v16008_v58  ;;  %14500 = vmatprep.mubr.msk.f32.mxu1 %vm15153_vm1, %v18542_v20 }
 0xa95   :  { %v6381_v51 = vmul.f32 %v14975_v45, %v16770_v34  ;;  %14508 = vmatprep.subr.mxu1 %v18542_v20 }
 0xa96   :  { %v7251_v14 = vpop.permute.xlu0 %7250 }
 0xa97   :  { %14496 = vmatmul.mubr.msk.f32.vlgmr.msra.gmra.mrb[90].mxu0 %vm1512_vm4, %v6381_v51  ;;  %v7274_v45 = vsel %vm798_vm3, %v16754_v23, %v7251_v14 }
 0xa98   :  { %v14977_v35 = vpop.eup %14976  ;;  %14504 = vmatpush3.msra.mxu0 %v16006_v56  ;;  %14505 = vmatprep.mubr.msk.f32.mxu0 %vm15153_vm1, %v18542_v20 }
 0xa99   :  { %14513 = vmatprep.subr.mxu0 %v18542_v20  ;;  %v6383_v58 = vmul.f32 %v14977_v35, %v16774_v26 }
 0xa9a   :  { %v7155_v60 = vpop.permute.xlu0 %7154 }
 0xa9b   :  { %14506 = vmatmul.mubr.msk.f32.vlgmr.msra.gmra.mrb[92].mxu0 %vm1512_vm4, %v6383_v58 }
 0xa9c   :  { %v14979_v0 = vpop.eup %14978  ;;  %14514 = vmatpush3.msra.mxu0 %v16010_v63  ;;  %14515 = vmatprep.mubr.msk.f32.mxu0 %vm15153_vm1, %v18542_v20  ;;  %v7275_v63 = vsel %vm798_vm3, %v16757_v61, %v16794_v38  ;;  %v7181_v61 = vsel %vm798_vm3, %v16840_v48, 1.0 }
 0xa9d   :  { %v14981_v34 = vpop.eup %14980  ;;  %v6382_v24 = vmul.f32 %v14979_v0, %v16778_v42  ;;  %14523 = vmatprep.subr.mxu0 %v18542_v20 }
 0xa9e   :  { %v7223_v56 = vpop.permute.xlu0 %7222  ;;  %v6385_v44 = vmul.f32 %v14981_v34, %v16780_v19 }
 0xa9f   :  { %14501 = vmatmul.mubr.msk.f32.vlgmr.msra.gmra.mrb[92].mxu1 %vm1512_vm4, %v6382_v24  ;;  %v7276_v23 = vsel %vm798_vm3, %v7223_v56, %v16833_v6 }
 0xaa0   :  { %14509 = vmatpush3.msra.mxu1 %v16012_v13  ;;  %14516 = vmatmul.mubr.msk.f32.vlgmr.msra.gmra.mrb[94].mxu0 %vm1512_vm4, %v6385_v44  ;;  %v7179_v13 = vsel %vm798_vm3, %v16830_v39, 1.0 }
 0xaa1   :  { %14525 = vmatprep.mubr.msk.f32.mxu0 %vm15153_vm1, %v18542_v20  ;;  %14510 = vmatprep.mubr.msk.f32.mxu1 %vm15153_vm1, %v18542_v20 }
 0xaa2   :  { %v7225_v26 = vpop.permute.xlu0 %7224  ;;  %14518 = vmatprep.subr.mxu1 %v18542_v20 }
 0xaa3   :  { %14524 = vmatpush3.xpose.msk.msra.mxu0 %vm903_vm2, %v7275_v63  ;;  %v7277_v42 = vsel %vm798_vm3, %v7225_v26, %v7257_v43 }
 0xaa4   :  { %14533 = vmatprep.subr.mxu0 %v18542_v20 }
 0xaa6   :  { %14526 = vmatmul.mubr.msk.f32.vlgmr.msra.gmra.mrb[96].mxu0 %vm903_vm2, %v7179_v13  ;;  %v7159_v19 = vpop.permute.xlu0 %7158 }
 0xaa7   :  { %14534 = vmatpush3.xpose.msk.msra.mxu0 %vm903_vm2, %v7277_v42  ;;  %14535 = vmatprep.mubr.msk.f32.mxu0 %vm15153_vm1, %v18542_v20  ;;  %v7180_v14 = vsel %vm798_vm3, %v7159_v19, 1.0 }
 0xaa8   :  { %14543 = vmatprep.subr.mxu0 %v18542_v20 }
 0xaaa   :  { %14536 = vmatmul.mubr.msk.f32.vlgmr.msra.gmra.mrb[98].mxu0 %vm903_vm2, %v7181_v61  ;;  %v7227_v38 = vpop.permute.xlu0 %7226 }
 0xaab   :  { %14545 = vmatprep.mubr.msk.f32.mxu0 %vm15153_vm1, %v18542_v20  ;;  %v7278_v6 = vsel %vm798_vm3, %v7227_v38, %v16842_v27 }
 0xaae   :  { %v7229_v39 = vpop.permute.xlu0 %7228 }
 0xaaf   :  { %v7279_v43 = vsel %vm798_vm3, %v7229_v39, %v16844_v59 }
 0xab0   :  { %14544 = vmatpush3.xpose.msk.msra.mxu0 %vm903_vm2, %v7279_v43 }
 0xab1   :  { %14553 = vmatprep.subr.mxu0 %v18542_v20 }
 0xab2   :  { %v7163_v3 = vpop.permute.xlu0 %7162 }
 0xab6   :  { %v7231_v49 = vpop.permute.xlu0 %7230 }
 0xaba   :  { %v7233_v55 = vpop.permute.xlu0 %7232 }
 0xabe   :  { %v7167_v58 = vpop.permute.xlu0 %7166 }
 0xabf   :  { %v7184_v27 = vsel %vm798_vm3, %v7167_v58, 1.0 }
 0xac6   :  { %v6366_v54 = vpop.xlane.xlu1 %6365 }
 0xac7   :  { %14982 = vrcp.f32 %v6366_v54 }
 0xaca   :  { %v7165_v57 = vpop.permute.xlu1 %7164 }
 0xacb   :  { %v7183_v48 = vsel %vm798_vm3, %v7165_v57, 1.0 }
 0xacc   :  { %14546 = vmatmul.mubr.msk.f32.vlgmr.msra.gmra.mrb[100].mxu0 %vm903_vm2, %v7183_v48 }
 0xacd   :  { %14555 = vmatprep.mubr.msk.f32.mxu0 %vm15153_vm1, %v18542_v20 }
 0xace   :  { %v7263_v30 = vpop.permute.xlu1 %7262 }
 0xad1   :  { %v14983_v33 = vpop.eup %14982 }
 0xad2   :  { %v7265_v59 = vpop.permute.xlu1 %7264  ;;  %v6384_v11 = vmul.f32 %v14983_v33, %v16810_v40  ;;  %v7178_v40 = vsel %vm798_vm3, %v7155_v60, 1.0  ;;  %v7280_v60 = vsel %vm798_vm3, %v7231_v49, %v7263_v30 }
 0xad3   :  { %v7281_v22 = vsel %vm798_vm3, %v7233_v55, %v7265_v59 }
 0xad4   :  { %14511 = vmatmul.mubr.msk.f32.vlgmr.msra.gmra.mrb[94].mxu1 %vm1512_vm4, %v6384_v11  ;;  %14554 = vmatpush3.xpose.msk.msra.mxu0 %vm903_vm2, %v7281_v22 }
 0xad5   :  { %14519 = vmatpush3.xpose.msk.msra.mxu1 %vm903_vm2, %v7274_v45  ;;  %14520 = vmatprep.mubr.msk.f32.mxu1 %vm15153_vm1, %v18542_v20 }
 0xad6   :  { %v7169_v51 = vpop.permute.xlu1 %7168  ;;  %14528 = vmatprep.subr.mxu1 %v18542_v20  ;;  %14563 = vmatprep.subr.mxu0 %v18542_v20 }
 0xad7   :  { %v7185_v35 = vsel %vm798_vm3, %v7169_v51, 1.0 }
 0xad8   :  { %14521 = vmatmul.mubr.msk.f32.vlgmr.msra.gmra.mrb[96].mxu1 %vm903_vm2, %v7178_v40  ;;  %14556 = vmatmul.mubr.msk.f32.vlgmr.msra.gmra.mrb[102].mxu0 %vm903_vm2, %v7185_v35 }
 0xad9   :  { %14529 = vmatpush3.xpose.msk.msra.mxu1 %vm903_vm2, %v7276_v23  ;;  %14564 = vmatpush3.msra.mxu0 %v16014_v31  ;;  %v7182_v31 = vsel %vm798_vm3, %v7163_v3, 1.0 }
 0xada   :  { %14530 = vmatprep.mubr.msk.f32.mxu1 %vm15153_vm1, %v18542_v20  ;;  %14538 = vmatprep.subr.mxu1 %v18542_v20 }
 0xadb   :  { %14565 = vmatprep.mubr.msk.f32.mxu0 %vm15153_vm1, %v18542_v20  ;;  %14573 = vmatprep.subr.mxu0 %v18542_v20 }
 0xadc   :  { %14531 = vmatmul.mubr.msk.f32.vlgmr.msra.gmra.mrb[98].mxu1 %vm903_vm2, %v7180_v14 }
 0xadd   :  { %14539 = vmatpush3.xpose.msk.msra.mxu1 %vm903_vm2, %v7278_v6  ;;  %14540 = vmatprep.mubr.msk.f32.mxu1 %vm15153_vm1, %v18542_v20 }
 0xade   :  { %14548 = vmatprep.subr.mxu1 %v18542_v20 }
 0xae0   :  { %14541 = vmatmul.mubr.msk.f32.vlgmr.msra.gmra.mrb[100].mxu1 %vm903_vm2, %v7182_v31 }
 0xae1   :  { %14549 = vmatpush3.xpose.msk.msra.mxu1 %vm903_vm2, %v7280_v60  ;;  %14550 = vmatprep.mubr.msk.f32.mxu1 %vm15153_vm1, %v18542_v20 }
 0xae2   :  { %14558 = vmatprep.subr.mxu1 %v18542_v20 }
 0xae4   :  { %14551 = vmatmul.mubr.msk.f32.vlgmr.msra.gmra.mrb[102].mxu1 %vm903_vm2, %v7184_v27 }
 0xae5   :  { %14559 = vmatpush3.msra.mxu1 %v16016_v1  ;;  %14560 = vmatprep.mubr.msk.f32.mxu1 %vm15153_vm1, %v18542_v20 }
 0xae6   :  { %14568 = vmatprep.subr.mxu1 %v18542_v20 }
 0xb39   :  { %v6528_v0 = vpop.f32.mrb[88].mxu0 }
 0xb3a   :  { %v14487_v34 = vpop.f32.mrb[89].mxu0  ;;  %v6978_v24 = vrot.slane %v6528_v0, 7  ;;  %v7011_v56 = vrot.slane %v6528_v0, 1  ;;  %v7028_v44 = vrot.slane %v6528_v0, 2  ;;  %v7045_v63 = vrot.slane %v6528_v0, 3 }
 0xb3b   :  { %v7060_v26 = vrot.slane %v6528_v0, 4  ;;  %v7077_v13 = vrot.slane %v6528_v0, 5  ;;  %v7094_v42 = vrot.slane %v6528_v0, 6 }
 0xb62   :  { %v6455_v19 = vpop.f32.mrb[88].mxu1 }
 0xb63   :  { %v6993_v61 = vrot.slane %v6455_v19, 1  ;;  %v7010_v38 = vrot.slane %v6455_v19, 2  ;;  %v7027_v39 = vrot.slane %v6455_v19, 3  ;;  %v7044_v43 = vrot.slane %v6455_v19, 4  ;;  %v14482_v1 = vpop.f32.mrb[89].mxu1 }
 0xb64   :  { %v7059_v3 = vrot.slane %v6455_v19, 5  ;;  %v7076_v54 = vrot.slane %v6455_v19, 6  ;;  %v7093_v57 = vrot.slane %v6455_v19, 7  ;;  %v6979_v48 = vsel %vm2194_vm5, %v6978_v24, %v6455_v19 }
 0xb65   :  { %v6994_v49 = vsel %vm2194_vm5, %v6528_v0, %v6993_v61  ;;  %v7012_v30 = vsel %vm2194_vm5, %v7011_v56, %v7010_v38  ;;  %v7029_v33 = vsel %vm2194_vm5, %v7028_v44, %v7027_v39  ;;  %v7046_v55 = vsel %vm2194_vm5, %v7045_v63, %v7044_v43 }
 0xb66   :  { %v6601_v59 = vpop.f32.mrb[90].mxu1  ;;  %v7061_v11 = vsel %vm2194_vm5, %v7060_v26, %v7059_v3  ;;  %v7078_v22 = vsel %vm2194_vm5, %v7077_v13, %v7076_v54  ;;  %v7095_v45 = vsel %vm2194_vm5, %v7094_v42, %v7093_v57 }
 0xb67   :  { %v14492_v51 = vpop.f32.mrb[91].mxu1  ;;  %v6995_v40 = vrot.slane %v6601_v59, 7  ;;  %v7062_v35 = vrot.slane %v6601_v59, 3  ;;  %v7013_v23 = vsel %vm2197_vm6, %v6601_v59, %v7012_v30  ;;  %v7079_v14 = vrot.slane %v6601_v59, 4 }
 0xb68   :  { %v7096_v6 = vrot.slane %v6601_v59, 5  ;;  %v7030_v31 = vrot.slane %v6601_v59, 1  ;;  %v6980_v58 = vrot.slane %v6601_v59, 6  ;;  %v7047_v60 = vrot.slane %v6601_v59, 2 }
 0xb69   :  { %v6996_v27 = vsel %vm2197_vm6, %v6995_v40, %v6994_v49  ;;  %v7063_v0 = vsel %vm2197_vm6, %v7062_v35, %v7061_v11  ;;  %v7080_v34 = vsel %vm2197_vm6, %v7079_v14, %v7078_v22 }
 0xb6a   :  { %v6674_v24 = vpop.f32.mrb[90].mxu0  ;;  %v7097_v56 = vsel %vm2197_vm6, %v7096_v6, %v7095_v45  ;;  %v7031_v44 = vsel %vm2197_vm6, %v7030_v31, %v7029_v33  ;;  %v6981_v63 = vsel %vm2197_vm6, %v6980_v58, %v6979_v48  ;;  %v7048_v26 = vsel %vm2197_vm6, %v7047_v60, %v7046_v55 }
 0xb6b   :  { %v14497_v13 = vpop.f32.mrb[91].mxu0  ;;  %v6997_v42 = vrot.slane %v6674_v24, 6  ;;  %v7064_v19 = vrot.slane %v6674_v24, 2  ;;  %v7014_v61 = vrot.slane %v6674_v24, 7  ;;  %v7081_v38 = vrot.slane %v6674_v24, 3 }
 0xb6c   :  { %v7098_v39 = vrot.slane %v6674_v24, 4  ;;  %v7032_v43 = vsel %vm2200_vm7, %v6674_v24, %v7031_v44  ;;  %v6982_v1 = vrot.slane %v6674_v24, 5  ;;  %v7049_v3 = vrot.slane %v6674_v24, 1 }
 0xb6d   :  { %v6998_v54 = vsel %vm2200_vm7, %v6997_v42, %v6996_v27  ;;  %v7065_v57 = vsel %vm2200_vm7, %v7064_v19, %v7063_v0  ;;  %v7015_v49 = vsel %vm2200_vm7, %v7014_v61, %v7013_v23  ;;  %v7082_v48 = vsel %vm2200_vm7, %v7081_v38, %v7080_v34 }
 0xb6e   :  { %v6820_v30 = vpop.f32.mrb[92].mxu0  ;;  %v7099_v33 = vsel %vm2200_vm7, %v7098_v39, %v7097_v56  ;;  %v6983_v55 = vsel %vm2200_vm7, %v6982_v1, %v6981_v63  ;;  %v7050_v59 = vsel %vm2200_vm7, %v7049_v3, %v7048_v26 }
 0xb6f   :  { %v14507_v11 = vpop.f32.mrb[93].mxu0  ;;  %v7001_v23 = vrot.slane %v6820_v30, 4  ;;  %v7018_v58 = vrot.slane %v6820_v30, 5  ;;  %v7085_v60 = vrot.slane %v6820_v30, 1  ;;  %v7052_v27 = vrot.slane %v6820_v30, 7 }
 0xb70   :  { %v7102_v38 = vrot.slane %v6820_v30, 2  ;;  %v7035_v39 = vrot.slane %v6820_v30, 6  ;;  %v6986_v1 = vrot.slane %v6820_v30, 3 }
 0xb72   :  { %v6747_v22 = vpop.f32.mrb[92].mxu1 }
 0xb73   :  { %v14502_v45 = vpop.f32.mrb[93].mxu1  ;;  %v16976_v51 = vpop.f32.mrb[94].mxu0  ;;  %v6999_v40 = vrot.slane %v6747_v22, 5  ;;  %v7066_v35 = vrot.slane %v6747_v22, 1  ;;  %v7016_v14 = vrot.slane %v6747_v22, 6  ;;  %v7083_v6 = vrot.slane %v6747_v22, 2 }
 0xb74   :  { %v14517_v31 = vpop.f32.mrb[95].mxu0  ;;  %v7100_v42 = vrot.slane %v6747_v22, 3  ;;  %v7033_v19 = vrot.slane %v6747_v22, 7  ;;  %v6984_v61 = vrot.slane %v6747_v22, 4  ;;  %v7051_v3 = vsel %vm2203_vm8, %v6747_v22, %v7050_v59 }
 0xb75   :  { %v7000_v0 = vsel %vm2203_vm8, %v6999_v40, %v6998_v54  ;;  %v7067_v34 = vsel %vm2203_vm8, %v7066_v35, %v7065_v57  ;;  %v7017_v24 = vsel %vm2203_vm8, %v7016_v14, %v7015_v49  ;;  %v7084_v56 = vsel %vm2203_vm8, %v7083_v6, %v7082_v48 }
 0xb76   :  { %v7002_v44 = vsel %vm2206_vm9, %v7001_v23, %v7000_v0  ;;  %v7068_v63 = vsel %vm2206_vm9, %v6820_v30, %v7067_v34  ;;  %v7019_v26 = vsel %vm2206_vm9, %v7018_v58, %v7017_v24  ;;  %v7086_v13 = vsel %vm2206_vm9, %v7085_v60, %v7084_v56 }
 0xb77   :  { %v7101_v57 = vsel %vm2203_vm8, %v7100_v42, %v7099_v33  ;;  %v7034_v49 = vsel %vm2203_vm8, %v7033_v19, %v7032_v43  ;;  %v6985_v48 = vsel %vm2203_vm8, %v6984_v61, %v6983_v55  ;;  %v7053_v11 = vsel %vm2206_vm9, %v7052_v27, %v7051_v3 }
 0xb78   :  { %v7103_v35 = vsel %vm2206_vm9, %v7102_v38, %v7101_v57  ;;  %v7036_v30 = vsel %vm2206_vm9, %v7035_v39, %v7034_v49  ;;  %v6987_v59 = vsel %vm2206_vm9, %v6986_v1, %v6985_v48  ;;  %v17002_v43 = vadd.f32 %v15235_v16, %v16032_v10 }
 0xb79   :  { %v16987_v54 = vpop.f32.mrb[96].mxu0  ;;  %v8731_v55 = vadd.f32 %v16030_v29, %v15235_v16  ;;  %v7005_v58 = vrot.slane %v16976_v51, 2  ;;  %v7071_v60 = vrot.slane %v16976_v51, 6  ;;  %v7022_v0 = vrot.slane %v16976_v51, 3 }
 0xb7a   :  { %v14527_v45 = vpop.f32.mrb[97].mxu0  ;;  %v7893_v40 = vsel %vm1512_vm4, %v16987_v54, -inf  ;;  %v8778_v14 = vmul.f32 2.0, %v17002_v43  ;;  %v7088_v34 = vrot.slane %v16976_v51, 7  ;;  %v7039_v24 = vrot.slane %v16976_v51, 4 }
 0xb7b   :  { %7894 = vmax.xlane.f32.xlu1 %v7893_v40  ;;  %v8779_v6 = vmul.f32 2.0, %v8731_v55  ;;  %v6990_v56 = vrot.slane %v16976_v51, 1 }
 0xb7d   :  { %v16998_v22 = vpop.f32.mrb[98].mxu0 }
 0xb7e   :  { %v14537_v33 = vpop.f32.mrb[99].mxu0 }
 0xb8c   :  { %8810 = vrot.lane.b32.xlu1 %v8778_v14, %s15154_s19 }
 0xb90   :  { %8812 = vrot.lane.b32.xlu1 %v8779_v6, %s15154_s19 }
 0xb9f   :  { %v17009_v31 = vpop.f32.mrb[100].mxu0 }
 0xba0   :  { %v14547_v23 = vpop.f32.mrb[101].mxu0 }
 0xba7   :  { %v6893_v27 = vpop.f32.mrb[94].mxu1 }
 0xba8   :  { %v14512_v42 = vpop.f32.mrb[95].mxu1  ;;  %v7003_v19 = vrot.slane %v6893_v27, 3  ;;  %v7069_v61 = vrot.slane %v6893_v27, 7  ;;  %v7020_v38 = vrot.slane %v6893_v27, 4  ;;  %v7087_v39 = vsel %vm2209_vm10, %v6893_v27, %v7086_v13 }
 0xba9   :  { %v17019_v1 = vsel %vm2212_vm11, %v7088_v34, %v7087_v39  ;;  %v7104_v3 = vrot.slane %v6893_v27, 1  ;;  %v7037_v57 = vrot.slane %v6893_v27, 5  ;;  %v6988_v49 = vrot.slane %v6893_v27, 2 }
 0xbaa   :  { %18548 = vst [vmem:[#allocation42_spill] sm:$0xff] %v17019_v1  ;;  %v7004_v48 = vsel %vm2209_vm10, %v7003_v19, %v7002_v44  ;;  %v7070_v45 = vsel %vm2209_vm10, %v7069_v61, %v7068_v63  ;;  %v7021_v40 = vsel %vm2209_vm10, %v7020_v38, %v7019_v26  ;;  %v7054_v33 = vrot.slane %v6893_v27, 6 }
 0xbab   :  { %v17024_v14 = vpop.f32.mrb[96].mxu1  ;;  %v17026_v6 = vpop.f32.mrb[102].mxu0  ;;  %v17029_v23 = vsel %vm2212_vm11, %v7005_v58, %v7004_v48  ;;  %v17032_v13 = vsel %vm2212_vm11, %v7071_v60, %v7070_v45  ;;  %v17035_v34 = vsel %vm2212_vm11, %v7022_v0, %v7021_v40  ;;  %v7105_v44 = vsel %vm2209_vm10, %v7104_v3, %v7103_v35 }
 0xbac   :  { %18549 = vst [vmem:[#allocation43_spill] sm:$0xff] %v17035_v34  ;;  %v14522_v42 = vpop.f32.mrb[97].mxu1  ;;  %v14557_v63 = vpop.f32.mrb[103].mxu0  ;;  %v7890_v26 = vsel %vm1512_vm4, %v17024_v14, -inf  ;;  %v17042_v27 = vsel %vm2212_vm11, %v16976_v51, %v7105_v44  ;;  %v7038_v58 = vsel %vm2209_vm10, %v7037_v57, %v7036_v30  ;;  %v7056_v19 = vrot.slane %v16976_v51, 5 }
 0xbad   :  { %18550 = vst [vmem:[#allocation44_spill] sm:$0xff] %v17042_v27  ;;  %7891 = vmax.xlane.f32.xlu0 %v7890_v26  ;;  %v17047_v60 = vsel %vm2212_vm11, %v7039_v24, %v7038_v58  ;;  %v6989_v0 = vsel %vm2209_vm10, %v6988_v49, %v6987_v59  ;;  %v7055_v35 = vsel %vm2209_vm10, %v7054_v33, %v7053_v11  ;;  %v7899_v59 = vsel %vm1512_vm4, %v16998_v22, -inf }
 0xbae   :  { %18551 = vst [vmem:[#allocation45_spill] sm:$0xff] %v17047_v60  ;;  %v17052_v61 = vsel %vm2212_vm11, %v6990_v56, %v6989_v0  ;;  %v17055_v38 = vsel %vm2212_vm11, %v7056_v19, %v7055_v35  ;;  %v7905_v49 = vsel %vm1512_vm4, %v17009_v31, -inf  ;;  %v7911_v48 = vsel %vm1512_vm4, %v17026_v6, -inf  ;;  %v18554_v0 = vld [vmem:[#allocation18_spill] sm:$0xff] }
 0xbaf   :  { %18552 = vst [vmem:[#allocation46_spill] sm:$0xff] %v17052_v61  ;;  %18553 = vst [vmem:[#allocation47_spill] sm:$0xff] %v17055_v38  ;;  %v7506_v39 = vpop.f32.mrb[98].mxu1  ;;  %v8787_v45 = vmul.f32 %v8731_v55, %v8731_v55  ;;  %v17072_v44 = vadd.f32 %v15235_v16, %v16036_v47  ;;  %v8723_v42 = vadd.f32 %v16030_v29, %v15237_v17 }
 0xbb0   :  { %v14532_v3 = vpop.f32.mrb[99].mxu1  ;;  %v7896_v30 = vsel %vm1512_vm4, %v7506_v39, -inf  ;;  %v17078_v63 = vadd.f32 %v16034_v12, %v15235_v16  ;;  %v17088_v35 = vadd.f32 %v15235_v16, %v18554_v0 }
 0xbb1   :  { %7897 = vmax.xlane.f32.xlu0 %v7896_v30  ;;  %v8795_v40 = vsub.f32 0.0, %v8787_v45  ;;  %v8788_v55 = vmul.f32 %v17072_v44, %v17072_v44  ;;  %v8725_v3 = vadd.f32 %v16034_v12, %v15237_v17  ;;  %v18555_v30 = vld [vmem:[#allocation17_spill] sm:$0xff] }
 0xbb2   :  { %v8789_v26 = vmul.f32 %v17078_v63, %v17078_v63 }
 0xbb3   :  { %v7658_v51 = vpop.f32.mrb[100].mxu1  ;;  %v8796_v58 = vsub.f32 0.0, %v8788_v55 }
 0xbb4   :  { %v14542_v57 = vpop.f32.mrb[101].mxu1  ;;  %v7902_v24 = vsel %vm1512_vm4, %v7658_v51, -inf  ;;  %v8797_v19 = vsub.f32 0.0, %v8789_v26 }
 0xbb5   :  { %7903 = vmax.xlane.f32.xlu1 %v7902_v24  ;;  %7900 = vmax.xlane.f32.xlu0 %v7899_v59  ;;  %v17095_v57 = vadd.f32 %v18555_v30, %v15235_v16  ;;  %v8790_v24 = vmul.f32 %v17088_v35, %v17088_v35 }
 0xbb7   :  { %v17061_v11 = vpop.f32.mrb[102].mxu1 }
 0xbb8   :  { %v14552_v56 = vpop.f32.mrb[103].mxu1  ;;  %v7908_v33 = vsel %vm1512_vm4, %v17061_v11, -inf }
 0xbb9   :  { %7906 = vmax.xlane.f32.xlu0 %v7905_v49  ;;  %v8791_v56 = vmul.f32 %v17095_v57, %v17095_v57  ;;  %v8798_v49 = vsub.f32 0.0, %v8790_v24 }
 0xbbd   :  { %7912 = vmax.xlane.f32.xlu0 %v7911_v48 }
 0xbc6   :  { %8844 = vrot.lane.b32.xlu1 %v8795_v40, %s15152_s18  ;;  %v8799_v40 = vsub.f32 0.0, %v8791_v56 }
 0xbea   :  { %7909 = vmax.xlane.f32.xlu1 %v7908_v33 }
 0xbfb   :  { %8748 = vrot.lane.b32.xlu1 %v8723_v42, %s15152_s18 }
 0xbff   :  { %8846 = vrot.lane.b32.xlu1 %v8796_v58, %s15152_s18 }
 0xc03   :  { %8848 = vrot.lane.b32.xlu1 %v8797_v19, %s15152_s18 }
 0xc07   :  { %8752 = vrot.lane.b32.xlu1 %v8725_v3, %s15152_s18 }
 0xc08   :  { %v7895_v59 = vpop.xlane.xlu1 %7894 }
 0xc09   :  { %v7915_v48 = vsub.f32 %v16987_v54, %v7895_v59 }
 0xc0b   :  { %v7924_v45 = vmul.f32 1.442695, %v7915_v48  ;;  %8850 = vrot.lane.b32.xlu1 %v8798_v49, %s15152_s18 }
 0xc0c   :  { %v17109_v55 = vpop.permute.xlu1 %8810 }
 0xc0d   :  { %14984 = vpow2.f32 %v7924_v45 }
 0xc0f   :  { %8852 = vrot.lane.b32.xlu1 %v8799_v40, %s15152_s18 }
 0xc10   :  { %v17112_v54 = vpop.permute.xlu1 %8812 }
 0xc17   :  { %v17105_v33 = vpop.eup %14984 }
 0xc18   :  { %v7941_v42 = vsel %vm1512_vm4, %v17105_v33, 0.0 }
 0xc19   :  { %7942 = vadd.xlane.f32.xlu0 %v7941_v42 }
 0xc3a   :  { %v7892_v26 = vpop.xlane.xlu0 %7891 }
 0xc3b   :  { %v7914_v58 = vsub.f32 %v17024_v14, %v7892_v26 }
 0xc3d   :  { %v7922_v19 = vmul.f32 1.442695, %v7914_v58 }
 0xc3e   :  { %v7898_v3 = vpop.xlane.xlu0 %7897 }
 0xc3f   :  { %14986 = vpow2.f32 %v7922_v19  ;;  %v7916_v24 = vsub.f32 %v7506_v39, %v7898_v3 }
 0xc41   :  { %v7926_v59 = vmul.f32 1.442695, %v7916_v24 }
 0xc42   :  { %v7904_v56 = vpop.xlane.xlu1 %7903  ;;  %v7901_v49 = vpop.xlane.xlu0 %7900 }
 0xc43   :  { %14988 = vpow2.f32 %v7926_v59  ;;  %v7918_v48 = vsub.f32 %v7658_v51, %v7904_v56  ;;  %v7917_v45 = vsub.f32 %v16998_v22, %v7901_v49 }
 0xc45   :  { %v7930_v40 = vmul.f32 1.442695, %v7918_v48  ;;  %v7928_v42 = vmul.f32 1.442695, %v7917_v45  ;;  %v8786_v48 = vmul.f32 %v17002_v43, %v17002_v43  ;;  %v8781_v43 = vmul.f32 2.0, %v17078_v63 }
 0xc46   :  { %v7907_v38 = vpop.xlane.xlu0 %7906  ;;  %v8726_v63 = vadd.f32 %v15237_v17, %v18554_v0 }
 0xc47   :  { %14990 = vpow2.f32 %v7930_v40  ;;  %v7919_v61 = vsub.f32 %v17009_v31, %v7907_v38  ;;  %v8794_v45 = vsub.f32 0.0, %v8786_v48  ;;  %v17144_v40 = vpop.permute.xlu1 %8844 }
 0xc48   :  { %14992 = vpow2.f32 %v7928_v42  ;;  %v8722_v42 = vadd.f32 %v15237_v17, %v16032_v10 }
 0xc49   :  { %v17116_v14 = vpop.eup %14986  ;;  %v7932_v26 = vmul.f32 1.442695, %v7919_v61 }
 0xc4a   :  { %v7913_v58 = vpop.xlane.xlu0 %7912  ;;  %v7938_v39 = vsel %vm1512_vm4, %v17116_v14, 0.0 }
 0xc4b   :  { %14994 = vpow2.f32 %v7932_v26  ;;  %v7921_v19 = vsub.f32 %v17026_v6, %v7913_v58  ;;  %7939 = vadd.xlane.f32.xlu1 %v7938_v39  ;;  %v8780_v58 = vmul.f32 2.0, %v17072_v44  ;;  %v8783_v44 = vmul.f32 2.0, %v17095_v57 }
 0xc4c   :  { %v8727_v57 = vadd.f32 %v18555_v30, %v15237_v17 }
 0xc4d   :  { %v17121_v51 = vpop.eup %14988  ;;  %v7936_v22 = vmul.f32 1.442695, %v7921_v19 }
 0xc4e   :  { %v7944_v3 = vsel %vm1512_vm4, %v17121_v51, 0.0 }
 0xc4f   :  { %14996 = vpow2.f32 %v7936_v22  ;;  %7945 = vadd.xlane.f32.xlu1 %v7944_v3  ;;  %v8724_v22 = vadd.f32 %v15237_v17, %v16036_v47  ;;  %v8782_v3 = vmul.f32 2.0, %v17088_v35  ;;  %v18557_v35 = vld [vmem:[#allocation19_spill] sm:$0xff] }
 0xc51   :  { %v17125_v31 = vpop.eup %14990 }
 0xc52   :  { %v17127_v38 = vpop.eup %14992  ;;  %v7950_v61 = vsel %vm1512_vm4, %v17125_v31, 0.0 }
 0xc53   :  { %7951 = vadd.xlane.f32.xlu1 %v7950_v61  ;;  %v7947_v6 = vsel %vm1512_vm4, %v17127_v38, 0.0 }
 0xc54   :  { %7948 = vadd.xlane.f32.xlu0 %v7947_v6  ;;  %v18556_v6 = vld [vmem:[#allocation20_spill] sm:$0xff] }
 0xc55   :  { %v17133_v24 = vpop.eup %14994 }
 0xc56   :  { %v7953_v59 = vsel %vm1512_vm4, %v17133_v24, 0.0 }
 0xc58   :  { %7954 = vadd.xlane.f32.xlu0 %v7953_v59  ;;  %v8736_v59 = vadd.f32 %v15235_v16, %v18556_v6 }
 0xc59   :  { %v17137_v56 = vpop.eup %14996 }
 0xc5a   :  { %v7959_v49 = vsel %vm1512_vm4, %v17137_v56, 0.0  ;;  %v8784_v48 = vmul.f32 2.0, %v8736_v59 }
 0xc5c   :  { %7960 = vadd.xlane.f32.xlu0 %v7959_v49  ;;  %v8737_v49 = vadd.f32 %v18557_v35, %v15235_v16 }
 0xc72   :  { %8842 = vrot.lane.b32.xlu0 %v8794_v45, %s15152_s18  ;;  %v8785_v45 = vmul.f32 2.0, %v8737_v49 }
 0xc76   :  { %8746 = vrot.lane.b32.xlu0 %v8722_v42, %s15152_s18  ;;  %v8792_v42 = vmul.f32 %v8736_v59, %v8736_v59 }
 0xc77   :  { %v7910_v26 = vpop.xlane.xlu1 %7909 }
 0xc78   :  { %v7920_v39 = vsub.f32 %v17061_v11, %v7910_v26  ;;  %v8728_v26 = vadd.f32 %v15237_v17, %v18556_v6 }
 0xc7a   :  { %v7934_v19 = vmul.f32 1.442695, %v7920_v39  ;;  %8814 = vrot.lane.b32.xlu0 %v8780_v58, %s15154_s19  ;;  %v8793_v58 = vmul.f32 %v8737_v49, %v8737_v49  ;;  %v8800_v39 = vsub.f32 0.0, %v8792_v42 }
 0xc7c   :  { %14998 = vpow2.f32 %v7934_v19  ;;  %v8801_v19 = vsub.f32 0.0, %v8793_v58 }
 0xc7e   :  { %8816 = vrot.lane.b32.xlu0 %v8781_v43, %s15154_s19  ;;  %v8729_v43 = vadd.f32 %v18557_v35, %v15237_v17 }
 0xc82   :  { %8750 = vrot.lane.b32.xlu0 %v8724_v22, %s15152_s18 }
 0xc86   :  { %v17158_v61 = vpop.eup %14998  ;;  %8818 = vrot.lane.b32.xlu0 %v8782_v3, %s15154_s19 }
 0xc87   :  { %v7956_v11 = vsel %vm1512_vm4, %v17158_v61, 0.0 }
 0xc88   :  { %7957 = vadd.xlane.f32.xlu1 %v7956_v11 }
 0xc8a   :  { %8820 = vrot.lane.b32.xlu0 %v8783_v44, %s15154_s19  ;;  %v8749_v44 = vpop.permute.xlu1 %8748 }
 0xc8e   :  { %8754 = vrot.lane.b32.xlu0 %v8726_v63, %s15152_s18  ;;  %v17191_v63 = vpop.permute.xlu1 %8846 }
 0xc92   :  { %8822 = vrot.lane.b32.xlu0 %v8784_v48, %s15154_s19  ;;  %v8849_v59 = vpop.permute.xlu1 %8848 }
 0xc96   :  { %8824 = vrot.lane.b32.xlu0 %v8785_v45, %s15154_s19  ;;  %v17193_v49 = vpop.permute.xlu1 %8752 }
 0xc99   :  { %8756 = vrot.lane.b32.xlu1 %v8727_v57, %s15152_s18 }
 0xc9a   :  { %8758 = vrot.lane.b32.xlu0 %v8728_v26, %s15152_s18  ;;  %v17195_v48 = vpop.permute.xlu1 %8850 }
 0xc9d   :  { %8854 = vrot.lane.b32.xlu1 %v8800_v39, %s15152_s18 }
 0xc9e   :  { %v17197_v45 = vpop.permute.xlu1 %8852 }
 0xca1   :  { %8856 = vrot.lane.b32.xlu1 %v8801_v19, %s15152_s18 }
 0xca5   :  { %8760 = vrot.lane.b32.xlu1 %v8729_v43, %s15152_s18 }
 0xca6   :  { %v7943_v22 = vpop.xlane.xlu0 %7942 }
 0xca7   :  { %15000 = vrcp.f32 %v7943_v22 }
 0xcb1   :  { %v15001_v3 = vpop.eup %15000 }
 0xcb2   :  { %v7971_v11 = vmul.f32 %v15001_v3, %v17105_v33 }
 0xcb4   :  { %14566 = vmatmul.mubr.msk.f32.vlgmr.msra.gmra.mrb[104].mxu0 %vm1512_vm4, %v7971_v11 }
 0xcb5   :  { %14574 = vmatpush3.msra.mxu0 %v16018_v2  ;;  %14575 = vmatprep.mubr.msk.f32.mxu0 %vm15153_vm1, %v18542_v20 }
 0xcb6   :  { %14583 = vmatprep.subr.mxu0 %v18542_v20 }
 0xcd8   :  { %v7940_v33 = vpop.xlane.xlu1 %7939 }
 0xcd9   :  { %15002 = vrcp.f32 %v7940_v33 }
 0xcdc   :  { %v7946_v57 = vpop.xlane.xlu1 %7945 }
 0xcdd   :  { %15004 = vrcp.f32 %v7946_v57  ;;  %v8867_v57 = vsel %vm798_vm3, %v17112_v54, %v17144_v40  ;;  %v8773_v54 = vsel %vm798_vm3, %v17193_v49, 1.0 }
 0xce0   :  { %v7952_v2 = vpop.xlane.xlu1 %7951 }
 0xce1   :  { %15006 = vrcp.f32 %v7952_v2  ;;  %v7949_v42 = vpop.xlane.xlu0 %7948 }
 0xce2   :  { %15008 = vrcp.f32 %v7949_v42 }
 0xce3   :  { %v15003_v26 = vpop.eup %15002 }
 0xce4   :  { %v7970_v58 = vmul.f32 %v15003_v26, %v17116_v14 }
 0xce5   :  { %v7955_v39 = vpop.xlane.xlu0 %7954 }
 0xce6   :  { %15010 = vrcp.f32 %v7955_v39  ;;  %14561 = vmatmul.mubr.msk.f32.vlgmr.msra.gmra.mrb[104].mxu1 %vm1512_vm4, %v7970_v58 }
 0xce7   :  { %v15005_v19 = vpop.eup %15004  ;;  %14569 = vmatpush3.msra.mxu1 %v16020_v15  ;;  %14570 = vmatprep.mubr.msk.f32.mxu1 %vm15153_vm1, %v18542_v20 }
 0xce8   :  { %14578 = vmatprep.subr.mxu1 %v18542_v20  ;;  %v7972_v43 = vmul.f32 %v15005_v19, %v17121_v51 }
 0xce9   :  { %v7961_v22 = vpop.xlane.xlu0 %7960 }
 0xcea   :  { %15012 = vrcp.f32 %v7961_v22  ;;  %14571 = vmatmul.mubr.msk.f32.vlgmr.msra.gmra.mrb[106].mxu1 %vm1512_vm4, %v7972_v43 }
 0xceb   :  { %v15007_v3 = vpop.eup %15006  ;;  %14579 = vmatpush3.msra.mxu1 %v16024_v5  ;;  %14580 = vmatprep.mubr.msk.f32.mxu1 %vm15153_vm1, %v18542_v20 }
 0xcec   :  { %v15009_v14 = vpop.eup %15008  ;;  %14588 = vmatprep.subr.mxu1 %v18542_v20  ;;  %v7974_v15 = vmul.f32 %v15007_v3, %v17125_v31 }
 0xced   :  { %v8843_v11 = vpop.permute.xlu0 %8842  ;;  %v7973_v33 = vmul.f32 %v15009_v14, %v17127_v38 }
 0xcee   :  { %14581 = vmatmul.mubr.msk.f32.vlgmr.msra.gmra.mrb[108].mxu1 %vm1512_vm4, %v7974_v15  ;;  %v8866_v15 = vsel %vm798_vm3, %v17109_v55, %v8843_v11 }
 0xcef   :  { %14576 = vmatmul.mubr.msk.f32.vlgmr.msra.gmra.mrb[106].mxu0 %vm1512_vm4, %v7973_v33  ;;  %14589 = vmatpush3.msra.mxu1 %v16028_v9 }
 0xcf0   :  { %v15011_v51 = vpop.eup %15010  ;;  %14584 = vmatpush3.msra.mxu0 %v16022_v4  ;;  %14585 = vmatprep.mubr.msk.f32.mxu0 %vm15153_vm1, %v18542_v20 }
 0xcf1   :  { %v8747_v5 = vpop.permute.xlu0 %8746  ;;  %14593 = vmatprep.subr.mxu0 %v18542_v20  ;;  %v7975_v31 = vmul.f32 %v15011_v51, %v17133_v24  ;;  %14590 = vmatprep.mubr.msk.f32.mxu1 %vm15153_vm1, %v18542_v20 }
 0xcf2   :  { %14598 = vmatprep.subr.mxu1 %v18542_v20 }
 0xcf3   :  { %14586 = vmatmul.mubr.msk.f32.vlgmr.msra.gmra.mrb[108].mxu0 %vm1512_vm4, %v7975_v31 }
 0xcf4   :  { %v15013_v38 = vpop.eup %15012  ;;  %14594 = vmatpush3.msra.mxu0 %v16026_v7  ;;  %14595 = vmatprep.mubr.msk.f32.mxu0 %vm15153_vm1, %v18542_v20  ;;  %v8771_v7 = vsel %vm798_vm3, %v8749_v44, 1.0 }
 0xcf5   :  { %v8815_v4 = vpop.permute.xlu0 %8814  ;;  %v7977_v9 = vmul.f32 %v15013_v38, %v17137_v56  ;;  %14603 = vmatprep.subr.mxu0 %v18542_v20 }
 0xcf6   :  { %v8868_v55 = vsel %vm798_vm3, %v8815_v4, %v17191_v63 }
 0xcf7   :  { %14596 = vmatmul.mubr.msk.f32.vlgmr.msra.gmra.mrb[110].mxu0 %vm1512_vm4, %v7977_v9 }
 0xcf8   :  { %14605 = vmatprep.mubr.msk.f32.mxu0 %vm15153_vm1, %v18542_v20 }
 0xcf9   :  { %v8817_v24 = vpop.permute.xlu0 %8816 }
 0xcfa   :  { %v8869_v56 = vsel %vm798_vm3, %v8817_v24, %v8849_v59 }
 0xcfb   :  { %14604 = vmatpush3.xpose.msk.msra.mxu0 %vm903_vm2, %v8867_v57 }
 0xcfc   :  { %14613 = vmatprep.subr.mxu0 %v18542_v20 }
 0xcfd   :  { %v8751_v2 = vpop.permute.xlu0 %8750 }
 0xcfe   :  { %14606 = vmatmul.mubr.msk.f32.vlgmr.msra.gmra.mrb[112].mxu0 %vm903_vm2, %v8771_v7  ;;  %v8772_v11 = vsel %vm798_vm3, %v8751_v2, 1.0 }
 0xcff   :  { %14614 = vmatpush3.xpose.msk.msra.mxu0 %vm903_vm2, %v8869_v56  ;;  %14615 = vmatprep.mubr.msk.f32.mxu0 %vm15153_vm1, %v18542_v20 }
 0xd00   :  { %14623 = vmatprep.subr.mxu0 %v18542_v20 }
 0xd01   :  { %v8819_v40 = vpop.permute.xlu0 %8818 }
 0xd02   :  { %14616 = vmatmul.mubr.msk.f32.vlgmr.msra.gmra.mrb[114].mxu0 %vm903_vm2, %v8773_v54  ;;  %v8870_v63 = vsel %vm798_vm3, %v8819_v40, %v17195_v48 }
 0xd03   :  { %14625 = vmatprep.mubr.msk.f32.mxu0 %vm15153_vm1, %v18542_v20 }
 0xd05   :  { %v8821_v44 = vpop.permute.xlu0 %8820 }
 0xd06   :  { %v8871_v59 = vsel %vm798_vm3, %v8821_v44, %v17197_v45 }
 0xd07   :  { %14624 = vmatpush3.xpose.msk.msra.mxu0 %vm903_vm2, %v8871_v59 }
 0xd08   :  { %14633 = vmatprep.subr.mxu0 %v18542_v20 }
 0xd09   :  { %v8755_v42 = vpop.permute.xlu0 %8754 }
 0xd0d   :  { %v8823_v39 = vpop.permute.xlu0 %8822 }
 0xd11   :  { %v8825_v22 = vpop.permute.xlu0 %8824 }
 0xd15   :  { %v7958_v26 = vpop.xlane.xlu1 %7957 }
 0xd16   :  { %15014 = vrcp.f32 %v7958_v26 }
 0xd19   :  { %v8757_v58 = vpop.permute.xlu1 %8756 }
 0xd1a   :  { %v8775_v49 = vsel %vm798_vm3, %v8757_v58, 1.0 }
 0xd1b   :  { %14626 = vmatmul.mubr.msk.f32.vlgmr.msra.gmra.mrb[116].mxu0 %vm903_vm2, %v8775_v49 }
 0xd1c   :  { %14635 = vmatprep.mubr.msk.f32.mxu0 %vm15153_vm1, %v18542_v20 }
 0xd1d   :  { %v8855_v19 = vpop.permute.xlu1 %8854 }
 0xd1e   :  { %v8872_v31 = vsel %vm798_vm3, %v8823_v39, %v8855_v19 }
 0xd20   :  { %v15015_v43 = vpop.eup %15014 }
 0xd21   :  { %v8857_v45 = vpop.permute.xlu1 %8856  ;;  %v7976_v3 = vmul.f32 %v15015_v43, %v17158_v61  ;;  %v8770_v61 = vsel %vm798_vm3, %v8747_v5, 1.0  ;;  %v8759_v5 = vpop.permute.xlu0 %8758 }
 0xd22   :  { %v8873_v14 = vsel %vm798_vm3, %v8825_v22, %v8857_v45  ;;  %v8776_v48 = vsel %vm798_vm3, %v8759_v5, 1.0 }
 0xd23   :  { %14591 = vmatmul.mubr.msk.f32.vlgmr.msra.gmra.mrb[110].mxu1 %vm1512_vm4, %v7976_v3  ;;  %14634 = vmatpush3.xpose.msk.msra.mxu0 %vm903_vm2, %v8873_v14 }
 0xd24   :  { %14599 = vmatpush3.xpose.msk.msra.mxu1 %vm903_vm2, %v8866_v15  ;;  %14600 = vmatprep.mubr.msk.f32.mxu1 %vm15153_vm1, %v18542_v20 }
 0xd25   :  { %v8761_v33 = vpop.permute.xlu1 %8760  ;;  %14608 = vmatprep.subr.mxu1 %v18542_v20  ;;  %14643 = vmatprep.subr.mxu0 %v18542_v20 }
 0xd26   :  { %v8777_v51 = vsel %vm798_vm3, %v8761_v33, 1.0 }
 0xd27   :  { %14601 = vmatmul.mubr.msk.f32.vlgmr.msra.gmra.mrb[112].mxu1 %vm903_vm2, %v8770_v61  ;;  %14636 = vmatmul.mubr.msk.f32.vlgmr.msra.gmra.mrb[118].mxu0 %vm903_vm2, %v8777_v51 }
 0xd28   :  { %14609 = vmatpush3.xpose.msk.msra.mxu1 %vm903_vm2, %v8868_v55  ;;  %14644 = vmatpush3.msra.mxu0 %v16030_v29  ;;  %v8774_v29 = vsel %vm798_vm3, %v8755_v42, 1.0 }
 0xd29   :  { %14610 = vmatprep.mubr.msk.f32.mxu1 %vm15153_vm1, %v18542_v20  ;;  %14618 = vmatprep.subr.mxu1 %v18542_v20 }
 0xd2a   :  { %14645 = vmatprep.mubr.msk.f32.mxu0 %vm15153_vm1, %v18542_v20  ;;  %14653 = vmatprep.subr.mxu0 %v18542_v20 }
 0xd2b   :  { %14611 = vmatmul.mubr.msk.f32.vlgmr.msra.gmra.mrb[114].mxu1 %vm903_vm2, %v8772_v11 }
 0xd2c   :  { %14619 = vmatpush3.xpose.msk.msra.mxu1 %vm903_vm2, %v8870_v63  ;;  %14620 = vmatprep.mubr.msk.f32.mxu1 %vm15153_vm1, %v18542_v20 }
 0xd2d   :  { %14628 = vmatprep.subr.mxu1 %v18542_v20 }
 0xd2f   :  { %14621 = vmatmul.mubr.msk.f32.vlgmr.msra.gmra.mrb[116].mxu1 %vm903_vm2, %v8774_v29 }
 0xd30   :  { %14629 = vmatpush3.xpose.msk.msra.mxu1 %vm903_vm2, %v8872_v31  ;;  %14630 = vmatprep.mubr.msk.f32.mxu1 %vm15153_vm1, %v18542_v20 }
 0xd31   :  { %14638 = vmatprep.subr.mxu1 %v18542_v20 }
 0xd33   :  { %14631 = vmatmul.mubr.msk.f32.vlgmr.msra.gmra.mrb[118].mxu1 %vm903_vm2, %v8776_v48 }
 0xd34   :  { %14639 = vmatpush3.msra.mxu1 %v16032_v10  ;;  %14640 = vmatprep.mubr.msk.f32.mxu1 %vm15153_vm1, %v18542_v20 }
 0xd35   :  { %14648 = vmatprep.subr.mxu1 %v18542_v20 }
 0xd87   :  { %v8120_v38 = vpop.f32.mrb[104].mxu0 }
 0xd88   :  { %v14567_v4 = vpop.f32.mrb[105].mxu0  ;;  %v8570_v9 = vrot.slane %v8120_v38, 7  ;;  %v8603_v24 = vrot.slane %v8120_v38, 1  ;;  %v8620_v57 = vrot.slane %v8120_v38, 2  ;;  %v8637_v7 = vrot.slane %v8120_v38, 3 }
 0xd89   :  { %v8652_v2 = vrot.slane %v8120_v38, 4  ;;  %v8669_v56 = vrot.slane %v8120_v38, 5  ;;  %v8686_v54 = vrot.slane %v8120_v38, 6 }
 0xdb9   :  { %v8047_v40 = vpop.f32.mrb[104].mxu1 }
 0xdba   :  { %v8585_v44 = vrot.slane %v8047_v40, 1  ;;  %v8602_v59 = vrot.slane %v8047_v40, 2  ;;  %v8619_v42 = vrot.slane %v8047_v40, 3  ;;  %v8636_v26 = vrot.slane %v8047_v40, 4  ;;  %v14562_v10 = vpop.f32.mrb[105].mxu1 }
 0xdbb   :  { %v8651_v58 = vrot.slane %v8047_v40, 5  ;;  %v8668_v49 = vrot.slane %v8047_v40, 6  ;;  %v8685_v39 = vrot.slane %v8047_v40, 7  ;;  %v8571_v19 = vsel %vm2194_vm5, %v8570_v9, %v8047_v40 }
 0xdbc   :  { %v8586_v43 = vsel %vm2194_vm5, %v8120_v38, %v8585_v44  ;;  %v8604_v22 = vsel %vm2194_vm5, %v8603_v24, %v8602_v59  ;;  %v8621_v45 = vsel %vm2194_vm5, %v8620_v57, %v8619_v42  ;;  %v8638_v3 = vsel %vm2194_vm5, %v8637_v7, %v8636_v26 }
 0xdbd   :  { %v8193_v14 = vpop.f32.mrb[106].mxu1  ;;  %v8653_v15 = vsel %vm2194_vm5, %v8652_v2, %v8651_v58  ;;  %v8670_v33 = vsel %vm2194_vm5, %v8669_v56, %v8668_v49  ;;  %v8687_v61 = vsel %vm2194_vm5, %v8686_v54, %v8685_v39 }
 0xdbe   :  { %v14572_v51 = vpop.f32.mrb[107].mxu1  ;;  %v8587_v55 = vrot.slane %v8193_v14, 7  ;;  %v8654_v11 = vrot.slane %v8193_v14, 3  ;;  %v8605_v63 = vsel %vm2197_vm6, %v8193_v14, %v8604_v22  ;;  %v8671_v29 = vrot.slane %v8193_v14, 4 }
 0xdbf   :  { %v8688_v5 = vrot.slane %v8193_v14, 5  ;;  %v8622_v31 = vrot.slane %v8193_v14, 1  ;;  %v8572_v48 = vrot.slane %v8193_v14, 6  ;;  %v8639_v38 = vrot.slane %v8193_v14, 2 }
 0xdc0   :  { %v8588_v4 = vsel %vm2197_vm6, %v8587_v55, %v8586_v43  ;;  %v8655_v9 = vsel %vm2197_vm6, %v8654_v11, %v8653_v15  ;;  %v8672_v24 = vsel %vm2197_vm6, %v8671_v29, %v8670_v33 }
 0xdc1   :  { %v8339_v57 = vpop.f32.mrb[108].mxu1  ;;  %v8689_v7 = vsel %vm2197_vm6, %v8688_v5, %v8687_v61  ;;  %v8623_v2 = vsel %vm2197_vm6, %v8622_v31, %v8621_v45  ;;  %v8573_v56 = vsel %vm2197_vm6, %v8572_v48, %v8571_v19  ;;  %v8640_v54 = vsel %vm2197_vm6, %v8639_v38, %v8638_v3 }
 0xdc2   :  { %v8266_v40 = vpop.f32.mrb[106].mxu0  ;;  %v14582_v44 = vpop.f32.mrb[109].mxu1  ;;  %v8591_v59 = vrot.slane %v8339_v57, 5  ;;  %v8658_v42 = vrot.slane %v8339_v57, 1  ;;  %v8608_v26 = vrot.slane %v8339_v57, 6  ;;  %v8675_v10 = vrot.slane %v8339_v57, 2 }
 0xdc3   :  { %v14577_v58 = vpop.f32.mrb[107].mxu0  ;;  %v8589_v49 = vrot.slane %v8266_v40, 6  ;;  %v8656_v39 = vrot.slane %v8266_v40, 2  ;;  %v8606_v43 = vrot.slane %v8266_v40, 7  ;;  %v8673_v22 = vrot.slane %v8266_v40, 3 }
 0xdc4   :  { %v8690_v14 = vrot.slane %v8266_v40, 4  ;;  %v8692_v15 = vrot.slane %v8339_v57, 3  ;;  %v8624_v33 = vsel %vm2200_vm7, %v8266_v40, %v8623_v2  ;;  %v8625_v45 = vrot.slane %v8339_v57, 7 }
 0xdc5   :  { %v8590_v19 = vsel %vm2200_vm7, %v8589_v49, %v8588_v4  ;;  %v8657_v3 = vsel %vm2200_vm7, %v8656_v39, %v8655_v9  ;;  %v8607_v61 = vsel %vm2200_vm7, %v8606_v43, %v8605_v63  ;;  %v8674_v51 = vsel %vm2200_vm7, %v8673_v22, %v8672_v24 }
 0xdc6   :  { %v8412_v55 = vpop.f32.mrb[108].mxu0  ;;  %v8592_v11 = vsel %vm2203_vm8, %v8591_v59, %v8590_v19  ;;  %v8659_v29 = vsel %vm2203_vm8, %v8658_v42, %v8657_v3  ;;  %v8609_v5 = vsel %vm2203_vm8, %v8608_v26, %v8607_v61  ;;  %v8676_v31 = vsel %vm2203_vm8, %v8675_v10, %v8674_v51 }
 0xdc7   :  { %v14587_v48 = vpop.f32.mrb[109].mxu0  ;;  %v8593_v38 = vrot.slane %v8412_v55, 4  ;;  %v8660_v2 = vsel %vm2206_vm9, %v8412_v55, %v8659_v29  ;;  %v8610_v4 = vrot.slane %v8412_v55, 5  ;;  %v8677_v44 = vrot.slane %v8412_v55, 1 }
 0xdc8   :  { %v8691_v9 = vsel %vm2200_vm7, %v8690_v14, %v8689_v7  ;;  %v8694_v63 = vrot.slane %v8412_v55, 2  ;;  %v8626_v24 = vsel %vm2203_vm8, %v8625_v45, %v8624_v33  ;;  %v8627_v58 = vrot.slane %v8412_v55, 6 }
 0xdc9   :  { %v8594_v59 = vsel %vm2206_vm9, %v8593_v38, %v8592_v11  ;;  %v8611_v42 = vsel %vm2206_vm9, %v8610_v4, %v8609_v5  ;;  %v8678_v26 = vsel %vm2206_vm9, %v8677_v44, %v8676_v31  ;;  %v8693_v10 = vsel %vm2203_vm8, %v8692_v15, %v8691_v9 }
 0xdca   :  { %v17336_v49 = vpop.f32.mrb[110].mxu0  ;;  %v8695_v39 = vsel %vm2206_vm9, %v8694_v63, %v8693_v10  ;;  %v8628_v43 = vsel %vm2206_vm9, %v8627_v58, %v8626_v24  ;;  %v8574_v22 = vrot.slane %v8266_v40, 5  ;;  %v8576_v7 = vrot.slane %v8339_v57, 4 }
 0xdcb   :  { %v14597_v14 = vpop.f32.mrb[111].mxu0  ;;  %v8578_v45 = vrot.slane %v8412_v55, 3  ;;  %v8641_v3 = vrot.slane %v8266_v40, 1  ;;  %v8644_v61 = vrot.slane %v8412_v55, 7  ;;  %v18558_v40 = vld [vmem:[#allocation22_spill] sm:$0xff]  ;;  %v8597_v24 = vrot.slane %v17336_v49, 2 }
 0xdcc   :  { %v8575_v33 = vsel %vm2200_vm7, %v8574_v22, %v8573_v56  ;;  %v17354_v55 = vadd.f32 %v15235_v16, %v18558_v40  ;;  %v8663_v58 = vrot.slane %v17336_v49, 6  ;;  %v8614_v22 = vrot.slane %v17336_v49, 3 }
 0xdcd   :  { %v8577_v19 = vsel %vm2203_vm8, %v8576_v7, %v8575_v33  ;;  %v8642_v15 = vsel %vm2200_vm7, %v8641_v3, %v8640_v54  ;;  %v18559_v54 = vld [vmem:[#allocation21_spill] sm:$0xff]  ;;  %v8680_v7 = vrot.slane %v17336_v49, 7  ;;  %v8631_v14 = vrot.slane %v17336_v49, 4 }
 0xdce   :  { %v8579_v51 = vsel %vm2206_vm9, %v8578_v45, %v8577_v19  ;;  %v8643_v11 = vsel %vm2203_vm8, %v8339_v57, %v8642_v15  ;;  %v10323_v4 = vadd.f32 %v18559_v54, %v15235_v16  ;;  %v10370_v57 = vmul.f32 2.0, %v17354_v55 }
 0xdcf   :  { %v8645_v5 = vsel %vm2206_vm9, %v8644_v61, %v8643_v11  ;;  %v8582_v33 = vrot.slane %v17336_v49, 1 }
 0xdd0   :  { %v10371_v44 = vmul.f32 2.0, %v10323_v4 }
 0xdd1   :  { %v17345_v29 = vpop.f32.mrb[112].mxu0 }
 0xdd2   :  { %v14607_v31 = vpop.f32.mrb[113].mxu0  ;;  %v9485_v48 = vsel %vm1512_vm4, %v17345_v29, -inf }
 0xdd3   :  { %9486 = vmax.xlane.f32.xlu1 %v9485_v48 }
 0xdd5   :  { %v17350_v56 = vpop.f32.mrb[114].mxu0 }
 0xdd6   :  { %v14617_v38 = vpop.f32.mrb[115].mxu0 }
 0xde4   :  { %10402 = vrot.lane.b32.xlu1 %v10370_v57, %s15154_s19 }
 0xde8   :  { %10404 = vrot.lane.b32.xlu1 %v10371_v44, %s15154_s19 }
 0xdee   :  { %v17361_v9 = vpop.f32.mrb[116].mxu0 }
 0xdef   :  { %v14627_v63 = vpop.f32.mrb[117].mxu0 }
 0xdf6   :  { %v8485_v10 = vpop.f32.mrb[110].mxu1 }
 0xdf7   :  { %v14592_v45 = vpop.f32.mrb[111].mxu1  ;;  %v8595_v19 = vrot.slane %v8485_v10, 3  ;;  %v8661_v3 = vrot.slane %v8485_v10, 7  ;;  %v8612_v61 = vrot.slane %v8485_v10, 4  ;;  %v8679_v15 = vsel %vm2209_vm10, %v8485_v10, %v8678_v26 }
 0xdf8   :  { %v17371_v11 = vsel %vm2212_vm11, %v8680_v7, %v8679_v15  ;;  %v8696_v31 = vrot.slane %v8485_v10, 1  ;;  %v8629_v48 = vrot.slane %v8485_v10, 5  ;;  %v8580_v38 = vrot.slane %v8485_v10, 2 }
 0xdf9   :  { %18560 = vst [vmem:[#allocation18_spill] sm:$0xff] %v17371_v11  ;;  %v8596_v57 = vsel %vm2209_vm10, %v8595_v19, %v8594_v59  ;;  %v8662_v44 = vsel %vm2209_vm10, %v8661_v3, %v8660_v2  ;;  %v8613_v63 = vsel %vm2209_vm10, %v8612_v61, %v8611_v42  ;;  %v8646_v36 = vrot.slane %v8485_v10, 6 }
 0xdfa   :  { %v17376_v25 = vpop.f32.mrb[112].mxu1  ;;  %v17378_v45 = vpop.f32.mrb[118].mxu0  ;;  %v17381_v60 = vsel %vm2212_vm11, %v8597_v24, %v8596_v57  ;;  %v17384_v26 = vsel %vm2212_vm11, %v8663_v58, %v8662_v44  ;;  %v17387_v7 = vsel %vm2212_vm11, %v8614_v22, %v8613_v63  ;;  %v8697_v59 = vsel %vm2209_vm10, %v8696_v31, %v8695_v39 }
 0xdfb   :  { %18561 = vst [vmem:[#allocation17_spill] sm:$0xff] %v17384_v26  ;;  %18562 = vst [vmem:[#allocation20_spill] sm:$0xff] %v17387_v7  ;;  %v14602_v19 = vpop.f32.mrb[113].mxu1  ;;  %v14637_v2 = vpop.f32.mrb[119].mxu0  ;;  %v9482_v42 = vsel %vm1512_vm4, %v17376_v25, -inf  ;;  %v17394_v10 = vsel %vm2212_vm11, %v17336_v49, %v8697_v59  ;;  %v8630_v24 = vsel %vm2209_vm10, %v8629_v48, %v8628_v43  ;;  %v8648_v3 = vrot.slane %v17336_v49, 5 }
 0xdfc   :  { %18563 = vst [vmem:[#allocation19_spill] sm:$0xff] %v17394_v10  ;;  %9483 = vmax.xlane.f32.xlu0 %v9482_v42  ;;  %v17399_v58 = vsel %vm2212_vm11, %v8631_v14, %v8630_v24  ;;  %v8581_v22 = vsel %vm2209_vm10, %v8580_v38, %v8579_v51  ;;  %v8647_v39 = vsel %vm2209_vm10, %v8646_v36, %v8645_v5  ;;  %v9491_v14 = vsel %vm1512_vm4, %v17350_v56, -inf  ;;  %v18567_v19 = vld [vmem:[#allocation24_spill] sm:$0xff]  ;;  %v18568_v24 = vld [vmem:[#allocation23_spill] sm:$0xff] }
 0xdfd   :  { %18564 = vst [vmem:[#allocation22_spill] sm:$0xff] %v17399_v58  ;;  %v17404_v61 = vsel %vm2212_vm11, %v8582_v33, %v8581_v22  ;;  %v17407_v15 = vsel %vm2212_vm11, %v8648_v3, %v8647_v39  ;;  %v9497_v5 = vsel %vm1512_vm4, %v17361_v9, -inf  ;;  %v9503_v38 = vsel %vm1512_vm4, %v17378_v45, -inf }
 0xdfe   :  { %18565 = vst [vmem:[#allocation21_spill] sm:$0xff] %v17404_v61  ;;  %18566 = vst [vmem:[#allocation48_spill] sm:$0xff] %v17407_v15  ;;  %v9098_v31 = vpop.f32.mrb[114].mxu1  ;;  %v10379_v44 = vmul.f32 %v10323_v4, %v10323_v4  ;;  %v17427_v2 = vadd.f32 %v15235_v16, %v18567_v19  ;;  %v10315_v42 = vadd.f32 %v18559_v54, %v15237_v17 }
 0xdff   :  { %v14612_v57 = vpop.f32.mrb[115].mxu1  ;;  %v9488_v43 = vsel %vm1512_vm4, %v9098_v31, -inf  ;;  %v17433_v3 = vadd.f32 %v18568_v24, %v15235_v16 }
 0xe00   :  { %9489 = vmax.xlane.f32.xlu0 %v9488_v43  ;;  %v10387_v63 = vsub.f32 0.0, %v10379_v44  ;;  %v10380_v4 = vmul.f32 %v17427_v2, %v17427_v2  ;;  %v18569_v43 = vld [vmem:[#allocation26_spill] sm:$0xff] }
 0xe01   :  { %v10381_v22 = vmul.f32 %v17433_v3, %v17433_v3 }
 0xe02   :  { %v17410_v49 = vpop.f32.mrb[116].mxu1  ;;  %v10388_v39 = vsub.f32 0.0, %v10380_v4 }
 0xe03   :  { %v14622_v48 = vpop.f32.mrb[117].mxu1  ;;  %v9494_v33 = vsel %vm1512_vm4, %v17410_v49, -inf  ;;  %v10389_v57 = vsub.f32 0.0, %v10381_v22 }
 0xe04   :  { %9492 = vmax.xlane.f32.xlu0 %v9491_v14  ;;  %v17443_v48 = vadd.f32 %v15235_v16, %v18569_v43  ;;  %v10317_v14 = vadd.f32 %v18568_v24, %v15237_v17 }
 0xe06   :  { %v17414_v51 = vpop.f32.mrb[118].mxu1 }
 0xe07   :  { %v14632_v36 = vpop.f32.mrb[119].mxu1  ;;  %v9500_v59 = vsel %vm1512_vm4, %v17414_v51, -inf }
 0xe08   :  { %9498 = vmax.xlane.f32.xlu0 %v9497_v5  ;;  %v18570_v36 = vld [vmem:[#allocation25_spill] sm:$0xff] }
 0xe09   :  { %v17450_v5 = vadd.f32 %v18570_v36, %v15235_v16 }
 0xe0c   :  { %9495 = vmax.xlane.f32.xlu1 %v9494_v33  ;;  %9504 = vmax.xlane.f32.xlu0 %v9503_v38  ;;  %v10382_v33 = vmul.f32 %v17443_v48, %v17443_v48  ;;  %v10383_v38 = vmul.f32 %v17450_v5, %v17450_v5 }
 0xe0e   :  { %v10390_v44 = vsub.f32 0.0, %v10382_v33  ;;  %v10391_v4 = vsub.f32 0.0, %v10383_v38 }
 0xe1d   :  { %10436 = vrot.lane.b32.xlu1 %v10387_v63, %s15152_s18 }
 0xe41   :  { %9501 = vmax.xlane.f32.xlu1 %v9500_v59 }
 0xe52   :  { %10340 = vrot.lane.b32.xlu1 %v10315_v42, %s15152_s18 }
 0xe56   :  { %10438 = vrot.lane.b32.xlu1 %v10388_v39, %s15152_s18 }
 0xe5a   :  { %10440 = vrot.lane.b32.xlu1 %v10389_v57, %s15152_s18 }
 0xe5e   :  { %10344 = vrot.lane.b32.xlu1 %v10317_v14, %s15152_s18 }
 0xe60   :  { %v9487_v63 = vpop.xlane.xlu1 %9486 }
 0xe61   :  { %v9507_v59 = vsub.f32 %v17345_v29, %v9487_v63 }
 0xe62   :  { %10442 = vrot.lane.b32.xlu1 %v10390_v44, %s15152_s18 }
 0xe63   :  { %v9516_v42 = vmul.f32 1.442695, %v9507_v59 }
 0xe64   :  { %v17465_v63 = vpop.permute.xlu1 %10402 }
 0xe65   :  { %15016 = vpow2.f32 %v9516_v42 }
 0xe66   :  { %10444 = vrot.lane.b32.xlu1 %v10391_v4, %s15152_s18 }
 0xe68   :  { %v17468_v4 = vpop.permute.xlu1 %10404 }
 0xe6f   :  { %v17460_v22 = vpop.eup %15016 }
 0xe70   :  { %v9533_v39 = vsel %vm1512_vm4, %v17460_v22, 0.0 }
 0xe71   :  { %9534 = vadd.xlane.f32.xlu0 %v9533_v39 }
 0xe89   :  { %v9484_v57 = vpop.xlane.xlu0 %9483 }
 0xe8a   :  { %v9506_v14 = vsub.f32 %v17376_v25, %v9484_v57 }
 0xe8c   :  { %v9514_v33 = vmul.f32 1.442695, %v9506_v14 }
 0xe8d   :  { %v9490_v15 = vpop.xlane.xlu0 %9489 }
 0xe8e   :  { %15018 = vpow2.f32 %v9514_v33  ;;  %v9508_v29 = vsub.f32 %v9098_v31, %v9490_v15 }
 0xe90   :  { %v9518_v44 = vmul.f32 1.442695, %v9508_v29 }
 0xe91   :  { %v9493_v38 = vpop.xlane.xlu0 %9492 }
 0xe92   :  { %15020 = vpow2.f32 %v9518_v44  ;;  %v9509_v59 = vsub.f32 %v17350_v56, %v9493_v38 }
 0xe94   :  { %v9520_v42 = vmul.f32 1.442695, %v9509_v59 }
 0xe95   :  { %v9499_v61 = vpop.xlane.xlu0 %9498 }
 0xe96   :  { %15022 = vpow2.f32 %v9520_v42  ;;  %v9511_v39 = vsub.f32 %v17361_v9, %v9499_v61 }
 0xe98   :  { %v17471_v58 = vpop.eup %15018  ;;  %v9524_v25 = vmul.f32 1.442695, %v9511_v39 }
 0xe99   :  { %v9496_v57 = vpop.xlane.xlu1 %9495  ;;  %v9505_v14 = vpop.xlane.xlu0 %9504  ;;  %v9530_v15 = vsel %vm1512_vm4, %v17471_v58, 0.0 }
 0xe9a   :  { %15024 = vpow2.f32 %v9524_v25  ;;  %v9510_v31 = vsub.f32 %v17410_v49, %v9496_v57  ;;  %v9513_v56 = vsub.f32 %v17378_v45, %v9505_v14  ;;  %9531 = vadd.xlane.f32.xlu1 %v9530_v15  ;;  %v10378_v57 = vmul.f32 %v17354_v55, %v17354_v55 }
 0xe9b   :  { %v10314_v15 = vadd.f32 %v15237_v17, %v18558_v40  ;;  %v10316_v55 = vadd.f32 %v15237_v17, %v18567_v19 }
 0xe9c   :  { %v17477_v33 = vpop.eup %15020  ;;  %v9522_v29 = vmul.f32 1.442695, %v9510_v31  ;;  %v9528_v44 = vmul.f32 1.442695, %v9513_v56  ;;  %v10386_v14 = vsub.f32 0.0, %v10378_v57  ;;  %v10372_v31 = vmul.f32 2.0, %v17427_v2 }
 0xe9d   :  { %v9536_v9 = vsel %vm1512_vm4, %v17477_v33, 0.0  ;;  %v17505_v56 = vpop.permute.xlu1 %10436  ;;  %v10375_v2 = vmul.f32 2.0, %v17450_v5 }
 0xe9e   :  { %15026 = vpow2.f32 %v9522_v29  ;;  %9537 = vadd.xlane.f32.xlu1 %v9536_v9  ;;  %v10373_v29 = vmul.f32 2.0, %v17433_v3  ;;  %v10318_v3 = vadd.f32 %v15237_v17, %v18569_v43 }
 0xe9f   :  { %15028 = vpow2.f32 %v9528_v44 }
 0xea0   :  { %v17481_v61 = vpop.eup %15022 }
 0xea1   :  { %v9539_v38 = vsel %vm1512_vm4, %v17481_v61, 0.0 }
 0xea2   :  { %9540 = vadd.xlane.f32.xlu0 %v9539_v38 }
 0xea4   :  { %v17485_v49 = vpop.eup %15024 }
 0xea5   :  { %v9545_v45 = vsel %vm1512_vm4, %v17485_v49, 0.0 }
 0xea6   :  { %9546 = vadd.xlane.f32.xlu0 %v9545_v45  ;;  %v10374_v45 = vmul.f32 2.0, %v17443_v48  ;;  %v18572_v48 = vld [vmem:[#allocation27_spill] sm:$0xff] }
 0xea8   :  { %v17489_v59 = vpop.eup %15026 }
 0xea9   :  { %v17491_v42 = vpop.eup %15028  ;;  %v9542_v39 = vsel %vm1512_vm4, %v17489_v59, 0.0 }
 0xeaa   :  { %9543 = vadd.xlane.f32.xlu1 %v9542_v39  ;;  %v9551_v25 = vsel %vm1512_vm4, %v17491_v42, 0.0  ;;  %v18571_v39 = vld [vmem:[#allocation28_spill] sm:$0xff] }
 0xeab   :  { %9552 = vadd.xlane.f32.xlu0 %v9551_v25  ;;  %v10328_v25 = vadd.f32 %v15235_v16, %v18571_v39 }
 0xec1   :  { %10434 = vrot.lane.b32.xlu0 %v10386_v14, %s15152_s18  ;;  %v10329_v14 = vadd.f32 %v18572_v48, %v15235_v16 }
 0xec3   :  { %v10377_v5 = vmul.f32 2.0, %v10329_v14 }
 0xec5   :  { %10338 = vrot.lane.b32.xlu0 %v10314_v15, %s15152_s18  ;;  %v10376_v15 = vmul.f32 2.0, %v10328_v25 }
 0xec9   :  { %10406 = vrot.lane.b32.xlu0 %v10372_v31, %s15154_s19  ;;  %v10320_v31 = vadd.f32 %v15237_v17, %v18571_v39 }
 0xecd   :  { %10408 = vrot.lane.b32.xlu0 %v10373_v29, %s15154_s19  ;;  %v10319_v29 = vadd.f32 %v18570_v36, %v15237_v17 }
 0xece   :  { %v9502_v44 = vpop.xlane.xlu1 %9501 }
 0xecf   :  { %v9512_v9 = vsub.f32 %v17414_v51, %v9502_v44  ;;  %v10384_v44 = vmul.f32 %v10328_v25, %v10328_v25 }
 0xed1   :  { %v9526_v38 = vmul.f32 1.442695, %v9512_v9  ;;  %10342 = vrot.lane.b32.xlu0 %v10316_v55, %s15152_s18  ;;  %v10385_v55 = vmul.f32 %v10329_v14, %v10329_v14  ;;  %v10392_v9 = vsub.f32 0.0, %v10384_v44 }
 0xed3   :  { %15030 = vpow2.f32 %v9526_v38  ;;  %v10393_v38 = vsub.f32 0.0, %v10385_v55 }
 0xed5   :  { %10410 = vrot.lane.b32.xlu0 %v10374_v45, %s15154_s19  ;;  %v10321_v45 = vadd.f32 %v18572_v48, %v15237_v17 }
 0xed9   :  { %10412 = vrot.lane.b32.xlu0 %v10375_v2, %s15154_s19 }
 0xedd   :  { %v17521_v57 = vpop.eup %15030  ;;  %10346 = vrot.lane.b32.xlu0 %v10318_v3, %s15152_s18  ;;  %v17541_v3 = vpop.permute.xlu1 %10340 }
 0xede   :  { %v9548_v51 = vsel %vm1512_vm4, %v17521_v57, 0.0 }
 0xedf   :  { %9549 = vadd.xlane.f32.xlu1 %v9548_v51 }
 0xee1   :  { %10414 = vrot.lane.b32.xlu0 %v10376_v15, %s15154_s19  ;;  %v17544_v15 = vpop.permute.xlu1 %10438 }
 0xee5   :  { %10416 = vrot.lane.b32.xlu0 %v10377_v5, %s15154_s19  ;;  %v10441_v14 = vpop.permute.xlu1 %10440 }
 0xee9   :  { %10350 = vrot.lane.b32.xlu0 %v10320_v31, %s15152_s18  ;;  %v17551_v5 = vpop.permute.xlu1 %10344 }
 0xeed   :  { %v17553_v31 = vpop.permute.xlu1 %10442 }
 0xef0   :  { %10348 = vrot.lane.b32.xlu1 %v10319_v29, %s15152_s18 }
 0xef1   :  { %v17555_v29 = vpop.permute.xlu1 %10444 }
 0xef4   :  { %10446 = vrot.lane.b32.xlu1 %v10392_v9, %s15152_s18 }
 0xef8   :  { %10448 = vrot.lane.b32.xlu1 %v10393_v38, %s15152_s18 }
 0xefc   :  { %10352 = vrot.lane.b32.xlu1 %v10321_v45, %s15152_s18 }
 0xefe   :  { %v9535_v2 = vpop.xlane.xlu0 %9534 }
 0xeff   :  { %15032 = vrcp.f32 %v9535_v2 }
 0xf09   :  { %v15033_v51 = vpop.eup %15032 }
 0xf0a   :  { %v9563_v25 = vmul.f32 %v15033_v51, %v17460_v22 }
 0xf0c   :  { %14646 = vmatmul.mubr.msk.f32.vlgmr.msra.gmra.mrb[120].mxu0 %vm1512_vm4, %v9563_v25 }
 0xf0d   :  { %14654 = vmatpush3.msra.mxu0 %v16034_v12  ;;  %14655 = vmatprep.mubr.msk.f32.mxu0 %vm15153_vm1, %v18542_v20 }
 0xf0e   :  { %14663 = vmatprep.subr.mxu0 %v18542_v20 }
 0xf27   :  { %v9532_v44 = vpop.xlane.xlu1 %9531 }
 0xf28   :  { %15034 = vrcp.f32 %v9532_v44 }
 0xf2b   :  { %v9538_v22 = vpop.xlane.xlu1 %9537 }
 0xf2c   :  { %15036 = vrcp.f32 %v9538_v22 }
 0xf2f   :  { %v9541_v55 = vpop.xlane.xlu0 %9540 }
 0xf30   :  { %15038 = vrcp.f32 %v9541_v55 }
 0xf32   :  { %v15035_v9 = vpop.eup %15034 }
 0xf33   :  { %v9547_v12 = vpop.xlane.xlu0 %9546  ;;  %v9562_v38 = vmul.f32 %v15035_v9, %v17471_v58 }
 0xf34   :  { %15040 = vrcp.f32 %v9547_v12 }
 0xf35   :  { %14641 = vmatmul.mubr.msk.f32.vlgmr.msra.gmra.mrb[120].mxu1 %vm1512_vm4, %v9562_v38 }
 0xf36   :  { %v15037_v45 = vpop.eup %15036  ;;  %14649 = vmatpush3.msra.mxu1 %v16036_v47  ;;  %14650 = vmatprep.mubr.msk.f32.mxu1 %vm15153_vm1, %v18542_v20 }
 0xf37   :  { %v9544_v2 = vpop.xlane.xlu1 %9543  ;;  %14658 = vmatprep.subr.mxu1 %v18542_v20  ;;  %v9564_v51 = vmul.f32 %v15037_v45, %v17477_v33 }
 0xf38   :  { %15042 = vrcp.f32 %v9544_v2  ;;  %v9553_v25 = vpop.xlane.xlu0 %9552 }
 0xf39   :  { %15044 = vrcp.f32 %v9553_v25  ;;  %14651 = vmatmul.mubr.msk.f32.vlgmr.msra.gmra.mrb[122].mxu1 %vm1512_vm4, %v9564_v51 }
 0xf3a   :  { %v15039_v58 = vpop.eup %15038  ;;  %14659 = vmatpush3.msra.mxu1 %v18554_v0  ;;  %14660 = vmatprep.mubr.msk.f32.mxu1 %vm15153_vm1, %v18542_v20 }
 0xf3b   :  { %v9565_v47 = vmul.f32 %v15039_v58, %v17481_v61  ;;  %14668 = vmatprep.subr.mxu1 %v18542_v20 }
 0xf3c   :  { %v10435_v44 = vpop.permute.xlu0 %10434 }
 0xf3d   :  { %14656 = vmatmul.mubr.msk.f32.vlgmr.msra.gmra.mrb[122].mxu0 %vm1512_vm4, %v9565_v47 }
 0xf3e   :  { %v15041_v22 = vpop.eup %15040  ;;  %14664 = vmatpush3.msra.mxu0 %v18555_v30  ;;  %14665 = vmatprep.mubr.msk.f32.mxu0 %vm15153_vm1, %v18542_v20 }
 0xf3f   :  { %14673 = vmatprep.subr.mxu0 %v18542_v20  ;;  %v9567_v0 = vmul.f32 %v15041_v22, %v17485_v49 }
 0xf40   :  { %v10339_v33 = vpop.permute.xlu0 %10338 }
 0xf41   :  { %14666 = vmatmul.mubr.msk.f32.vlgmr.msra.gmra.mrb[124].mxu0 %vm1512_vm4, %v9567_v0 }
 0xf42   :  { %v15043_v55 = vpop.eup %15042  ;;  %14674 = vmatpush3.msra.mxu0 %v18557_v35  ;;  %14675 = vmatprep.mubr.msk.f32.mxu0 %vm15153_vm1, %v18542_v20  ;;  %v10459_v35 = vsel %vm798_vm3, %v17468_v4, %v17505_v56  ;;  %v10365_v4 = vsel %vm798_vm3, %v17551_v5, 1.0 }
 0xf43   :  { %v15045_v61 = vpop.eup %15044  ;;  %v9566_v9 = vmul.f32 %v15043_v55, %v17489_v59  ;;  %14683 = vmatprep.subr.mxu0 %v18542_v20  ;;  %v10458_v55 = vsel %vm798_vm3, %v17465_v63, %v10435_v44 }
 0xf44   :  { %v10407_v30 = vpop.permute.xlu0 %10406  ;;  %v9569_v12 = vmul.f32 %v15045_v61, %v17491_v42 }
 0xf45   :  { %14661 = vmatmul.mubr.msk.f32.vlgmr.msra.gmra.mrb[124].mxu1 %vm1512_vm4, %v9566_v9  ;;  %v10460_v63 = vsel %vm798_vm3, %v10407_v30, %v17544_v15 }
 0xf46   :  { %14669 = vmatpush3.msra.mxu1 %v18556_v6  ;;  %14676 = vmatmul.mubr.msk.f32.vlgmr.msra.gmra.mrb[126].mxu0 %vm1512_vm4, %v9569_v12  ;;  %v10363_v6 = vsel %vm798_vm3, %v17541_v3, 1.0 }
 0xf47   :  { %14685 = vmatprep.mubr.msk.f32.mxu0 %vm15153_vm1, %v18542_v20  ;;  %14670 = vmatprep.mubr.msk.f32.mxu1 %vm15153_vm1, %v18542_v20 }
 0xf48   :  { %v10409_v49 = vpop.permute.xlu0 %10408  ;;  %14678 = vmatprep.subr.mxu1 %v18542_v20 }
 0xf49   :  { %14684 = vmatpush3.xpose.msk.msra.mxu0 %vm903_vm2, %v10459_v35  ;;  %v10461_v59 = vsel %vm798_vm3, %v10409_v49, %v10441_v14 }
 0xf4a   :  { %14693 = vmatprep.subr.mxu0 %v18542_v20 }
 0xf4c   :  { %14686 = vmatmul.mubr.msk.f32.vlgmr.msra.gmra.mrb[128].mxu0 %vm903_vm2, %v10363_v6  ;;  %v10343_v42 = vpop.permute.xlu0 %10342 }
 0xf4d   :  { %14694 = vmatpush3.xpose.msk.msra.mxu0 %vm903_vm2, %v10461_v59  ;;  %14695 = vmatprep.mubr.msk.f32.mxu0 %vm15153_vm1, %v18542_v20  ;;  %v10364_v44 = vsel %vm798_vm3, %v10343_v42, 1.0 }
 0xf4e   :  { %14703 = vmatprep.subr.mxu0 %v18542_v20 }
 0xf50   :  { %14696 = vmatmul.mubr.msk.f32.vlgmr.msra.gmra.mrb[130].mxu0 %vm903_vm2, %v10365_v4  ;;  %v10411_v56 = vpop.permute.xlu0 %10410 }
 0xf51   :  { %14705 = vmatprep.mubr.msk.f32.mxu0 %vm15153_vm1, %v18542_v20  ;;  %v10462_v15 = vsel %vm798_vm3, %v10411_v56, %v17553_v31 }
 0xf54   :  { %v10413_v3 = vpop.permute.xlu0 %10412 }
 0xf55   :  { %v10463_v14 = vsel %vm798_vm3, %v10413_v3, %v17555_v29 }
 0xf56   :  { %14704 = vmatpush3.xpose.msk.msra.mxu0 %vm903_vm2, %v10463_v14 }
 0xf57   :  { %14713 = vmatprep.subr.mxu0 %v18542_v20 }
 0xf58   :  { %v10347_v38 = vpop.permute.xlu0 %10346 }
 0xf5c   :  { %v10415_v51 = vpop.permute.xlu0 %10414 }
 0xf60   :  { %v10417_v47 = vpop.permute.xlu0 %10416 }
 0xf6c   :  { %v9550_v45 = vpop.xlane.xlu1 %9549 }
 0xf6d   :  { %15046 = vrcp.f32 %v9550_v45 }
 0xf70   :  { %v10349_v2 = vpop.permute.xlu1 %10348 }
 0xf71   :  { %v10367_v5 = vsel %vm798_vm3, %v10349_v2, 1.0 }
 0xf72   :  { %14706 = vmatmul.mubr.msk.f32.vlgmr.msra.gmra.mrb[132].mxu0 %vm903_vm2, %v10367_v5 }
 0xf73   :  { %14715 = vmatprep.mubr.msk.f32.mxu0 %vm15153_vm1, %v18542_v20 }
 0xf74   :  { %v10447_v25 = vpop.permute.xlu1 %10446 }
 0xf75   :  { %v10464_v30 = vsel %vm798_vm3, %v10415_v51, %v10447_v25 }
 0xf77   :  { %v15047_v58 = vpop.eup %15046 }
 0xf78   :  { %v10449_v29 = vpop.permute.xlu1 %10448  ;;  %v9568_v22 = vmul.f32 %v15047_v58, %v17521_v57  ;;  %v10362_v57 = vsel %vm798_vm3, %v10339_v33, 1.0  ;;  %v10351_v33 = vpop.permute.xlu0 %10350 }
 0xf79   :  { %v10465_v0 = vsel %vm798_vm3, %v10417_v47, %v10449_v29  ;;  %v10368_v31 = vsel %vm798_vm3, %v10351_v33, 1.0 }
 0xf7a   :  { %14671 = vmatmul.mubr.msk.f32.vlgmr.msra.gmra.mrb[126].mxu1 %vm1512_vm4, %v9568_v22  ;;  %14714 = vmatpush3.xpose.msk.msra.mxu0 %vm903_vm2, %v10465_v0 }
 0xf7b   :  { %14679 = vmatpush3.xpose.msk.msra.mxu1 %vm903_vm2, %v10458_v55  ;;  %14680 = vmatprep.mubr.msk.f32.mxu1 %vm15153_vm1, %v18542_v20 }
 0xf7c   :  { %v10353_v61 = vpop.permute.xlu1 %10352  ;;  %14688 = vmatprep.subr.mxu1 %v18542_v20  ;;  %14723 = vmatprep.subr.mxu0 %v18542_v20 }
 0xf7d   :  { %v10369_v9 = vsel %vm798_vm3, %v10353_v61, 1.0 }
 0xf7e   :  { %14681 = vmatmul.mubr.msk.f32.vlgmr.msra.gmra.mrb[128].mxu1 %vm903_vm2, %v10362_v57  ;;  %14716 = vmatmul.mubr.msk.f32.vlgmr.msra.gmra.mrb[134].mxu0 %vm903_vm2, %v10369_v9 }
 0xf7f   :  { %14689 = vmatpush3.xpose.msk.msra.mxu1 %vm903_vm2, %v10460_v63  ;;  %14724 = vmatpush3.msra.mxu0 %v18559_v54  ;;  %v10366_v54 = vsel %vm798_vm3, %v10347_v38, 1.0 }
 0xf80   :  { %14690 = vmatprep.mubr.msk.f32.mxu1 %vm15153_vm1, %v18542_v20  ;;  %14698 = vmatprep.subr.mxu1 %v18542_v20 }
 0xf81   :  { %14725 = vmatprep.mubr.msk.f32.mxu0 %vm15153_vm1, %v18542_v20  ;;  %14733 = vmatprep.subr.mxu0 %v18542_v20 }
 0xf82   :  { %14691 = vmatmul.mubr.msk.f32.vlgmr.msra.gmra.mrb[130].mxu1 %vm903_vm2, %v10364_v44 }
 0xf83   :  { %14699 = vmatpush3.xpose.msk.msra.mxu1 %vm903_vm2, %v10462_v15  ;;  %14700 = vmatprep.mubr.msk.f32.mxu1 %vm15153_vm1, %v18542_v20 }
 0xf84   :  { %14708 = vmatprep.subr.mxu1 %v18542_v20 }
 0xf86   :  { %14701 = vmatmul.mubr.msk.f32.vlgmr.msra.gmra.mrb[132].mxu1 %vm903_vm2, %v10366_v54 }
 0xf87   :  { %14709 = vmatpush3.xpose.msk.msra.mxu1 %vm903_vm2, %v10464_v30  ;;  %14710 = vmatprep.mubr.msk.f32.mxu1 %vm15153_vm1, %v18542_v20 }
 0xf88   :  { %14718 = vmatprep.subr.mxu1 %v18542_v20 }
 0xf8a   :  { %14711 = vmatmul.mubr.msk.f32.vlgmr.msra.gmra.mrb[134].mxu1 %vm903_vm2, %v10368_v31 }
 0xf8b   :  { %14719 = vmatpush3.msra.mxu1 %v18558_v40  ;;  %14720 = vmatprep.mubr.msk.f32.mxu1 %vm15153_vm1, %v18542_v20 }
 0xf8c   :  { %14728 = vmatprep.subr.mxu1 %v18542_v20 }
 0xfdf   :  { %v9712_v12 = vpop.f32.mrb[120].mxu0 }
 0xfe0   :  { %v14647_v35 = vpop.f32.mrb[121].mxu0  ;;  %v10162_v49 = vrot.slane %v9712_v12, 7  ;;  %v10195_v6 = vrot.slane %v9712_v12, 1  ;;  %v10212_v59 = vrot.slane %v9712_v12, 2  ;;  %v10229_v42 = vrot.slane %v9712_v12, 3 }
 0xfe1   :  { %v10244_v4 = vrot.slane %v9712_v12, 4  ;;  %v10261_v56 = vrot.slane %v9712_v12, 5  ;;  %v10278_v3 = vrot.slane %v9712_v12, 6 }
0x1008   :  { %v9639_v14 = vpop.f32.mrb[120].mxu1 }
0x1009   :  { %v10177_v38 = vrot.slane %v9639_v14, 1  ;;  %v10194_v45 = vrot.slane %v9639_v14, 2  ;;  %v10211_v2 = vrot.slane %v9639_v14, 3  ;;  %v10228_v5 = vrot.slane %v9639_v14, 4  ;;  %v14642_v40 = vpop.f32.mrb[121].mxu1 }
0x100a   :  { %v10243_v51 = vrot.slane %v9639_v14, 5  ;;  %v10260_v25 = vrot.slane %v9639_v14, 6  ;;  %v10277_v58 = vrot.slane %v9639_v14, 7  ;;  %v10163_v47 = vsel %vm2194_vm5, %v10162_v49, %v9639_v14 }
0x100b   :  { %v10178_v29 = vsel %vm2194_vm5, %v9712_v12, %v10177_v38  ;;  %v10196_v22 = vsel %vm2194_vm5, %v10195_v6, %v10194_v45  ;;  %v10213_v0 = vsel %vm2194_vm5, %v10212_v59, %v10211_v2  ;;  %v10230_v55 = vsel %vm2194_vm5, %v10229_v42, %v10228_v5 }
0x100c   :  { %v9785_v61 = vpop.f32.mrb[122].mxu1  ;;  %v10245_v57 = vsel %vm2194_vm5, %v10244_v4, %v10243_v51  ;;  %v10262_v9 = vsel %vm2194_vm5, %v10261_v56, %v10260_v25  ;;  %v10279_v63 = vsel %vm2194_vm5, %v10278_v3, %v10277_v58 }
0x100d   :  { %v14652_v44 = vpop.f32.mrb[123].mxu1  ;;  %v10179_v15 = vrot.slane %v9785_v61, 7  ;;  %v10246_v54 = vrot.slane %v9785_v61, 3  ;;  %v10197_v33 = vsel %vm2197_vm6, %v9785_v61, %v10196_v22  ;;  %v10263_v30 = vrot.slane %v9785_v61, 4 }
0x100e   :  { %v10280_v31 = vrot.slane %v9785_v61, 5  ;;  %v10214_v12 = vrot.slane %v9785_v61, 1  ;;  %v10164_v35 = vrot.slane %v9785_v61, 6  ;;  %v10231_v49 = vrot.slane %v9785_v61, 2 }
0x100f   :  { %v10180_v6 = vsel %vm2197_vm6, %v10179_v15, %v10178_v29  ;;  %v10247_v59 = vsel %vm2197_vm6, %v10246_v54, %v10245_v57  ;;  %v10264_v42 = vsel %vm2197_vm6, %v10263_v30, %v10262_v9 }
0x1010   :  { %v9858_v4 = vpop.f32.mrb[122].mxu0  ;;  %v10281_v56 = vsel %vm2197_vm6, %v10280_v31, %v10279_v63  ;;  %v10215_v3 = vsel %vm2197_vm6, %v10214_v12, %v10213_v0  ;;  %v10165_v14 = vsel %vm2197_vm6, %v10164_v35, %v10163_v47  ;;  %v10232_v38 = vsel %vm2197_vm6, %v10231_v49, %v10230_v55 }
0x1011   :  { %v14657_v45 = vpop.f32.mrb[123].mxu0  ;;  %v10181_v2 = vrot.slane %v9858_v4, 6  ;;  %v10248_v5 = vrot.slane %v9858_v4, 2  ;;  %v10198_v40 = vrot.slane %v9858_v4, 7  ;;  %v10265_v51 = vrot.slane %v9858_v4, 3 }
0x1012   :  { %v10282_v25 = vrot.slane %v9858_v4, 4  ;;  %v10216_v58 = vsel %vm2200_vm7, %v9858_v4, %v10215_v3  ;;  %v10166_v29 = vrot.slane %v9858_v4, 5  ;;  %v10233_v22 = vrot.slane %v9858_v4, 1 }
0x1013   :  { %v10182_v61 = vsel %vm2200_vm7, %v10181_v2, %v10180_v6  ;;  %v10249_v57 = vsel %vm2200_vm7, %v10248_v5, %v10247_v59  ;;  %v10199_v0 = vsel %vm2200_vm7, %v10198_v40, %v10197_v33  ;;  %v10266_v47 = vsel %vm2200_vm7, %v10265_v51, %v10264_v42 }
0x1014   :  { %v10004_v9 = vpop.f32.mrb[124].mxu0  ;;  %v10283_v55 = vsel %vm2200_vm7, %v10282_v25, %v10281_v56  ;;  %v10167_v63 = vsel %vm2200_vm7, %v10166_v29, %v10165_v14  ;;  %v10234_v44 = vsel %vm2200_vm7, %v10233_v22, %v10232_v38 }
0x1015   :  { %v14667_v15 = vpop.f32.mrb[125].mxu0  ;;  %v10185_v33 = vrot.slane %v10004_v9, 4  ;;  %v10202_v4 = vrot.slane %v10004_v9, 5  ;;  %v10269_v42 = vrot.slane %v10004_v9, 1  ;;  %v10236_v3 = vrot.slane %v10004_v9, 7 }
0x1016   :  { %v10170_v15 = vrot.slane %v10004_v9, 3 }
0x1018   :  { %v9931_v54 = vpop.f32.mrb[124].mxu1 }
0x1019   :  { %v14662_v30 = vpop.f32.mrb[125].mxu1  ;;  %v17687_v31 = vpop.f32.mrb[126].mxu0  ;;  %v10183_v12 = vrot.slane %v9931_v54, 5  ;;  %v10250_v35 = vrot.slane %v9931_v54, 1  ;;  %v10200_v49 = vrot.slane %v9931_v54, 6  ;;  %v10267_v6 = vrot.slane %v9931_v54, 2 }
0x101a   :  { %v14677_v59 = vpop.f32.mrb[127].mxu0  ;;  %v10284_v25 = vrot.slane %v9931_v54, 3  ;;  %v10217_v29 = vrot.slane %v9931_v54, 7  ;;  %v10168_v22 = vrot.slane %v9931_v54, 4 }
0x101b   :  { %v10184_v56 = vsel %vm2203_vm8, %v10183_v12, %v10182_v61  ;;  %v10251_v14 = vsel %vm2203_vm8, %v10250_v35, %v10249_v57  ;;  %v10201_v38 = vsel %vm2203_vm8, %v10200_v49, %v10199_v0  ;;  %v10268_v45 = vsel %vm2203_vm8, %v10267_v6, %v10266_v47 }
0x101c   :  { %v17694_v2 = vsel %vm2206_vm9, %v10185_v33, %v10184_v56  ;;  %v17697_v5 = vsel %vm2206_vm9, %v10004_v9, %v10251_v14  ;;  %v17700_v40 = vsel %vm2206_vm9, %v10202_v4, %v10201_v38  ;;  %v10270_v51 = vsel %vm2206_vm9, %v10269_v42, %v10268_v45  ;;  %v18574_v4 = vld [vmem:[#allocation29_spill] sm:$0xff]  ;;  %v18575_v45 = vld [vmem:[#allocation32_spill] sm:$0xff] }
0x101d   :  { %v10286_v61 = vrot.slane %v10004_v9, 2  ;;  %v10219_v57 = vrot.slane %v10004_v9, 6  ;;  %v10235_v0 = vsel %vm2203_vm8, %v9931_v54, %v10234_v44  ;;  %v10285_v30 = vsel %vm2203_vm8, %v10284_v25, %v10283_v55 }
0x101e   :  { %v10218_v12 = vsel %vm2203_vm8, %v10217_v29, %v10216_v58  ;;  %v10169_v35 = vsel %vm2203_vm8, %v10168_v22, %v10167_v63  ;;  %v17710_v49 = vsel %vm2206_vm9, %v10236_v3, %v10235_v0  ;;  %v18573_v63 = vld [vmem:[#allocation30_spill] sm:$0xff]  ;;  %v11915_v42 = vadd.f32 %v18574_v4, %v15235_v16  ;;  %v18576_v22 = vld [vmem:[#allocation31_spill] sm:$0xff] }
0x101f   :  { %v17704_v47 = vpop.f32.mrb[128].mxu0  ;;  %v10287_v33 = vsel %vm2206_vm9, %v10286_v61, %v10285_v30  ;;  %v17716_v9 = vsel %vm2206_vm9, %v10219_v57, %v10218_v12  ;;  %v17719_v44 = vsel %vm2206_vm9, %v10170_v15, %v10169_v35  ;;  %v17725_v54 = vadd.f32 %v15235_v16, %v18573_v63  ;;  %v18577_v12 = vld [vmem:[#allocation34_spill] sm:$0xff] }
0x1020   :  { %v14687_v6 = vpop.f32.mrb[129].mxu0  ;;  %v11077_v59 = vsel %vm1512_vm4, %v17704_v47, -inf  ;;  %v11963_v56 = vmul.f32 2.0, %v11915_v42  ;;  %v11971_v14 = vmul.f32 %v11915_v42, %v11915_v42  ;;  %v17734_v25 = vadd.f32 %v15235_v16, %v18575_v45 }
0x1021   :  { %11078 = vmax.xlane.f32.xlu1 %v11077_v59  ;;  %v11962_v3 = vmul.f32 2.0, %v17725_v54  ;;  %v11907_v29 = vadd.f32 %v18574_v4, %v15237_v17  ;;  %v17741_v61 = vadd.f32 %v18576_v22, %v15235_v16  ;;  %v17751_v35 = vadd.f32 %v15235_v16, %v18577_v12 }
0x1022   :  { %v11979_v38 = vsub.f32 0.0, %v11971_v14  ;;  %v11972_v57 = vmul.f32 %v17734_v25, %v17734_v25  ;;  %v10255_v14 = vrot.slane %v17687_v31, 6 }
0x1023   :  { %v17721_v55 = vpop.f32.mrb[130].mxu0  ;;  %v11973_v15 = vmul.f32 %v17741_v61, %v17741_v61  ;;  %v11974_v42 = vmul.f32 %v17751_v35, %v17751_v35 }
0x1024   :  { %v14697_v58 = vpop.f32.mrb[131].mxu0  ;;  %v11980_v0 = vsub.f32 0.0, %v11972_v57  ;;  %v10272_v57 = vrot.slane %v17687_v31, 7 }
0x1025   :  { %v11981_v30 = vsub.f32 0.0, %v11973_v15  ;;  %v11909_v58 = vadd.f32 %v18576_v22, %v15237_v17  ;;  %v10223_v15 = vrot.slane %v17687_v31, 4 }
0x1032   :  { %11994 = vrot.lane.b32.xlu1 %v11962_v3, %s15154_s19  ;;  %v11982_v3 = vsub.f32 0.0, %v11974_v42 }
0x1036   :  { %11996 = vrot.lane.b32.xlu1 %v11963_v56, %s15154_s19  ;;  %v10189_v56 = vrot.slane %v17687_v31, 2 }
0x103a   :  { %12028 = vrot.lane.b32.xlu1 %v11979_v38, %s15152_s18 }
0x103e   :  { %11932 = vrot.lane.b32.xlu1 %v11907_v29, %s15152_s18  ;;  %v10206_v29 = vrot.slane %v17687_v31, 3 }
0x1042   :  { %12030 = vrot.lane.b32.xlu1 %v11980_v0, %s15152_s18  ;;  %v10174_v0 = vrot.slane %v17687_v31, 1 }
0x1045   :  { %v17753_v6 = vpop.f32.mrb[132].mxu0 }
0x1046   :  { %v14707_v59 = vpop.f32.mrb[133].mxu0  ;;  %12032 = vrot.lane.b32.xlu1 %v11981_v30, %s15152_s18 }
0x104a   :  { %11936 = vrot.lane.b32.xlu1 %v11909_v58, %s15152_s18 }
0x104d   :  { %v10077_v38 = vpop.f32.mrb[126].mxu1 }
0x104e   :  { %v14672_v30 = vpop.f32.mrb[127].mxu1  ;;  %12034 = vrot.lane.b32.xlu1 %v11982_v3, %s15152_s18  ;;  %v10187_v59 = vrot.slane %v10077_v38, 3  ;;  %v10253_v10 = vrot.slane %v10077_v38, 7  ;;  %v10204_v58 = vrot.slane %v10077_v38, 4  ;;  %v10271_v42 = vsel %vm2209_vm10, %v10077_v38, %v10270_v51 }
0x104f   :  { %v17770_v27 = vsel %vm2212_vm11, %v10272_v57, %v10271_v42  ;;  %v10288_v46 = vrot.slane %v10077_v38, 1  ;;  %v10221_v11 = vrot.slane %v10077_v38, 5  ;;  %v10172_v22 = vrot.slane %v10077_v38, 2 }
0x1050   :  { %v10188_v1 = vsel %vm2209_vm10, %v10187_v59, %v17694_v2  ;;  %v10254_v7 = vsel %vm2209_vm10, %v10253_v10, %v17697_v5  ;;  %v10205_v3 = vsel %vm2209_vm10, %v10204_v58, %v17700_v40  ;;  %v10238_v30 = vrot.slane %v10077_v38, 6 }
0x1051   :  { %v10538_v34 = vpop.f32.mrb[128].mxu1  ;;  %v17778_v26 = vpop.f32.mrb[134].mxu0  ;;  %v17781_v51 = vsel %vm2212_vm11, %v10189_v56, %v10188_v1  ;;  %v17784_v57 = vsel %vm2212_vm11, %v10255_v14, %v10254_v7  ;;  %v17787_v42 = vsel %vm2212_vm11, %v10206_v29, %v10205_v3  ;;  %v10289_v2 = vsel %vm2209_vm10, %v10288_v46, %v10287_v33 }
0x1052   :  { %v14682_v59 = vpop.f32.mrb[129].mxu1  ;;  %v14717_v10 = vpop.f32.mrb[135].mxu0  ;;  %v11074_v5 = vsel %vm1512_vm4, %v10538_v34, -inf  ;;  %v17793_v40 = vsel %vm2212_vm11, %v17687_v31, %v10289_v2  ;;  %v10222_v1 = vsel %vm2209_vm10, %v10221_v11, %v17716_v9  ;;  %v10240_v56 = vrot.slane %v17687_v31, 5  ;;  %v18580_v2 = vld [vmem:[#allocation33_spill] sm:$0xff] }
0x1053   :  { %11075 = vmax.xlane.f32.xlu0 %v11074_v5  ;;  %v17799_v7 = vsel %vm2212_vm11, %v10223_v15, %v10222_v1  ;;  %v10173_v46 = vsel %vm2209_vm10, %v10172_v22, %v17719_v44  ;;  %v10239_v33 = vsel %vm2209_vm10, %v10238_v30, %v17710_v49  ;;  %v11083_v44 = vsel %vm1512_vm4, %v17721_v55, -inf }
0x1054   :  { %v17806_v14 = vsel %vm2212_vm11, %v10174_v0, %v10173_v46  ;;  %v17809_v38 = vsel %vm2212_vm11, %v10240_v56, %v10239_v33  ;;  %v11089_v0 = vsel %vm1512_vm4, %v17753_v6, -inf  ;;  %v11095_v58 = vsel %vm1512_vm4, %v17778_v26, -inf }
0x1055   :  { %18578 = vst [vmem:[#allocation24_spill] sm:$0xff] %v17806_v14  ;;  %18579 = vst [vmem:[#allocation23_spill] sm:$0xff] %v17809_v38  ;;  %v10690_v29 = vpop.f32.mrb[130].mxu1  ;;  %v17828_v59 = vadd.f32 %v18580_v2, %v15235_v16 }
0x1056   :  { %v14692_v11 = vpop.f32.mrb[131].mxu1  ;;  %v11080_v31 = vsel %vm1512_vm4, %v10690_v29, -inf }
0x1057   :  { %11081 = vmax.xlane.f32.xlu0 %v11080_v31  ;;  %v11975_v10 = vmul.f32 %v17828_v59, %v17828_v59 }
0x1059   :  { %v17812_v9 = vpop.f32.mrb[132].mxu1  ;;  %v11983_v5 = vsub.f32 0.0, %v11975_v10 }
0x105a   :  { %v14702_v15 = vpop.f32.mrb[133].mxu1  ;;  %v11086_v3 = vsel %vm1512_vm4, %v17812_v9, -inf }
0x105b   :  { %11084 = vmax.xlane.f32.xlu0 %v11083_v44 }
0x105d   :  { %v17816_v22 = vpop.f32.mrb[134].mxu1 }
0x105e   :  { %v14712_v49 = vpop.f32.mrb[135].mxu1  ;;  %v11092_v30 = vsel %vm1512_vm4, %v17816_v22, -inf }
0x105f   :  { %11090 = vmax.xlane.f32.xlu0 %v11089_v0 }
0x1063   :  { %11096 = vmax.xlane.f32.xlu0 %v11095_v58 }
0x1072   :  { %11087 = vmax.xlane.f32.xlu1 %v11086_v3 }
0x1076   :  { %11093 = vmax.xlane.f32.xlu1 %v11092_v30 }
0x1087   :  { %12036 = vrot.lane.b32.xlu1 %v11983_v5, %s15152_s18 }
0x10ae   :  { %v11079_v1 = vpop.xlane.xlu1 %11078 }
0x10af   :  { %v11099_v56 = vsub.f32 %v17704_v47, %v11079_v1 }
0x10b1   :  { %v11108_v46 = vmul.f32 1.442695, %v11099_v56 }
0x10b2   :  { %v17838_v31 = vpop.permute.xlu1 %11994 }
0x10b3   :  { %15048 = vpow2.f32 %v11108_v46 }
0x10b6   :  { %v17840_v15 = vpop.permute.xlu1 %11996 }
0x10ba   :  { %v17842_v44 = vpop.permute.xlu1 %12028 }
0x10bd   :  { %v17834_v33 = vpop.eup %15048 }
0x10be   :  { %v11125_v11 = vsel %vm1512_vm4, %v17834_v33, 0.0  ;;  %v17844_v58 = vpop.permute.xlu1 %11932 }
0x10bf   :  { %11126 = vadd.xlane.f32.xlu0 %v11125_v11 }
0x10c2   :  { %v17846_v1 = vpop.permute.xlu1 %12030 }
0x10e0   :  { %v11076_v49 = vpop.xlane.xlu0 %11075 }
0x10e1   :  { %v11098_v0 = vsub.f32 %v10538_v34, %v11076_v49  ;;  %v17852_v34 = vpop.permute.xlu1 %12032 }
0x10e3   :  { %v11106_v3 = vmul.f32 1.442695, %v11098_v0 }
0x10e4   :  { %v11082_v47 = vpop.xlane.xlu0 %11081 }
0x10e5   :  { %15050 = vpow2.f32 %v11106_v3  ;;  %v11100_v30 = vsub.f32 %v10690_v29, %v11082_v47 }
0x10e7   :  { %v11110_v10 = vmul.f32 1.442695, %v11100_v30 }
0x10e8   :  { %v11085_v5 = vpop.xlane.xlu0 %11084 }
0x10e9   :  { %15052 = vpow2.f32 %v11110_v10  ;;  %v11101_v56 = vsub.f32 %v17721_v55, %v11085_v5 }
0x10eb   :  { %v11112_v46 = vmul.f32 1.442695, %v11101_v56 }
0x10ec   :  { %v11091_v11 = vpop.xlane.xlu0 %11090 }
0x10ed   :  { %15054 = vpow2.f32 %v11112_v46  ;;  %v11103_v38 = vsub.f32 %v17753_v6, %v11091_v11  ;;  %v17861_v6 = vpop.permute.xlu1 %11936 }
0x10ef   :  { %v17850_v14 = vpop.eup %15050  ;;  %v11116_v49 = vmul.f32 1.442695, %v11103_v38 }
0x10f0   :  { %v11097_v0 = vpop.xlane.xlu0 %11096  ;;  %v11122_v29 = vsel %vm1512_vm4, %v17850_v14, 0.0 }
0x10f1   :  { %15056 = vpow2.f32 %v11116_v49  ;;  %v11105_v3 = vsub.f32 %v17778_v26, %v11097_v0  ;;  %11123 = vadd.xlane.f32.xlu1 %v11122_v29  ;;  %v17869_v26 = vpop.permute.xlu1 %12034 }
0x10f3   :  { %v17857_v47 = vpop.eup %15052  ;;  %v11120_v55 = vmul.f32 1.442695, %v11105_v3 }
0x10f4   :  { %v11128_v30 = vsel %vm1512_vm4, %v17857_v47, 0.0 }
0x10f5   :  { %15058 = vpow2.f32 %v11120_v55  ;;  %11129 = vadd.xlane.f32.xlu1 %v11128_v30  ;;  %v11970_v30 = vmul.f32 %v17725_v54, %v17725_v54  ;;  %v11908_v54 = vadd.f32 %v15237_v17, %v18575_v45 }
0x10f7   :  { %v17863_v10 = vpop.eup %15054 }
0x10f8   :  { %v11131_v38 = vsel %vm1512_vm4, %v17863_v10, 0.0 }
0x10f9   :  { %11132 = vadd.xlane.f32.xlu0 %v11131_v38  ;;  %v11978_v38 = vsub.f32 0.0, %v11970_v30  ;;  %v18581_v30 = vld [vmem:[#allocation36_spill] sm:$0xff] }
0x10fb   :  { %v17867_v5 = vpop.eup %15056 }
0x10fc   :  { %v11137_v56 = vsel %vm1512_vm4, %v17867_v5, 0.0 }
0x10fd   :  { %11138 = vadd.xlane.f32.xlu0 %v11137_v56  ;;  %v11964_v56 = vmul.f32 2.0, %v17734_v25 }
0x10ff   :  { %v17873_v46 = vpop.eup %15058  ;;  %v11088_v11 = vpop.xlane.xlu1 %11087 }
0x1100   :  { %v11102_v49 = vsub.f32 %v17812_v9, %v11088_v11  ;;  %v11143_v0 = vsel %vm1512_vm4, %v17873_v46, 0.0  ;;  %v11906_v9 = vadd.f32 %v15237_v17, %v18573_v63  ;;  %v11911_v11 = vadd.f32 %v18580_v2, %v15237_v17 }
0x1101   :  { %11144 = vadd.xlane.f32.xlu0 %v11143_v0  ;;  %v11966_v0 = vmul.f32 2.0, %v17751_v35  ;;  %v18582_v35 = vld [vmem:[#allocation35_spill] sm:$0xff] }
0x1102   :  { %v11114_v29 = vmul.f32 1.442695, %v11102_v49  ;;  %v11965_v49 = vmul.f32 2.0, %v17741_v61  ;;  %v11910_v61 = vadd.f32 %v15237_v17, %v18577_v12 }
0x1103   :  { %v11094_v25 = vpop.xlane.xlu1 %11093 }
0x1104   :  { %15060 = vpow2.f32 %v11114_v29  ;;  %v11967_v29 = vmul.f32 2.0, %v17828_v59 }
0x110e   :  { %v17878_v3 = vpop.eup %15060 }
0x110f   :  { %v11134_v55 = vsel %vm1512_vm4, %v17878_v3, 0.0 }
0x1110   :  { %11135 = vadd.xlane.f32.xlu1 %v11134_v55  ;;  %v11104_v55 = vsub.f32 %v17816_v22, %v11094_v25  ;;  %v11912_v22 = vadd.f32 %v15237_v17, %v18581_v30 }
0x1117   :  { %12026 = vrot.lane.b32.xlu0 %v11978_v38, %s15152_s18  ;;  %v11920_v38 = vadd.f32 %v15235_v16, %v18581_v30 }
0x111b   :  { %11930 = vrot.lane.b32.xlu0 %v11906_v9, %s15152_s18  ;;  %v11118_v9 = vmul.f32 1.442695, %v11104_v55 }
0x111d   :  { %15062 = vpow2.f32 %v11118_v9 }
0x111f   :  { %11998 = vrot.lane.b32.xlu0 %v11964_v56, %s15154_s19  ;;  %v11921_v56 = vadd.f32 %v18582_v35, %v15235_v16  ;;  %v11976_v16 = vmul.f32 %v11920_v38, %v11920_v38 }
0x1121   :  { %11940 = vrot.lane.b32.xlu1 %v11911_v11, %s15152_s18  ;;  %v11968_v11 = vmul.f32 2.0, %v11920_v38  ;;  %v11969_v59 = vmul.f32 2.0, %v11921_v56  ;;  %v11977_v25 = vmul.f32 %v11921_v56, %v11921_v56  ;;  %v11913_v38 = vadd.f32 %v18582_v35, %v15237_v17  ;;  %v17930_v56 = vpop.permute.xlu1 %12036 }
0x1123   :  { %12000 = vrot.lane.b32.xlu0 %v11965_v49, %s15154_s19 }
0x1127   :  { %11934 = vrot.lane.b32.xlu0 %v11908_v54, %s15152_s18  ;;  %v17915_v49 = vpop.eup %15062 }
0x1128   :  { %v11140_v54 = vsel %vm1512_vm4, %v17915_v49, 0.0 }
0x112b   :  { %12002 = vrot.lane.b32.xlu0 %v11966_v0, %s15154_s19 }
0x112f   :  { %12004 = vrot.lane.b32.xlu0 %v11967_v29, %s15154_s19  ;;  %v11984_v29 = vsub.f32 0.0, %v11976_v16 }
0x1133   :  { %11938 = vrot.lane.b32.xlu0 %v11910_v61, %s15152_s18  ;;  %v11985_v61 = vsub.f32 0.0, %v11977_v25 }
0x1137   :  { %12006 = vrot.lane.b32.xlu0 %v11968_v11, %s15154_s19 }
0x113b   :  { %12008 = vrot.lane.b32.xlu0 %v11969_v59, %s15154_s19  ;;  %s15156_s19 = smov 64  }
0x113f   :  { %11942 = vrot.lane.b32.xlu0 %v11912_v22, %s15152_s18 }
0x1145   :  { %11141 = vadd.xlane.f32.xlu1 %v11140_v54 }
0x114c   :  { %v11127_v0 = vpop.xlane.xlu0 %11126 }
0x114d   :  { %15064 = vrcp.f32 %v11127_v0 }
0x1156   :  { %12038 = vrot.lane.b32.xlu1 %v11984_v29, %s15152_s18 }
0x1157   :  { %v15065_v55 = vpop.eup %15064 }
0x1158   :  { %v11155_v9 = vmul.f32 %v15065_v55, %v17834_v33 }
0x115a   :  { %12040 = vrot.lane.b32.xlu1 %v11985_v61, %s15152_s18  ;;  %14726 = vmatmul.mubr.msk.f32.vlgmr.msra.gmra.mrb[136].mxu0 %vm1512_vm4, %v11155_v9 }
0x115b   :  { %14734 = vmatpush3.msra.mxu0 %v18568_v24  ;;  %14735 = vmatprep.mubr.msk.f32.mxu0 %vm15153_vm1, %v18542_v20 }
0x115c   :  { %14743 = vmatprep.subr.mxu0 %v18542_v20 }
0x115e   :  { %11944 = vrot.lane.b32.xlu1 %v11913_v38, %s15152_s18 }
0x117e   :  { %v11124_v11 = vpop.xlane.xlu1 %11123 }
0x117f   :  { %15066 = vrcp.f32 %v11124_v11 }
0x1182   :  { %v11130_v33 = vpop.xlane.xlu1 %11129 }
0x1183   :  { %15068 = vrcp.f32 %v11130_v33 }
0x1186   :  { %v11133_v59 = vpop.xlane.xlu0 %11132 }
0x1187   :  { %15070 = vrcp.f32 %v11133_v59 }
0x1189   :  { %v15067_v22 = vpop.eup %15066 }
0x118a   :  { %v11154_v24 = vmul.f32 %v15067_v22, %v17850_v14  ;;  %v11139_v54 = vpop.xlane.xlu0 %11138 }
0x118b   :  { %15072 = vrcp.f32 %v11139_v54 }
0x118c   :  { %14721 = vmatmul.mubr.msk.f32.vlgmr.msra.gmra.mrb[136].mxu1 %vm1512_vm4, %v11154_v24 }
0x118d   :  { %v15069_v17 = vpop.eup %15068  ;;  %14729 = vmatpush3.msra.mxu1 %v18567_v19  ;;  %14730 = vmatprep.mubr.msk.f32.mxu1 %vm15153_vm1, %v18542_v20 }
0x118e   :  { %v11156_v0 = vmul.f32 %v15069_v17, %v17857_v47  ;;  %v11145_v16 = vpop.xlane.xlu0 %11144  ;;  %14738 = vmatprep.subr.mxu1 %v18542_v20 }
0x118f   :  { %15074 = vrcp.f32 %v11145_v16 }
0x1190   :  { %14731 = vmatmul.mubr.msk.f32.vlgmr.msra.gmra.mrb[138].mxu1 %vm1512_vm4, %v11156_v0 }
0x1191   :  { %v15071_v25 = vpop.eup %15070  ;;  %14739 = vmatpush3.msra.mxu1 %v18569_v43  ;;  %14740 = vmatprep.mubr.msk.f32.mxu1 %vm15153_vm1, %v18542_v20 }
0x1192   :  { %v11157_v14 = vmul.f32 %v15071_v25, %v17863_v10  ;;  %v17944_v19 = vpop.permute.xlu0 %12026  ;;  %14748 = vmatprep.subr.mxu1 %v18542_v20 }
0x1194   :  { %14736 = vmatmul.mubr.msk.f32.vlgmr.msra.gmra.mrb[138].mxu0 %vm1512_vm4, %v11157_v14 }
0x1195   :  { %v15073_v47 = vpop.eup %15072  ;;  %14744 = vmatpush3.msra.mxu0 %v18570_v36  ;;  %14745 = vmatprep.mubr.msk.f32.mxu0 %vm15153_vm1, %v18542_v20 }
0x1196   :  { %v11159_v29 = vmul.f32 %v15073_v47, %v17867_v5  ;;  %v17952_v43 = vpop.permute.xlu0 %11930  ;;  %14753 = vmatprep.subr.mxu0 %v18542_v20  ;;  %v12050_v47 = vsel %vm798_vm3, %v17838_v31, %v17944_v19 }
0x1198   :  { %14746 = vmatmul.mubr.msk.f32.vlgmr.msra.gmra.mrb[140].mxu0 %vm1512_vm4, %v11159_v29 }
0x1199   :  { %v15075_v10 = vpop.eup %15074  ;;  %14754 = vmatpush3.msra.mxu0 %v18572_v48  ;;  %14755 = vmatprep.mubr.msk.f32.mxu0 %vm15153_vm1, %v18542_v20  ;;  %v12051_v48 = vsel %vm798_vm3, %v17840_v15, %v17842_v44  ;;  %v11957_v15 = vsel %vm798_vm3, %v17861_v6, 1.0 }
0x119a   :  { %v11161_v55 = vmul.f32 %v15075_v10, %v17873_v46  ;;  %v11999_v36 = vpop.permute.xlu0 %11998  ;;  %14763 = vmatprep.subr.mxu0 %v18542_v20  ;;  %v11955_v46 = vsel %vm798_vm3, %v17844_v58, 1.0 }
0x119b   :  { %v12052_v31 = vsel %vm798_vm3, %v11999_v36, %v17846_v1 }
0x119c   :  { %14756 = vmatmul.mubr.msk.f32.vlgmr.msra.gmra.mrb[142].mxu0 %vm1512_vm4, %v11161_v55 }
0x119d   :  { %v11136_v5 = vpop.xlane.xlu1 %11135  ;;  %14765 = vmatprep.mubr.msk.f32.mxu0 %vm15153_vm1, %v18542_v20 }
0x119e   :  { %15076 = vrcp.f32 %v11136_v5  ;;  %v12001_v61 = vpop.permute.xlu0 %12000 }
0x119f   :  { %v12053_v38 = vsel %vm798_vm3, %v12001_v61, %v17852_v34 }
0x11a0   :  { %14764 = vmatpush3.xpose.msk.msra.mxu0 %vm903_vm2, %v12051_v48 }
0x11a1   :  { %14773 = vmatprep.subr.mxu0 %v18542_v20  ;;  %v11941_v33 = vpop.permute.xlu1 %11940 }
0x11a2   :  { %v11935_v9 = vpop.permute.xlu0 %11934  ;;  %v11959_v6 = vsel %vm798_vm3, %v11941_v33, 1.0 }
0x11a3   :  { %14766 = vmatmul.mubr.msk.f32.vlgmr.msra.gmra.mrb[144].mxu0 %vm903_vm2, %v11955_v46 }
0x11a4   :  { %14774 = vmatpush3.xpose.msk.msra.mxu0 %vm903_vm2, %v12053_v38  ;;  %14775 = vmatprep.mubr.msk.f32.mxu0 %vm15153_vm1, %v18542_v20 }
0x11a5   :  { %14783 = vmatprep.subr.mxu0 %v18542_v20 }
0x11a6   :  { %v12003_v44 = vpop.permute.xlu0 %12002 }
0x11a7   :  { %14776 = vmatmul.mubr.msk.f32.vlgmr.msra.gmra.mrb[146].mxu0 %vm903_vm2, %v11957_v15  ;;  %v12054_v19 = vsel %vm798_vm3, %v12003_v44, %v17869_v26 }
0x11a8   :  { %v15077_v58 = vpop.eup %15076  ;;  %14785 = vmatprep.mubr.msk.f32.mxu0 %vm15153_vm1, %v18542_v20 }
0x11a9   :  { %v11158_v34 = vmul.f32 %v15077_v58, %v17878_v3 }
0x11aa   :  { %v12005_v11 = vpop.permute.xlu0 %12004 }
0x11ab   :  { %v12055_v59 = vsel %vm798_vm3, %v12005_v11, %v17930_v56  ;;  %14741 = vmatmul.mubr.msk.f32.vlgmr.msra.gmra.mrb[140].mxu1 %vm1512_vm4, %v11158_v34 }
0x11ac   :  { %14749 = vmatpush3.msra.mxu1 %v18571_v39  ;;  %14784 = vmatpush3.xpose.msk.msra.mxu0 %vm903_vm2, %v12055_v59 }
0x11ad   :  { %14793 = vmatprep.subr.mxu0 %v18542_v20  ;;  %14750 = vmatprep.mubr.msk.f32.mxu1 %vm15153_vm1, %v18542_v20 }
0x11ae   :  { %14758 = vmatprep.subr.mxu1 %v18542_v20  ;;  %v11939_v3 = vpop.permute.xlu0 %11938 }
0x11af   :  { %14786 = vmatmul.mubr.msk.f32.vlgmr.msra.gmra.mrb[148].mxu0 %vm903_vm2, %v11959_v6  ;;  %v11958_v1 = vsel %vm798_vm3, %v11939_v3, 1.0 }
0x11b0   :  { %14795 = vmatprep.mubr.msk.f32.mxu0 %vm15153_vm1, %v18542_v20 }
0x11b2   :  { %v12007_v39 = vpop.permute.xlu0 %12006 }
0x11b6   :  { %v12009_v24 = vpop.permute.xlu0 %12008 }
0x11ba   :  { %v11943_v29 = vpop.permute.xlu0 %11942 }
0x11bb   :  { %v11960_v26 = vsel %vm798_vm3, %v11943_v29, 1.0 }
0x11d2   :  { %v11142_v56 = vpop.xlane.xlu1 %11141 }
0x11d3   :  { %15078 = vrcp.f32 %v11142_v56 }
0x11d6   :  { %v12039_v22 = vpop.permute.xlu1 %12038 }
0x11da   :  { %v12041_v54 = vpop.permute.xlu1 %12040 }
0x11db   :  { %v12057_v17 = vsel %vm798_vm3, %v12009_v24, %v12041_v54 }
0x11dc   :  { %14794 = vmatpush3.xpose.msk.msra.mxu0 %vm903_vm2, %v12057_v17 }
0x11dd   :  { %v15079_v0 = vpop.eup %15078  ;;  %14803 = vmatprep.subr.mxu0 %v18542_v20 }
0x11de   :  { %v11160_v16 = vmul.f32 %v15079_v0, %v17915_v49  ;;  %v11945_v25 = vpop.permute.xlu1 %11944  ;;  %v11954_v49 = vsel %vm798_vm3, %v17952_v43, 1.0  ;;  %v12056_v43 = vsel %vm798_vm3, %v12007_v39, %v12039_v22 }
0x11df   :  { %v11961_v14 = vsel %vm798_vm3, %v11945_v25, 1.0 }
0x11e0   :  { %14751 = vmatmul.mubr.msk.f32.vlgmr.msra.gmra.mrb[142].mxu1 %vm1512_vm4, %v11160_v16  ;;  %14796 = vmatmul.mubr.msk.f32.vlgmr.msra.gmra.mrb[150].mxu0 %vm903_vm2, %v11961_v14 }
0x11e1   :  { %14759 = vmatpush3.xpose.msk.msra.mxu1 %vm903_vm2, %v12050_v47  ;;  %14804 = vmatpush3.msra.mxu0 %v18574_v4  ;;  %v11956_v4 = vsel %vm798_vm3, %v11935_v9, 1.0 }
0x11e2   :  { %14760 = vmatprep.mubr.msk.f32.mxu1 %vm15153_vm1, %v18542_v20  ;;  %14768 = vmatprep.subr.mxu1 %v18542_v20 }
0x11e3   :  { %14805 = vmatprep.mubr.msk.f32.mxu0 %vm15153_vm1, %v18542_v20  ;;  %14813 = vmatprep.subr.mxu0 %v18542_v20 }
0x11e4   :  { %14761 = vmatmul.mubr.msk.f32.vlgmr.msra.gmra.mrb[144].mxu1 %vm903_vm2, %v11954_v49 }
0x11e5   :  { %14769 = vmatpush3.xpose.msk.msra.mxu1 %vm903_vm2, %v12052_v31  ;;  %14770 = vmatprep.mubr.msk.f32.mxu1 %vm15153_vm1, %v18542_v20 }
0x11e6   :  { %14778 = vmatprep.subr.mxu1 %v18542_v20 }
0x11e8   :  { %14771 = vmatmul.mubr.msk.f32.vlgmr.msra.gmra.mrb[146].mxu1 %vm903_vm2, %v11956_v4 }
0x11e9   :  { %14779 = vmatpush3.xpose.msk.msra.mxu1 %vm903_vm2, %v12054_v19  ;;  %14780 = vmatprep.mubr.msk.f32.mxu1 %vm15153_vm1, %v18542_v20 }
0x11ea   :  { %14788 = vmatprep.subr.mxu1 %v18542_v20 }
0x11ec   :  { %14781 = vmatmul.mubr.msk.f32.vlgmr.msra.gmra.mrb[148].mxu1 %vm903_vm2, %v11958_v1 }
0x11ed   :  { %14789 = vmatpush3.xpose.msk.msra.mxu1 %vm903_vm2, %v12056_v43  ;;  %14790 = vmatprep.mubr.msk.f32.mxu1 %vm15153_vm1, %v18542_v20 }
0x11ee   :  { %14798 = vmatprep.subr.mxu1 %v18542_v20 }
0x11f0   :  { %14791 = vmatmul.mubr.msk.f32.vlgmr.msra.gmra.mrb[150].mxu1 %vm903_vm2, %v11960_v26 }
0x11f1   :  { %14799 = vmatpush3.msra.mxu1 %v18573_v63  ;;  %14800 = vmatprep.mubr.msk.f32.mxu1 %vm15153_vm1, %v18542_v20 }
0x11f2   :  { %14808 = vmatprep.subr.mxu1 %v18542_v20 }
0x122d   :  { %v11304_v10 = vpop.f32.mrb[136].mxu0 }
0x122e   :  { %v14727_v55 = vpop.f32.mrb[137].mxu0  ;;  %v11754_v36 = vrot.slane %v11304_v10, 7  ;;  %v11787_v5 = vrot.slane %v11304_v10, 1  ;;  %v11804_v61 = vrot.slane %v11304_v10, 2  ;;  %v11821_v48 = vrot.slane %v11304_v10, 3 }
0x122f   :  { %v11836_v46 = vrot.slane %v11304_v10, 4  ;;  %v11853_v9 = vrot.slane %v11304_v10, 5  ;;  %v11870_v38 = vrot.slane %v11304_v10, 6 }
0x125f   :  { %v11231_v15 = vpop.f32.mrb[136].mxu1 }
0x1260   :  { %v11769_v44 = vrot.slane %v11231_v15, 1  ;;  %v11786_v58 = vrot.slane %v11231_v15, 2  ;;  %v11803_v34 = vrot.slane %v11231_v15, 3  ;;  %v11820_v11 = vrot.slane %v11231_v15, 4  ;;  %v14722_v63 = vpop.f32.mrb[137].mxu1 }
0x1261   :  { %v11835_v33 = vrot.slane %v11231_v15, 5  ;;  %v11852_v59 = vrot.slane %v11231_v15, 6  ;;  %v11869_v6 = vrot.slane %v11231_v15, 7  ;;  %v11755_v3 = vsel %vm2194_vm5, %v11754_v36, %v11231_v15 }
0x1262   :  { %v11770_v56 = vsel %vm2194_vm5, %v11304_v10, %v11769_v44  ;;  %v11788_v39 = vsel %vm2194_vm5, %v11787_v5, %v11786_v58  ;;  %v11805_v22 = vsel %vm2194_vm5, %v11804_v61, %v11803_v34  ;;  %v11822_v24 = vsel %vm2194_vm5, %v11821_v48, %v11820_v11 }
0x1263   :  { %v11377_v54 = vpop.f32.mrb[138].mxu1  ;;  %v11837_v17 = vsel %vm2194_vm5, %v11836_v46, %v11835_v33  ;;  %v11854_v0 = vsel %vm2194_vm5, %v11853_v9, %v11852_v59  ;;  %v11871_v16 = vsel %vm2194_vm5, %v11870_v38, %v11869_v6 }
0x1264   :  { %v14732_v25 = vpop.f32.mrb[139].mxu1  ;;  %v11771_v14 = vrot.slane %v11377_v54, 7  ;;  %v11838_v47 = vrot.slane %v11377_v54, 3  ;;  %v11789_v49 = vsel %vm2197_vm6, %v11377_v54, %v11788_v39  ;;  %v11855_v31 = vrot.slane %v11377_v54, 4 }
0x1265   :  { %v11872_v4 = vrot.slane %v11377_v54, 5  ;;  %v11806_v19 = vrot.slane %v11377_v54, 1  ;;  %v11756_v1 = vrot.slane %v11377_v54, 6  ;;  %v11823_v29 = vrot.slane %v11377_v54, 2 }
0x1266   :  { %v11772_v43 = vsel %vm2197_vm6, %v11771_v14, %v11770_v56  ;;  %v11839_v26 = vsel %vm2197_vm6, %v11838_v47, %v11837_v17  ;;  %v11856_v10 = vsel %vm2197_vm6, %v11855_v31, %v11854_v0 }
0x1267   :  { %v11450_v55 = vpop.f32.mrb[138].mxu0  ;;  %v11873_v36 = vsel %vm2197_vm6, %v11872_v4, %v11871_v16  ;;  %v11807_v5 = vsel %vm2197_vm6, %v11806_v19, %v11805_v22  ;;  %v11757_v61 = vsel %vm2197_vm6, %v11756_v1, %v11755_v3  ;;  %v11824_v48 = vsel %vm2197_vm6, %v11823_v29, %v11822_v24 }
0x1268   :  { %v14737_v46 = vpop.f32.mrb[139].mxu0  ;;  %v11773_v9 = vrot.slane %v11450_v55, 6  ;;  %v11840_v38 = vrot.slane %v11450_v55, 2  ;;  %v11790_v15 = vrot.slane %v11450_v55, 7  ;;  %v11857_v44 = vrot.slane %v11450_v55, 3 }
0x1269   :  { %v11874_v58 = vrot.slane %v11450_v55, 4  ;;  %v11808_v34 = vsel %vm2200_vm7, %v11450_v55, %v11807_v5  ;;  %v11758_v11 = vrot.slane %v11450_v55, 5  ;;  %v11825_v63 = vrot.slane %v11450_v55, 1 }
0x126a   :  { %v11774_v33 = vsel %vm2200_vm7, %v11773_v9, %v11772_v43  ;;  %v11841_v59 = vsel %vm2200_vm7, %v11840_v38, %v11839_v26  ;;  %v11791_v6 = vsel %vm2200_vm7, %v11790_v15, %v11789_v49  ;;  %v11858_v3 = vsel %vm2200_vm7, %v11857_v44, %v11856_v10 }
0x126b   :  { %v11596_v56 = vpop.f32.mrb[140].mxu0  ;;  %v11875_v39 = vsel %vm2200_vm7, %v11874_v58, %v11873_v36  ;;  %v11759_v22 = vsel %vm2200_vm7, %v11758_v11, %v11757_v61  ;;  %v11826_v24 = vsel %vm2200_vm7, %v11825_v63, %v11824_v48 }
0x126c   :  { %v14747_v54 = vpop.f32.mrb[141].mxu0  ;;  %v11777_v31 = vrot.slane %v11596_v56, 4  ;;  %v11794_v4 = vrot.slane %v11596_v56, 5  ;;  %v11861_v19 = vrot.slane %v11596_v56, 1  ;;  %v11878_v29 = vrot.slane %v11596_v56, 2 }
0x126d   :  { %v11811_v43 = vrot.slane %v11596_v56, 6  ;;  %v11762_v26 = vrot.slane %v11596_v56, 3  ;;  %v11828_v10 = vrot.slane %v11596_v56, 7 }
0x126f   :  { %v18069_v17 = vpop.f32.mrb[142].mxu0 }
0x1270   :  { %v14757_v0 = vpop.f32.mrb[143].mxu0 }
0x1276   :  { %v18071_v16 = vpop.f32.mrb[144].mxu0 }
0x1277   :  { %v14767_v25 = vpop.f32.mrb[145].mxu0  ;;  %v12669_v14 = vsel %vm1512_vm4, %v18071_v16, -inf }
0x1278   :  { %12670 = vmax.xlane.f32.xlu1 %v12669_v14 }
0x127a   :  { %v18075_v47 = vpop.f32.mrb[146].mxu0 }
0x127b   :  { %v14777_v49 = vpop.f32.mrb[147].mxu0 }
0x127e   :  { %v11523_v1 = vpop.f32.mrb[140].mxu1 }
0x127f   :  { %v14742_v55 = vpop.f32.mrb[141].mxu1  ;;  %v11775_v36 = vrot.slane %v11523_v1, 5  ;;  %v11842_v5 = vrot.slane %v11523_v1, 1  ;;  %v11792_v61 = vrot.slane %v11523_v1, 6  ;;  %v11859_v48 = vrot.slane %v11523_v1, 2 }
0x1280   :  { %v11876_v46 = vrot.slane %v11523_v1, 3  ;;  %v11809_v9 = vrot.slane %v11523_v1, 7  ;;  %v11760_v38 = vrot.slane %v11523_v1, 4  ;;  %v11827_v15 = vsel %vm2203_vm8, %v11523_v1, %v11826_v24 }
0x1281   :  { %v11776_v44 = vsel %vm2203_vm8, %v11775_v36, %v11774_v33  ;;  %v11843_v58 = vsel %vm2203_vm8, %v11842_v5, %v11841_v59  ;;  %v11793_v11 = vsel %vm2203_vm8, %v11792_v61, %v11791_v6  ;;  %v11860_v63 = vsel %vm2203_vm8, %v11859_v48, %v11858_v3 }
0x1282   :  { %v18082_v54 = vpop.f32.mrb[148].mxu0  ;;  %v11778_v0 = vsel %vm2206_vm9, %v11777_v31, %v11776_v44  ;;  %v11844_v25 = vsel %vm2206_vm9, %v11596_v56, %v11843_v58  ;;  %v11795_v14 = vsel %vm2206_vm9, %v11794_v4, %v11793_v11  ;;  %v11862_v49 = vsel %vm2206_vm9, %v11861_v19, %v11860_v63 }
0x1283   :  { %v14787_v55 = vpop.f32.mrb[149].mxu0  ;;  %v11877_v24 = vsel %vm2203_vm8, %v11876_v46, %v11875_v39  ;;  %v11810_v33 = vsel %vm2203_vm8, %v11809_v9, %v11808_v34  ;;  %v11761_v59 = vsel %vm2203_vm8, %v11760_v38, %v11759_v22  ;;  %v11829_v31 = vsel %vm2206_vm9, %v11828_v10, %v11827_v15 }
0x1284   :  { %v11879_v6 = vsel %vm2206_vm9, %v11878_v29, %v11877_v24  ;;  %v11812_v3 = vsel %vm2206_vm9, %v11811_v43, %v11810_v33  ;;  %v11763_v1 = vsel %vm2206_vm9, %v11762_v26, %v11761_v59  ;;  %v11781_v56 = vrot.slane %v18069_v17, 2 }
0x1285   :  { %v11847_v19 = vrot.slane %v18069_v17, 6  ;;  %v11798_v39 = vrot.slane %v18069_v17, 3  ;;  %v11864_v34 = vrot.slane %v18069_v17, 7  ;;  %v11815_v22 = vrot.slane %v18069_v17, 4 }
0x1286   :  { %v11766_v10 = vrot.slane %v18069_v17, 1 }
0x12b3   :  { %v11669_v4 = vpop.f32.mrb[142].mxu1  ;;  %v18096_v36 = vpop.f32.mrb[150].mxu0 }
0x12b4   :  { %v14752_v29 = vpop.f32.mrb[143].mxu1  ;;  %v14797_v5 = vpop.f32.mrb[151].mxu0  ;;  %v11779_v43 = vrot.slane %v11669_v4, 3  ;;  %v11845_v61 = vrot.slane %v11669_v4, 7  ;;  %v11796_v26 = vrot.slane %v11669_v4, 4  ;;  %v11863_v48 = vsel %vm2209_vm10, %v11669_v4, %v11862_v49 }
0x12b5   :  { %v11880_v46 = vrot.slane %v11669_v4, 1  ;;  %v11813_v9 = vrot.slane %v11669_v4, 5  ;;  %v11764_v38 = vrot.slane %v11669_v4, 2  ;;  %v18108_v11 = vsel %vm2212_vm11, %v11864_v34, %v11863_v48 }
0x12b6   :  { %v11780_v15 = vsel %vm2209_vm10, %v11779_v43, %v11778_v0  ;;  %v11846_v44 = vsel %vm2209_vm10, %v11845_v61, %v11844_v25  ;;  %v11797_v58 = vsel %vm2209_vm10, %v11796_v26, %v11795_v14  ;;  %v11830_v34 = vrot.slane %v11669_v4, 6 }
0x12b7   :  { %v12130_v63 = vpop.f32.mrb[144].mxu1  ;;  %v18111_v55 = vsel %vm2212_vm11, %v11781_v56, %v11780_v15  ;;  %v18114_v24 = vsel %vm2212_vm11, %v11847_v19, %v11846_v44  ;;  %v18117_v49 = vsel %vm2212_vm11, %v11798_v39, %v11797_v58  ;;  %v11881_v33 = vsel %vm2209_vm10, %v11880_v46, %v11879_v6 }
0x12b8   :  { %v14762_v0 = vpop.f32.mrb[145].mxu1  ;;  %v12666_v25 = vsel %vm1512_vm4, %v12130_v63, -inf  ;;  %v18123_v14 = vsel %vm2212_vm11, %v18069_v17, %v11881_v33  ;;  %v11814_v59 = vsel %vm2209_vm10, %v11813_v9, %v11812_v3  ;;  %v11765_v56 = vsel %vm2209_vm10, %v11764_v38, %v11763_v1 }
0x12b9   :  { %12667 = vmax.xlane.f32.xlu0 %v12666_v25  ;;  %v18128_v19 = vsel %vm2212_vm11, %v11815_v22, %v11814_v59  ;;  %v18131_v39 = vsel %vm2212_vm11, %v11766_v10, %v11765_v56  ;;  %v11832_v6 = vrot.slane %v18069_v17, 5  ;;  %v11831_v5 = vsel %vm2209_vm10, %v11830_v34, %v11829_v31 }
0x12ba   :  { %v12675_v10 = vsel %vm1512_vm4, %v18075_v47, -inf  ;;  %v12681_v48 = vsel %vm1512_vm4, %v18082_v54, -inf  ;;  %v12687_v46 = vsel %vm1512_vm4, %v18096_v36, -inf }
0x12bb   :  { %v12282_v29 = vpop.f32.mrb[146].mxu1  ;;  %v18137_v3 = vsel %vm2212_vm11, %v11832_v6, %v11831_v5 }
0x12bc   :  { %v14772_v43 = vpop.f32.mrb[147].mxu1  ;;  %v12672_v61 = vsel %vm1512_vm4, %v12282_v29, -inf }
0x12bd   :  { %12673 = vmax.xlane.f32.xlu0 %v12672_v61 }
0x12bf   :  { %v12434_v1 = vpop.f32.mrb[148].mxu1 }
0x12c0   :  { %v14782_v26 = vpop.f32.mrb[149].mxu1  ;;  %v12678_v22 = vsel %vm1512_vm4, %v12434_v1, -inf }
0x12c1   :  { %12679 = vmax.xlane.f32.xlu1 %v12678_v22  ;;  %12676 = vmax.xlane.f32.xlu0 %v12675_v10 }
0x12c3   :  { %v12586_v17 = vpop.f32.mrb[150].mxu1 }
0x12c4   :  { %v14792_v4 = vpop.f32.mrb[151].mxu1  ;;  %v12684_v31 = vsel %vm1512_vm4, %v12586_v17, -inf }
0x12c5   :  { %12685 = vmax.xlane.f32.xlu1 %v12684_v31  ;;  %12682 = vmax.xlane.f32.xlu0 %v12681_v48 }
0x12c9   :  { %12688 = vmax.xlane.f32.xlu0 %v12687_v46 }
0x1305   :  { %v12671_v9 = vpop.xlane.xlu1 %12670 }
0x1306   :  { %v12691_v38 = vsub.f32 %v18071_v16, %v12671_v9 }
0x1308   :  { %v12700_v15 = vmul.f32 1.442695, %v12691_v38 }
0x130a   :  { %15080 = vpow2.f32 %v12700_v15 }
0x1314   :  { %v18148_v44 = vpop.eup %15080 }
0x1315   :  { %v12717_v58 = vsel %vm1512_vm4, %v18148_v44, 0.0 }
0x1316   :  { %12718 = vadd.xlane.f32.xlu0 %v12717_v58 }
0x1346   :  { %v12668_v33 = vpop.xlane.xlu0 %12667 }
0x1347   :  { %v12690_v0 = vsub.f32 %v12130_v63, %v12668_v33 }
0x1349   :  { %v12698_v25 = vmul.f32 1.442695, %v12690_v0 }
0x134a   :  { %v12674_v59 = vpop.xlane.xlu0 %12673 }
0x134b   :  { %15082 = vpow2.f32 %v12698_v25  ;;  %v12692_v56 = vsub.f32 %v12282_v29, %v12674_v59 }
0x134d   :  { %v12702_v34 = vmul.f32 1.442695, %v12692_v56 }
0x134e   :  { %v12680_v6 = vpop.xlane.xlu1 %12679  ;;  %v12677_v5 = vpop.xlane.xlu0 %12676 }
0x134f   :  { %15084 = vpow2.f32 %v12702_v34  ;;  %v12694_v43 = vsub.f32 %v12434_v1, %v12680_v6  ;;  %v12693_v16 = vsub.f32 %v18075_v47, %v12677_v5  ;;  %v18583_v6 = vld [vmem:[#allocation10_spill] sm:$0xff]  ;;  %v18584_v5 = vld [vmem:[#allocation11_spill] sm:$0xff] }
0x1351   :  { %v12706_v61 = vmul.f32 1.442695, %v12694_v43  ;;  %v12704_v26 = vmul.f32 1.442695, %v12693_v16  ;;  %v18585_v43 = vld [vmem:[#allocation12_spill] sm:$0xff]  ;;  %v18586_v16 = vld [vmem:[#allocation13_spill] sm:$0xff] }
0x1352   :  { %v12686_v22 = vpop.xlane.xlu1 %12685  ;;  %v12683_v10 = vpop.xlane.xlu0 %12682 }
0x1353   :  { %15086 = vpow2.f32 %v12706_v61  ;;  %v12696_v4 = vsub.f32 %v12586_v17, %v12686_v22  ;;  %v12695_v31 = vsub.f32 %v18082_v54, %v12683_v10  ;;  %v18587_v61 = vld [vmem:[#allocation9_spill] sm:$0xff] }
0x1354   :  { %15088 = vpow2.f32 %v12704_v26  ;;  %v18588_v26 = vld [vmem:[#allocation14_spill] sm:$0xff] }
0x1355   :  { %v18154_v63 = vpop.eup %15082  ;;  %v12710_v48 = vmul.f32 1.442695, %v12696_v4  ;;  %v12708_v29 = vmul.f32 1.442695, %v12695_v31  ;;  %v18600_v31 = vld [vmem:[#allocation15_spill] sm:$0xff] }
0x1356   :  { %v12689_v46 = vpop.xlane.xlu0 %12688  ;;  %v12714_v9 = vsel %vm1512_vm4, %v18154_v63, 0.0 }
0x1357   :  { %15090 = vpow2.f32 %v12710_v48  ;;  %v12697_v47 = vsub.f32 %v18096_v36, %v12689_v46  ;;  %12715 = vadd.xlane.f32.xlu1 %v12714_v9 }
0x1358   :  { %15092 = vpow2.f32 %v12708_v29 }
0x1359   :  { %v18159_v1 = vpop.eup %15084  ;;  %v12712_v38 = vmul.f32 1.442695, %v12697_v47 }
0x135a   :  { %v12720_v54 = vsel %vm1512_vm4, %v18159_v1, 0.0 }
0x135b   :  { %15094 = vpow2.f32 %v12712_v38  ;;  %12721 = vadd.xlane.f32.xlu1 %v12720_v54  ;;  %v18601_v54 = vld [vmem:[#allocation16_spill] sm:$0xff] }
0x135d   :  { %v18163_v17 = vpop.eup %15086 }
0x135e   :  { %v18165_v15 = vpop.eup %15088  ;;  %v12726_v58 = vsel %vm1512_vm4, %v18163_v17, 0.0 }
0x135f   :  { %12727 = vadd.xlane.f32.xlu1 %v12726_v58  ;;  %v12723_v36 = vsel %vm1512_vm4, %v18165_v15, 0.0 }
0x1360   :  { %12724 = vadd.xlane.f32.xlu0 %v12723_v36 }
0x1361   :  { %v18171_v33 = vpop.eup %15090 }
0x1362   :  { %v18173_v0 = vpop.eup %15092  ;;  %v12732_v25 = vsel %vm1512_vm4, %v18171_v33, 0.0 }
0x1363   :  { %12733 = vadd.xlane.f32.xlu1 %v12732_v25  ;;  %v12729_v59 = vsel %vm1512_vm4, %v18173_v0, 0.0  ;;  %v18602_v25 = vld [vmem:[#allocation37_spill] sm:$0xff] }
0x1364   :  { %12730 = vadd.xlane.f32.xlu0 %v12729_v59 }
0x1365   :  { %v18179_v56 = vpop.eup %15094 }
0x1366   :  { %v12735_v34 = vsel %vm1512_vm4, %v18179_v56, 0.0 }
0x1368   :  { %12736 = vadd.xlane.f32.xlu0 %v12735_v34 }
0x1374   :  { %2229 = vrot.lane.b32.xlu1 %v18583_v6, %s15155_s0 }
0x1378   :  { %2263 = vrot.lane.b32.xlu1 %v18584_v5, %s15152_s18 }
0x137c   :  { %2295 = vrot.lane.b32.xlu1 %v18585_v43, %s15155_s0 }
0x137e   :  { %2246 = vrot.lane.b32.xlu0 %v18586_v16, %s15156_s19 }
0x1380   :  { %2329 = vrot.lane.b32.xlu1 %v18587_v61, %s15152_s18 }
0x1382   :  { %2312 = vrot.lane.b32.xlu0 %v18588_v26, %s15156_s19 }
0x1384   :  { %3840 = vrot.lane.b32.xlu1 %v16322_v8, %s15156_s19 }
0x1386   :  { %3823 = vrot.lane.b32.xlu0 %v16325_v28, %s15155_s0  ;;  %v18590_v28 = vld [vmem:[#allocation43_spill] sm:$0xff] }
0x1388   :  { %3889 = vrot.lane.b32.xlu1 %v16328_v52, %s15155_s0  ;;  %v18591_v52 = vld [vmem:[#allocation20_spill] sm:$0xff] }
0x138a   :  { %3857 = vrot.lane.b32.xlu0 %v16331_v37, %s15152_s18 }
0x138c   :  { %3923 = vrot.lane.b32.xlu1 %v16319_v62, %s15152_s18  ;;  %v18589_v62 = vld [vmem:[#allocation17_spill] sm:$0xff] }
0x138e   :  { %3906 = vrot.lane.b32.xlu0 %v16334_v53, %s15156_s19  ;;  %v18592_v53 = vld [vmem:[#allocation42_spill] sm:$0xff] }
0x1390   :  { %5432 = vrot.lane.b32.xlu1 %v16668_v41, %s15156_s19 }
0x1392   :  { %5415 = vrot.lane.b32.xlu0 %v16671_v21, %s15155_s0  ;;  %v18593_v21 = vld [vmem:[#allocation31_spill] sm:$0xff] }
0x1394   :  { %5481 = vrot.lane.b32.xlu1 %v16674_v32, %s15155_s0  ;;  %v18594_v32 = vld [vmem:[#allocation18_spill] sm:$0xff] }
0x1396   :  { %5449 = vrot.lane.b32.xlu0 %v16677_v50, %s15152_s18  ;;  %v18595_v50 = vld [vmem:[#allocation39_spill] sm:$0xff] }
0x1398   :  { %7007 = vrot.lane.b32.xlu1 %v17029_v23, %s15155_s0  ;;  %v18597_v23 = vld [vmem:[#allocation45_spill] sm:$0xff] }
0x139a   :  { %5498 = vrot.lane.b32.xlu0 %v16682_v18, %s15156_s19  ;;  %v18596_v18 = vld [vmem:[#allocation44_spill] sm:$0xff] }
0x139c   :  { %8599 = vrot.lane.b32.xlu1 %v17381_v60, %s15155_s0  ;;  %v18599_v60 = vld [vmem:[#allocation22_spill] sm:$0xff] }
0x139e   :  { %7073 = vrot.lane.b32.xlu0 %v17032_v13, %s15155_s0  ;;  %v18598_v13 = vld [vmem:[#allocation19_spill] sm:$0xff] }
0x13a0   :  { %10191 = vrot.lane.b32.xlu1 %v17781_v51, %s15155_s0 }
0x13a2   :  { %8665 = vrot.lane.b32.xlu0 %v18589_v62, %s15155_s0 }
0x13a3   :  { %v12719_v8 = vpop.xlane.xlu0 %12718 }
0x13a4   :  { %15096 = vrcp.f32 %v12719_v8  ;;  %11783 = vrot.lane.b32.xlu1 %v18111_v55, %s15155_s0 }
0x13a6   :  { %10257 = vrot.lane.b32.xlu0 %v17784_v57, %s15155_s0 }
0x13a8   :  { %7024 = vrot.lane.b32.xlu1 %v18590_v28, %s15156_s19  ;;  %v18604_v28 = vld [vmem:[#allocation40_spill] sm:$0xff] }
0x13aa   :  { %11849 = vrot.lane.b32.xlu0 %v18114_v24, %s15155_s0 }
0x13ac   :  { %8616 = vrot.lane.b32.xlu1 %v18591_v52, %s15156_s19 }
0x13ae   :  { %v15097_v37 = vpop.eup %15096  ;;  %7090 = vrot.lane.b32.xlu0 %v18592_v53, %s15156_s19 }
0x13af   :  { %v12747_v41 = vmul.f32 %v15097_v37, %v18148_v44 }
0x13b0   :  { %10208 = vrot.lane.b32.xlu1 %v17787_v42, %s15156_s19 }
0x13b1   :  { %14806 = vmatmul.mubr.msk.f32.vlgmr.msra.gmra.mrb[152].mxu0 %vm1512_vm4, %v12747_v41 }
0x13b2   :  { %14814 = vmatpush3.msra.mxu0 %v18593_v21  ;;  %8682 = vrot.lane.b32.xlu0 %v18594_v32, %s15156_s19 }
0x13b3   :  { %14815 = vmatprep.mubr.msk.f32.mxu0 %vm15153_vm1, %v18542_v20  ;;  %14823 = vmatprep.subr.mxu0 %v18542_v20 }
0x13b4   :  { %11800 = vrot.lane.b32.xlu1 %v18117_v49, %s15156_s19 }
0x13b6   :  { %10274 = vrot.lane.b32.xlu0 %v17770_v27, %s15156_s19 }
0x13b8   :  { %5515 = vrot.lane.b32.xlu1 %v18595_v50, %s15152_s18 }
0x13ba   :  { %11866 = vrot.lane.b32.xlu0 %v18108_v11, %s15156_s19 }
0x13bc   :  { %7107 = vrot.lane.b32.xlu1 %v18596_v18, %s15152_s18 }
0x13be   :  { %7041 = vrot.lane.b32.xlu0 %v18597_v23, %s15152_s18 }
0x13c0   :  { %8699 = vrot.lane.b32.xlu1 %v18598_v13, %s15152_s18 }
0x13c2   :  { %8633 = vrot.lane.b32.xlu0 %v18599_v60, %s15152_s18 }
0x13c4   :  { %10291 = vrot.lane.b32.xlu1 %v17793_v40, %s15152_s18 }
0x13c6   :  { %10225 = vrot.lane.b32.xlu0 %v17799_v7, %s15152_s18 }
0x13c8   :  { %11883 = vrot.lane.b32.xlu1 %v18123_v14, %s15152_s18 }
0x13ca   :  { %11817 = vrot.lane.b32.xlu0 %v18128_v19, %s15152_s18 }
0x13e4   :  { %v12716_v27 = vpop.xlane.xlu1 %12715 }
0x13e5   :  { %15098 = vrcp.f32 %v12716_v27 }
0x13e8   :  { %v12722_v51 = vpop.xlane.xlu1 %12721 }
0x13e9   :  { %15100 = vrcp.f32 %v12722_v51 }
0x13ec   :  { %v12728_v57 = vpop.xlane.xlu1 %12727 }
0x13ed   :  { %15102 = vrcp.f32 %v12728_v57  ;;  %v12725_v42 = vpop.xlane.xlu0 %12724 }
0x13ee   :  { %15104 = vrcp.f32 %v12725_v42 }
0x13ef   :  { %v15099_v11 = vpop.eup %15098 }
0x13f0   :  { %v12746_v40 = vmul.f32 %v15099_v11, %v18154_v63  ;;  %v12734_v55 = vpop.xlane.xlu1 %12733 }
0x13f1   :  { %15106 = vrcp.f32 %v12734_v55  ;;  %v12731_v7 = vpop.xlane.xlu0 %12730 }
0x13f2   :  { %15108 = vrcp.f32 %v12731_v7  ;;  %14801 = vmatmul.mubr.msk.f32.vlgmr.msra.gmra.mrb[152].mxu1 %vm1512_vm4, %v12746_v40 }
0x13f3   :  { %v15101_v24 = vpop.eup %15100  ;;  %14809 = vmatpush3.msra.mxu1 %v18575_v45  ;;  %14810 = vmatprep.mubr.msk.f32.mxu1 %vm15153_vm1, %v18542_v20 }
0x13f4   :  { %v12748_v49 = vmul.f32 %v15101_v24, %v18159_v1  ;;  %v2230_v14 = vpop.permute.xlu1 %2229  ;;  %14818 = vmatprep.subr.mxu1 %v18542_v20 }
0x13f5   :  { %v12737_v19 = vpop.xlane.xlu0 %12736  ;;  %v2332_v63 = vsel %vm96_vm0, %v18600_v31, %v2230_v14 }
0x13f6   :  { %15110 = vrcp.f32 %v12737_v19  ;;  %14811 = vmatmul.mubr.msk.f32.vlgmr.msra.gmra.mrb[154].mxu1 %vm1512_vm4, %v12748_v49  ;;  %v18605_v19 = vld [vmem:[#allocation41_spill] sm:$0xff] }
0x13f7   :  { %v15103_v44 = vpop.eup %15102  ;;  %14819 = vmatpush3.msra.mxu1 %v18577_v12  ;;  %14820 = vmatprep.mubr.msk.f32.mxu1 %vm15153_vm1, %v18542_v20 }
0x13f8   :  { %v15105_v45 = vpop.eup %15104  ;;  %v12750_v22 = vmul.f32 %v15103_v44, %v18163_v17  ;;  %v2264_v10 = vpop.permute.xlu1 %2263  ;;  %14828 = vmatprep.subr.mxu1 %v18542_v20 }
0x13f9   :  { %v12749_v4 = vmul.f32 %v15105_v45, %v18165_v15  ;;  %v2247_v48 = vpop.permute.xlu0 %2246 }
0x13fa   :  { %v2334_v29 = vsel %vm2333_vm12, %v2332_v63, %v2247_v48  ;;  %14821 = vmatmul.mubr.msk.f32.vlgmr.msra.gmra.mrb[156].mxu1 %vm1512_vm4, %v12750_v22 }
0x13fb   :  { %v15107_v12 = vpop.eup %15106  ;;  %v2336_v46 = vsel %vm2335_vm13, %v2334_v29, %v2264_v10  ;;  %14816 = vmatmul.mubr.msk.f32.vlgmr.msra.gmra.mrb[154].mxu0 %vm1512_vm4, %v12749_v4  ;;  %14829 = vmatpush3.msra.mxu1 %v18581_v30  ;;  %v18606_v10 = vld [vmem:[#allocation46_spill] sm:$0xff] }
0x13fc   :  { %v15109_v9 = vpop.eup %15108  ;;  %v12752_v47 = vmul.f32 %v15107_v12, %v18171_v33  ;;  %2343 = vst [vmem:[#allocation6] sm:$0xff] %v2336_v46  ;;  %14824 = vmatpush3.msra.mxu0 %v18580_v2  ;;  %v2296_v1 = vpop.permute.xlu1 %2295  ;;  %14825 = vmatprep.mubr.msk.f32.mxu0 %vm15153_vm1, %v18542_v20  ;;  %v18607_v46 = vld [vmem:[#allocation47_spill] sm:$0xff] }
0x13fd   :  { %v12751_v38 = vmul.f32 %v15109_v9, %v18173_v0  ;;  %v2337_v17 = vsel %vm96_vm0, %v18601_v54, %v2296_v1  ;;  %v2313_v15 = vpop.permute.xlu0 %2312  ;;  %14830 = vmatprep.mubr.msk.f32.mxu1 %vm15153_vm1, %v18542_v20  ;;  %14833 = vmatprep.subr.mxu0 %v18542_v20 }
0x13fe   :  { %14831 = vmatmul.mubr.msk.f32.vlgmr.msra.gmra.mrb[158].mxu1 %vm1512_vm4, %v12752_v47  ;;  %v2338_v30 = vsel %vm2333_vm12, %v2337_v17, %v2313_v15  ;;  %v18608_v47 = vld [vmem:[#allocation21_spill] sm:$0xff] }
0x13ff   :  { %14826 = vmatmul.mubr.msk.f32.vlgmr.msra.gmra.mrb[156].mxu0 %vm1512_vm4, %v12751_v38 }
0x1400   :  { %v15111_v2 = vpop.eup %15110  ;;  %14834 = vmatpush3.msra.mxu0 %v18582_v35  ;;  %v2330_v58 = vpop.permute.xlu1 %2329  ;;  %14835 = vmatprep.mubr.msk.f32.mxu0 %vm15153_vm1, %v18542_v20  ;;  %v18603_v20 = vld [vmem:[#allocation38_spill] sm:$0xff] }
0x1401   :  { %v12753_v36 = vmul.f32 %v15111_v2, %v18179_v56  ;;  %v2339_v33 = vsel %vm2335_vm13, %v2338_v30, %v2330_v58  ;;  %v3824_v0 = vpop.permute.xlu0 %3823  ;;  %v18609_v58 = vld [vmem:[#allocation48_spill] sm:$0xff] }
0x1402   :  { %2344 = vst [vmem:[#allocation6 + $0x8] sm:$0xff] %v2339_v33  ;;  %v3926_v59 = vsel %vm96_vm0, %v18602_v25, %v3824_v0  ;;  %v18610_v33 = vld [vmem:[#allocation24_spill] sm:$0xff] }
0x1403   :  { %14836 = vmatmul.mubr.msk.f32.vlgmr.msra.gmra.mrb[158].mxu0 %vm1512_vm4, %v12753_v36 }
0x1404   :  { %v3841_v34 = vpop.permute.xlu1 %3840 }
0x1405   :  { %v3927_v6 = vsel %vm2333_vm12, %v3926_v59, %v3841_v34  ;;  %v3858_v5 = vpop.permute.xlu0 %3857 }
0x1406   :  { %v3928_v35 = vsel %vm2335_vm13, %v3927_v6, %v3858_v5 }
0x1407   :  { %3935 = vst [vmem:[#allocation6 + $0x10] sm:$0xff] %v3928_v35 }
0x1408   :  { %v3890_v43 = vpop.permute.xlu1 %3889 }
0x1409   :  { %v3929_v56 = vsel %vm96_vm0, %v18603_v20, %v3890_v43  ;;  %v3907_v16 = vpop.permute.xlu0 %3906  ;;  %v18611_v43 = vld [vmem:[#allocation23_spill] sm:$0xff] }
0x140a   :  { %v3930_v61 = vsel %vm2333_vm12, %v3929_v56, %v3907_v16 }
0x140c   :  { %v3924_v26 = vpop.permute.xlu1 %3923 }
0x140d   :  { %v3931_v62 = vsel %vm2335_vm13, %v3930_v61, %v3924_v26  ;;  %v5416_v8 = vpop.permute.xlu0 %5415 }
0x140e   :  { %3936 = vst [vmem:[#allocation6 + $0x18] sm:$0xff] %v3931_v62  ;;  %v5518_v52 = vsel %vm96_vm0, %v18604_v28, %v5416_v8 }
0x1410   :  { %v5433_v37 = vpop.permute.xlu1 %5432 }
0x1411   :  { %v5519_v53 = vsel %vm2333_vm12, %v5518_v52, %v5433_v37  ;;  %v5450_v41 = vpop.permute.xlu0 %5449 }
0x1412   :  { %v5520_v21 = vsel %vm2335_vm13, %v5519_v53, %v5450_v41 }
0x1413   :  { %5527 = vst [vmem:[#allocation6 + $0x20] sm:$0xff] %v5520_v21 }
0x1414   :  { %v5482_v32 = vpop.permute.xlu1 %5481 }
0x1415   :  { %v5499_v50 = vpop.permute.xlu0 %5498  ;;  %v5521_v44 = vsel %vm96_vm0, %v18605_v19, %v5482_v32 }
0x1416   :  { %v5522_v22 = vsel %vm2333_vm12, %v5521_v44, %v5499_v50 }
0x1418   :  { %v7008_v18 = vpop.permute.xlu1 %7007 }
0x1419   :  { %v7074_v23 = vpop.permute.xlu0 %7073  ;;  %v7110_v4 = vsel %vm96_vm0, %v18606_v10, %v7008_v18 }
0x141a   :  { %v7113_v9 = vsel %vm96_vm0, %v18607_v46, %v7074_v23 }
0x141c   :  { %v8600_v13 = vpop.permute.xlu1 %8599 }
0x141d   :  { %v8666_v60 = vpop.permute.xlu0 %8665  ;;  %v8702_v1 = vsel %vm96_vm0, %v18608_v47, %v8600_v13 }
0x141e   :  { %v8705_v36 = vsel %vm96_vm0, %v18609_v58, %v8666_v60 }
0x1420   :  { %v10192_v27 = vpop.permute.xlu1 %10191 }
0x1421   :  { %v10258_v51 = vpop.permute.xlu0 %10257  ;;  %v10294_v0 = vsel %vm96_vm0, %v18610_v33, %v10192_v27 }
0x1422   :  { %v10297_v20 = vsel %vm96_vm0, %v18611_v43, %v10258_v51 }
0x1424   :  { %v11784_v57 = vpop.permute.xlu1 %11783 }
0x1425   :  { %v11850_v42 = vpop.permute.xlu0 %11849  ;;  %v11886_v56 = vsel %vm96_vm0, %v18131_v39, %v11784_v57 }
0x1426   :  { %v11889_v52 = vsel %vm96_vm0, %v18137_v3, %v11850_v42 }
0x1428   :  { %v7025_v11 = vpop.permute.xlu1 %7024 }
0x1429   :  { %v7091_v40 = vpop.permute.xlu0 %7090  ;;  %v7111_v63 = vsel %vm2333_vm12, %v7110_v4, %v7025_v11 }
0x142a   :  { %v7114_v38 = vsel %vm2333_vm12, %v7113_v9, %v7091_v40 }
0x142c   :  { %v8617_v55 = vpop.permute.xlu1 %8616 }
0x142d   :  { %v8683_v7 = vpop.permute.xlu0 %8682  ;;  %v8703_v17 = vsel %vm2333_vm12, %v8702_v1, %v8617_v55 }
0x142e   :  { %v8706_v25 = vsel %vm2333_vm12, %v8705_v36, %v8683_v7 }
0x1430   :  { %v10209_v24 = vpop.permute.xlu1 %10208 }
0x1431   :  { %v10275_v49 = vpop.permute.xlu0 %10274  ;;  %v10295_v34 = vsel %vm2333_vm12, %v10294_v0, %v10209_v24 }
0x1432   :  { %v10298_v16 = vsel %vm2333_vm12, %v10297_v20, %v10275_v49 }
0x1434   :  { %v11801_v14 = vpop.permute.xlu1 %11800 }
0x1435   :  { %v11867_v45 = vpop.permute.xlu0 %11866  ;;  %v11887_v26 = vsel %vm2333_vm12, %v11886_v56, %v11801_v14 }
0x1436   :  { %v11890_v37 = vsel %vm2333_vm12, %v11889_v52, %v11867_v45 }
0x1438   :  { %v5516_v31 = vpop.permute.xlu1 %5515 }
0x1439   :  { %v5523_v48 = vsel %vm2335_vm13, %v5522_v22, %v5516_v31  ;;  %v7042_v29 = vpop.permute.xlu0 %7041 }
0x143a   :  { %5528 = vst [vmem:[#allocation6 + $0x28] sm:$0xff] %v5523_v48  ;;  %v7112_v12 = vsel %vm2335_vm13, %v7111_v63, %v7042_v29 }
0x143b   :  { %7119 = vst [vmem:[#allocation6 + $0x30] sm:$0xff] %v7112_v12 }
0x143c   :  { %v7108_v54 = vpop.permute.xlu1 %7107 }
0x143d   :  { %v7115_v15 = vsel %vm2335_vm13, %v7114_v38, %v7108_v54  ;;  %v8634_v2 = vpop.permute.xlu0 %8633 }
0x143e   :  { %7120 = vst [vmem:[#allocation6 + $0x38] sm:$0xff] %v7115_v15  ;;  %v8704_v30 = vsel %vm2335_vm13, %v8703_v17, %v8634_v2 }
0x143f   :  { %8711 = vst [vmem:[#allocation6 + $0x40] sm:$0xff] %v8704_v30 }
0x1440   :  { %v8700_v59 = vpop.permute.xlu1 %8699 }
0x1441   :  { %v8707_v6 = vsel %vm2335_vm13, %v8706_v25, %v8700_v59  ;;  %v10226_v5 = vpop.permute.xlu0 %10225 }
0x1442   :  { %8712 = vst [vmem:[#allocation6 + $0x48] sm:$0xff] %v8707_v6  ;;  %v10296_v35 = vsel %vm2335_vm13, %v10295_v34, %v10226_v5 }
0x1443   :  { %10303 = vst [vmem:[#allocation6 + $0x50] sm:$0xff] %v10296_v35 }
0x1444   :  { %v10292_v61 = vpop.permute.xlu1 %10291 }
0x1445   :  { %v10299_v62 = vsel %vm2335_vm13, %v10298_v16, %v10292_v61  ;;  %v11818_v8 = vpop.permute.xlu0 %11817 }
0x1446   :  { %10304 = vst [vmem:[#allocation6 + $0x58] sm:$0xff] %v10299_v62  ;;  %v11888_v28 = vsel %vm2335_vm13, %v11887_v26, %v11818_v8 }
0x1447   :  { %11895 = vst [vmem:[#allocation6 + $0x60] sm:$0xff] %v11888_v28 }
0x1448   :  { %v11884_v53 = vpop.permute.xlu1 %11883 }
0x1449   :  { %v11891_v39 = vsel %vm2335_vm13, %v11890_v37, %v11884_v53 }
0x144a   :  { %11896 = vst [vmem:[#allocation6 + $0x68] sm:$0xff] %v11891_v39 }
0x1484   :  { %v12896_v41 = vpop.f32.mrb[152].mxu0 }
0x1485   :  { %v14807_v21 = vpop.f32.mrb[153].mxu0  ;;  %v13346_v32 = vrot.slane %v12896_v41, 7  ;;  %v13379_v50 = vrot.slane %v12896_v41, 1  ;;  %v13396_v18 = vrot.slane %v12896_v41, 2  ;;  %v13413_v23 = vrot.slane %v12896_v41, 3 }
0x1486   :  { %v13428_v13 = vrot.slane %v12896_v41, 4  ;;  %v13445_v60 = vrot.slane %v12896_v41, 5  ;;  %v13462_v27 = vrot.slane %v12896_v41, 6 }
0x14c5   :  { %v12823_v51 = vpop.f32.mrb[152].mxu1 }
0x14c6   :  { %v13361_v57 = vrot.slane %v12823_v51, 1  ;;  %v13378_v11 = vrot.slane %v12823_v51, 2  ;;  %v13395_v3 = vrot.slane %v12823_v51, 3  ;;  %v13412_v42 = vrot.slane %v12823_v51, 4  ;;  %v14802_v40 = vpop.f32.mrb[153].mxu1 }
0x14c7   :  { %v13427_v55 = vrot.slane %v12823_v51, 5  ;;  %v13444_v7 = vrot.slane %v12823_v51, 6  ;;  %v13461_v24 = vrot.slane %v12823_v51, 7  ;;  %v13347_v49 = vsel %vm2194_vm5, %v13346_v32, %v12823_v51 }
0x14c8   :  { %v13362_v14 = vsel %vm2194_vm5, %v12896_v41, %v13361_v57  ;;  %v13380_v19 = vsel %vm2194_vm5, %v13379_v50, %v13378_v11  ;;  %v13397_v44 = vsel %vm2194_vm5, %v13396_v18, %v13395_v3  ;;  %v13414_v45 = vsel %vm2194_vm5, %v13413_v23, %v13412_v42 }
0x14c9   :  { %v12969_v22 = vpop.f32.mrb[154].mxu1  ;;  %v13446_v10 = vsel %vm2194_vm5, %v13445_v60, %v13444_v7  ;;  %v13429_v4 = vsel %vm2194_vm5, %v13428_v13, %v13427_v55  ;;  %v13463_v31 = vsel %vm2194_vm5, %v13462_v27, %v13461_v24 }
0x14ca   :  { %v14812_v63 = vpop.f32.mrb[155].mxu1  ;;  %v13447_v48 = vrot.slane %v12969_v22, 4  ;;  %v13363_v29 = vrot.slane %v12969_v22, 7  ;;  %v13430_v12 = vrot.slane %v12969_v22, 3  ;;  %v13381_v46 = vsel %vm2197_vm6, %v12969_v22, %v13380_v19 }
0x14cb   :  { %v13398_v9 = vrot.slane %v12969_v22, 1  ;;  %v13464_v47 = vrot.slane %v12969_v22, 5  ;;  %v13348_v1 = vrot.slane %v12969_v22, 6  ;;  %v13415_v38 = vrot.slane %v12969_v22, 2 }
0x14cc   :  { %v13448_v54 = vsel %vm2197_vm6, %v13447_v48, %v13446_v10  ;;  %v13364_v17 = vsel %vm2197_vm6, %v13363_v29, %v13362_v14  ;;  %v13431_v15 = vsel %vm2197_vm6, %v13430_v12, %v13429_v4 }
0x14cd   :  { %v18373_v2 = vpop.f32.mrb[156].mxu1  ;;  %v13399_v30 = vsel %vm2197_vm6, %v13398_v9, %v13397_v44  ;;  %v13465_v58 = vsel %vm2197_vm6, %v13464_v47, %v13463_v31  ;;  %v18378_v36 = vsel %vm2197_vm6, %v13348_v1, %v13347_v49  ;;  %v18381_v33 = vsel %vm2197_vm6, %v13415_v38, %v13414_v45 }
0x14ce   :  { %v18383_v0 = vpop.f32.mrb[154].mxu0  ;;  %v14822_v25 = vpop.f32.mrb[157].mxu1  ;;  %v13451_v59 = vrot.slane %v18373_v2, 2  ;;  %v13367_v34 = vrot.slane %v18373_v2, 5  ;;  %v13434_v6 = vrot.slane %v18373_v2, 1  ;;  %v13384_v5 = vrot.slane %v18373_v2, 6 }
0x14cf   :  { %v14817_v35 = vpop.f32.mrb[155].mxu0  ;;  %v13449_v43 = vrot.slane %v18383_v0, 3  ;;  %v13365_v20 = vrot.slane %v18383_v0, 6  ;;  %v13432_v56 = vrot.slane %v18383_v0, 2  ;;  %v13382_v16 = vrot.slane %v18383_v0, 7 }
0x14d0   :  { %v13400_v61 = vsel %vm2200_vm7, %v18383_v0, %v13399_v30  ;;  %v13401_v26 = vrot.slane %v18373_v2, 7  ;;  %v13466_v62 = vrot.slane %v18383_v0, 4  ;;  %v13468_v8 = vrot.slane %v18373_v2, 3 }
0x14d1   :  { %v18398_v28 = vpop.f32.mrb[158].mxu1  ;;  %v13450_v52 = vsel %vm2200_vm7, %v13449_v43, %v13448_v54  ;;  %v13366_v37 = vsel %vm2200_vm7, %v13365_v20, %v13364_v17  ;;  %v13433_v53 = vsel %vm2200_vm7, %v13432_v56, %v13431_v15  ;;  %v13383_v39 = vsel %vm2200_vm7, %v13382_v16, %v13381_v46 }
0x14d2   :  { %v18404_v41 = vpop.f32.mrb[156].mxu0  ;;  %v14832_v21 = vpop.f32.mrb[159].mxu1  ;;  %v13452_v32 = vsel %vm2203_vm8, %v13451_v59, %v13450_v52  ;;  %v13368_v50 = vsel %vm2203_vm8, %v13367_v34, %v13366_v37  ;;  %v13371_v18 = vrot.slane %v18398_v28, 3  ;;  %v13435_v23 = vsel %vm2203_vm8, %v13434_v6, %v13433_v53 }
0x14d3   :  { %v14827_v13 = vpop.f32.mrb[157].mxu0  ;;  %v13453_v60 = vrot.slane %v18404_v41, 1  ;;  %v13369_v27 = vrot.slane %v18404_v41, 4  ;;  %v13436_v51 = vsel %vm2206_vm9, %v18404_v41, %v13435_v23  ;;  %v13437_v57 = vrot.slane %v18398_v28, 7 }
0x14d4   :  { %v13385_v11 = vsel %vm2203_vm8, %v13384_v5, %v13383_v39  ;;  %v13386_v3 = vrot.slane %v18404_v41, 5  ;;  %v13388_v42 = vrot.slane %v18398_v28, 4  ;;  %v13402_v40 = vsel %vm2203_vm8, %v13401_v26, %v13400_v61 }
0x14d5   :  { %v13454_v55 = vsel %vm2206_vm9, %v13453_v60, %v13452_v32  ;;  %v13370_v7 = vsel %vm2206_vm9, %v13369_v27, %v13368_v50  ;;  %v13438_v24 = vsel %vm2209_vm10, %v13437_v57, %v13436_v51  ;;  %v13403_v49 = vrot.slane %v18404_v41, 6 }
0x14d6   :  { %v13334_v14 = vpop.f32.mrb[158].mxu0  ;;  %v13455_v19 = vsel %vm2209_vm10, %v18398_v28, %v13454_v55  ;;  %v13372_v44 = vsel %vm2209_vm10, %v13371_v18, %v13370_v7  ;;  %v13387_v45 = vsel %vm2206_vm9, %v13386_v3, %v13385_v11  ;;  %v13405_v22 = vrot.slane %v18398_v28, 5 }
0x14d7   :  { %v14837_v10 = vpop.f32.mrb[159].mxu0  ;;  %v13456_v4 = vrot.slane %v13334_v14, 7  ;;  %v13373_v31 = vrot.slane %v13334_v14, 2  ;;  %v13439_v63 = vrot.slane %v13334_v14, 6  ;;  %v13389_v48 = vsel %vm2209_vm10, %v13388_v42, %v13387_v45 }
0x14d8   :  { %v13390_v29 = vrot.slane %v13334_v14, 3  ;;  %v13404_v12 = vsel %vm2206_vm9, %v13403_v49, %v13402_v40  ;;  %v13407_v46 = vrot.slane %v13334_v14, 4  ;;  %v13467_v9 = vsel %vm2200_vm7, %v13466_v62, %v13465_v58 }
0x14d9   :  { %v13457_v47 = vsel %vm2212_vm11, %v13456_v4, %v13455_v19  ;;  %v13374_v1 = vsel %vm2212_vm11, %v13373_v31, %v13372_v44  ;;  %v13440_v38 = vsel %vm2212_vm11, %v13439_v63, %v13438_v24  ;;  %v13406_v54 = vsel %vm2209_vm10, %v13405_v22, %v13404_v12 }
0x14da   :  { %13458 = vrot.lane.b32.xlu0 %v13457_v47, %s15156_s19  ;;  %13375 = vrot.lane.b32.xlu1 %v13374_v1, %s15155_s0  ;;  %v13391_v17 = vsel %vm2212_vm11, %v13390_v29, %v13389_v48  ;;  %v13408_v15 = vsel %vm2212_vm11, %v13407_v46, %v13406_v54  ;;  %v13469_v30 = vsel %vm2203_vm8, %v13468_v8, %v13467_v9  ;;  %v13470_v58 = vrot.slane %v18404_v41, 2 }
0x14db   :  { %v13472_v25 = vrot.slane %v18398_v28, 1  ;;  %v13350_v59 = vrot.slane %v18383_v0, 5  ;;  %v13352_v34 = vrot.slane %v18373_v2, 4  ;;  %v13354_v6 = vrot.slane %v18404_v41, 3 }
0x14dc   :  { %v13471_v5 = vsel %vm2206_vm9, %v13470_v58, %v13469_v30  ;;  %v13356_v35 = vrot.slane %v18398_v28, 2  ;;  %v13358_v43 = vrot.slane %v13334_v14, 1  ;;  %v13417_v20 = vrot.slane %v18383_v0, 1 }
0x14dd   :  { %v13473_v56 = vsel %vm2209_vm10, %v13472_v25, %v13471_v5  ;;  %v13351_v16 = vsel %vm2200_vm7, %v13350_v59, %v18378_v36  ;;  %v13420_v61 = vrot.slane %v18404_v41, 7  ;;  %v13422_v26 = vrot.slane %v18398_v28, 6 }
0x14de   :  { %13441 = vrot.lane.b32.xlu0 %v13440_v38, %s15155_s0  ;;  %13392 = vrot.lane.b32.xlu1 %v13391_v17, %s15156_s19  ;;  %v13474_v62 = vsel %vm2212_vm11, %v13334_v14, %v13473_v56  ;;  %v13353_v8 = vsel %vm2203_vm8, %v13352_v34, %v13351_v16  ;;  %v13418_v0 = vsel %vm2200_vm7, %v13417_v20, %v18381_v33  ;;  %v13424_v52 = vrot.slane %v13334_v14, 5 }
0x14df   :  { %v13355_v37 = vsel %vm2206_vm9, %v13354_v6, %v13353_v8  ;;  %v13419_v36 = vsel %vm2203_vm8, %v18373_v2, %v13418_v0 }
0x14e0   :  { %v13357_v53 = vsel %vm2209_vm10, %v13356_v35, %v13355_v37  ;;  %v13421_v28 = vsel %vm2206_vm9, %v13420_v61, %v13419_v36 }
0x14e1   :  { %v13359_v39 = vsel %vm2212_vm11, %v13358_v43, %v13357_v53  ;;  %v13423_v41 = vsel %vm2209_vm10, %v13422_v26, %v13421_v28 }
0x14e2   :  { %13409 = vrot.lane.b32.xlu0 %v13408_v15, %s15152_s18  ;;  %13475 = vrot.lane.b32.xlu1 %v13474_v62, %s15152_s18  ;;  %v13425_v33 = vsel %vm2212_vm11, %v13424_v52, %v13423_v41  ;;  %s15124_s18 = scalar_lea.vmem %s13495_s2, 2048 }
0x14e3   :  { %p15125_p5 = scmp.ne.s32.totalorder %s13495_s2, %s15124_s18  ;;  %p15130_p7 = scmp.lt.s32.totalorder %s15124_s18, %s15124_s18 }
0x14e5   :  { %p15131_p8 = por %p15130_p7, %p15129_p6 }
0x14e7   :  { %p15132_p9 = pnand %p15131_p8, %p15125_p5 }
0x154c   :  { %v13459_v21 = vpop.permute.xlu0 %13458  ;;  %v13376_v32 = vpop.permute.xlu1 %13375 }
0x154d   :  { %v13478_v23 = vsel %vm96_vm0, %v13359_v39, %v13376_v32 }
0x1550   :  { %v13442_v50 = vpop.permute.xlu0 %13441  ;;  %v13393_v18 = vpop.permute.xlu1 %13392 }
0x1551   :  { %v13481_v2 = vsel %vm96_vm0, %v13425_v33, %v13442_v50  ;;  %v13479_v13 = vsel %vm2333_vm12, %v13478_v23, %v13393_v18 }
0x1552   :  { %v13482_v27 = vsel %vm2333_vm12, %v13481_v2, %v13459_v21 }
0x1554   :  { %v13410_v60 = vpop.permute.xlu0 %13409  ;;  %v13476_v51 = vpop.permute.xlu1 %13475 }
0x1555   :  { %v13480_v57 = vsel %vm2335_vm13, %v13479_v13, %v13410_v60  ;;  %v13483_v11 = vsel %vm2335_vm13, %v13482_v27, %v13476_v51 }
0x1556   :  { %13487 = vst [vmem:[#allocation6 + $0x70] sm:$0xff] %v13480_v57  ;;  %13488 = vst [vmem:[#allocation6 + $0x78] sm:$0xff] %v13483_v11 }
0x1557   :  { %15135 = shalt.err (!%p15132_p9)
}
0x1558   :  { %s15136_s23 = scalar_lea.hbm %s18490_s3, 2048 }
0x1559   :  { %p15137_p10 = scmp.ne.s32.totalorder %s18490_s3, %s15136_s23  ;;  %p15140_p11 = scmp.lt.u32.totalorder %s15136_s23, %s18490_s3 }
0x155b   :  { %p15142_p12 = pnand %p15140_p11, %p15137_p10 }
0x155d   :  { %15145 = shalt.err (!%p15142_p12)
}
0x155e   :  { %s15158_s28 = smov 256   ;;  %s15159_s29 = smov 16  }
0x155f   :  { %13500 = dma.vmem_to_hbm [thread:$0]  %s13495_s2, 2048, %s18490_s3, [#allocation4], %s15158_s28, %s15158_s28, %s15159_s29  }
0x1560   :  { %15148 = dma.done.wait [#allocation4], 2048  }
0x1561   :  { %15149 = vsyncadd [#allocation4], 4294965248 }
0x1562   :  { %13504 = vsyncpa [#allocation4], 1 }
0x1563   :  { %13505 = vsyncpa [#allocation5], 1 }

</bundles_post_ra>
